<compile_context>
chip_gen: v7x
topology: tpu7x:2x2x1
jax: 0.10.0
libtpu: 0.0.40
codegen_flags: <defaults>
</compile_context>

<pallas_src>
import jax
import jax.numpy as jnp
from jax import lax
from jax.experimental import pallas as pl
from jax.experimental.pallas import tpu as pltpu

# ---- problem sizes (small, consistent with the module) ----
N = 64                 # number of points (single batch, o = [N])
D_IN = 32              # d_in == d_out (required by the residual add)
D_OUT = 32
BOTTLENECK_RATIO = 2
D_MID = D_IN // BOTTLENECK_RATIO          # 16
NSAMPLE = 8            # nsample for queryandgroup (kNN, includes self)
NUM_KERNEL = 15        # k_015_center_3D.npy has 15 kernel points
SIGMA = 0.3
SCALE = SIGMA ** 2 * 2 + 1e-10
NEG_INV_SCALE = -1.0 / SCALE
BN_EPS = 1e-5
C_GATHER = 3 + D_MID                      # [p | xr] gather width = 19
IDX_MASK = N - 1                          # 63: column index fits in 6 bits
KEY_CLEAR = ~IDX_MASK                     # -64: clears the low 6 mantissa bits


def _batch_norm(x, gamma, beta):
    # PyTorch BatchNorm1d training-mode forward: batch stats, biased variance.
    mean = jnp.mean(x, axis=0, keepdims=True)
    var = jnp.mean((x - mean) ** 2, axis=0, keepdims=True)
    return (x - mean) * lax.rsqrt(var + BN_EPS) * gamma + beta


def residual_block_kernel(p_ref, pt_ref, x_ref,
                          w1_ref, b1_ref, g1_ref, be1_ref,
                          kpt_ref, wdw_ref, bdw_ref, g2_ref, be2_ref,
                          w2_ref, b2_ref, g3_ref, be3_ref,
                          o_ref,
                          c_ref, gath_ref):
    p = p_ref[...]                      # (N, 3)
    pt = pt_ref[...]                    # (3, N)  — transposed copy (layout only)
    x = x_ref[...]                      # (N, D_IN)
    identity = x

    # ---------------- reduction: Linear -> BN -> ReLU ----------------
    xr = jnp.dot(x, w1_ref[...], preferred_element_type=jnp.float32) + b1_ref[...]
    xr = jnp.maximum(_batch_norm(xr, g1_ref[...], be1_ref[...]), 0.0)   # (N, D_MID)

    # Assemble the gather matrix [p | xr] once in VMEM -> ONE one_hot matmul
    # per kNN step gathers both coordinates and features.
    c_ref[:, 0:3] = p
    c_ref[:, 3:C_GATHER] = xr
    c = c_ref[...]                                                      # (N, 19)

    # -------- pointops.queryandgroup (kNN incl. self, use_xyz=True) --------
    # Pairwise squared distances via the Gram identity (no (N,N,3) tensor).
    cross = jnp.dot(p, pt, preferred_element_type=jnp.float32)          # (N, N)
    psq_col = jnp.sum(p * p, axis=1, keepdims=True)                     # (N, 1)
    psq_row = jnp.sum(pt * pt, axis=0, keepdims=True)                   # (1, N)
    dist = jnp.maximum(psq_col + psq_row - 2.0 * cross, 0.0)            # (N, N)

    # Packed argmin key: non-negative f32 distance bits (order preserving),
    # low 6 mantissa bits cleared and replaced by the column index, then
    # bitcast back to f32 so a single float min per step yields both the
    # nearest distance and its index (lowest-index tie-break preserved).
    col_i32 = lax.broadcasted_iota(jnp.int32, (N, N), 1)
    dist_bits = pltpu.bitcast(dist, jnp.int32)
    key = pltpu.bitcast(
        jnp.bitwise_or(jnp.bitwise_and(dist_bits, jnp.int32(KEY_CLEAR)), col_i32),
        jnp.float32)

    max_l2sq = jnp.zeros((N, 1), jnp.float32)
    for s in range(NSAMPLE):
        kmin = jnp.min(key, axis=1, keepdims=True)                      # (N, 1)
        idx = jnp.bitwise_and(pltpu.bitcast(kmin, jnp.int32),
                              jnp.int32(IDX_MASK))                      # (N, 1)
        sel = col_i32 == idx                                            # (N, N)
        one_hot = sel.astype(jnp.float32)
        gathered = jnp.dot(one_hot, c,
                           preferred_element_type=jnp.float32)          # (N, 19)
        gath_ref[s] = gathered                # park in VMEM; not kept in vregs
        pj_s = gath_ref[s, :, 0:3] - p                                  # (N, 3)
        l2sq = jnp.sum(pj_s * pj_s, axis=1, keepdims=True)              # (N, 1)
        max_l2sq = jnp.maximum(max_l2sq, l2sq)
        key = jnp.where(sel, jnp.float32(jnp.inf), key)   # exclude chosen

    # ---------------- DepthwiseKPConv ----------------
    # pj normalized per point by the max neighbor L2 norm (+1e-10), then
    # Gaussian correlation to the kernel points; the K contraction with the
    # depthwise weights is done per sample on the MXU:
    #   xdw = sum_s xj_s * (corr_s @ wdw) + bdw        (== sum_k wdw*feat)
    inv_den = 1.0 / (jnp.sqrt(max_l2sq) + 1e-10)                        # (N, 1)
    kpt = kpt_ref[...]                                                  # (3, K)
    kp_sq = jnp.sum(kpt * kpt, axis=0, keepdims=True)                   # (1, K)
    wdw = wdw_ref[...]                                                  # (K, D_MID)

    acc = jnp.zeros((N, D_MID), jnp.float32)
    for s in range(NSAMPLE):
        pj_s = gath_ref[s, :, 0:3] - p                                  # (N, 3)
        xj_s = gath_ref[s, :, 3:C_GATHER]                               # (N, D_MID)
        pjn = pj_s * inv_den                                            # (N, 3)
        pjn_sq = jnp.sum(pjn * pjn, axis=1, keepdims=True)              # (N, 1)
        ck = jnp.dot(pjn, kpt, preferred_element_type=jnp.float32)      # (N, K)
        sqr = kp_sq + pjn_sq - 2.0 * ck                                 # (N, K)
        corr = jnp.exp(sqr * NEG_INV_SCALE)                             # (N, K)
        wsum = jnp.dot(corr, wdw, preferred_element_type=jnp.float32)   # (N, D_MID)
        acc = acc + xj_s * wsum

    xdw = acc + bdw_ref[...]                                            # (N, D_MID)
    xdw = jnp.maximum(_batch_norm(xdw, g2_ref[...], be2_ref[...]), 0.0)

    # ---------------- expansion: Linear -> BN -> ReLU ----------------
    xe = jnp.dot(xdw, w2_ref[...], preferred_element_type=jnp.float32) + b2_ref[...]
    xe = jnp.maximum(_batch_norm(xe, g3_ref[...], be3_ref[...]), 0.0)   # (N, D_OUT)

    # ---------------- residual add ----------------
    o_ref[...] = identity + xe


def residual_block_forward(p, x, params):
    (w1, b1, g1, be1, kp, wdw, bdw, g2, be2, w2, b2, g3, be3) = params
    # Wrapper-side layout plumbing only: transposed copies so the kernel never
    # performs an in-kernel transpose (p.T for the Gram matmul, kp.T for the
    # kernel-point correlation matmul).
    pt = p.T                      # (3, N)
    kpt = kp.T                    # (3, NUM_KERNEL)
    args = (p, pt, x, w1, b1, g1, be1, kpt, wdw, bdw, g2, be2, w2, b2, g3, be3)
    in_specs = [pl.BlockSpec(a.shape, lambda i: (0, 0)) for a in args]
    # TODO(synk): for many point clouds / segments, add a leading "parallel"
    # grid axis so v7x's two TensorCores are both used; a single N=64 cloud
    # only needs grid=(1,).
    out = pl.pallas_call(
        residual_block_kernel,
        grid=(1,),
        in_specs=in_specs,
        out_specs=pl.BlockSpec((N, D_OUT), lambda i: (0, 0)),
        out_shape=jax.ShapeDtypeStruct((N, D_OUT), jnp.float32),
        scratch_shapes=[
            pltpu.VMEM((N, C_GATHER), jnp.float32),            # [p | xr]
            pltpu.VMEM((NSAMPLE, N, C_GATHER), jnp.float32),   # gathered neighbors
        ],
        compiler_params=pltpu.CompilerParams(
            dimension_semantics=("arbitrary",)),
    )(*args)
    # ResidualBlock.forward returns (p, x, o)
    o = jnp.array([N], jnp.int32)
    return p, out, o


def init_params(key):
    ks = jax.random.split(key, 16)
    f32 = jnp.float32
    # reduction Linear(d_in, d_mid) + BN(d_mid)
    w1 = (jax.random.normal(ks[0], (D_IN, D_MID)) * 0.1).astype(f32)
    b1 = (jax.random.normal(ks[1], (1, D_MID)) * 0.1).astype(f32)
    g1 = (1.0 + 0.1 * jax.random.normal(ks[2], (1, D_MID))).astype(f32)
    be1 = (0.1 * jax.random.normal(ks[3], (1, D_MID))).astype(f32)
    # TODO(synk): kernel dispositions are loaded from k_015_center_3D.npy in the
    # original code; here 15 deterministic synthetic kernel points are used.
    kp = (jax.random.normal(ks[4], (NUM_KERNEL, 3)) * 0.5).astype(f32)
    # depthwise Conv1d weight is (d_mid, 1, K) in PyTorch; stored here as (K, d_mid)
    wdw = (jax.random.normal(ks[5], (NUM_KERNEL, D_MID)) * 0.1).astype(f32)
    bdw = (jax.random.normal(ks[6], (1, D_MID)) * 0.1).astype(f32)
    g2 = (1.0 + 0.1 * jax.random.normal(ks[7], (1, D_MID))).astype(f32)
    be2 = (0.1 * jax.random.normal(ks[8], (1, D_MID))).astype(f32)
    # expansion Linear(d_mid, d_out) + BN(d_out)
    w2 = (jax.random.normal(ks[9], (D_MID, D_OUT)) * 0.1).astype(f32)
    b2 = (jax.random.normal(ks[10], (1, D_OUT)) * 0.1).astype(f32)
    g3 = (1.0 + 0.1 * jax.random.normal(ks[11], (1, D_OUT))).astype(f32)
    be3 = (0.1 * jax.random.normal(ks[12], (1, D_OUT))).astype(f32)
    return (w1, b1, g1, be1, kp, wdw, bdw, g2, be2, w2, b2, g3, be3)


if __name__ == "__main__":
    key = jax.random.PRNGKey(0)
    kp_key, kx_key, kparams = jax.random.split(key, 3)
    p = jax.random.normal(kp_key, (N, 3), jnp.float32)
    x = jax.random.normal(kx_key, (N, D_IN), jnp.float32)
    params = init_params(kparams)

    p_out, x_out, o_out = jax.jit(residual_block_forward)(p, x, params)
    x_out = jax.block_until_ready(x_out)

    assert x_out.shape == (N, D_OUT)
    assert bool(jnp.all(jnp.isfinite(x_out)))
    print("KERNEL_OK")
</pallas_src>

<mosaic_0001>
module attributes {stable_mosaic.version = 11 : i64} {
  func.func @residual_block_kernel(%arg0: i32, %arg1: memref<64x3xf32, #tpu.memory_space<vmem>>, %arg2: memref<3x64xf32, #tpu.memory_space<vmem>>, %arg3: memref<64x32xf32, #tpu.memory_space<vmem>>, %arg4: memref<32x16xf32, #tpu.memory_space<vmem>>, %arg5: memref<1x16xf32, #tpu.memory_space<vmem>>, %arg6: memref<1x16xf32, #tpu.memory_space<vmem>>, %arg7: memref<1x16xf32, #tpu.memory_space<vmem>>, %arg8: memref<3x15xf32, #tpu.memory_space<vmem>>, %arg9: memref<15x16xf32, #tpu.memory_space<vmem>>, %arg10: memref<1x16xf32, #tpu.memory_space<vmem>>, %arg11: memref<1x16xf32, #tpu.memory_space<vmem>>, %arg12: memref<1x16xf32, #tpu.memory_space<vmem>>, %arg13: memref<16x32xf32, #tpu.memory_space<vmem>>, %arg14: memref<1x32xf32, #tpu.memory_space<vmem>>, %arg15: memref<1x32xf32, #tpu.memory_space<vmem>>, %arg16: memref<1x32xf32, #tpu.memory_space<vmem>>, %arg17: memref<64x32xf32, #tpu.memory_space<vmem>>, %arg18: memref<64x19xf32, #tpu.memory_space<vmem>>, %arg19: memref<8x64x19xf32, #tpu.memory_space<vmem>>) attributes {dimension_semantics = [#tpu.dimension_semantics<arbitrary>], iteration_bounds = array<i64: 1>, scalar_prefetch = 0 : i64, scratch_operands = 2 : i64, tpu.core_type = #tpu.core_type<tc>, window_params = [{pipeline_mode = #tpu.pipeline_mode<synchronous>, transform_indices = @transform_0, window_bounds = array<i64: 64, 3>}, {pipeline_mode = #tpu.pipeline_mode<synchronous>, transform_indices = @transform_1, window_bounds = array<i64: 3, 64>}, {pipeline_mode = #tpu.pipeline_mode<synchronous>, transform_indices = @transform_2, window_bounds = array<i64: 64, 32>}, {pipeline_mode = #tpu.pipeline_mode<synchronous>, transform_indices = @transform_3, window_bounds = array<i64: 32, 16>}, {pipeline_mode = #tpu.pipeline_mode<synchronous>, transform_indices = @transform_4, window_bounds = array<i64: 1, 16>}, {pipeline_mode = #tpu.pipeline_mode<synchronous>, transform_indices = @transform_5, window_bounds = array<i64: 1, 16>}, {pipeline_mode = #tpu.pipeline_mode<synchronous>, transform_indices = @transform_6, window_bounds = array<i64: 1, 16>}, {pipeline_mode = #tpu.pipeline_mode<synchronous>, transform_indices = @transform_7, window_bounds = array<i64: 3, 15>}, {pipeline_mode = #tpu.pipeline_mode<synchronous>, transform_indices = @transform_8, window_bounds = array<i64: 15, 16>}, {pipeline_mode = #tpu.pipeline_mode<synchronous>, transform_indices = @transform_9, window_bounds = array<i64: 1, 16>}, {pipeline_mode = #tpu.pipeline_mode<synchronous>, transform_indices = @transform_10, window_bounds = array<i64: 1, 16>}, {pipeline_mode = #tpu.pipeline_mode<synchronous>, transform_indices = @transform_11, window_bounds = array<i64: 1, 16>}, {pipeline_mode = #tpu.pipeline_mode<synchronous>, transform_indices = @transform_12, window_bounds = array<i64: 16, 32>}, {pipeline_mode = #tpu.pipeline_mode<synchronous>, transform_indices = @transform_13, window_bounds = array<i64: 1, 32>}, {pipeline_mode = #tpu.pipeline_mode<synchronous>, transform_indices = @transform_14, window_bounds = array<i64: 1, 32>}, {pipeline_mode = #tpu.pipeline_mode<synchronous>, transform_indices = @transform_15, window_bounds = array<i64: 1, 32>}, {pipeline_mode = #tpu.pipeline_mode<synchronous>, transform_indices = @transform_16, window_bounds = array<i64: 64, 32>}]} {
    %c0 = arith.constant 0 : index
    %c0_0 = arith.constant 0 : index
    %0 = vector.load %arg1[%c0, %c0_0] : memref<64x3xf32, #tpu.memory_space<vmem>>, vector<64x3xf32>
    %c0_1 = arith.constant 0 : index
    %c0_2 = arith.constant 0 : index
    %1 = vector.load %arg2[%c0_1, %c0_2] : memref<3x64xf32, #tpu.memory_space<vmem>>, vector<3x64xf32>
    %c0_3 = arith.constant 0 : index
    %c0_4 = arith.constant 0 : index
    %2 = vector.load %arg3[%c0_3, %c0_4] : memref<64x32xf32, #tpu.memory_space<vmem>>, vector<64x32xf32>
    %c0_5 = arith.constant 0 : index
    %c0_6 = arith.constant 0 : index
    %3 = vector.load %arg4[%c0_5, %c0_6] : memref<32x16xf32, #tpu.memory_space<vmem>>, vector<32x16xf32>
    %cst = arith.constant dense<0.000000e+00> : vector<64x16xf32>
    %4 = tpu.matmul %2, %3, %cst {dimension_numbers = #tpu.dot_dimension_numbers<[1], [0], [0], [1], [0, 0, 1, 1], [], []>} : vector<64x32xf32>, vector<32x16xf32>, vector<64x16xf32> -> vector<64x16xf32>
    %c0_7 = arith.constant 0 : index
    %c0_8 = arith.constant 0 : index
    %5 = vector.load %arg5[%c0_7, %c0_8] : memref<1x16xf32, #tpu.memory_space<vmem>>, vector<1x16xf32>
    %6 = vector.broadcast %5 : vector<1x16xf32> to vector<64x16xf32>
    %7 = arith.addf %4, %6 : vector<64x16xf32>
    %c0_9 = arith.constant 0 : index
    %c0_10 = arith.constant 0 : index
    %8 = vector.load %arg6[%c0_9, %c0_10] : memref<1x16xf32, #tpu.memory_space<vmem>>, vector<1x16xf32>
    %c0_11 = arith.constant 0 : index
    %c0_12 = arith.constant 0 : index
    %9 = vector.load %arg7[%c0_11, %c0_12] : memref<1x16xf32, #tpu.memory_space<vmem>>, vector<1x16xf32>
    %cst_13 = arith.constant dense<0.000000e+00> : vector<16xf32>
    %10 = vector.multi_reduction <add>, %7, %cst_13 [0] : vector<64x16xf32> to vector<16xf32>
    %11 = vector.shape_cast %10 : vector<16xf32> to vector<1x16xf32>
    %cst_14 = arith.constant 6.400000e+01 : f32
    %12 = vector.broadcast %cst_14 : f32 to vector<1x16xf32>
    %13 = arith.divf %11, %12 : vector<1x16xf32>
    %14 = vector.broadcast %13 : vector<1x16xf32> to vector<64x16xf32>
    %15 = arith.subf %7, %14 : vector<64x16xf32>
    %16 = arith.mulf %15, %15 : vector<64x16xf32>
    %cst_15 = arith.constant dense<0.000000e+00> : vector<16xf32>
    %17 = vector.multi_reduction <add>, %16, %cst_15 [0] : vector<64x16xf32> to vector<16xf32>
    %18 = vector.shape_cast %17 : vector<16xf32> to vector<1x16xf32>
    %cst_16 = arith.constant 6.400000e+01 : f32
    %19 = vector.broadcast %cst_16 : f32 to vector<1x16xf32>
    %20 = arith.divf %18, %19 : vector<1x16xf32>
    %21 = vector.broadcast %13 : vector<1x16xf32> to vector<64x16xf32>
    %22 = arith.subf %7, %21 : vector<64x16xf32>
    %cst_17 = arith.constant 9.99999974E-6 : f32
    %23 = vector.broadcast %cst_17 : f32 to vector<1x16xf32>
    %24 = arith.addf %20, %23 : vector<1x16xf32>
    %25 = math.rsqrt %24 : vector<1x16xf32>
    %26 = vector.broadcast %25 : vector<1x16xf32> to vector<64x16xf32>
    %27 = arith.mulf %22, %26 : vector<64x16xf32>
    %28 = vector.broadcast %8 : vector<1x16xf32> to vector<64x16xf32>
    %29 = arith.mulf %27, %28 : vector<64x16xf32>
    %30 = vector.broadcast %9 : vector<1x16xf32> to vector<64x16xf32>
    %31 = arith.addf %29, %30 : vector<64x16xf32>
    %cst_18 = arith.constant 0.000000e+00 : f32
    %32 = vector.broadcast %cst_18 : f32 to vector<64x16xf32>
    %33 = arith.maximumf %31, %32 : vector<64x16xf32>
    %c0_19 = arith.constant 0 : index
    %c0_20 = arith.constant 0 : index
    %34 = vector.load %arg18[%c0_19, %c0_20] : memref<64x19xf32, #tpu.memory_space<vmem>>, vector<64x3xf32>
    tpu.vector_store %arg18[%c0_19, %c0_20], %0 {strides = array<i32>} : memref<64x19xf32, #tpu.memory_space<vmem>>, vector<64x3xf32>,
    %c0_21 = arith.constant 0 : index
    %c3 = arith.constant 3 : index
    %35 = vector.load %arg18[%c0_21, %c3] : memref<64x19xf32, #tpu.memory_space<vmem>>, vector<64x16xf32>
    tpu.vector_store %arg18[%c0_21, %c3], %33 {strides = array<i32>} : memref<64x19xf32, #tpu.memory_space<vmem>>, vector<64x16xf32>,
    %c0_22 = arith.constant 0 : index
    %c0_23 = arith.constant 0 : index
    %36 = vector.load %arg18[%c0_22, %c0_23] : memref<64x19xf32, #tpu.memory_space<vmem>>, vector<64x19xf32>
    %cst_24 = arith.constant dense<0.000000e+00> : vector<64x64xf32>
    %37 = tpu.matmul %0, %1, %cst_24 {dimension_numbers = #tpu.dot_dimension_numbers<[1], [0], [0], [1], [0, 0, 1, 1], [], []>} : vector<64x3xf32>, vector<3x64xf32>, vector<64x64xf32> -> vector<64x64xf32>
    %38 = arith.mulf %0, %0 : vector<64x3xf32>
    %cst_25 = arith.constant dense<0.000000e+00> : vector<64xf32>
    %39 = vector.multi_reduction <add>, %38, %cst_25 [1] : vector<64x3xf32> to vector<64xf32>
    %40 = vector.shape_cast %39 : vector<64xf32> to vector<64x1xf32>
    %41 = arith.mulf %1, %1 : vector<3x64xf32>
    %cst_26 = arith.constant dense<0.000000e+00> : vector<64xf32>
    %42 = vector.multi_reduction <add>, %41, %cst_26 [0] : vector<3x64xf32> to vector<64xf32>
    %43 = vector.shape_cast %42 : vector<64xf32> to vector<1x64xf32>
    %44 = vector.broadcast %40 : vector<64x1xf32> to vector<64x64xf32>
    %45 = vector.broadcast %43 : vector<1x64xf32> to vector<64x64xf32>
    %46 = arith.addf %44, %45 : vector<64x64xf32>
    %cst_27 = arith.constant 2.000000e+00 : f32
    %47 = vector.broadcast %cst_27 : f32 to vector<64x64xf32>
    %48 = arith.mulf %47, %37 : vector<64x64xf32>
    %49 = arith.subf %46, %48 : vector<64x64xf32>
    %cst_28 = arith.constant 0.000000e+00 : f32
    %50 = vector.broadcast %cst_28 : f32 to vector<64x64xf32>
    %51 = arith.maximumf %49, %50 : vector<64x64xf32>
    %52 = tpu.iota {dimensions = array<i32: 1>} : vector<64x64xi32>
    %53 = tpu.bitcast %51 : vector<64x64xf32> -> vector<64x64xi32>
    %c-64_i32 = arith.constant -64 : i32
    %54 = vector.broadcast %c-64_i32 : i32 to vector<64x64xi32>
    %55 = arith.andi %53, %54 : vector<64x64xi32>
    %56 = arith.ori %55, %52 : vector<64x64xi32>
    %57 = tpu.bitcast %56 : vector<64x64xi32> -> vector<64x64xf32>
    %cst_29 = arith.constant 0.000000e+00 : f32
    %58 = vector.broadcast %cst_29 : f32 to vector<64x1xf32>
    %cst_30 = arith.constant dense<0x7F800000> : vector<64xf32>
    %59 = vector.multi_reduction <minimumf>, %57, %cst_30 [1] : vector<64x64xf32> to vector<64xf32>
    %60 = vector.shape_cast %59 : vector<64xf32> to vector<64x1xf32>
    %61 = tpu.bitcast %60 : vector<64x1xf32> -> vector<64x1xi32>
    %c63_i32 = arith.constant 63 : i32
    %62 = vector.broadcast %c63_i32 : i32 to vector<64x1xi32>
    %63 = arith.andi %61, %62 : vector<64x1xi32>
    %64 = vector.broadcast %63 : vector<64x1xi32> to vector<64x64xi32>
    %65 = arith.cmpi eq, %52, %64 : vector<64x64xi32>
    %66 = arith.extui %65 : vector<64x64xi1> to vector<64x64xi32>
    %67 = arith.sitofp %66 : vector<64x64xi32> to vector<64x64xf32>
    %cst_31 = arith.constant dense<0.000000e+00> : vector<64x19xf32>
    %68 = tpu.matmul %67, %36, %cst_31 {dimension_numbers = #tpu.dot_dimension_numbers<[1], [0], [0], [1], [0, 0, 1, 1], [], []>} : vector<64x64xf32>, vector<64x19xf32>, vector<64x19xf32> -> vector<64x19xf32>
    %c0_32 = arith.constant 0 : index
    %c0_33 = arith.constant 0 : index
    %c0_34 = arith.constant 0 : index
    %69 = vector.load %arg19[%c0_32, %c0_33, %c0_34] : memref<8x64x19xf32, #tpu.memory_space<vmem>>, vector<1x64x19xf32>
    %70 = vector.shape_cast %69 : vector<1x64x19xf32> to vector<64x19xf32>
    %71 = vector.shape_cast %68 : vector<64x19xf32> to vector<1x64x19xf32>
    tpu.vector_store %arg19[%c0_32, %c0_33, %c0_34], %71 {strides = array<i32>} : memref<8x64x19xf32, #tpu.memory_space<vmem>>, vector<1x64x19xf32>,
    %c0_35 = arith.constant 0 : index
    %c0_36 = arith.constant 0 : index
    %c0_37 = arith.constant 0 : index
    %72 = vector.load %arg19[%c0_35, %c0_36, %c0_37] : memref<8x64x19xf32, #tpu.memory_space<vmem>>, vector<1x64x3xf32>
    %73 = vector.shape_cast %72 : vector<1x64x3xf32> to vector<64x3xf32>
    %74 = arith.subf %73, %0 : vector<64x3xf32>
    %75 = arith.mulf %74, %74 : vector<64x3xf32>
    %cst_38 = arith.constant dense<0.000000e+00> : vector<64xf32>
    %76 = vector.multi_reduction <add>, %75, %cst_38 [1] : vector<64x3xf32> to vector<64xf32>
    %77 = vector.shape_cast %76 : vector<64xf32> to vector<64x1xf32>
    %78 = arith.maximumf %58, %77 : vector<64x1xf32>
    %cst_39 = arith.constant 0x7F800000 : f32
    %79 = vector.broadcast %cst_39 : f32 to vector<64x64xf32>
    %80 = arith.select %65, %79, %57 : vector<64x64xi1>, vector<64x64xf32>
    %cst_40 = arith.constant dense<0x7F800000> : vector<64xf32>
    %81 = vector.multi_reduction <minimumf>, %80, %cst_40 [1] : vector<64x64xf32> to vector<64xf32>
    %82 = vector.shape_cast %81 : vector<64xf32> to vector<64x1xf32>
    %83 = tpu.bitcast %82 : vector<64x1xf32> -> vector<64x1xi32>
    %c63_i32_41 = arith.constant 63 : i32
    %84 = vector.broadcast %c63_i32_41 : i32 to vector<64x1xi32>
    %85 = arith.andi %83, %84 : vector<64x1xi32>
    %86 = vector.broadcast %85 : vector<64x1xi32> to vector<64x64xi32>
    %87 = arith.cmpi eq, %52, %86 : vector<64x64xi32>
    %88 = arith.extui %87 : vector<64x64xi1> to vector<64x64xi32>
    %89 = arith.sitofp %88 : vector<64x64xi32> to vector<64x64xf32>
    %cst_42 = arith.constant dense<0.000000e+00> : vector<64x19xf32>
    %90 = tpu.matmul %89, %36, %cst_42 {dimension_numbers = #tpu.dot_dimension_numbers<[1], [0], [0], [1], [0, 0, 1, 1], [], []>} : vector<64x64xf32>, vector<64x19xf32>, vector<64x19xf32> -> vector<64x19xf32>
    %c1 = arith.constant 1 : index
    %c0_43 = arith.constant 0 : index
    %c0_44 = arith.constant 0 : index
    %91 = vector.load %arg19[%c1, %c0_43, %c0_44] : memref<8x64x19xf32, #tpu.memory_space<vmem>>, vector<1x64x19xf32>
    %92 = vector.shape_cast %91 : vector<1x64x19xf32> to vector<64x19xf32>
    %93 = vector.shape_cast %90 : vector<64x19xf32> to vector<1x64x19xf32>
    tpu.vector_store %arg19[%c1, %c0_43, %c0_44], %93 {strides = array<i32>} : memref<8x64x19xf32, #tpu.memory_space<vmem>>, vector<1x64x19xf32>,
    %c1_45 = arith.constant 1 : index
    %c0_46 = arith.constant 0 : index
    %c0_47 = arith.constant 0 : index
    %94 = vector.load %arg19[%c1_45, %c0_46, %c0_47] : memref<8x64x19xf32, #tpu.memory_space<vmem>>, vector<1x64x3xf32>
    %95 = vector.shape_cast %94 : vector<1x64x3xf32> to vector<64x3xf32>
    %96 = arith.subf %95, %0 : vector<64x3xf32>
    %97 = arith.mulf %96, %96 : vector<64x3xf32>
    %cst_48 = arith.constant dense<0.000000e+00> : vector<64xf32>
    %98 = vector.multi_reduction <add>, %97, %cst_48 [1] : vector<64x3xf32> to vector<64xf32>
    %99 = vector.shape_cast %98 : vector<64xf32> to vector<64x1xf32>
    %100 = arith.maximumf %78, %99 : vector<64x1xf32>
    %cst_49 = arith.constant 0x7F800000 : f32
    %101 = vector.broadcast %cst_49 : f32 to vector<64x64xf32>
    %102 = arith.select %87, %101, %80 : vector<64x64xi1>, vector<64x64xf32>
    %cst_50 = arith.constant dense<0x7F800000> : vector<64xf32>
    %103 = vector.multi_reduction <minimumf>, %102, %cst_50 [1] : vector<64x64xf32> to vector<64xf32>
    %104 = vector.shape_cast %103 : vector<64xf32> to vector<64x1xf32>
    %105 = tpu.bitcast %104 : vector<64x1xf32> -> vector<64x1xi32>
    %c63_i32_51 = arith.constant 63 : i32
    %106 = vector.broadcast %c63_i32_51 : i32 to vector<64x1xi32>
    %107 = arith.andi %105, %106 : vector<64x1xi32>
    %108 = vector.broadcast %107 : vector<64x1xi32> to vector<64x64xi32>
    %109 = arith.cmpi eq, %52, %108 : vector<64x64xi32>
    %110 = arith.extui %109 : vector<64x64xi1> to vector<64x64xi32>
    %111 = arith.sitofp %110 : vector<64x64xi32> to vector<64x64xf32>
    %cst_52 = arith.constant dense<0.000000e+00> : vector<64x19xf32>
    %112 = tpu.matmul %111, %36, %cst_52 {dimension_numbers = #tpu.dot_dimension_numbers<[1], [0], [0], [1], [0, 0, 1, 1], [], []>} : vector<64x64xf32>, vector<64x19xf32>, vector<64x19xf32> -> vector<64x19xf32>
    %c2 = arith.constant 2 : index
    %c0_53 = arith.constant 0 : index
    %c0_54 = arith.constant 0 : index
    %113 = vector.load %arg19[%c2, %c0_53, %c0_54] : memref<8x64x19xf32, #tpu.memory_space<vmem>>, vector<1x64x19xf32>
    %114 = vector.shape_cast %113 : vector<1x64x19xf32> to vector<64x19xf32>
    %115 = vector.shape_cast %112 : vector<64x19xf32> to vector<1x64x19xf32>
    tpu.vector_store %arg19[%c2, %c0_53, %c0_54], %115 {strides = array<i32>} : memref<8x64x19xf32, #tpu.memory_space<vmem>>, vector<1x64x19xf32>,
    %c2_55 = arith.constant 2 : index
    %c0_56 = arith.constant 0 : index
    %c0_57 = arith.constant 0 : index
    %116 = vector.load %arg19[%c2_55, %c0_56, %c0_57] : memref<8x64x19xf32, #tpu.memory_space<vmem>>, vector<1x64x3xf32>
    %117 = vector.shape_cast %116 : vector<1x64x3xf32> to vector<64x3xf32>
    %118 = arith.subf %117, %0 : vector<64x3xf32>
    %119 = arith.mulf %118, %118 : vector<64x3xf32>
    %cst_58 = arith.constant dense<0.000000e+00> : vector<64xf32>
    %120 = vector.multi_reduction <add>, %119, %cst_58 [1] : vector<64x3xf32> to vector<64xf32>
    %121 = vector.shape_cast %120 : vector<64xf32> to vector<64x1xf32>
    %122 = arith.maximumf %100, %121 : vector<64x1xf32>
    %cst_59 = arith.constant 0x7F800000 : f32
    %123 = vector.broadcast %cst_59 : f32 to vector<64x64xf32>
    %124 = arith.select %109, %123, %102 : vector<64x64xi1>, vector<64x64xf32>
    %cst_60 = arith.constant dense<0x7F800000> : vector<64xf32>
    %125 = vector.multi_reduction <minimumf>, %124, %cst_60 [1] : vector<64x64xf32> to vector<64xf32>
    %126 = vector.shape_cast %125 : vector<64xf32> to vector<64x1xf32>
    %127 = tpu.bitcast %126 : vector<64x1xf32> -> vector<64x1xi32>
    %c63_i32_61 = arith.constant 63 : i32
    %128 = vector.broadcast %c63_i32_61 : i32 to vector<64x1xi32>
    %129 = arith.andi %127, %128 : vector<64x1xi32>
    %130 = vector.broadcast %129 : vector<64x1xi32> to vector<64x64xi32>
    %131 = arith.cmpi eq, %52, %130 : vector<64x64xi32>
    %132 = arith.extui %131 : vector<64x64xi1> to vector<64x64xi32>
    %133 = arith.sitofp %132 : vector<64x64xi32> to vector<64x64xf32>
    %cst_62 = arith.constant dense<0.000000e+00> : vector<64x19xf32>
    %134 = tpu.matmul %133, %36, %cst_62 {dimension_numbers = #tpu.dot_dimension_numbers<[1], [0], [0], [1], [0, 0, 1, 1], [], []>} : vector<64x64xf32>, vector<64x19xf32>, vector<64x19xf32> -> vector<64x19xf32>
    %c3_63 = arith.constant 3 : index
    %c0_64 = arith.constant 0 : index
    %c0_65 = arith.constant 0 : index
    %135 = vector.load %arg19[%c3_63, %c0_64, %c0_65] : memref<8x64x19xf32, #tpu.memory_space<vmem>>, vector<1x64x19xf32>
    %136 = vector.shape_cast %135 : vector<1x64x19xf32> to vector<64x19xf32>
    %137 = vector.shape_cast %134 : vector<64x19xf32> to vector<1x64x19xf32>
    tpu.vector_store %arg19[%c3_63, %c0_64, %c0_65], %137 {strides = array<i32>} : memref<8x64x19xf32, #tpu.memory_space<vmem>>, vector<1x64x19xf32>,
    %c3_66 = arith.constant 3 : index
    %c0_67 = arith.constant 0 : index
    %c0_68 = arith.constant 0 : index
    %138 = vector.load %arg19[%c3_66, %c0_67, %c0_68] : memref<8x64x19xf32, #tpu.memory_space<vmem>>, vector<1x64x3xf32>
    %139 = vector.shape_cast %138 : vector<1x64x3xf32> to vector<64x3xf32>
    %140 = arith.subf %139, %0 : vector<64x3xf32>
    %141 = arith.mulf %140, %140 : vector<64x3xf32>
    %cst_69 = arith.constant dense<0.000000e+00> : vector<64xf32>
    %142 = vector.multi_reduction <add>, %141, %cst_69 [1] : vector<64x3xf32> to vector<64xf32>
    %143 = vector.shape_cast %142 : vector<64xf32> to vector<64x1xf32>
    %144 = arith.maximumf %122, %143 : vector<64x1xf32>
    %cst_70 = arith.constant 0x7F800000 : f32
    %145 = vector.broadcast %cst_70 : f32 to vector<64x64xf32>
    %146 = arith.select %131, %145, %124 : vector<64x64xi1>, vector<64x64xf32>
    %cst_71 = arith.constant dense<0x7F800000> : vector<64xf32>
    %147 = vector.multi_reduction <minimumf>, %146, %cst_71 [1] : vector<64x64xf32> to vector<64xf32>
    %148 = vector.shape_cast %147 : vector<64xf32> to vector<64x1xf32>
    %149 = tpu.bitcast %148 : vector<64x1xf32> -> vector<64x1xi32>
    %c63_i32_72 = arith.constant 63 : i32
    %150 = vector.broadcast %c63_i32_72 : i32 to vector<64x1xi32>
    %151 = arith.andi %149, %150 : vector<64x1xi32>
    %152 = vector.broadcast %151 : vector<64x1xi32> to vector<64x64xi32>
    %153 = arith.cmpi eq, %52, %152 : vector<64x64xi32>
    %154 = arith.extui %153 : vector<64x64xi1> to vector<64x64xi32>
    %155 = arith.sitofp %154 : vector<64x64xi32> to vector<64x64xf32>
    %cst_73 = arith.constant dense<0.000000e+00> : vector<64x19xf32>
    %156 = tpu.matmul %155, %36, %cst_73 {dimension_numbers = #tpu.dot_dimension_numbers<[1], [0], [0], [1], [0, 0, 1, 1], [], []>} : vector<64x64xf32>, vector<64x19xf32>, vector<64x19xf32> -> vector<64x19xf32>
    %c4 = arith.constant 4 : index
    %c0_74 = arith.constant 0 : index
    %c0_75 = arith.constant 0 : index
    %157 = vector.load %arg19[%c4, %c0_74, %c0_75] : memref<8x64x19xf32, #tpu.memory_space<vmem>>, vector<1x64x19xf32>
    %158 = vector.shape_cast %157 : vector<1x64x19xf32> to vector<64x19xf32>
    %159 = vector.shape_cast %156 : vector<64x19xf32> to vector<1x64x19xf32>
    tpu.vector_store %arg19[%c4, %c0_74, %c0_75], %159 {strides = array<i32>} : memref<8x64x19xf32, #tpu.memory_space<vmem>>, vector<1x64x19xf32>,
    %c4_76 = arith.constant 4 : index
    %c0_77 = arith.constant 0 : index
    %c0_78 = arith.constant 0 : index
    %160 = vector.load %arg19[%c4_76, %c0_77, %c0_78] : memref<8x64x19xf32, #tpu.memory_space<vmem>>, vector<1x64x3xf32>
    %161 = vector.shape_cast %160 : vector<1x64x3xf32> to vector<64x3xf32>
    %162 = arith.subf %161, %0 : vector<64x3xf32>
    %163 = arith.mulf %162, %162 : vector<64x3xf32>
    %cst_79 = arith.constant dense<0.000000e+00> : vector<64xf32>
    %164 = vector.multi_reduction <add>, %163, %cst_79 [1] : vector<64x3xf32> to vector<64xf32>
    %165 = vector.shape_cast %164 : vector<64xf32> to vector<64x1xf32>
    %166 = arith.maximumf %144, %165 : vector<64x1xf32>
    %cst_80 = arith.constant 0x7F800000 : f32
    %167 = vector.broadcast %cst_80 : f32 to vector<64x64xf32>
    %168 = arith.select %153, %167, %146 : vector<64x64xi1>, vector<64x64xf32>
    %cst_81 = arith.constant dense<0x7F800000> : vector<64xf32>
    %169 = vector.multi_reduction <minimumf>, %168, %cst_81 [1] : vector<64x64xf32> to vector<64xf32>
    %170 = vector.shape_cast %169 : vector<64xf32> to vector<64x1xf32>
    %171 = tpu.bitcast %170 : vector<64x1xf32> -> vector<64x1xi32>
    %c63_i32_82 = arith.constant 63 : i32
    %172 = vector.broadcast %c63_i32_82 : i32 to vector<64x1xi32>
    %173 = arith.andi %171, %172 : vector<64x1xi32>
    %174 = vector.broadcast %173 : vector<64x1xi32> to vector<64x64xi32>
    %175 = arith.cmpi eq, %52, %174 : vector<64x64xi32>
    %176 = arith.extui %175 : vector<64x64xi1> to vector<64x64xi32>
    %177 = arith.sitofp %176 : vector<64x64xi32> to vector<64x64xf32>
    %cst_83 = arith.constant dense<0.000000e+00> : vector<64x19xf32>
    %178 = tpu.matmul %177, %36, %cst_83 {dimension_numbers = #tpu.dot_dimension_numbers<[1], [0], [0], [1], [0, 0, 1, 1], [], []>} : vector<64x64xf32>, vector<64x19xf32>, vector<64x19xf32> -> vector<64x19xf32>
    %c5 = arith.constant 5 : index
    %c0_84 = arith.constant 0 : index
    %c0_85 = arith.constant 0 : index
    %179 = vector.load %arg19[%c5, %c0_84, %c0_85] : memref<8x64x19xf32, #tpu.memory_space<vmem>>, vector<1x64x19xf32>
    %180 = vector.shape_cast %179 : vector<1x64x19xf32> to vector<64x19xf32>
    %181 = vector.shape_cast %178 : vector<64x19xf32> to vector<1x64x19xf32>
    tpu.vector_store %arg19[%c5, %c0_84, %c0_85], %181 {strides = array<i32>} : memref<8x64x19xf32, #tpu.memory_space<vmem>>, vector<1x64x19xf32>,
    %c5_86 = arith.constant 5 : index
    %c0_87 = arith.constant 0 : index
    %c0_88 = arith.constant 0 : index
    %182 = vector.load %arg19[%c5_86, %c0_87, %c0_88] : memref<8x64x19xf32, #tpu.memory_space<vmem>>, vector<1x64x3xf32>
    %183 = vector.shape_cast %182 : vector<1x64x3xf32> to vector<64x3xf32>
    %184 = arith.subf %183, %0 : vector<64x3xf32>
    %185 = arith.mulf %184, %184 : vector<64x3xf32>
    %cst_89 = arith.constant dense<0.000000e+00> : vector<64xf32>
    %186 = vector.multi_reduction <add>, %185, %cst_89 [1] : vector<64x3xf32> to vector<64xf32>
    %187 = vector.shape_cast %186 : vector<64xf32> to vector<64x1xf32>
    %188 = arith.maximumf %166, %187 : vector<64x1xf32>
    %cst_90 = arith.constant 0x7F800000 : f32
    %189 = vector.broadcast %cst_90 : f32 to vector<64x64xf32>
    %190 = arith.select %175, %189, %168 : vector<64x64xi1>, vector<64x64xf32>
    %cst_91 = arith.constant dense<0x7F800000> : vector<64xf32>
    %191 = vector.multi_reduction <minimumf>, %190, %cst_91 [1] : vector<64x64xf32> to vector<64xf32>
    %192 = vector.shape_cast %191 : vector<64xf32> to vector<64x1xf32>
    %193 = tpu.bitcast %192 : vector<64x1xf32> -> vector<64x1xi32>
    %c63_i32_92 = arith.constant 63 : i32
    %194 = vector.broadcast %c63_i32_92 : i32 to vector<64x1xi32>
    %195 = arith.andi %193, %194 : vector<64x1xi32>
    %196 = vector.broadcast %195 : vector<64x1xi32> to vector<64x64xi32>
    %197 = arith.cmpi eq, %52, %196 : vector<64x64xi32>
    %198 = arith.extui %197 : vector<64x64xi1> to vector<64x64xi32>
    %199 = arith.sitofp %198 : vector<64x64xi32> to vector<64x64xf32>
    %cst_93 = arith.constant dense<0.000000e+00> : vector<64x19xf32>
    %200 = tpu.matmul %199, %36, %cst_93 {dimension_numbers = #tpu.dot_dimension_numbers<[1], [0], [0], [1], [0, 0, 1, 1], [], []>} : vector<64x64xf32>, vector<64x19xf32>, vector<64x19xf32> -> vector<64x19xf32>
    %c6 = arith.constant 6 : index
    %c0_94 = arith.constant 0 : index
    %c0_95 = arith.constant 0 : index
    %201 = vector.load %arg19[%c6, %c0_94, %c0_95] : memref<8x64x19xf32, #tpu.memory_space<vmem>>, vector<1x64x19xf32>
    %202 = vector.shape_cast %201 : vector<1x64x19xf32> to vector<64x19xf32>
    %203 = vector.shape_cast %200 : vector<64x19xf32> to vector<1x64x19xf32>
    tpu.vector_store %arg19[%c6, %c0_94, %c0_95], %203 {strides = array<i32>} : memref<8x64x19xf32, #tpu.memory_space<vmem>>, vector<1x64x19xf32>,
    %c6_96 = arith.constant 6 : index
    %c0_97 = arith.constant 0 : index
    %c0_98 = arith.constant 0 : index
    %204 = vector.load %arg19[%c6_96, %c0_97, %c0_98] : memref<8x64x19xf32, #tpu.memory_space<vmem>>, vector<1x64x3xf32>
    %205 = vector.shape_cast %204 : vector<1x64x3xf32> to vector<64x3xf32>
    %206 = arith.subf %205, %0 : vector<64x3xf32>
    %207 = arith.mulf %206, %206 : vector<64x3xf32>
    %cst_99 = arith.constant dense<0.000000e+00> : vector<64xf32>
    %208 = vector.multi_reduction <add>, %207, %cst_99 [1] : vector<64x3xf32> to vector<64xf32>
    %209 = vector.shape_cast %208 : vector<64xf32> to vector<64x1xf32>
    %210 = arith.maximumf %188, %209 : vector<64x1xf32>
    %cst_100 = arith.constant 0x7F800000 : f32
    %211 = vector.broadcast %cst_100 : f32 to vector<64x64xf32>
    %212 = arith.select %197, %211, %190 : vector<64x64xi1>, vector<64x64xf32>
    %cst_101 = arith.constant dense<0x7F800000> : vector<64xf32>
    %213 = vector.multi_reduction <minimumf>, %212, %cst_101 [1] : vector<64x64xf32> to vector<64xf32>
    %214 = vector.shape_cast %213 : vector<64xf32> to vector<64x1xf32>
    %215 = tpu.bitcast %214 : vector<64x1xf32> -> vector<64x1xi32>
    %c63_i32_102 = arith.constant 63 : i32
    %216 = vector.broadcast %c63_i32_102 : i32 to vector<64x1xi32>
    %217 = arith.andi %215, %216 : vector<64x1xi32>
    %218 = vector.broadcast %217 : vector<64x1xi32> to vector<64x64xi32>
    %219 = arith.cmpi eq, %52, %218 : vector<64x64xi32>
    %220 = arith.extui %219 : vector<64x64xi1> to vector<64x64xi32>
    %221 = arith.sitofp %220 : vector<64x64xi32> to vector<64x64xf32>
    %cst_103 = arith.constant dense<0.000000e+00> : vector<64x19xf32>
    %222 = tpu.matmul %221, %36, %cst_103 {dimension_numbers = #tpu.dot_dimension_numbers<[1], [0], [0], [1], [0, 0, 1, 1], [], []>} : vector<64x64xf32>, vector<64x19xf32>, vector<64x19xf32> -> vector<64x19xf32>
    %c7 = arith.constant 7 : index
    %c0_104 = arith.constant 0 : index
    %c0_105 = arith.constant 0 : index
    %223 = vector.load %arg19[%c7, %c0_104, %c0_105] : memref<8x64x19xf32, #tpu.memory_space<vmem>>, vector<1x64x19xf32>
    %224 = vector.shape_cast %223 : vector<1x64x19xf32> to vector<64x19xf32>
    %225 = vector.shape_cast %222 : vector<64x19xf32> to vector<1x64x19xf32>
    tpu.vector_store %arg19[%c7, %c0_104, %c0_105], %225 {strides = array<i32>} : memref<8x64x19xf32, #tpu.memory_space<vmem>>, vector<1x64x19xf32>,
    %c7_106 = arith.constant 7 : index
    %c0_107 = arith.constant 0 : index
    %c0_108 = arith.constant 0 : index
    %226 = vector.load %arg19[%c7_106, %c0_107, %c0_108] : memref<8x64x19xf32, #tpu.memory_space<vmem>>, vector<1x64x3xf32>
    %227 = vector.shape_cast %226 : vector<1x64x3xf32> to vector<64x3xf32>
    %228 = arith.subf %227, %0 : vector<64x3xf32>
    %229 = arith.mulf %228, %228 : vector<64x3xf32>
    %cst_109 = arith.constant dense<0.000000e+00> : vector<64xf32>
    %230 = vector.multi_reduction <add>, %229, %cst_109 [1] : vector<64x3xf32> to vector<64xf32>
    %231 = vector.shape_cast %230 : vector<64xf32> to vector<64x1xf32>
    %232 = arith.maximumf %210, %231 : vector<64x1xf32>
    %233 = math.sqrt %232 : vector<64x1xf32>
    %cst_110 = arith.constant 1.000000e-10 : f32
    %234 = vector.broadcast %cst_110 : f32 to vector<64x1xf32>
    %235 = arith.addf %233, %234 : vector<64x1xf32>
    %cst_111 = arith.constant 1.000000e+00 : f32
    %236 = vector.broadcast %cst_111 : f32 to vector<64x1xf32>
    %237 = arith.divf %236, %235 : vector<64x1xf32>
    %c0_112 = arith.constant 0 : index
    %c0_113 = arith.constant 0 : index
    %238 = vector.load %arg8[%c0_112, %c0_113] : memref<3x15xf32, #tpu.memory_space<vmem>>, vector<3x15xf32>
    %239 = arith.mulf %238, %238 : vector<3x15xf32>
    %cst_114 = arith.constant dense<0.000000e+00> : vector<15xf32>
    %240 = vector.multi_reduction <add>, %239, %cst_114 [0] : vector<3x15xf32> to vector<15xf32>
    %241 = vector.shape_cast %240 : vector<15xf32> to vector<1x15xf32>
    %c0_115 = arith.constant 0 : index
    %c0_116 = arith.constant 0 : index
    %242 = vector.load %arg9[%c0_115, %c0_116] : memref<15x16xf32, #tpu.memory_space<vmem>>, vector<15x16xf32>
    %cst_117 = arith.constant 0.000000e+00 : f32
    %243 = vector.broadcast %cst_117 : f32 to vector<64x16xf32>
    %c0_118 = arith.constant 0 : index
    %c0_119 = arith.constant 0 : index
    %c0_120 = arith.constant 0 : index
    %244 = vector.load %arg19[%c0_118, %c0_119, %c0_120] : memref<8x64x19xf32, #tpu.memory_space<vmem>>, vector<1x64x3xf32>
    %245 = vector.shape_cast %244 : vector<1x64x3xf32> to vector<64x3xf32>
    %246 = arith.subf %245, %0 : vector<64x3xf32>
    %c0_121 = arith.constant 0 : index
    %c0_122 = arith.constant 0 : index
    %c3_123 = arith.constant 3 : index
    %247 = vector.load %arg19[%c0_121, %c0_122, %c3_123] : memref<8x64x19xf32, #tpu.memory_space<vmem>>, vector<1x64x16xf32>
    %248 = vector.shape_cast %247 : vector<1x64x16xf32> to vector<64x16xf32>
    %249 = vector.broadcast %237 : vector<64x1xf32> to vector<64x3xf32>
    %250 = arith.mulf %246, %249 : vector<64x3xf32>
    %251 = arith.mulf %250, %250 : vector<64x3xf32>
    %cst_124 = arith.constant dense<0.000000e+00> : vector<64xf32>
    %252 = vector.multi_reduction <add>, %251, %cst_124 [1] : vector<64x3xf32> to vector<64xf32>
    %253 = vector.shape_cast %252 : vector<64xf32> to vector<64x1xf32>
    %cst_125 = arith.constant dense<0.000000e+00> : vector<64x15xf32>
    %254 = tpu.matmul %250, %238, %cst_125 {dimension_numbers = #tpu.dot_dimension_numbers<[1], [0], [0], [1], [0, 0, 1, 1], [], []>} : vector<64x3xf32>, vector<3x15xf32>, vector<64x15xf32> -> vector<64x15xf32>
    %255 = vector.broadcast %241 : vector<1x15xf32> to vector<64x15xf32>
    %256 = vector.broadcast %253 : vector<64x1xf32> to vector<64x15xf32>
    %257 = arith.addf %255, %256 : vector<64x15xf32>
    %cst_126 = arith.constant 2.000000e+00 : f32
    %258 = vector.broadcast %cst_126 : f32 to vector<64x15xf32>
    %259 = arith.mulf %258, %254 : vector<64x15xf32>
    %260 = arith.subf %257, %259 : vector<64x15xf32>
    %cst_127 = arith.constant -5.55555534 : f32
    %261 = vector.broadcast %cst_127 : f32 to vector<64x15xf32>
    %262 = arith.mulf %260, %261 : vector<64x15xf32>
    %263 = math.exp %262 : vector<64x15xf32>
    %cst_128 = arith.constant dense<0.000000e+00> : vector<64x16xf32>
    %264 = tpu.matmul %263, %242, %cst_128 {dimension_numbers = #tpu.dot_dimension_numbers<[1], [0], [0], [1], [0, 0, 1, 1], [], []>} : vector<64x15xf32>, vector<15x16xf32>, vector<64x16xf32> -> vector<64x16xf32>
    %265 = arith.mulf %248, %264 : vector<64x16xf32>
    %266 = arith.addf %243, %265 : vector<64x16xf32>
    %c1_129 = arith.constant 1 : index
    %c0_130 = arith.constant 0 : index
    %c0_131 = arith.constant 0 : index
    %267 = vector.load %arg19[%c1_129, %c0_130, %c0_131] : memref<8x64x19xf32, #tpu.memory_space<vmem>>, vector<1x64x3xf32>
    %268 = vector.shape_cast %267 : vector<1x64x3xf32> to vector<64x3xf32>
    %269 = arith.subf %268, %0 : vector<64x3xf32>
    %c1_132 = arith.constant 1 : index
    %c0_133 = arith.constant 0 : index
    %c3_134 = arith.constant 3 : index
    %270 = vector.load %arg19[%c1_132, %c0_133, %c3_134] : memref<8x64x19xf32, #tpu.memory_space<vmem>>, vector<1x64x16xf32>
    %271 = vector.shape_cast %270 : vector<1x64x16xf32> to vector<64x16xf32>
    %272 = vector.broadcast %237 : vector<64x1xf32> to vector<64x3xf32>
    %273 = arith.mulf %269, %272 : vector<64x3xf32>
    %274 = arith.mulf %273, %273 : vector<64x3xf32>
    %cst_135 = arith.constant dense<0.000000e+00> : vector<64xf32>
    %275 = vector.multi_reduction <add>, %274, %cst_135 [1] : vector<64x3xf32> to vector<64xf32>
    %276 = vector.shape_cast %275 : vector<64xf32> to vector<64x1xf32>
    %cst_136 = arith.constant dense<0.000000e+00> : vector<64x15xf32>
    %277 = tpu.matmul %273, %238, %cst_136 {dimension_numbers = #tpu.dot_dimension_numbers<[1], [0], [0], [1], [0, 0, 1, 1], [], []>} : vector<64x3xf32>, vector<3x15xf32>, vector<64x15xf32> -> vector<64x15xf32>
    %278 = vector.broadcast %241 : vector<1x15xf32> to vector<64x15xf32>
    %279 = vector.broadcast %276 : vector<64x1xf32> to vector<64x15xf32>
    %280 = arith.addf %278, %279 : vector<64x15xf32>
    %cst_137 = arith.constant 2.000000e+00 : f32
    %281 = vector.broadcast %cst_137 : f32 to vector<64x15xf32>
    %282 = arith.mulf %281, %277 : vector<64x15xf32>
    %283 = arith.subf %280, %282 : vector<64x15xf32>
    %cst_138 = arith.constant -5.55555534 : f32
    %284 = vector.broadcast %cst_138 : f32 to vector<64x15xf32>
    %285 = arith.mulf %283, %284 : vector<64x15xf32>
    %286 = math.exp %285 : vector<64x15xf32>
    %cst_139 = arith.constant dense<0.000000e+00> : vector<64x16xf32>
    %287 = tpu.matmul %286, %242, %cst_139 {dimension_numbers = #tpu.dot_dimension_numbers<[1], [0], [0], [1], [0, 0, 1, 1], [], []>} : vector<64x15xf32>, vector<15x16xf32>, vector<64x16xf32> -> vector<64x16xf32>
    %288 = arith.mulf %271, %287 : vector<64x16xf32>
    %289 = arith.addf %266, %288 : vector<64x16xf32>
    %c2_140 = arith.constant 2 : index
    %c0_141 = arith.constant 0 : index
    %c0_142 = arith.constant 0 : index
    %290 = vector.load %arg19[%c2_140, %c0_141, %c0_142] : memref<8x64x19xf32, #tpu.memory_space<vmem>>, vector<1x64x3xf32>
    %291 = vector.shape_cast %290 : vector<1x64x3xf32> to vector<64x3xf32>
    %292 = arith.subf %291, %0 : vector<64x3xf32>
    %c2_143 = arith.constant 2 : index
    %c0_144 = arith.constant 0 : index
    %c3_145 = arith.constant 3 : index
    %293 = vector.load %arg19[%c2_143, %c0_144, %c3_145] : memref<8x64x19xf32, #tpu.memory_space<vmem>>, vector<1x64x16xf32>
    %294 = vector.shape_cast %293 : vector<1x64x16xf32> to vector<64x16xf32>
    %295 = vector.broadcast %237 : vector<64x1xf32> to vector<64x3xf32>
    %296 = arith.mulf %292, %295 : vector<64x3xf32>
    %297 = arith.mulf %296, %296 : vector<64x3xf32>
    %cst_146 = arith.constant dense<0.000000e+00> : vector<64xf32>
    %298 = vector.multi_reduction <add>, %297, %cst_146 [1] : vector<64x3xf32> to vector<64xf32>
    %299 = vector.shape_cast %298 : vector<64xf32> to vector<64x1xf32>
    %cst_147 = arith.constant dense<0.000000e+00> : vector<64x15xf32>
    %300 = tpu.matmul %296, %238, %cst_147 {dimension_numbers = #tpu.dot_dimension_numbers<[1], [0], [0], [1], [0, 0, 1, 1], [], []>} : vector<64x3xf32>, vector<3x15xf32>, vector<64x15xf32> -> vector<64x15xf32>
    %301 = vector.broadcast %241 : vector<1x15xf32> to vector<64x15xf32>
    %302 = vector.broadcast %299 : vector<64x1xf32> to vector<64x15xf32>
    %303 = arith.addf %301, %302 : vector<64x15xf32>
    %cst_148 = arith.constant 2.000000e+00 : f32
    %304 = vector.broadcast %cst_148 : f32 to vector<64x15xf32>
    %305 = arith.mulf %304, %300 : vector<64x15xf32>
    %306 = arith.subf %303, %305 : vector<64x15xf32>
    %cst_149 = arith.constant -5.55555534 : f32
    %307 = vector.broadcast %cst_149 : f32 to vector<64x15xf32>
    %308 = arith.mulf %306, %307 : vector<64x15xf32>
    %309 = math.exp %308 : vector<64x15xf32>
    %cst_150 = arith.constant dense<0.000000e+00> : vector<64x16xf32>
    %310 = tpu.matmul %309, %242, %cst_150 {dimension_numbers = #tpu.dot_dimension_numbers<[1], [0], [0], [1], [0, 0, 1, 1], [], []>} : vector<64x15xf32>, vector<15x16xf32>, vector<64x16xf32> -> vector<64x16xf32>
    %311 = arith.mulf %294, %310 : vector<64x16xf32>
    %312 = arith.addf %289, %311 : vector<64x16xf32>
    %c3_151 = arith.constant 3 : index
    %c0_152 = arith.constant 0 : index
    %c0_153 = arith.constant 0 : index
    %313 = vector.load %arg19[%c3_151, %c0_152, %c0_153] : memref<8x64x19xf32, #tpu.memory_space<vmem>>, vector<1x64x3xf32>
    %314 = vector.shape_cast %313 : vector<1x64x3xf32> to vector<64x3xf32>
    %315 = arith.subf %314, %0 : vector<64x3xf32>
    %c3_154 = arith.constant 3 : index
    %c0_155 = arith.constant 0 : index
    %c3_156 = arith.constant 3 : index
    %316 = vector.load %arg19[%c3_154, %c0_155, %c3_156] : memref<8x64x19xf32, #tpu.memory_space<vmem>>, vector<1x64x16xf32>
    %317 = vector.shape_cast %316 : vector<1x64x16xf32> to vector<64x16xf32>
    %318 = vector.broadcast %237 : vector<64x1xf32> to vector<64x3xf32>
    %319 = arith.mulf %315, %318 : vector<64x3xf32>
    %320 = arith.mulf %319, %319 : vector<64x3xf32>
    %cst_157 = arith.constant dense<0.000000e+00> : vector<64xf32>
    %321 = vector.multi_reduction <add>, %320, %cst_157 [1] : vector<64x3xf32> to vector<64xf32>
    %322 = vector.shape_cast %321 : vector<64xf32> to vector<64x1xf32>
    %cst_158 = arith.constant dense<0.000000e+00> : vector<64x15xf32>
    %323 = tpu.matmul %319, %238, %cst_158 {dimension_numbers = #tpu.dot_dimension_numbers<[1], [0], [0], [1], [0, 0, 1, 1], [], []>} : vector<64x3xf32>, vector<3x15xf32>, vector<64x15xf32> -> vector<64x15xf32>
    %324 = vector.broadcast %241 : vector<1x15xf32> to vector<64x15xf32>
    %325 = vector.broadcast %322 : vector<64x1xf32> to vector<64x15xf32>
    %326 = arith.addf %324, %325 : vector<64x15xf32>
    %cst_159 = arith.constant 2.000000e+00 : f32
    %327 = vector.broadcast %cst_159 : f32 to vector<64x15xf32>
    %328 = arith.mulf %327, %323 : vector<64x15xf32>
    %329 = arith.subf %326, %328 : vector<64x15xf32>
    %cst_160 = arith.constant -5.55555534 : f32
    %330 = vector.broadcast %cst_160 : f32 to vector<64x15xf32>
    %331 = arith.mulf %329, %330 : vector<64x15xf32>
    %332 = math.exp %331 : vector<64x15xf32>
    %cst_161 = arith.constant dense<0.000000e+00> : vector<64x16xf32>
    %333 = tpu.matmul %332, %242, %cst_161 {dimension_numbers = #tpu.dot_dimension_numbers<[1], [0], [0], [1], [0, 0, 1, 1], [], []>} : vector<64x15xf32>, vector<15x16xf32>, vector<64x16xf32> -> vector<64x16xf32>
    %334 = arith.mulf %317, %333 : vector<64x16xf32>
    %335 = arith.addf %312, %334 : vector<64x16xf32>
    %c4_162 = arith.constant 4 : index
    %c0_163 = arith.constant 0 : index
    %c0_164 = arith.constant 0 : index
    %336 = vector.load %arg19[%c4_162, %c0_163, %c0_164] : memref<8x64x19xf32, #tpu.memory_space<vmem>>, vector<1x64x3xf32>
    %337 = vector.shape_cast %336 : vector<1x64x3xf32> to vector<64x3xf32>
    %338 = arith.subf %337, %0 : vector<64x3xf32>
    %c4_165 = arith.constant 4 : index
    %c0_166 = arith.constant 0 : index
    %c3_167 = arith.constant 3 : index
    %339 = vector.load %arg19[%c4_165, %c0_166, %c3_167] : memref<8x64x19xf32, #tpu.memory_space<vmem>>, vector<1x64x16xf32>
    %340 = vector.shape_cast %339 : vector<1x64x16xf32> to vector<64x16xf32>
    %341 = vector.broadcast %237 : vector<64x1xf32> to vector<64x3xf32>
    %342 = arith.mulf %338, %341 : vector<64x3xf32>
    %343 = arith.mulf %342, %342 : vector<64x3xf32>
    %cst_168 = arith.constant dense<0.000000e+00> : vector<64xf32>
    %344 = vector.multi_reduction <add>, %343, %cst_168 [1] : vector<64x3xf32> to vector<64xf32>
    %345 = vector.shape_cast %344 : vector<64xf32> to vector<64x1xf32>
    %cst_169 = arith.constant dense<0.000000e+00> : vector<64x15xf32>
    %346 = tpu.matmul %342, %238, %cst_169 {dimension_numbers = #tpu.dot_dimension_numbers<[1], [0], [0], [1], [0, 0, 1, 1], [], []>} : vector<64x3xf32>, vector<3x15xf32>, vector<64x15xf32> -> vector<64x15xf32>
    %347 = vector.broadcast %241 : vector<1x15xf32> to vector<64x15xf32>
    %348 = vector.broadcast %345 : vector<64x1xf32> to vector<64x15xf32>
    %349 = arith.addf %347, %348 : vector<64x15xf32>
    %cst_170 = arith.constant 2.000000e+00 : f32
    %350 = vector.broadcast %cst_170 : f32 to vector<64x15xf32>
    %351 = arith.mulf %350, %346 : vector<64x15xf32>
    %352 = arith.subf %349, %351 : vector<64x15xf32>
    %cst_171 = arith.constant -5.55555534 : f32
    %353 = vector.broadcast %cst_171 : f32 to vector<64x15xf32>
    %354 = arith.mulf %352, %353 : vector<64x15xf32>
    %355 = math.exp %354 : vector<64x15xf32>
    %cst_172 = arith.constant dense<0.000000e+00> : vector<64x16xf32>
    %356 = tpu.matmul %355, %242, %cst_172 {dimension_numbers = #tpu.dot_dimension_numbers<[1], [0], [0], [1], [0, 0, 1, 1], [], []>} : vector<64x15xf32>, vector<15x16xf32>, vector<64x16xf32> -> vector<64x16xf32>
    %357 = arith.mulf %340, %356 : vector<64x16xf32>
    %358 = arith.addf %335, %357 : vector<64x16xf32>
    %c5_173 = arith.constant 5 : index
    %c0_174 = arith.constant 0 : index
    %c0_175 = arith.constant 0 : index
    %359 = vector.load %arg19[%c5_173, %c0_174, %c0_175] : memref<8x64x19xf32, #tpu.memory_space<vmem>>, vector<1x64x3xf32>
    %360 = vector.shape_cast %359 : vector<1x64x3xf32> to vector<64x3xf32>
    %361 = arith.subf %360, %0 : vector<64x3xf32>
    %c5_176 = arith.constant 5 : index
    %c0_177 = arith.constant 0 : index
    %c3_178 = arith.constant 3 : index
    %362 = vector.load %arg19[%c5_176, %c0_177, %c3_178] : memref<8x64x19xf32, #tpu.memory_space<vmem>>, vector<1x64x16xf32>
    %363 = vector.shape_cast %362 : vector<1x64x16xf32> to vector<64x16xf32>
    %364 = vector.broadcast %237 : vector<64x1xf32> to vector<64x3xf32>
    %365 = arith.mulf %361, %364 : vector<64x3xf32>
    %366 = arith.mulf %365, %365 : vector<64x3xf32>
    %cst_179 = arith.constant dense<0.000000e+00> : vector<64xf32>
    %367 = vector.multi_reduction <add>, %366, %cst_179 [1] : vector<64x3xf32> to vector<64xf32>
    %368 = vector.shape_cast %367 : vector<64xf32> to vector<64x1xf32>
    %cst_180 = arith.constant dense<0.000000e+00> : vector<64x15xf32>
    %369 = tpu.matmul %365, %238, %cst_180 {dimension_numbers = #tpu.dot_dimension_numbers<[1], [0], [0], [1], [0, 0, 1, 1], [], []>} : vector<64x3xf32>, vector<3x15xf32>, vector<64x15xf32> -> vector<64x15xf32>
    %370 = vector.broadcast %241 : vector<1x15xf32> to vector<64x15xf32>
    %371 = vector.broadcast %368 : vector<64x1xf32> to vector<64x15xf32>
    %372 = arith.addf %370, %371 : vector<64x15xf32>
    %cst_181 = arith.constant 2.000000e+00 : f32
    %373 = vector.broadcast %cst_181 : f32 to vector<64x15xf32>
    %374 = arith.mulf %373, %369 : vector<64x15xf32>
    %375 = arith.subf %372, %374 : vector<64x15xf32>
    %cst_182 = arith.constant -5.55555534 : f32
    %376 = vector.broadcast %cst_182 : f32 to vector<64x15xf32>
    %377 = arith.mulf %375, %376 : vector<64x15xf32>
    %378 = math.exp %377 : vector<64x15xf32>
    %cst_183 = arith.constant dense<0.000000e+00> : vector<64x16xf32>
    %379 = tpu.matmul %378, %242, %cst_183 {dimension_numbers = #tpu.dot_dimension_numbers<[1], [0], [0], [1], [0, 0, 1, 1], [], []>} : vector<64x15xf32>, vector<15x16xf32>, vector<64x16xf32> -> vector<64x16xf32>
    %380 = arith.mulf %363, %379 : vector<64x16xf32>
    %381 = arith.addf %358, %380 : vector<64x16xf32>
    %c6_184 = arith.constant 6 : index
    %c0_185 = arith.constant 0 : index
    %c0_186 = arith.constant 0 : index
    %382 = vector.load %arg19[%c6_184, %c0_185, %c0_186] : memref<8x64x19xf32, #tpu.memory_space<vmem>>, vector<1x64x3xf32>
    %383 = vector.shape_cast %382 : vector<1x64x3xf32> to vector<64x3xf32>
    %384 = arith.subf %383, %0 : vector<64x3xf32>
    %c6_187 = arith.constant 6 : index
    %c0_188 = arith.constant 0 : index
    %c3_189 = arith.constant 3 : index
    %385 = vector.load %arg19[%c6_187, %c0_188, %c3_189] : memref<8x64x19xf32, #tpu.memory_space<vmem>>, vector<1x64x16xf32>
    %386 = vector.shape_cast %385 : vector<1x64x16xf32> to vector<64x16xf32>
    %387 = vector.broadcast %237 : vector<64x1xf32> to vector<64x3xf32>
    %388 = arith.mulf %384, %387 : vector<64x3xf32>
    %389 = arith.mulf %388, %388 : vector<64x3xf32>
    %cst_190 = arith.constant dense<0.000000e+00> : vector<64xf32>
    %390 = vector.multi_reduction <add>, %389, %cst_190 [1] : vector<64x3xf32> to vector<64xf32>
    %391 = vector.shape_cast %390 : vector<64xf32> to vector<64x1xf32>
    %cst_191 = arith.constant dense<0.000000e+00> : vector<64x15xf32>
    %392 = tpu.matmul %388, %238, %cst_191 {dimension_numbers = #tpu.dot_dimension_numbers<[1], [0], [0], [1], [0, 0, 1, 1], [], []>} : vector<64x3xf32>, vector<3x15xf32>, vector<64x15xf32> -> vector<64x15xf32>
    %393 = vector.broadcast %241 : vector<1x15xf32> to vector<64x15xf32>
    %394 = vector.broadcast %391 : vector<64x1xf32> to vector<64x15xf32>
    %395 = arith.addf %393, %394 : vector<64x15xf32>
    %cst_192 = arith.constant 2.000000e+00 : f32
    %396 = vector.broadcast %cst_192 : f32 to vector<64x15xf32>
    %397 = arith.mulf %396, %392 : vector<64x15xf32>
    %398 = arith.subf %395, %397 : vector<64x15xf32>
    %cst_193 = arith.constant -5.55555534 : f32
    %399 = vector.broadcast %cst_193 : f32 to vector<64x15xf32>
    %400 = arith.mulf %398, %399 : vector<64x15xf32>
    %401 = math.exp %400 : vector<64x15xf32>
    %cst_194 = arith.constant dense<0.000000e+00> : vector<64x16xf32>
    %402 = tpu.matmul %401, %242, %cst_194 {dimension_numbers = #tpu.dot_dimension_numbers<[1], [0], [0], [1], [0, 0, 1, 1], [], []>} : vector<64x15xf32>, vector<15x16xf32>, vector<64x16xf32> -> vector<64x16xf32>
    %403 = arith.mulf %386, %402 : vector<64x16xf32>
    %404 = arith.addf %381, %403 : vector<64x16xf32>
    %c7_195 = arith.constant 7 : index
    %c0_196 = arith.constant 0 : index
    %c0_197 = arith.constant 0 : index
    %405 = vector.load %arg19[%c7_195, %c0_196, %c0_197] : memref<8x64x19xf32, #tpu.memory_space<vmem>>, vector<1x64x3xf32>
    %406 = vector.shape_cast %405 : vector<1x64x3xf32> to vector<64x3xf32>
    %407 = arith.subf %406, %0 : vector<64x3xf32>
    %c7_198 = arith.constant 7 : index
    %c0_199 = arith.constant 0 : index
    %c3_200 = arith.constant 3 : index
    %408 = vector.load %arg19[%c7_198, %c0_199, %c3_200] : memref<8x64x19xf32, #tpu.memory_space<vmem>>, vector<1x64x16xf32>
    %409 = vector.shape_cast %408 : vector<1x64x16xf32> to vector<64x16xf32>
    %410 = vector.broadcast %237 : vector<64x1xf32> to vector<64x3xf32>
    %411 = arith.mulf %407, %410 : vector<64x3xf32>
    %412 = arith.mulf %411, %411 : vector<64x3xf32>
    %cst_201 = arith.constant dense<0.000000e+00> : vector<64xf32>
    %413 = vector.multi_reduction <add>, %412, %cst_201 [1] : vector<64x3xf32> to vector<64xf32>
    %414 = vector.shape_cast %413 : vector<64xf32> to vector<64x1xf32>
    %cst_202 = arith.constant dense<0.000000e+00> : vector<64x15xf32>
    %415 = tpu.matmul %411, %238, %cst_202 {dimension_numbers = #tpu.dot_dimension_numbers<[1], [0], [0], [1], [0, 0, 1, 1], [], []>} : vector<64x3xf32>, vector<3x15xf32>, vector<64x15xf32> -> vector<64x15xf32>
    %416 = vector.broadcast %241 : vector<1x15xf32> to vector<64x15xf32>
    %417 = vector.broadcast %414 : vector<64x1xf32> to vector<64x15xf32>
    %418 = arith.addf %416, %417 : vector<64x15xf32>
    %cst_203 = arith.constant 2.000000e+00 : f32
    %419 = vector.broadcast %cst_203 : f32 to vector<64x15xf32>
    %420 = arith.mulf %419, %415 : vector<64x15xf32>
    %421 = arith.subf %418, %420 : vector<64x15xf32>
    %cst_204 = arith.constant -5.55555534 : f32
    %422 = vector.broadcast %cst_204 : f32 to vector<64x15xf32>
    %423 = arith.mulf %421, %422 : vector<64x15xf32>
    %424 = math.exp %423 : vector<64x15xf32>
    %cst_205 = arith.constant dense<0.000000e+00> : vector<64x16xf32>
    %425 = tpu.matmul %424, %242, %cst_205 {dimension_numbers = #tpu.dot_dimension_numbers<[1], [0], [0], [1], [0, 0, 1, 1], [], []>} : vector<64x15xf32>, vector<15x16xf32>, vector<64x16xf32> -> vector<64x16xf32>
    %426 = arith.mulf %409, %425 : vector<64x16xf32>
    %427 = arith.addf %404, %426 : vector<64x16xf32>
    %c0_206 = arith.constant 0 : index
    %c0_207 = arith.constant 0 : index
    %428 = vector.load %arg10[%c0_206, %c0_207] : memref<1x16xf32, #tpu.memory_space<vmem>>, vector<1x16xf32>
    %429 = vector.broadcast %428 : vector<1x16xf32> to vector<64x16xf32>
    %430 = arith.addf %427, %429 : vector<64x16xf32>
    %c0_208 = arith.constant 0 : index
    %c0_209 = arith.constant 0 : index
    %431 = vector.load %arg11[%c0_208, %c0_209] : memref<1x16xf32, #tpu.memory_space<vmem>>, vector<1x16xf32>
    %c0_210 = arith.constant 0 : index
    %c0_211 = arith.constant 0 : index
    %432 = vector.load %arg12[%c0_210, %c0_211] : memref<1x16xf32, #tpu.memory_space<vmem>>, vector<1x16xf32>
    %cst_212 = arith.constant dense<0.000000e+00> : vector<16xf32>
    %433 = vector.multi_reduction <add>, %430, %cst_212 [0] : vector<64x16xf32> to vector<16xf32>
    %434 = vector.shape_cast %433 : vector<16xf32> to vector<1x16xf32>
    %cst_213 = arith.constant 6.400000e+01 : f32
    %435 = vector.broadcast %cst_213 : f32 to vector<1x16xf32>
    %436 = arith.divf %434, %435 : vector<1x16xf32>
    %437 = vector.broadcast %436 : vector<1x16xf32> to vector<64x16xf32>
    %438 = arith.subf %430, %437 : vector<64x16xf32>
    %439 = arith.mulf %438, %438 : vector<64x16xf32>
    %cst_214 = arith.constant dense<0.000000e+00> : vector<16xf32>
    %440 = vector.multi_reduction <add>, %439, %cst_214 [0] : vector<64x16xf32> to vector<16xf32>
    %441 = vector.shape_cast %440 : vector<16xf32> to vector<1x16xf32>
    %cst_215 = arith.constant 6.400000e+01 : f32
    %442 = vector.broadcast %cst_215 : f32 to vector<1x16xf32>
    %443 = arith.divf %441, %442 : vector<1x16xf32>
    %444 = vector.broadcast %436 : vector<1x16xf32> to vector<64x16xf32>
    %445 = arith.subf %430, %444 : vector<64x16xf32>
    %cst_216 = arith.constant 9.99999974E-6 : f32
    %446 = vector.broadcast %cst_216 : f32 to vector<1x16xf32>
    %447 = arith.addf %443, %446 : vector<1x16xf32>
    %448 = math.rsqrt %447 : vector<1x16xf32>
    %449 = vector.broadcast %448 : vector<1x16xf32> to vector<64x16xf32>
    %450 = arith.mulf %445, %449 : vector<64x16xf32>
    %451 = vector.broadcast %431 : vector<1x16xf32> to vector<64x16xf32>
    %452 = arith.mulf %450, %451 : vector<64x16xf32>
    %453 = vector.broadcast %432 : vector<1x16xf32> to vector<64x16xf32>
    %454 = arith.addf %452, %453 : vector<64x16xf32>
    %cst_217 = arith.constant 0.000000e+00 : f32
    %455 = vector.broadcast %cst_217 : f32 to vector<64x16xf32>
    %456 = arith.maximumf %454, %455 : vector<64x16xf32>
    %c0_218 = arith.constant 0 : index
    %c0_219 = arith.constant 0 : index
    %457 = vector.load %arg13[%c0_218, %c0_219] : memref<16x32xf32, #tpu.memory_space<vmem>>, vector<16x32xf32>
    %cst_220 = arith.constant dense<0.000000e+00> : vector<64x32xf32>
    %458 = tpu.matmul %456, %457, %cst_220 {dimension_numbers = #tpu.dot_dimension_numbers<[1], [0], [0], [1], [0, 0, 1, 1], [], []>} : vector<64x16xf32>, vector<16x32xf32>, vector<64x32xf32> -> vector<64x32xf32>
    %c0_221 = arith.constant 0 : index
    %c0_222 = arith.constant 0 : index
    %459 = vector.load %arg14[%c0_221, %c0_222] : memref<1x32xf32, #tpu.memory_space<vmem>>, vector<1x32xf32>
    %460 = vector.broadcast %459 : vector<1x32xf32> to vector<64x32xf32>
    %461 = arith.addf %458, %460 : vector<64x32xf32>
    %c0_223 = arith.constant 0 : index
    %c0_224 = arith.constant 0 : index
    %462 = vector.load %arg15[%c0_223, %c0_224] : memref<1x32xf32, #tpu.memory_space<vmem>>, vector<1x32xf32>
    %c0_225 = arith.constant 0 : index
    %c0_226 = arith.constant 0 : index
    %463 = vector.load %arg16[%c0_225, %c0_226] : memref<1x32xf32, #tpu.memory_space<vmem>>, vector<1x32xf32>
    %cst_227 = arith.constant dense<0.000000e+00> : vector<32xf32>
    %464 = vector.multi_reduction <add>, %461, %cst_227 [0] : vector<64x32xf32> to vector<32xf32>
    %465 = vector.shape_cast %464 : vector<32xf32> to vector<1x32xf32>
    %cst_228 = arith.constant 6.400000e+01 : f32
    %466 = vector.broadcast %cst_228 : f32 to vector<1x32xf32>
    %467 = arith.divf %465, %466 : vector<1x32xf32>
    %468 = vector.broadcast %467 : vector<1x32xf32> to vector<64x32xf32>
    %469 = arith.subf %461, %468 : vector<64x32xf32>
    %470 = arith.mulf %469, %469 : vector<64x32xf32>
    %cst_229 = arith.constant dense<0.000000e+00> : vector<32xf32>
    %471 = vector.multi_reduction <add>, %470, %cst_229 [0] : vector<64x32xf32> to vector<32xf32>
    %472 = vector.shape_cast %471 : vector<32xf32> to vector<1x32xf32>
    %cst_230 = arith.constant 6.400000e+01 : f32
    %473 = vector.broadcast %cst_230 : f32 to vector<1x32xf32>
    %474 = arith.divf %472, %473 : vector<1x32xf32>
    %475 = vector.broadcast %467 : vector<1x32xf32> to vector<64x32xf32>
    %476 = arith.subf %461, %475 : vector<64x32xf32>
    %cst_231 = arith.constant 9.99999974E-6 : f32
    %477 = vector.broadcast %cst_231 : f32 to vector<1x32xf32>
    %478 = arith.addf %474, %477 : vector<1x32xf32>
    %479 = math.rsqrt %478 : vector<1x32xf32>
    %480 = vector.broadcast %479 : vector<1x32xf32> to vector<64x32xf32>
    %481 = arith.mulf %476, %480 : vector<64x32xf32>
    %482 = vector.broadcast %462 : vector<1x32xf32> to vector<64x32xf32>
    %483 = arith.mulf %481, %482 : vector<64x32xf32>
    %484 = vector.broadcast %463 : vector<1x32xf32> to vector<64x32xf32>
    %485 = arith.addf %483, %484 : vector<64x32xf32>
    %cst_232 = arith.constant 0.000000e+00 : f32
    %486 = vector.broadcast %cst_232 : f32 to vector<64x32xf32>
    %487 = arith.maximumf %485, %486 : vector<64x32xf32>
    %488 = arith.addf %2, %487 : vector<64x32xf32>
    %c0_233 = arith.constant 0 : index
    %c0_234 = arith.constant 0 : index
    %489 = vector.load %arg17[%c0_233, %c0_234] : memref<64x32xf32, #tpu.memory_space<vmem>>, vector<64x32xf32>
    tpu.vector_store %arg17[%c0_233, %c0_234], %488 {strides = array<i32>} : memref<64x32xf32, #tpu.memory_space<vmem>>, vector<64x32xf32>,
    return
  }
  func.func @transform_0(%arg0: i32) -> (i32, i32) {
    %c0_i32 = arith.constant 0 : i32
    %c0_i32_0 = arith.constant 0 : i32
    %c0_i32_1 = arith.constant 0 : i32
    return %c0_i32, %c0_i32_0 : i32, i32
  }
  func.func @transform_1(%arg0: i32) -> (i32, i32) {
    %c0_i32 = arith.constant 0 : i32
    %c0_i32_0 = arith.constant 0 : i32
    %c0_i32_1 = arith.constant 0 : i32
    return %c0_i32, %c0_i32_0 : i32, i32
  }
  func.func @transform_2(%arg0: i32) -> (i32, i32) {
    %c0_i32 = arith.constant 0 : i32
    %c0_i32_0 = arith.constant 0 : i32
    %c0_i32_1 = arith.constant 0 : i32
    return %c0_i32, %c0_i32_0 : i32, i32
  }
  func.func @transform_3(%arg0: i32) -> (i32, i32) {
    %c0_i32 = arith.constant 0 : i32
    %c0_i32_0 = arith.constant 0 : i32
    %c0_i32_1 = arith.constant 0 : i32
    return %c0_i32, %c0_i32_0 : i32, i32
  }
  func.func @transform_4(%arg0: i32) -> (i32, i32) {
    %c0_i32 = arith.constant 0 : i32
    %c0_i32_0 = arith.constant 0 : i32
    %c0_i32_1 = arith.constant 0 : i32
    return %c0_i32, %c0_i32_0 : i32, i32
  }
  func.func @transform_5(%arg0: i32) -> (i32, i32) {
    %c0_i32 = arith.constant 0 : i32
    %c0_i32_0 = arith.constant 0 : i32
    %c0_i32_1 = arith.constant 0 : i32
    return %c0_i32, %c0_i32_0 : i32, i32
  }
  func.func @transform_6(%arg0: i32) -> (i32, i32) {
    %c0_i32 = arith.constant 0 : i32
    %c0_i32_0 = arith.constant 0 : i32
    %c0_i32_1 = arith.constant 0 : i32
    return %c0_i32, %c0_i32_0 : i32, i32
  }
  func.func @transform_7(%arg0: i32) -> (i32, i32) {
    %c0_i32 = arith.constant 0 : i32
    %c0_i32_0 = arith.constant 0 : i32
    %c0_i32_1 = arith.constant 0 : i32
    return %c0_i32, %c0_i32_0 : i32, i32
  }
  func.func @transform_8(%arg0: i32) -> (i32, i32) {
    %c0_i32 = arith.constant 0 : i32
    %c0_i32_0 = arith.constant 0 : i32
    %c0_i32_1 = arith.constant 0 : i32
    return %c0_i32, %c0_i32_0 : i32, i32
  }
  func.func @transform_9(%arg0: i32) -> (i32, i32) {
    %c0_i32 = arith.constant 0 : i32
    %c0_i32_0 = arith.constant 0 : i32
    %c0_i32_1 = arith.constant 0 : i32
    return %c0_i32, %c0_i32_0 : i32, i32
  }
  func.func @transform_10(%arg0: i32) -> (i32, i32) {
    %c0_i32 = arith.constant 0 : i32
    %c0_i32_0 = arith.constant 0 : i32
    %c0_i32_1 = arith.constant 0 : i32
    return %c0_i32, %c0_i32_0 : i32, i32
  }
  func.func @transform_11(%arg0: i32) -> (i32, i32) {
    %c0_i32 = arith.constant 0 : i32
    %c0_i32_0 = arith.constant 0 : i32
    %c0_i32_1 = arith.constant 0 : i32
    return %c0_i32, %c0_i32_0 : i32, i32
  }
  func.func @transform_12(%arg0: i32) -> (i32, i32) {
    %c0_i32 = arith.constant 0 : i32
    %c0_i32_0 = arith.constant 0 : i32
    %c0_i32_1 = arith.constant 0 : i32
    return %c0_i32, %c0_i32_0 : i32, i32
  }
  func.func @transform_13(%arg0: i32) -> (i32, i32) {
    %c0_i32 = arith.constant 0 : i32
    %c0_i32_0 = arith.constant 0 : i32
    %c0_i32_1 = arith.constant 0 : i32
    return %c0_i32, %c0_i32_0 : i32, i32
  }
  func.func @transform_14(%arg0: i32) -> (i32, i32) {
    %c0_i32 = arith.constant 0 : i32
    %c0_i32_0 = arith.constant 0 : i32
    %c0_i32_1 = arith.constant 0 : i32
    return %c0_i32, %c0_i32_0 : i32, i32
  }
  func.func @transform_15(%arg0: i32) -> (i32, i32) {
    %c0_i32 = arith.constant 0 : i32
    %c0_i32_0 = arith.constant 0 : i32
    %c0_i32_1 = arith.constant 0 : i32
    return %c0_i32, %c0_i32_0 : i32, i32
  }
  func.func @transform_16(%arg0: i32) -> (i32, i32) {
    %c0_i32 = arith.constant 0 : i32
    %c0_i32_0 = arith.constant 0 : i32
    %c0_i32_1 = arith.constant 0 : i32
    return %c0_i32, %c0_i32_0 : i32, i32
  }
}

</mosaic_0001>

<bundles_post_ra>
// kernel: residual_block_forward.1
= control target key start
LH: loop header
LB: loop body
LE: loop exit
PB: predicated region body
PF: predicated region fallthrough
CT: control target
= control target key end

     0   :  { %vm10659_vm0 = vcmask 1042432   ;;  %vm10660_vm1 = vcmask 23552   ;;  %vm545_vm2 = vcmask 518144   ;;  %v585_v41 = vlaneseq  ;;  %s10641_s1 = inlined_call_operand.vmem [shape: f32[3,64], index: 1, kind: input, shape index: {}]   ;;  %s10642_s0 = inlined_call_operand.vmem [shape: f32[64,3], index: 0, kind: input, shape index: {}]   ;;  %s10643_s3 = inlined_call_operand.vmem [shape: f32[32,16], index: 3, kind: input, shape index: {}]   ;;  %s10644_s2 = inlined_call_operand.vmem [shape: f32[64,32], index: 2, kind: input, shape index: {}]   ;;  %s10645_s4 = inlined_call_operand.vmem [shape: f32[1,16], index: 4, kind: input, shape index: {}]   ;;  %s10646_s5 = inlined_call_operand.vmem [shape: f32[1,16], index: 5, kind: input, shape index: {}]   ;;  %s10647_s6 = inlined_call_operand.vmem [shape: f32[1,16], index: 6, kind: input, shape index: {}]   ;;  %s10648_s7 = inlined_call_operand.vmem [shape: f32[3,15], index: 7, kind: input, shape index: {}]   ;;  %s10649_s8 = inlined_call_operand.vmem [shape: f32[15,16], index: 8, kind: input, shape index: {}]   ;;  %s10650_s9 = inlined_call_operand.vmem [shape: f32[1,16], index: 9, kind: input, shape index: {}]   ;;  %s10651_s11 = inlined_call_operand.vmem [shape: f32[1,16], index: 11, kind: input, shape index: {}]   ;;  %s10652_s10 = inlined_call_operand.vmem [shape: f32[1,16], index: 10, kind: input, shape index: {}]   ;;  %s10653_s12 = inlined_call_operand.vmem [shape: f32[16,32], index: 12, kind: input, shape index: {}]   ;;  %s10654_s13 = inlined_call_operand.vmem [shape: f32[1,32], index: 13, kind: input, shape index: {}]   ;;  %s10655_s14 = inlined_call_operand.vmem [shape: f32[1,32], index: 14, kind: input, shape index: {}]   ;;  %s10656_s15 = inlined_call_operand.vmem [shape: f32[1,32], index: 15, kind: input, shape index: {}]   ;;  %s10657_s16 = inlined_call_operand.vmem [shape: f32[64,32], index: 16, kind: output, shape index: {}]  }
   0x1   :  { %10753 = sst [smem:[#allocation25_spill]] %s10641_s1  ;;  %v8174_v1 = vld [vmem:[%s10642_s0] sm:$0xff]  ;;  %v8179_v2 = vld [vmem:[%s10642_s0 + $0x8] sm:$0xff]  ;;  %v8191_v3 = vld [vmem:[%s10642_s0 + $0x10] sm:$0xff]  ;;  %vm10679_vm3 = vcmask 523264   ;;  %vm10658_vm4 = vcmask 261120  }
   0x2   :  { %s10754_s23 = sld [smem:[#allocation25_spill]]  ;;  %10755 = vst [vmem:[#allocation4_spill] sm:$0xff] %v8174_v1  ;;  %10756 = vst [vmem:[#allocation5_spill] sm:$0xff] %v8179_v2  ;;  %7154 = vmatprep.mubr.msk.f32.mxu1 %vm10660_vm1, %v8174_v1  ;;  %v8196_v4 = vld [vmem:[%s10642_s0 + $0x18] sm:$0xff]  ;;  %v8201_v5 = vld [vmem:[%s10642_s0 + $0x20] sm:$0xff]  ;;  %v512_v6 = vmul.f32 %v8174_v1, %v8174_v1  ;;  %v513_v7 = vmul.f32 %v8179_v2, %v8179_v2  ;;  %v514_v11 = vmul.f32 %v8191_v3, %v8191_v3 }
   0x3   :  { %322 = vst.msk [vmem:[#allocation2] sm:$0xff] %vm10660_vm1, %v8174_v1  ;;  %323 = vst.msk [vmem:[#allocation2 + $0x8] sm:$0xff] %vm10660_vm1, %v8179_v2  ;;  %v8217_v8 = vld [vmem:[%s10642_s0 + $0x28] sm:$0xff]  ;;  %v8222_v9 = vld [vmem:[%s10642_s0 + $0x30] sm:$0xff]  ;;  %v515_v12 = vmul.f32 %v8196_v4, %v8196_v4  ;;  %v516_v16 = vmul.f32 %v8201_v5, %v8201_v5  ;;  %v8269_v53 = vand.u32 127, %v585_v41 }
   0x4   :  { %10757 = vst [vmem:[#allocation6_spill] sm:$0xff] %v8191_v3  ;;  %10758 = vst [vmem:[#allocation7_spill] sm:$0xff] %v8196_v4  ;;  %v8227_v10 = vld [vmem:[%s10642_s0 + $0x38] sm:$0xff]  ;;  %v520_v13 = vsel %vm10660_vm1, %v512_v6, 0.0  ;;  %v526_v14 = vsel %vm10660_vm1, %v514_v11, 0.0  ;;  %v523_v15 = vsel %vm10660_vm1, %v513_v7, 0.0  ;;  %v517_v18 = vmul.f32 %v8217_v8, %v8217_v8 }
   0x5   :  { %10759 = vst [vmem:[#allocation8_spill] sm:$0xff] %v8201_v5  ;;  %324 = vst.msk [vmem:[#allocation2 + $0x10] sm:$0xff] %vm10660_vm1, %v8191_v3  ;;  %521 = vadd.xlane.f32.xlu0 %v520_v13  ;;  %527 = vadd.xlane.f32.xlu1 %v526_v14  ;;  %v529_v17 = vsel %vm10660_vm1, %v515_v12, 0.0  ;;  %v532_v19 = vsel %vm10660_vm1, %v516_v16, 0.0  ;;  %v518_v20 = vmul.f32 %v8222_v9, %v8222_v9 }
   0x6   :  { %325 = vst.msk [vmem:[#allocation2 + $0x18] sm:$0xff] %vm10660_vm1, %v8196_v4  ;;  %326 = vst.msk [vmem:[#allocation2 + $0x20] sm:$0xff] %vm10660_vm1, %v8201_v5  ;;  %v535_v21 = vsel %vm10660_vm1, %v517_v18, 0.0  ;;  %v519_v22 = vmul.f32 %v8227_v10, %v8227_v10 }
   0x7   :  { %10760 = vst [vmem:[#allocation9_spill] sm:$0xff] %v8217_v8  ;;  %10761 = vst [vmem:[#allocation10_spill] sm:$0xff] %v8222_v9  ;;  %v538_v23 = vsel %vm10660_vm1, %v518_v20, 0.0 }
   0x8   :  { %v61_v0 = vld [vmem:[%s10754_s23] sm:$0x7]  ;;  %10762 = vst [vmem:[#allocation11_spill] sm:$0xff] %v8227_v10  ;;  %327 = vst.msk [vmem:[#allocation2 + $0x28] sm:$0xff] %vm10660_vm1, %v8217_v8  ;;  %v541_v24 = vsel %vm10660_vm1, %v519_v22, 0.0 }
   0x9   :  { %7152 = vmatprep.subr.msk.mxu1 %vm10659_vm0, %v61_v0  ;;  %328 = vst.msk [vmem:[#allocation2 + $0x30] sm:$0xff] %vm10660_vm1, %v8222_v9  ;;  %329 = vst.msk [vmem:[#allocation2 + $0x38] sm:$0xff] %vm10660_vm1, %v8227_v10  ;;  %524 = vadd.xlane.f32.xlu0 %v523_v15  ;;  %v544_v25 = vmul.f32 %v61_v0, %v61_v0 }
   0xa   :  { %7153 = vmatpush3.msk.msra.mxu1 %vm10659_vm0, %v61_v0  ;;  %530 = vadd.xlane.f32.xlu1 %v529_v17 }
   0xb   :  { %7155 = vmatmul.mubr.msk.f32.vlgmr.msra.gmra.mrb[0].mxu1 %vm10660_vm1, %v8179_v2  ;;  %v546_v26 = vsel %vm545_vm2, %v544_v25, 0.0 }
   0xc   :  { %7157 = vmatprep.mubr.msk.f32.mxu1 %vm10660_vm1, %v8191_v3  ;;  %v547_v27 = vrot.slane %v546_v26, 4 }
   0xd   :  { %533 = vadd.xlane.f32.xlu0 %v532_v19 }
   0xe   :  { %536 = vadd.xlane.f32.xlu1 %v535_v21  ;;  %v548_v28 = vadd.f32 %v547_v27, %v546_v26 }
   0xf   :  { %7158 = vmatmul.mubr.msk.f32.gmra.mrb[2].mxu1 %vm10660_vm1, %v8196_v4 }
  0x10   :  { %7160 = vmatprep.mubr.msk.f32.mxu1 %vm10660_vm1, %v8201_v5  ;;  %v549_v29 = vrot.slane %v548_v28, 2 }
  0x11   :  { %539 = vadd.xlane.f32.xlu0 %v538_v23 }
  0x12   :  { %542 = vadd.xlane.f32.xlu1 %v541_v24  ;;  %v550_v30 = vadd.f32 %v549_v29, %v548_v28 }
  0x13   :  { %7161 = vmatmul.mubr.msk.f32.gmra.mrb[4].mxu1 %vm10660_vm1, %v8217_v8 }
  0x14   :  { %7163 = vmatprep.mubr.msk.f32.mxu1 %vm10660_vm1, %v8222_v9  ;;  %v551_v33 = vrot.slane %v550_v30, 1 }
  0x16   :  { %v552_v36 = vadd.f32 %v551_v33, %v550_v30 }
  0x17   :  { %7164 = vmatmul.mubr.msk.f32.gmra.mrb[6].mxu1 %vm10660_vm1, %v8227_v10 }
  0x92   :  { %v522_v31 = vpop.xlane.xlu0 %521  ;;  %v528_v32 = vpop.xlane.xlu1 %527 }
  0x93   :  { %v553_v42 = vadd.f32 %v552_v36, %v522_v31  ;;  %v555_v54 = vadd.f32 %v552_v36, %v528_v32 }
  0x96   :  { %v525_v34 = vpop.xlane.xlu0 %524 }
  0x97   :  { %v531_v35 = vpop.xlane.xlu1 %530  ;;  %v554_v37 = vadd.f32 %v552_v36, %v525_v34 }
  0x98   :  { %v556_v46 = vadd.f32 %v552_v36, %v531_v35 }
  0x9a   :  { %v534_v47 = vpop.xlane.xlu0 %533 }
  0x9b   :  { %v537_v44 = vpop.xlane.xlu1 %536  ;;  %v557_v63 = vadd.f32 %v552_v36, %v534_v47 }
  0x9c   :  { %v558_v59 = vadd.f32 %v552_v36, %v537_v44 }
  0x9e   :  { %v540_v13 = vpop.xlane.xlu0 %539 }
  0x9f   :  { %v543_v0 = vpop.xlane.xlu1 %542  ;;  %v559_v24 = vadd.f32 %v552_v36, %v540_v13 }
  0xa0   :  { %v560_v19 = vadd.f32 %v552_v36, %v543_v0 }
  0xde   :  { %v7156_v38 = vpop.f32.mrb[0].mxu1 }
  0xdf   :  { %v562_v39 = vmul.f32 2.0, %v7156_v38  ;;  %v473_v40 = vpop.f32.mrb[1].mxu1 }
  0xe0   :  { %v561_v43 = vmul.f32 2.0, %v473_v40 }
  0xe1   :  { %v570_v45 = vsub.f32 %v554_v37, %v562_v39 }
  0xe2   :  { %v569_v48 = vsub.f32 %v553_v42, %v561_v43  ;;  %v7159_v49 = vpop.f32.mrb[2].mxu1 }
  0xe3   :  { %v578_v50 = vmax.f32 %v570_v45, 0.0  ;;  %v564_v51 = vmul.f32 2.0, %v7159_v49  ;;  %v483_v52 = vpop.f32.mrb[3].mxu1 }
  0xe4   :  { %v577_v55 = vmax.f32 %v569_v48, 0.0  ;;  %v563_v56 = vmul.f32 2.0, %v483_v52  ;;  %v71_v52 = vld [vmem:[%s10643_s3 + $0x8] sm:$0xff] }
  0xe5   :  { %v596_v57 = vand.u32 4294967232, %v578_v50  ;;  %v572_v58 = vsub.f32 %v556_v46, %v564_v51  ;;  %v70_v51 = vld [vmem:[%s10643_s3] sm:$0xff] }
  0xe6   :  { %v595_v60 = vand.u32 4294967232, %v577_v55  ;;  %v571_v61 = vsub.f32 %v555_v54, %v563_v56  ;;  %v7162_v62 = vpop.f32.mrb[4].mxu1  ;;  %v72_v54 = vld [vmem:[%s10643_s3 + $0x10] sm:$0xff]  ;;  %v7646_v55 = vpack.c.bf16 %v71_v52, %v70_v51  ;;  %v73_v56 = vld [vmem:[%s10643_s3 + $0x18] sm:$0xff] }
  0xe7   :  { %v580_v6 = vmax.f32 %v572_v58, 0.0  ;;  %v566_v7 = vmul.f32 2.0, %v7162_v62  ;;  %v493_v11 = vpop.f32.mrb[5].mxu1  ;;  %v8272_v12 = vor.u32 %v596_v57, %v8269_v53  ;;  %v62_v57 = vld [vmem:[%s10644_s2] sm:$0xff]  ;;  %v7650_v58 = vpack.c.bf16 %v73_v56, %v72_v54 }
  0xe8   :  { %v579_v14 = vmax.f32 %v571_v61, 0.0  ;;  %v565_v15 = vmul.f32 2.0, %v493_v11  ;;  %v8275_v16 = vor.u32 %v595_v60, %v8269_v53  ;;  %7140 = vmatprep.mubr.msk.f32.mxu0 %vm10658_vm4, %v62_v57  ;;  %7647 = vmatprep.subr.bf16.mxu0 %v7646_v55  ;;  %v64_v60 = vld [vmem:[%s10644_s2 + $0x10] sm:$0xff]  ;;  %v65_v61 = vld [vmem:[%s10644_s2 + $0x18] sm:$0xff]  ;;  %v66_v62 = vld [vmem:[%s10644_s2 + $0x20] sm:$0xff] }
  0xe9   :  { %v598_v17 = vand.u32 4294967232, %v580_v6  ;;  %v574_v18 = vsub.f32 %v558_v59, %v566_v7  ;;  %v623_v20 = vsel %vm10679_vm3, %v8272_v12, inf  ;;  %7649 = vmatpush3.bf16.msra.mxu0 %v7646_v55  ;;  %v63_v59 = vld [vmem:[%s10644_s2 + $0x8] sm:$0xff] }
  0xea   :  { %v597_v21 = vand.u32 4294967232, %v579_v14  ;;  %v573_v22 = vsub.f32 %v557_v63, %v565_v15  ;;  %624 = vmin.xlane.f32.xlu1 %v623_v20  ;;  %v7165_v23 = vpop.f32.mrb[6].mxu1  ;;  %v620_v25 = vsel %vm10679_vm3, %v8275_v16, inf  ;;  %7651 = vmatprep.subr.bf16.mxu0 %v7650_v58 }
  0xeb   :  { %v582_v26 = vmax.f32 %v574_v18, 0.0  ;;  %v568_v27 = vmul.f32 2.0, %v7165_v23  ;;  %621 = vmin.xlane.f32.xlu0 %v620_v25  ;;  %v503_v28 = vpop.f32.mrb[7].mxu1  ;;  %v8282_v29 = vor.u32 %v598_v17, %v8269_v53  ;;  %v10669_v18 = vmov 0.0  }
  0xec   :  { %v581_v30 = vmax.f32 %v573_v22, 0.0  ;;  %v567_v31 = vmul.f32 2.0, %v503_v28  ;;  %v8285_v32 = vor.u32 %v597_v21, %v8269_v53 }
  0xed   :  { %v600_v33 = vand.u32 4294967232, %v582_v26  ;;  %v576_v34 = vsub.f32 %v560_v19, %v568_v27  ;;  %v629_v35 = vsel %vm10679_vm3, %v8282_v29, inf  ;;  %7653 = vmatpush3.bf16.msra.mxu0 %v7650_v58 }
  0xee   :  { %v599_v36 = vand.u32 4294967232, %v581_v30  ;;  %v575_v37 = vsub.f32 %v559_v24, %v567_v31  ;;  %630 = vmin.xlane.f32.xlu1 %v629_v35  ;;  %v626_v38 = vsel %vm10679_vm3, %v8285_v32, inf }
  0xef   :  { %v584_v39 = vmax.f32 %v576_v34, 0.0  ;;  %627 = vmin.xlane.f32.xlu0 %v626_v38  ;;  %v8292_v40 = vor.u32 %v600_v33, %v8269_v53 }
  0xf0   :  { %v583_v41 = vmax.f32 %v575_v37, 0.0  ;;  %v8295_v42 = vor.u32 %v599_v36, %v8269_v53  ;;  %7141 = vmatmul.mubr.msk.f32.vlgmr.msra.gmra.mrb[0].mxu0 %vm10658_vm4, %v63_v59 }
  0xf1   :  { %v602_v43 = vand.u32 4294967232, %v584_v39  ;;  %v635_v44 = vsel %vm10679_vm3, %v8292_v40, inf  ;;  %7143 = vmatprep.mubr.msk.f32.mxu0 %vm10658_vm4, %v64_v60 }
  0xf2   :  { %v601_v45 = vand.u32 4294967232, %v583_v41  ;;  %636 = vmin.xlane.f32.xlu1 %v635_v44  ;;  %v632_v46 = vsel %vm10679_vm3, %v8295_v42, inf }
  0xf3   :  { %633 = vmin.xlane.f32.xlu0 %v632_v46  ;;  %v8302_v47 = vor.u32 %v602_v43, %v8269_v53 }
  0xf4   :  { %v8305_v48 = vor.u32 %v601_v45, %v8269_v53  ;;  %7144 = vmatmul.mubr.msk.f32.gmra.mrb[2].mxu0 %vm10658_vm4, %v65_v61  ;;  %v10775_v45 = vmov 0 }
  0xf5   :  { %v641_v49 = vsel %vm10679_vm3, %v8302_v47, inf  ;;  %7146 = vmatprep.mubr.msk.f32.mxu0 %vm10658_vm4, %v66_v62 }
  0xf6   :  { %642 = vmin.xlane.f32.xlu1 %v641_v49  ;;  %v638_v50 = vsel %vm10679_vm3, %v8305_v48, inf }
  0xf7   :  { %639 = vmin.xlane.f32.xlu0 %v638_v50  ;;  %v67_v50 = vld [vmem:[%s10644_s2 + $0x28] sm:$0xff] }
  0xf8   :  { %7147 = vmatmul.mubr.msk.f32.gmra.mrb[4].mxu0 %vm10658_vm4, %v67_v50 }
 0x177   :  { %v625_v63 = vpop.xlane.xlu1 %624 }
 0x178   :  { %v653_v0 = vand.u32 63, %v625_v63  ;;  %v622_v6 = vpop.xlane.xlu0 %621 }
 0x179   :  { %v652_v7 = vand.u32 63, %v622_v6 }
 0x17a   :  { %vm8344_vm5 = vcmp.eq.s32.totalorder %v8269_v53, %v653_v0 }
 0x17b   :  { %vm660_vm6 = vcmp.eq.s32.totalorder %v8269_v53, %v652_v7  ;;  %v631_v13 = vpop.xlane.xlu1 %630  ;;  %v879_v14 = vsel %vm8344_vm5, inf, %v8272_v12 }
 0x17c   :  { %v655_v15 = vand.u32 63, %v631_v13  ;;  %v628_v17 = vpop.xlane.xlu0 %627  ;;  %v6535_v19 = vsel %vm660_vm6, 1.0, %v10669_v18  ;;  %v889_v20 = vsel %vm10679_vm3, %v879_v14, inf  ;;  %v878_v21 = vsel %vm660_vm6, inf, %v8275_v16 }
 0x17d   :  { %v654_v22 = vand.u32 63, %v628_v17  ;;  %7182 = vmatprep.mubr.msk.f32.mxu1 %vm10679_vm3, %v6535_v19  ;;  %890 = vmin.xlane.f32.xlu1 %v889_v20  ;;  %v886_v23 = vsel %vm10679_vm3, %v878_v21, inf }
 0x17e   :  { %887 = vmin.xlane.f32.xlu0 %v886_v23  ;;  %vm8358_vm7 = vcmp.eq.s32.totalorder %v8269_v53, %v655_v15 }
 0x17f   :  { %v637_v12 = vpop.xlane.xlu1 %636  ;;  %v881_v25 = vsel %vm8358_vm7, inf, %v8282_v29  ;;  %vm8366_vm8 = vcmp.eq.s32.totalorder %v8269_v53, %v654_v22 }
 0x180   :  { %v657_v26 = vand.u32 63, %v637_v12  ;;  %v634_v27 = vpop.xlane.xlu0 %633  ;;  %v895_v28 = vsel %vm10679_vm3, %v881_v25, inf  ;;  %v880_v30 = vsel %vm8366_vm8, inf, %v8285_v32  ;;  %v10783_v12 = vmov 0 }
 0x181   :  { %v656_v31 = vand.u32 63, %v634_v27  ;;  %896 = vmin.xlane.f32.xlu1 %v895_v28  ;;  %v892_v33 = vsel %vm10679_vm3, %v880_v30, inf }
 0x182   :  { %893 = vmin.xlane.f32.xlu0 %v892_v33  ;;  %vm8376_vm9 = vcmp.eq.s32.totalorder %v8269_v53, %v657_v26 }
 0x183   :  { %v643_v34 = vpop.xlane.xlu1 %642  ;;  %v883_v35 = vsel %vm8376_vm9, inf, %v8292_v40  ;;  %vm8384_vm10 = vcmp.eq.s32.totalorder %v8269_v53, %v656_v31  ;;  %v10773_v40 = vmov 0 }
 0x184   :  { %v659_v32 = vand.u32 63, %v643_v34  ;;  %v640_v37 = vpop.xlane.xlu0 %639  ;;  %v901_v38 = vsel %vm10679_vm3, %v883_v35, inf  ;;  %v882_v39 = vsel %vm8384_vm10, inf, %v8295_v42 }
 0x185   :  { %v658_v41 = vand.u32 63, %v640_v37  ;;  %902 = vmin.xlane.f32.xlu1 %v901_v38  ;;  %v898_v43 = vsel %vm10679_vm3, %v882_v39, inf  ;;  %v10789_v38 = vmov 0 }
 0x186   :  { %899 = vmin.xlane.f32.xlu0 %v898_v43  ;;  %vm8394_vm11 = vcmp.eq.s32.totalorder %v8269_v53, %v659_v32 }
 0x187   :  { %v10774_v40 = vsel %vm8394_vm11, 4294967295, %v10773_v40  ;;  %v885_v44 = vsel %vm8394_vm11, inf, %v8302_v47  ;;  %vm8402_vm12 = vcmp.eq.s32.totalorder %v8269_v53, %v658_v41  ;;  %v68_v47 = vld [vmem:[%s10644_s2 + $0x30] sm:$0xff] }
 0x188   :  { %v10776_v45 = vsel %vm8402_vm12, 4294967295, %v10775_v45  ;;  %v907_v42 = vsel %vm10679_vm3, %v885_v44, inf  ;;  %v884_v46 = vsel %vm8402_vm12, inf, %v8305_v48  ;;  %7149 = vmatprep.mubr.msk.f32.mxu0 %vm10658_vm4, %v68_v47  ;;  %v69_v48 = vld [vmem:[%s10644_s2 + $0x38] sm:$0xff] }
 0x189   :  { %908 = vmin.xlane.f32.xlu1 %v907_v42  ;;  %v904_v49 = vsel %vm10679_vm3, %v884_v46, inf  ;;  %7150 = vmatmul.mubr.msk.f32.gmra.mrb[6].mxu0 %vm10658_vm4, %v69_v48 }
 0x18a   :  { %905 = vmin.xlane.f32.xlu0 %v904_v49 }
 0x20a   :  { %v891_v51 = vpop.xlane.xlu1 %890 }
 0x20b   :  { %v919_v52 = vand.u32 63, %v891_v51  ;;  %v888_v54 = vpop.xlane.xlu0 %887 }
 0x20c   :  { %v918_v55 = vand.u32 63, %v888_v54 }
 0x20d   :  { %vm8424_vm13 = vcmp.eq.s32.totalorder %v8269_v53, %v919_v52 }
 0x20e   :  { %vm926_vm14 = vcmp.eq.s32.totalorder %v8269_v53, %v918_v55  ;;  %v897_v57 = vpop.xlane.xlu1 %896  ;;  %v1145_v58 = vsel %vm8424_vm13, inf, %v879_v14 }
 0x20f   :  { %v921_v59 = vand.u32 63, %v897_v57  ;;  %v894_v60 = vpop.xlane.xlu0 %893  ;;  %v1155_v61 = vsel %vm10679_vm3, %v1145_v58, inf  ;;  %v6551_v62 = vsel %vm926_vm14, 1.0, %v10669_v18  ;;  %v1144_v63 = vsel %vm926_vm14, inf, %v878_v21 }
 0x210   :  { %v920_v0 = vand.u32 63, %v894_v60  ;;  %1156 = vmin.xlane.f32.xlu1 %v1155_v61  ;;  %7210 = vmatprep.mubr.msk.f32.mxu0 %vm10679_vm3, %v6551_v62  ;;  %v1152_v6 = vsel %vm10679_vm3, %v1144_v63, inf  ;;  %v10795_v60 = vmov 0 }
 0x211   :  { %1153 = vmin.xlane.f32.xlu0 %v1152_v6  ;;  %vm8436_vm15 = vcmp.eq.s32.totalorder %v8269_v53, %v921_v59 }
 0x212   :  { %v903_v13 = vpop.xlane.xlu1 %902  ;;  %v1147_v14 = vsel %vm8436_vm15, inf, %v881_v25  ;;  %vm8443_vm2 = vcmp.eq.s32.totalorder %v8269_v53, %v920_v0 }
 0x213   :  { %v923_v17 = vand.u32 63, %v903_v13  ;;  %v900_v19 = vpop.xlane.xlu0 %899  ;;  %v1161_v20 = vsel %vm10679_vm3, %v1147_v14, inf  ;;  %v1146_v21 = vsel %vm8443_vm2, inf, %v880_v30 }
 0x214   :  { %v922_v22 = vand.u32 63, %v900_v19  ;;  %1162 = vmin.xlane.f32.xlu1 %v1161_v20  ;;  %v1158_v23 = vsel %vm10679_vm3, %v1146_v21, inf  ;;  %v10799_v20 = vmov 0 }
 0x215   :  { %1159 = vmin.xlane.f32.xlu0 %v1158_v23  ;;  %vm8452_vm6 = vcmp.eq.s32.totalorder %v8269_v53, %v923_v17 }
 0x216   :  { %v10784_v12 = vsel %vm8452_vm6, 4294967295, %v10783_v12  ;;  %v909_v25 = vpop.xlane.xlu1 %908  ;;  %v1149_v26 = vsel %vm8452_vm6, inf, %v883_v35  ;;  %vm8459_vm14 = vcmp.eq.s32.totalorder %v8269_v53, %v922_v22  ;;  %v10787_v35 = vmov 0 }
 0x217   :  { %v925_v28 = vand.u32 63, %v909_v25  ;;  %v906_v30 = vpop.xlane.xlu0 %905  ;;  %v1167_v31 = vsel %vm10679_vm3, %v1149_v26, inf  ;;  %v1148_v33 = vsel %vm8459_vm14, inf, %v882_v39 }
 0x218   :  { %v924_v34 = vand.u32 63, %v906_v30  ;;  %1168 = vmin.xlane.f32.xlu1 %v1167_v31  ;;  %v1164_v32 = vsel %vm10679_vm3, %v1148_v33, inf }
 0x219   :  { %1165 = vmin.xlane.f32.xlu0 %v1164_v32  ;;  %vm8468_vm4 = vcmp.eq.s32.totalorder %v8269_v53, %v925_v28  ;;  %v10803_v32 = vmov 0 }
 0x21a   :  { %v10788_v35 = vsel %vm8468_vm4, 4294967295, %v10787_v35  ;;  %v1151_v37 = vsel %vm8468_vm4, inf, %v885_v44  ;;  %vm8475_vm0 = vcmp.eq.s32.totalorder %v8269_v53, %v924_v34  ;;  %v10791_v44 = vmov 0 }
 0x21b   :  { %v10790_v38 = vsel %vm8475_vm0, 4294967295, %v10789_v38  ;;  %v1173_v39 = vsel %vm10679_vm3, %v1151_v37, inf  ;;  %v1150_v41 = vsel %vm8475_vm0, inf, %v884_v46  ;;  %v10793_v46 = vmov 0 }
 0x21c   :  { %1174 = vmin.xlane.f32.xlu1 %v1173_v39  ;;  %v1170_v43 = vsel %vm10679_vm3, %v1150_v41, inf }
 0x21d   :  { %1171 = vmin.xlane.f32.xlu0 %v1170_v43  ;;  %v10805_v43 = vmov 0 }
 0x29d   :  { %v1157_v42 = vpop.xlane.xlu1 %1156 }
 0x29e   :  { %v1185_v49 = vand.u32 63, %v1157_v42  ;;  %v1154_v50 = vpop.xlane.xlu0 %1153 }
 0x29f   :  { %v1184_v47 = vand.u32 63, %v1154_v50  ;;  %v7142_v50 = vpop.f32.mrb[0].mxu0 }
 0x2a0   :  { %vm8484_vm1 = vcmp.eq.s32.totalorder %v8269_v53, %v1185_v49 }
 0x2a1   :  { %v10792_v44 = vsel %vm8484_vm1, 4294967295, %v10791_v44  ;;  %v1163_v48 = vpop.xlane.xlu1 %1162  ;;  %v8490_v51 = vsel %vm8484_vm1, inf, %v1145_v58  ;;  %vm8493_vm4 = vcmp.eq.s32.totalorder %v8269_v53, %v1184_v47  ;;  %v172_v47 = vpop.f32.mrb[1].mxu0 }
 0x2a2   :  { %v10794_v46 = vsel %vm8493_vm4, 4294967295, %v10793_v46  ;;  %v1187_v52 = vand.u32 63, %v1163_v48  ;;  %v1160_v54 = vpop.xlane.xlu0 %1159  ;;  %v1421_v55 = vsel %vm10679_vm3, %v8490_v51, inf  ;;  %v8501_v57 = vsel %vm8493_vm4, inf, %v1144_v63 }
 0x2a3   :  { %v1186_v59 = vand.u32 63, %v1160_v54  ;;  %1422 = vmin.xlane.f32.xlu1 %v1421_v55  ;;  %v1418_v58 = vsel %vm10679_vm3, %v8501_v57, inf  ;;  %v10797_v63 = vmov 0  ;;  %v7145_v54 = vpop.f32.mrb[2].mxu0 }
 0x2a4   :  { %1419 = vmin.xlane.f32.xlu0 %v1418_v58  ;;  %vm8506_vm1 = vcmp.eq.s32.totalorder %v8269_v53, %v1187_v52 }
 0x2a5   :  { %v10796_v60 = vsel %vm8506_vm1, 4294967295, %v10795_v60  ;;  %v1169_v61 = vpop.xlane.xlu1 %1168  ;;  %v8512_v62 = vsel %vm8506_vm1, inf, %v1147_v14  ;;  %vm8515_vm11 = vcmp.eq.s32.totalorder %v8269_v53, %v1186_v59  ;;  %v182_v59 = vpop.f32.mrb[3].mxu0 }
 0x2a6   :  { %v10798_v63 = vsel %vm8515_vm11, 4294967295, %v10797_v63  ;;  %v1189_v0 = vand.u32 63, %v1169_v61  ;;  %v1166_v6 = vpop.xlane.xlu0 %1165  ;;  %v1427_v13 = vsel %vm10679_vm3, %v8512_v62, inf  ;;  %v8523_v17 = vsel %vm8515_vm11, inf, %v1146_v21 }
 0x2a7   :  { %v1188_v19 = vand.u32 63, %v1166_v6  ;;  %1428 = vmin.xlane.f32.xlu1 %v1427_v13  ;;  %v1424_v14 = vsel %vm10679_vm3, %v8523_v17, inf  ;;  %v10801_v21 = vmov 0 }
 0x2a8   :  { %1425 = vmin.xlane.f32.xlu0 %v1424_v14  ;;  %vm8528_vm1 = vcmp.eq.s32.totalorder %v8269_v53, %v1189_v0  ;;  %v7148_v0 = vpop.f32.mrb[4].mxu0 }
 0x2a9   :  { %v10800_v20 = vsel %vm8528_vm1, 4294967295, %v10799_v20  ;;  %v1175_v22 = vpop.xlane.xlu1 %1174  ;;  %v8534_v23 = vsel %vm8528_vm1, inf, %v1149_v26  ;;  %vm8537_vm4 = vcmp.eq.s32.totalorder %v8269_v53, %v1188_v19  ;;  %v192_v13 = vpop.f32.mrb[5].mxu0 }
 0x2aa   :  { %v10802_v21 = vsel %vm8537_vm4, 4294967295, %v10801_v21  ;;  %v1191_v25 = vand.u32 63, %v1175_v22  ;;  %v1172_v28 = vpop.xlane.xlu0 %1171  ;;  %v1433_v30 = vsel %vm10679_vm3, %v8534_v23, inf  ;;  %v8545_v31 = vsel %vm8537_vm4, inf, %v1148_v33 }
 0x2ab   :  { %v1190_v34 = vand.u32 63, %v1172_v28  ;;  %1434 = vmin.xlane.f32.xlu1 %v1433_v30  ;;  %v1430_v26 = vsel %vm10679_vm3, %v8545_v31, inf  ;;  %v7151_v28 = vpop.f32.mrb[6].mxu0 }
 0x2ac   :  { %1431 = vmin.xlane.f32.xlu0 %v1430_v26  ;;  %vm8550_vm1 = vcmp.eq.s32.totalorder %v8269_v53, %v1191_v25 }
 0x2ad   :  { %v10804_v32 = vsel %vm8550_vm1, 4294967295, %v10803_v32  ;;  %v8556_v39 = vsel %vm8550_vm1, inf, %v1151_v37  ;;  %vm8559_vm11 = vcmp.eq.s32.totalorder %v8269_v53, %v1190_v34  ;;  %v6515_v37 = vld [vmem:[%s10645_s4] ss:$0 sm:$0xff]  ;;  %vm10681_vm1 = vcmask 130048   ;;  %v202_v34 = vpop.f32.mrb[7].mxu0 }
 0x2ae   :  { %v10806_v43 = vsel %vm8559_vm11, 4294967295, %v10805_v43  ;;  %v1439_v33 = vsel %vm10679_vm3, %v8556_v39, inf  ;;  %v8567_v42 = vsel %vm8559_vm11, inf, %v1150_v41  ;;  %v178_v48 = vadd.f32 %v7142_v50, %v6515_v37 }
 0x2af   :  { %1440 = vmin.xlane.f32.xlu1 %v1439_v33  ;;  %v1436_v49 = vsel %vm10679_vm3, %v8567_v42, inf  ;;  %v173_v52 = vadd.f32 %v6515_v37, %v172_v47  ;;  %v188_v55 = vadd.f32 %v7145_v54, %v6515_v37  ;;  %v183_v61 = vadd.f32 %v6515_v37, %v182_v59 }
 0x2b0   :  { %1437 = vmin.xlane.f32.xlu0 %v1436_v49  ;;  %v215_v41 = vsel %vm10681_vm1, %v178_v48, 0.0  ;;  %v198_v22 = vadd.f32 %v7148_v0, %v6515_v37  ;;  %v193_v25 = vadd.f32 %v6515_v37, %v192_v13  ;;  %v203_v33 = vadd.f32 %v6515_v37, %v202_v34 }
 0x2b1   :  { %v214_v58 = vsel %vm10681_vm1, %v173_v52, 0.0  ;;  %v219_v19 = vsel %vm10681_vm1, %v188_v55, 0.0  ;;  %v217_v14 = vsel %vm10681_vm1, %v183_v61, 0.0  ;;  %v208_v47 = vadd.f32 %v7151_v28, %v6515_v37 }
 0x2b2   :  { %v216_v6 = vadd.f32 %v215_v41, %v214_v58  ;;  %v221_v26 = vsel %vm10681_vm1, %v193_v25, 0.0  ;;  %v223_v50 = vsel %vm10681_vm1, %v198_v22, 0.0  ;;  %v225_v59 = vsel %vm10681_vm1, %v203_v33, 0.0 }
 0x2b3   :  { %v227_v58 = vsel %vm10681_vm1, %v208_v47, 0.0 }
 0x2b4   :  { %v218_v30 = vadd.f32 %v217_v14, %v216_v6 }
 0x2b6   :  { %v220_v49 = vadd.f32 %v219_v19, %v218_v30 }
 0x2b8   :  { %v222_v54 = vadd.f32 %v221_v26, %v220_v49 }
 0x2ba   :  { %v224_v41 = vadd.f32 %v223_v50, %v222_v54 }
 0x2bc   :  { %v226_v18 = vadd.f32 %v225_v59, %v224_v41 }
 0x2be   :  { %v228_v10 = vadd.f32 %v227_v58, %v226_v18 }
 0x2c0   :  { %v229_v0 = vrot.slane %v228_v10, 4 }
 0x2c2   :  { %v230_v13 = vadd.f32 %v229_v0, %v228_v10 }
 0x2c4   :  { %v231_v9 = vrot.slane %v230_v13, 2 }
 0x2c6   :  { %v232_v6 = vadd.f32 %v231_v9, %v230_v13 }
 0x2c8   :  { %v233_v14 = vrot.slane %v232_v6, 1 }
 0x2ca   :  { %v234_v8 = vadd.f32 %v233_v14, %v232_v6 }
 0x2cc   :  { %v236_v5 = vmul.f32 0.015625, %v234_v8 }
 0x2ce   :  { %v8582_v34 = vsub.f32 %v173_v52, %v236_v5  ;;  %v8584_v19 = vsub.f32 %v178_v48, %v236_v5  ;;  %v8586_v37 = vsub.f32 %v183_v61, %v236_v5  ;;  %v8588_v28 = vsub.f32 %v188_v55, %v236_v5 }
 0x2cf   :  { %v8590_v30 = vsub.f32 %v193_v25, %v236_v5  ;;  %v8592_v26 = vsub.f32 %v198_v22, %v236_v5  ;;  %v8594_v18 = vsub.f32 %v203_v33, %v236_v5  ;;  %v8596_v10 = vsub.f32 %v208_v47, %v236_v5 }
 0x2d0   :  { %v245_v9 = vmul.f32 %v8582_v34, %v8582_v34  ;;  %v246_v8 = vmul.f32 %v8584_v19, %v8584_v19  ;;  %v247_v48 = vmul.f32 %v8586_v37, %v8586_v37  ;;  %v248_v52 = vmul.f32 %v8588_v28, %v8588_v28 }
 0x2d1   :  { %v249_v55 = vmul.f32 %v8590_v30, %v8590_v30  ;;  %v250_v33 = vmul.f32 %v8592_v26, %v8592_v26  ;;  %v251_v47 = vmul.f32 %v8594_v18, %v8594_v18  ;;  %v252_v14 = vmul.f32 %v8596_v10, %v8596_v10 }
 0x2d2   :  { %v253_v61 = vsel %vm10681_vm1, %v245_v9, 0.0  ;;  %v254_v5 = vsel %vm10681_vm1, %v246_v8, 0.0  ;;  %v256_v22 = vsel %vm10681_vm1, %v247_v48, 0.0  ;;  %v258_v49 = vsel %vm10681_vm1, %v248_v52, 0.0 }
 0x2d3   :  { %v255_v25 = vadd.f32 %v254_v5, %v253_v61  ;;  %v260_v54 = vsel %vm10681_vm1, %v249_v55, 0.0  ;;  %v262_v41 = vsel %vm10681_vm1, %v250_v33, 0.0  ;;  %v264_v0 = vsel %vm10681_vm1, %v251_v47, 0.0 }
 0x2d4   :  { %v266_v61 = vsel %vm10681_vm1, %v252_v14, 0.0  ;;  %v10807_v55 = vmov 0  ;;  %vm10811_vm1 = vcmask 523264  }
 0x2d5   :  { %v257_v50 = vadd.f32 %v256_v22, %v255_v25  ;;  %v10809_v25 = vmov 0  ;;  %vm10812_vm4 = vmmov %vm10811_vm1 }
 0x2d7   :  { %v259_v59 = vadd.f32 %v258_v49, %v257_v50 }
 0x2d9   :  { %v261_v58 = vadd.f32 %v260_v54, %v259_v59 }
 0x2db   :  { %v263_v13 = vadd.f32 %v262_v41, %v261_v58  ;;  %v10813_v41 = vmov 0 }
 0x2dd   :  { %v265_v6 = vadd.f32 %v264_v0, %v263_v13 }
 0x2df   :  { %v267_v54 = vadd.f32 %v266_v61, %v265_v6 }
 0x330   :  { %v1423_v9 = vpop.xlane.xlu1 %1422 }
 0x331   :  { %v1451_v8 = vand.u32 63, %v1423_v9  ;;  %v1420_v48 = vpop.xlane.xlu0 %1419 }
 0x332   :  { %v1450_v52 = vand.u32 63, %v1420_v48 }
 0x333   :  { %vm8623_vm3 = vcmp.eq.s32.totalorder %v8269_v53, %v1451_v8  ;;  %v268_v8 = vrot.slane %v267_v54, 4 }
 0x334   :  { %v10808_v55 = vsel %vm8623_vm3, 4294967295, %v10807_v55  ;;  %v1429_v5 = vpop.xlane.xlu1 %1428  ;;  %v8630_v22 = vsel %vm8623_vm3, inf, %v8490_v51  ;;  %vm8633_vm11 = vcmp.eq.s32.totalorder %v8269_v53, %v1450_v52  ;;  %v10818_v52 = vmov 0 }
 0x335   :  { %v10810_v25 = vsel %vm8633_vm11, 4294967295, %v10809_v25  ;;  %v1453_v33 = vand.u32 63, %v1429_v5  ;;  %v1426_v49 = vpop.xlane.xlu0 %1425  ;;  %v1687_v50 = vsel %vm10811_vm1, %v8630_v22, inf  ;;  %v8642_v47 = vsel %vm8633_vm11, inf, %v8501_v57 }
 0x336   :  { %v1452_v59 = vand.u32 63, %v1426_v49  ;;  %1688 = vmin.xlane.f32.xlu1 %v1687_v50  ;;  %v1684_v51 = vsel %vm10812_vm4, %v8642_v47, inf  ;;  %v10815_v57 = vmov 0 }
 0x337   :  { %1685 = vmin.xlane.f32.xlu0 %v1684_v51  ;;  %vm8647_vm3 = vcmp.eq.s32.totalorder %v8269_v53, %v1453_v33  ;;  %v269_v51 = vadd.f32 %v268_v8, %v267_v54 }
 0x338   :  { %v10814_v41 = vsel %vm8647_vm3, 4294967295, %v10813_v41  ;;  %v1435_v58 = vpop.xlane.xlu1 %1434  ;;  %v8654_v0 = vsel %vm8647_vm3, inf, %v8512_v62  ;;  %vm8657_vm1 = vcmp.eq.s32.totalorder %v8269_v53, %v1452_v59  ;;  %vm10817_vm3 = vmmov %vm10812_vm4 }
 0x339   :  { %v10816_v57 = vsel %vm8657_vm1, 4294967295, %v10815_v57  ;;  %v1455_v13 = vand.u32 63, %v1435_v58  ;;  %v1432_v6 = vpop.xlane.xlu0 %1431  ;;  %v1693_v14 = vsel %vm10812_vm4, %v8654_v0, inf  ;;  %v8666_v9 = vsel %vm8657_vm1, inf, %v8523_v17 }
 0x33a   :  { %v1454_v48 = vand.u32 63, %v1432_v6  ;;  %1694 = vmin.xlane.f32.xlu1 %v1693_v14  ;;  %v1690_v62 = vsel %vm10817_vm3, %v8666_v9, inf  ;;  %v10820_v17 = vmov 0  ;;  %v270_v8 = vrot.slane %v269_v51, 2 }
 0x33b   :  { %1691 = vmin.xlane.f32.xlu0 %v1690_v62  ;;  %vm8671_vm11 = vcmp.eq.s32.totalorder %v8269_v53, %v1455_v13  ;;  %v10823_v13 = vmov 0 }
 0x33c   :  { %v10819_v52 = vsel %vm8671_vm11, 4294967295, %v10818_v52  ;;  %v1441_v61 = vpop.xlane.xlu1 %1440  ;;  %v8678_v5 = vsel %vm8671_vm11, inf, %v8534_v23  ;;  %vm8681_vm4 = vcmp.eq.s32.totalorder %v8269_v53, %v1454_v48  ;;  %vm10822_vm11 = vmmov %vm10817_vm3 }
 0x33d   :  { %v10821_v17 = vsel %vm8681_vm4, 4294967295, %v10820_v17  ;;  %v1457_v33 = vand.u32 63, %v1441_v61  ;;  %v1438_v49 = vpop.xlane.xlu0 %1437  ;;  %v1699_v50 = vsel %vm10817_vm3, %v8678_v5, inf  ;;  %v8690_v59 = vsel %vm8681_vm4, inf, %v8545_v31  ;;  %vm10827_vm4 = vmmov %vm10822_vm11 }
 0x33e   :  { %v1456_v58 = vand.u32 63, %v1438_v49  ;;  %1700 = vmin.xlane.f32.xlu1 %v1699_v50  ;;  %v1696_v23 = vsel %vm10822_vm11, %v8690_v59, inf  ;;  %v10825_v31 = vmov 0  ;;  %vm10828_vm11 = vmmov %vm10827_vm4 }
 0x33f   :  { %1697 = vmin.xlane.f32.xlu0 %v1696_v23  ;;  %vm8695_vm1 = vcmp.eq.s32.totalorder %v8269_v53, %v1457_v33  ;;  %v8727_v23 = vld [vmem:[%s10646_s5] ss:$0 sm:$0xff]  ;;  %s8080_s5 = smov 3  }
 0x340   :  { %v10824_v13 = vsel %vm8695_vm1, 4294967295, %v10823_v13  ;;  %v8702_v6 = vsel %vm8695_vm1, inf, %v8556_v39  ;;  %vm8705_vm3 = vcmp.eq.s32.totalorder %v8269_v53, %v1456_v58  ;;  %v271_v39 = vadd.f32 %v270_v8, %v269_v51 }
 0x341   :  { %v10826_v31 = vsel %vm8705_vm3, 4294967295, %v10825_v31  ;;  %v1705_v54 = vsel %vm10827_vm4, %v8702_v6, inf  ;;  %v8714_v14 = vsel %vm8705_vm3, inf, %v8567_v42  ;;  %vm10833_vm1 = vcmask 523264  }
 0x342   :  { %1706 = vmin.xlane.f32.xlu1 %v1705_v54  ;;  %v1702_v48 = vsel %vm10828_vm11, %v8714_v14, inf  ;;  %v272_v62 = vrot.slane %v271_v39, 1  ;;  %v8733_v54 = vld [vmem:[%s10647_s6] ss:$0 sm:$0xff] }
 0x343   :  { %1703 = vmin.xlane.f32.xlu0 %v1702_v48 }
 0x344   :  { %v273_v61 = vadd.f32 %v272_v62, %v271_v39 }
 0x346   :  { %v274_v33 = vmul.f32 0.015625, %v273_v61 }
 0x348   :  { %v275_v49 = vadd.f32 1e-05, %v274_v33  ;;  %v10829_v33 = vmov 0 }
 0x34a   :  { %7840 = vrsqrt.f32 %v275_v49 }
 0x354   :  { %v8718_v50 = vpop.eup %7840 }
 0x355   :  { %v283_v58 = vmul.f32 %v8718_v50, %v8594_v18  ;;  %v284_v42 = vmul.f32 %v8718_v50, %v8596_v10 }
 0x357   :  { %v298_v51 = vmul.f32 %v8727_v23, %v284_v42  ;;  %v297_v8 = vmul.f32 %v8727_v23, %v283_v58  ;;  %v10831_v42 = vmov 0 }
 0x359   :  { %v8737_v48 = vadd.f32 %v8733_v54, %v298_v51  ;;  %v8740_v18 = vadd.f32 %v8733_v54, %v297_v8 }
 0x3c3   :  { %v1689_v10 = vpop.xlane.xlu1 %1688 }
 0x3c4   :  { %v1717_v39 = vand.u32 63, %v1689_v10  ;;  %v1686_v62 = vpop.xlane.xlu0 %1685 }
 0x3c5   :  { %v1716_v61 = vand.u32 63, %v1686_v62 }
 0x3c6   :  { %vm8743_vm4 = vcmp.eq.s32.totalorder %v8269_v53, %v1717_v39 }
 0x3c7   :  { %v10830_v33 = vsel %vm8743_vm4, 4294967295, %v10829_v33  ;;  %v1695_v49 = vpop.xlane.xlu1 %1694  ;;  %v8750_v58 = vsel %vm8743_vm4, inf, %v8630_v22  ;;  %vm8753_vm11 = vcmp.eq.s32.totalorder %v8269_v53, %v1716_v61  ;;  %vm10834_vm4 = vmmov %vm10833_vm1  ;;  %v10835_v61 = vmov 0 }
 0x3c8   :  { %v10832_v42 = vsel %vm8753_vm11, 4294967295, %v10831_v42  ;;  %v1719_v51 = vand.u32 63, %v1695_v49  ;;  %v1692_v8 = vpop.xlane.xlu0 %1691  ;;  %v1953_v10 = vsel %vm10833_vm1, %v8750_v58, inf  ;;  %v8762_v39 = vsel %vm8753_vm11, inf, %v8642_v47 }
 0x3c9   :  { %v1718_v62 = vand.u32 63, %v1692_v8  ;;  %1954 = vmin.xlane.f32.xlu1 %v1953_v10  ;;  %v1950_v22 = vsel %vm10834_vm4, %v8762_v39, inf  ;;  %v10837_v47 = vmov 0 }
 0x3ca   :  { %1951 = vmin.xlane.f32.xlu0 %v1950_v22  ;;  %vm8767_vm3 = vcmp.eq.s32.totalorder %v8269_v53, %v1719_v51 }
 0x3cb   :  { %v10836_v61 = vsel %vm8767_vm3, 4294967295, %v10835_v61  ;;  %v1701_v49 = vpop.xlane.xlu1 %1700  ;;  %v8774_v4 = vsel %vm8767_vm3, inf, %v8654_v0  ;;  %vm8777_vm1 = vcmp.eq.s32.totalorder %v8269_v53, %v1718_v62  ;;  %vm10839_vm3 = vmmov %vm10834_vm4  ;;  %v10840_v62 = vmov 0 }
 0x3cc   :  { %v10838_v47 = vsel %vm8777_vm1, 4294967295, %v10837_v47  ;;  %v1721_v8 = vand.u32 63, %v1701_v49  ;;  %v1698_v10 = vpop.xlane.xlu0 %1697  ;;  %v1959_v22 = vsel %vm10834_vm4, %v8774_v4, inf  ;;  %v8786_v51 = vsel %vm8777_vm1, inf, %v8666_v9 }
 0x3cd   :  { %v1720_v3 = vand.u32 63, %v1698_v10  ;;  %1960 = vmin.xlane.f32.xlu1 %v1959_v22  ;;  %v1956_v0 = vsel %vm10839_vm3, %v8786_v51, inf  ;;  %v10843_v9 = vmov 0 }
 0x3ce   :  { %1957 = vmin.xlane.f32.xlu0 %v1956_v0  ;;  %vm8791_vm11 = vcmp.eq.s32.totalorder %v8269_v53, %v1721_v8 }
 0x3cf   :  { %v10841_v62 = vsel %vm8791_vm11, 4294967295, %v10840_v62  ;;  %v1707_v49 = vpop.xlane.xlu1 %1706  ;;  %v8798_v1 = vsel %vm8791_vm11, inf, %v8678_v5  ;;  %vm8801_vm4 = vcmp.eq.s32.totalorder %v8269_v53, %v1720_v3  ;;  %vm10845_vm11 = vmmov %vm10839_vm3  ;;  %v10846_v3 = vmov 0 }
 0x3d0   :  { %10842 = vst [vmem:[#allocation12_spill] sm:$0xff] %v10841_v62  ;;  %v10844_v9 = vsel %vm8801_vm4, 4294967295, %v10843_v9  ;;  %v1723_v10 = vand.u32 63, %v1707_v49  ;;  %v1704_v22 = vpop.xlane.xlu0 %1703  ;;  %v1965_v0 = vsel %vm10839_vm3, %v8798_v1, inf  ;;  %v8810_v8 = vsel %vm8801_vm4, inf, %v8690_v59  ;;  %vm10852_vm4 = vmmov %vm10845_vm11 }
 0x3d1   :  { %v1722_v2 = vand.u32 63, %v1704_v22  ;;  %1966 = vmin.xlane.f32.xlu1 %v1965_v0  ;;  %v1962_v5 = vsel %vm10845_vm11, %v8810_v8, inf  ;;  %v10849_v59 = vmov 0  ;;  %vm10853_vm11 = vmmov %vm10852_vm4 }
 0x3d2   :  { %1963 = vmin.xlane.f32.xlu0 %v1962_v5  ;;  %vm8815_vm1 = vcmp.eq.s32.totalorder %v8269_v53, %v1723_v10  ;;  %v279_v5 = vmul.f32 %v8718_v50, %v8586_v37 }
 0x3d3   :  { %v10847_v3 = vsel %vm8815_vm1, 4294967295, %v10846_v3  ;;  %v8822_v49 = vsel %vm8815_vm1, inf, %v8702_v6  ;;  %vm8825_vm3 = vcmp.eq.s32.totalorder %v8269_v53, %v1722_v2  ;;  %v278_v6 = vmul.f32 %v8718_v50, %v8584_v19 }
 0x3d4   :  { %10848 = vst [vmem:[#allocation13_spill] sm:$0xff] %v10847_v3  ;;  %v10850_v59 = vsel %vm8825_vm3, 4294967295, %v10849_v59  ;;  %v1971_v22 = vsel %vm10852_vm4, %v8822_v49, inf  ;;  %v8834_v10 = vsel %vm8825_vm3, inf, %v8714_v14  ;;  %v277_v3 = vmul.f32 %v8718_v50, %v8582_v34 }
 0x3d5   :  { %10851 = vst [vmem:[#allocation14_spill] sm:$0xff] %v10850_v59  ;;  %1972 = vmin.xlane.f32.xlu1 %v1971_v22  ;;  %v1968_v0 = vsel %vm10853_vm11, %v8834_v10, inf  ;;  %v292_v2 = vmul.f32 %v8727_v23, %v278_v6  ;;  %v293_v14 = vmul.f32 %v8727_v23, %v279_v5  ;;  %v280_v22 = vmul.f32 %v8718_v50, %v8588_v28 }
 0x3d6   :  { %1969 = vmin.xlane.f32.xlu0 %v1968_v0  ;;  %v291_v0 = vmul.f32 %v8727_v23, %v277_v3  ;;  %v281_v19 = vmul.f32 %v8718_v50, %v8590_v30  ;;  %v282_v34 = vmul.f32 %v8718_v50, %v8592_v26  ;;  %vm10858_vm1 = vcmask 523264  }
 0x3d7   :  { %v306_v59 = vadd.f32 %v8733_v54, %v292_v2  ;;  %v307_v6 = vadd.f32 %v8733_v54, %v293_v14  ;;  %v294_v37 = vmul.f32 %v8727_v23, %v280_v22  ;;  %vm10859_vm3 = vmmov %vm10858_vm1 }
 0x3d8   :  { %v305_v2 = vadd.f32 %v8733_v54, %v291_v0  ;;  %v295_v28 = vmul.f32 %v8727_v23, %v281_v19  ;;  %v296_v30 = vmul.f32 %v8727_v23, %v282_v34 }
 0x3d9   :  { %v314_v62 = vmax.f32 %v306_v59, 0.0  ;;  %v315_v5 = vmax.f32 %v307_v6, 0.0  ;;  %v308_v3 = vadd.f32 %v8733_v54, %v294_v37  ;;  %v10854_v37 = vmov 0 }
 0x3da   :  { %v313_v59 = vmax.f32 %v305_v2, 0.0  ;;  %v309_v14 = vadd.f32 %v8733_v54, %v295_v28  ;;  %v310_v50 = vadd.f32 %v8733_v54, %v296_v30  ;;  %v10856_v2 = vmov 0 }
 0x3db   :  { %v316_v26 = vmax.f32 %v308_v3, 0.0 }
 0x3dc   :  { %v318_v22 = vmax.f32 %v310_v50, 0.0 }
 0x3e6   :  { %340 = vrot.lane.b32.xlu1 %v314_v62, %s8080_s5  ;;  %v317_v62 = vmax.f32 %v309_v14, 0.0  ;;  %v10860_v14 = vmov 0 }
 0x3ea   :  { %342 = vrot.lane.b32.xlu1 %v315_v5, %s8080_s5 }
 0x3ec   :  { %338 = vrot.lane.b32.xlu0 %v313_v59, %s8080_s5 }
 0x3ee   :  { %344 = vrot.lane.b32.xlu1 %v316_v26, %s8080_s5 }
 0x3f0   :  { %346 = vrot.lane.b32.xlu0 %v317_v62, %s8080_s5 }
 0x3f2   :  { %348 = vrot.lane.b32.xlu1 %v318_v22, %s8080_s5 }
 0x456   :  { %v1955_v0 = vpop.xlane.xlu1 %1954 }
 0x457   :  { %v1983_v23 = vand.u32 63, %v1955_v0  ;;  %v1952_v19 = vpop.xlane.xlu0 %1951 }
 0x458   :  { %v1982_v6 = vand.u32 63, %v1952_v19 }
 0x459   :  { %vm8869_vm4 = vcmp.eq.s32.totalorder %v8269_v53, %v1983_v23 }
 0x45a   :  { %v10855_v37 = vsel %vm8869_vm4, 4294967295, %v10854_v37  ;;  %v1961_v34 = vpop.xlane.xlu1 %1960  ;;  %v8876_v54 = vsel %vm8869_vm4, inf, %v8750_v58  ;;  %vm8879_vm11 = vcmp.eq.s32.totalorder %v8269_v53, %v1982_v6  ;;  %v10865_v6 = vmov 0 }
 0x45b   :  { %v10857_v2 = vsel %vm8879_vm11, 4294967295, %v10856_v2  ;;  %v1985_v28 = vand.u32 63, %v1961_v34  ;;  %v1958_v5 = vpop.xlane.xlu0 %1957  ;;  %v2219_v3 = vsel %vm10858_vm1, %v8876_v54, inf  ;;  %v8888_v30 = vsel %vm8879_vm11, inf, %v8762_v39 }
 0x45c   :  { %v1984_v59 = vand.u32 63, %v1958_v5  ;;  %2220 = vmin.xlane.f32.xlu1 %v2219_v3  ;;  %v2216_v58 = vsel %vm10859_vm3, %v8888_v30, inf  ;;  %v10862_v39 = vmov 0 }
 0x45d   :  { %2217 = vmin.xlane.f32.xlu0 %v2216_v58  ;;  %vm8893_vm4 = vcmp.eq.s32.totalorder %v8269_v53, %v1985_v28 }
 0x45e   :  { %v10861_v14 = vsel %vm8893_vm4, 4294967295, %v10860_v14  ;;  %v1967_v26 = vpop.xlane.xlu1 %1966  ;;  %v8900_v50 = vsel %vm8893_vm4, inf, %v8774_v4  ;;  %vm8903_vm1 = vcmp.eq.s32.totalorder %v8269_v53, %v1984_v59  ;;  %vm10864_vm4 = vmmov %vm10859_vm3 }
 0x45f   :  { %v10863_v39 = vsel %vm8903_vm1, 4294967295, %v10862_v39  ;;  %v1987_v62 = vand.u32 63, %v1967_v26  ;;  %v1964_v22 = vpop.xlane.xlu0 %1963  ;;  %v2225_v0 = vsel %vm10859_vm3, %v8900_v50, inf  ;;  %v8912_v23 = vsel %vm8903_vm1, inf, %v8786_v51 }
 0x460   :  { %v1986_v19 = vand.u32 63, %v1964_v22  ;;  %2226 = vmin.xlane.f32.xlu1 %v2225_v0  ;;  %v2222_v4 = vsel %vm10864_vm4, %v8912_v23, inf  ;;  %v10867_v51 = vmov 0  ;;  %vm10718_vm1 = vcmask 154648  }
 0x461   :  { %2223 = vmin.xlane.f32.xlu0 %v2222_v4  ;;  %vm8917_vm11 = vcmp.eq.s32.totalorder %v8269_v53, %v1987_v62  ;;  %v10870_v62 = vmov 0 }
 0x462   :  { %v10866_v6 = vsel %vm8917_vm11, 4294967295, %v10865_v6  ;;  %v1973_v34 = vpop.xlane.xlu1 %1972  ;;  %v8924_v28 = vsel %vm8917_vm11, inf, %v8798_v1  ;;  %vm8927_vm3 = vcmp.eq.s32.totalorder %v8269_v53, %v1986_v19  ;;  %vm10869_vm11 = vmmov %vm10864_vm4 }
 0x463   :  { %v10868_v51 = vsel %vm8927_vm3, 4294967295, %v10867_v51  ;;  %v1989_v5 = vand.u32 63, %v1973_v34  ;;  %v1970_v3 = vpop.xlane.xlu0 %1969  ;;  %v2231_v59 = vsel %vm10864_vm4, %v8924_v28, inf  ;;  %v8936_v58 = vsel %vm8927_vm3, inf, %v8810_v8 }
 0x464   :  { %v1988_v26 = vand.u32 63, %v1970_v3  ;;  %2232 = vmin.xlane.f32.xlu1 %v2231_v59  ;;  %v2228_v1 = vsel %vm10869_vm11, %v8936_v58, inf  ;;  %v10873_v8 = vmov 0 }
 0x465   :  { %2229 = vmin.xlane.f32.xlu0 %v2228_v1  ;;  %vm8941_vm0 = vcmp.eq.s32.totalorder %v8269_v53, %v1989_v5 }
 0x466   :  { %v10871_v62 = vsel %vm8941_vm0, 4294967295, %v10870_v62  ;;  %v341_v22 = vpop.permute.xlu1 %340  ;;  %v8948_v0 = vsel %vm8941_vm0, inf, %v8822_v49  ;;  %vm8951_vm4 = vcmp.eq.s32.totalorder %v8269_v53, %v1988_v26  ;;  %vm10876_vm0 = vmmov %vm10869_vm11 }
 0x467   :  { %10872 = vst [vmem:[#allocation15_spill] sm:$0xff] %v10871_v62  ;;  %v10874_v8 = vsel %vm8951_vm4, 4294967295, %v10873_v8  ;;  %364 = vst.msk [vmem:[#allocation2 + $0x8] sm:$0xff] %vm10718_vm1, %v341_v22  ;;  %v339_v19 = vpop.permute.xlu0 %338  ;;  %v2237_v4 = vsel %vm10869_vm11, %v8948_v0, inf  ;;  %v8961_v34 = vsel %vm8951_vm4, inf, %v8834_v10 }
 0x468   :  { %10875 = vst [vmem:[#allocation16_spill] sm:$0xff] %v10874_v8  ;;  %363 = vst.msk [vmem:[#allocation2] sm:$0xff] %vm10718_vm1, %v339_v19  ;;  %2238 = vmin.xlane.f32.xlu1 %v2237_v4  ;;  %v2234_v49 = vsel %vm10876_vm0, %v8961_v34, inf }
 0x469   :  { %2235 = vmin.xlane.f32.xlu0 %v2234_v49 }
 0x46a   :  { %v343_v5 = vpop.permute.xlu1 %342 }
 0x46b   :  { %365 = vst.msk [vmem:[#allocation2 + $0x10] sm:$0xff] %vm10718_vm1, %v343_v5  ;;  %v347_v3 = vpop.permute.xlu0 %346  ;;  %v320_v5 = vmax.f32 %v8737_v48, 0.0  ;;  %v319_v48 = vmax.f32 %v8740_v18, 0.0 }
 0x46c   :  { %367 = vst.msk [vmem:[#allocation2 + $0x20] sm:$0xff] %vm10718_vm1, %v347_v3 }
 0x46e   :  { %v372_v59 = vld [vmem:[#allocation2 + $0x8] sm:$0xff]  ;;  %v345_v26 = vpop.permute.xlu1 %344 }
 0x46f   :  { %v371_v1 = vld [vmem:[#allocation2] sm:$0xff]  ;;  %366 = vst.msk [vmem:[#allocation2 + $0x18] sm:$0xff] %vm10718_vm1, %v345_v26 }
 0x470   :  { %v8969_v10 = vpack.c.bf16 %v372_v59, %v371_v1 }
 0x472   :  { %v349_v22 = vpop.permute.xlu1 %348  ;;  %7655 = vmatprep.subr.bf16.mxu1 %v8969_v10  ;;  %7671 = vmatprep.subr.bf16.mxu0 %v8969_v10  ;;  %v373_v19 = vld [vmem:[#allocation2 + $0x10] sm:$0xff] }
 0x473   :  { %368 = vst.msk [vmem:[#allocation2 + $0x28] sm:$0xff] %vm10718_vm1, %v349_v22  ;;  %7657 = vmatpush3.bf16.msra.mxu1 %v8969_v10  ;;  %7673 = vmatpush3.bf16.msra.mxu0 %v8969_v10  ;;  %v375_v3 = vld [vmem:[#allocation2 + $0x20] sm:$0xff]  ;;  %vm10881_vm1 = vcmask 523264  }
 0x474   :  { %vm10882_vm4 = vmmov %vm10881_vm1 }
 0x476   :  { %v374_v4 = vld [vmem:[#allocation2 + $0x18] sm:$0xff] }
 0x477   :  { %v8976_v49 = vpack.c.bf16 %v374_v4, %v373_v19 }
 0x479   :  { %352 = vrot.lane.b32.xlu1 %v320_v5, %s8080_s5  ;;  %7659 = vmatprep.subr.bf16.mxu1 %v8976_v49  ;;  %v10877_v5 = vmov 0 }
 0x47a   :  { %v376_v59 = vld [vmem:[#allocation2 + $0x28] sm:$0xff]  ;;  %7675 = vmatprep.subr.bf16.mxu0 %v8976_v49  ;;  %7661 = vmatpush3.bf16.msra.mxu1 %v8976_v49 }
 0x47b   :  { %v8983_v26 = vpack.c.bf16 %v376_v59, %v375_v3  ;;  %7677 = vmatpush3.bf16.msra.mxu0 %v8976_v49  ;;  %v10879_v59 = vmov 0 }
 0x47d   :  { %7663 = vmatprep.subr.bf16.mxu1 %v8983_v26  ;;  %7679 = vmatprep.subr.bf16.mxu0 %v8983_v26 }
 0x47e   :  { %7665 = vmatpush3.bf16.msra.mxu1 %v8983_v26 }
 0x47f   :  { %7681 = vmatpush3.bf16.msra.mxu0 %v8983_v26  ;;  %350 = vrot.lane.b32.xlu0 %v319_v48, %s8080_s5 }
 0x4e9   :  { %v2221_v1 = vpop.xlane.xlu1 %2220 }
 0x4ea   :  { %v2249_v22 = vand.u32 63, %v2221_v1  ;;  %v2218_v19 = vpop.xlane.xlu0 %2217 }
 0x4eb   :  { %v2248_v4 = vand.u32 63, %v2218_v19 }
 0x4ec   :  { %vm8993_vm0 = vcmp.eq.s32.totalorder %v8269_v53, %v2249_v22 }
 0x4ed   :  { %v10878_v5 = vsel %vm8993_vm0, 4294967295, %v10877_v5  ;;  %v2227_v3 = vpop.xlane.xlu1 %2226  ;;  %v2475_v18 = vsel %vm8993_vm0, inf, %v8876_v54  ;;  %vm9001_vm11 = vcmp.eq.s32.totalorder %v8269_v53, %v2248_v4  ;;  %v10883_v54 = vmov 0 }
 0x4ee   :  { %v10880_v59 = vsel %vm9001_vm11, 4294967295, %v10879_v59  ;;  %v2251_v48 = vand.u32 63, %v2227_v3  ;;  %v2224_v62 = vpop.xlane.xlu0 %2223  ;;  %v2485_v1 = vsel %vm10881_vm1, %v2475_v18, inf  ;;  %v2474_v22 = vsel %vm9001_vm11, inf, %v8888_v30  ;;  %vm10888_vm11 = vmmov %vm10882_vm4 }
 0x4ef   :  { %v2250_v19 = vand.u32 63, %v2224_v62  ;;  %2486 = vmin.xlane.f32.xlu1 %v2485_v1  ;;  %v2482_v8 = vsel %vm10882_vm4, %v2474_v22, inf  ;;  %v10886_v18 = vmov 0  ;;  %vm10893_vm3 = vmmov %vm10888_vm11 }
 0x4f0   :  { %2483 = vmin.xlane.f32.xlu0 %v2482_v8  ;;  %vm9011_vm0 = vcmp.eq.s32.totalorder %v8269_v53, %v2251_v48  ;;  %v10889_v48 = vmov 0 }
 0x4f1   :  { %v10884_v54 = vsel %vm9011_vm0, 4294967295, %v10883_v54  ;;  %v2233_v4 = vpop.xlane.xlu1 %2232  ;;  %v2477_v3 = vsel %vm9011_vm0, inf, %v8900_v50  ;;  %vm9019_vm1 = vcmp.eq.s32.totalorder %v8269_v53, %v2250_v19 }
 0x4f2   :  { %10885 = vst [vmem:[#allocation17_spill] sm:$0xff] %v10884_v54  ;;  %v10887_v18 = vsel %vm9019_vm1, 4294967295, %v10886_v18  ;;  %v2253_v30 = vand.u32 63, %v2233_v4  ;;  %v2230_v62 = vpop.xlane.xlu0 %2229  ;;  %v2491_v1 = vsel %vm10888_vm11, %v2477_v3, inf  ;;  %v2476_v50 = vsel %vm9019_vm1, inf, %v8912_v23 }
 0x4f3   :  { %v2252_v8 = vand.u32 63, %v2230_v62  ;;  %v2488_v54 = vsel %vm10893_vm3, %v2476_v50, inf  ;;  %v10894_v23 = vmov 0  ;;  %vm10898_vm3 = vcmask 154648  }
 0x4f4   :  { %2492 = vmin.xlane.f32.xlu0 %v2491_v1  ;;  %vm9025_vm4 = vcmp.eq.s32.totalorder %v8269_v53, %v2253_v30  ;;  %vm10900_vm12 = vmmov %vm10898_vm3 }
 0x4f5   :  { %v10890_v48 = vsel %vm9025_vm4, 4294967295, %v10889_v48  ;;  %v2239_v22 = vpop.xlane.xlu1 %2238  ;;  %v2479_v19 = vsel %vm9025_vm4, inf, %v8924_v28  ;;  %vm9036_vm0 = vcmp.eq.s32.totalorder %v8269_v53, %v2252_v8  ;;  %vm10899_vm4 = vcmask 523264  }
 0x4f6   :  { %v2255_v3 = vand.u32 63, %v2239_v22  ;;  %v2236_v62 = vpop.xlane.xlu0 %2235  ;;  %v2497_v30 = vsel %vm10888_vm11, %v2479_v19, inf  ;;  %v2478_v28 = vsel %vm9036_vm0, inf, %v8936_v58  ;;  %vm10901_vm6 = vmmov %vm10899_vm4 }
 0x4f7   :  { %v2254_v1 = vand.u32 63, %v2236_v62  ;;  %2498 = vmin.xlane.f32.xlu1 %v2497_v30  ;;  %v2494_v58 = vsel %vm10901_vm6, %v2478_v28, inf }
 0x4f8   :  { %2489 = vmin.xlane.f32.xlu0 %v2488_v54  ;;  %vm9043_vm1 = vcmp.eq.s32.totalorder %v8269_v53, %v2255_v3 }
 0x4f9   :  { %v10895_v23 = vsel %vm9043_vm1, 4294967295, %v10894_v23  ;;  %v353_v8 = vpop.permute.xlu1 %352  ;;  %v2481_v22 = vsel %vm9043_vm1, inf, %v8948_v0  ;;  %vm9054_vm11 = vcmp.eq.s32.totalorder %v8269_v53, %v2254_v1  ;;  %vm10902_vm1 = vmmov %vm10899_vm4 }
 0x4fa   :  { %370 = vst.msk [vmem:[#allocation2 + $0x38] sm:$0xff] %vm10898_vm3, %v353_v8  ;;  %v351_v54 = vpop.permute.xlu0 %350  ;;  %v2503_v50 = vsel %vm10899_vm4, %v2481_v22, inf  ;;  %v2480_v0 = vsel %vm9054_vm11, inf, %v8961_v34  ;;  %v10903_v34 = vmov 0.0   ;;  %vm10905_vm6 = vmmov %vm10902_vm1  ;;  %vm10915_vm3 = vnez %v10790_v38 }
 0x4fb   :  { %369 = vst.msk [vmem:[#allocation2 + $0x30] sm:$0xff] %vm10900_vm12, %v351_v54  ;;  %2504 = vmin.xlane.f32.xlu1 %v2503_v50  ;;  %v2500_v3 = vsel %vm10902_vm1, %v2480_v0, inf  ;;  %v6536_v28 = vsel %vm8344_vm5, 1.0, %v10903_v34  ;;  %v6552_v8 = vsel %vm8424_vm13, 1.0, %v10903_v34  ;;  %vm10904_vm12 = vmmov %vm10902_vm1  ;;  %v6537_v22 = vsel %vm8366_vm8, 1.0, %v10903_v34  ;;  %v10986_v0 = vld [vmem:[#allocation15_spill] sm:$0xff] }
 0x4fc   :  { %2495 = vmin.xlane.f32.xlu0 %v2494_v58  ;;  %v6553_v54 = vsel %vm8443_vm2, 1.0, %v10903_v34  ;;  %vm10906_vm4 = vmmov %vm10902_vm1  ;;  %v6538_v11 = vsel %vm8358_vm7, 1.0, %v10903_v34  ;;  %v6554_v16 = vsel %vm8436_vm15, 1.0, %v10903_v34  ;;  %v6539_v56 = vsel %vm8384_vm10, 1.0, %v10903_v34 }
 0x4fd   :  { %vm10907_vm5 = vmmov %vm10902_vm1  ;;  %v6555_v15 = vsel %vm8459_vm14, 1.0, %v10903_v34  ;;  %v6540_v24 = vsel %vm8376_vm9, 1.0, %v10903_v34  ;;  %vm10911_vm7 = vnez %v10784_v12  ;;  %vm10914_vm14 = vnez %v10776_v45 }
 0x4fe   :  { %vm10908_vm8 = vmmov %vm10902_vm1  ;;  %v6556_v36 = vsel %vm10911_vm7, 1.0, %v10903_v34  ;;  %v6541_v7 = vsel %vm10914_vm14, 1.0, %v10903_v34  ;;  %v6557_v27 = vsel %vm10915_vm3, 1.0, %v10903_v34  ;;  %vm10918_vm9 = vnez %v10774_v40 }
 0x4ff   :  { %vm10909_vm13 = vmmov %vm10902_vm1  ;;  %v6542_v29 = vsel %vm10918_vm9, 1.0, %v10903_v34 }
 0x500   :  { %2501 = vmin.xlane.f32.xlu0 %v2500_v3  ;;  %vm10910_vm2 = vmmov %vm10902_vm1 }
 0x501   :  { %v378_v62 = vld [vmem:[#allocation2 + $0x38] sm:$0xff]  ;;  %vm10912_vm10 = vmmov %vm10902_vm1 }
 0x502   :  { %v377_v30 = vld [vmem:[#allocation2 + $0x30] sm:$0xff]  ;;  %vm10913_vm15 = vmmov %vm10902_vm1 }
 0x503   :  { %v9066_v1 = vpack.c.bf16 %v378_v62, %v377_v30  ;;  %vm10924_vm7 = vmmov %vm10910_vm2 }
 0x504   :  { %vm10927_vm14 = vmmov %vm10910_vm2 }
 0x505   :  { %7667 = vmatprep.subr.bf16.mxu1 %v9066_v1  ;;  %7683 = vmatprep.subr.bf16.mxu0 %v9066_v1  ;;  %vm10928_vm3 = vmmov %vm10910_vm2 }
 0x506   :  { %7669 = vmatpush3.bf16.msra.mxu1 %v9066_v1  ;;  %7685 = vmatpush3.bf16.msra.mxu0 %v9066_v1  ;;  %vm10931_vm9 = vmmov %vm10910_vm2 }
 0x507   :  { %7687 = vmatprep.subr.bf16.mxu1 %v8969_v10  ;;  %7703 = vmatprep.subr.bf16.mxu0 %v8969_v10 }
 0x509   :  { %7183 = vmatmul.mubr.msk.f32.vlgmr.msra.gmra.mrb[8].mxu1 %vm10904_vm12, %v6536_v28  ;;  %7211 = vmatmul.mubr.msk.f32.vlgmr.msra.gmra.mrb[8].mxu0 %vm10905_vm6, %v6552_v8  ;;  %vm10916_vm12 = vmmov %vm10902_vm1 }
 0x50a   :  { %7185 = vmatprep.mubr.msk.f32.mxu1 %vm10902_vm1, %v6537_v22  ;;  %7213 = vmatprep.mubr.msk.f32.mxu0 %vm10906_vm4, %v6553_v54  ;;  %vm10917_vm6 = vmmov %vm10902_vm1  ;;  %vm10919_vm1 = vnez %v10788_v35 }
 0x50b   :  { %7689 = vmatpush3.bf16.msra.mxu1 %v8969_v10  ;;  %7705 = vmatpush3.bf16.msra.mxu0 %v8969_v10  ;;  %v6558_v45 = vsel %vm10919_vm1, 1.0, %v10903_v34  ;;  %vm10920_vm4 = vmmov %vm10910_vm2 }
 0x50c   :  { %7691 = vmatprep.subr.bf16.mxu1 %v8976_v49  ;;  %7707 = vmatprep.subr.bf16.mxu0 %v8976_v49  ;;  %vm10932_vm1 = vmmov %vm10910_vm2 }
 0x50d   :  { %7186 = vmatmul.mubr.msk.f32.gmra.mrb[10].mxu1 %vm10907_vm5, %v6538_v11  ;;  %7214 = vmatmul.mubr.msk.f32.gmra.mrb[10].mxu0 %vm10908_vm8, %v6554_v16  ;;  %vm10921_vm5 = vmmov %vm10910_vm2  ;;  %vm10922_vm8 = vnez %v10794_v46 }
 0x50e   :  { %7188 = vmatprep.mubr.msk.f32.mxu1 %vm10909_vm13, %v6539_v56  ;;  %7216 = vmatprep.mubr.msk.f32.mxu0 %vm10910_vm2, %v6555_v15  ;;  %v6567_v12 = vsel %vm10922_vm8, 1.0, %v10903_v34  ;;  %vm10923_vm13 = vnez %v10810_v25  ;;  %vm10935_vm8 = vmmov %vm10932_vm1 }
 0x50f   :  { %7693 = vmatpush3.bf16.msra.mxu1 %v8976_v49  ;;  %7709 = vmatpush3.bf16.msra.mxu0 %v8976_v49  ;;  %v6583_v38 = vsel %vm10923_vm13, 1.0, %v10903_v34  ;;  %vm10936_vm13 = vmmov %vm10932_vm1 }
 0x510   :  { %7695 = vmatprep.subr.bf16.mxu1 %v8983_v26  ;;  %7711 = vmatprep.subr.bf16.mxu0 %v8983_v26 }
 0x511   :  { %7189 = vmatmul.mubr.msk.f32.gmra.mrb[12].mxu1 %vm10912_vm10, %v6540_v24  ;;  %7217 = vmatmul.mubr.msk.f32.gmra.mrb[12].mxu0 %vm10913_vm15, %v6556_v36  ;;  %vm10925_vm10 = vnez %v10792_v44  ;;  %vm10926_vm15 = vnez %v10808_v55 }
 0x512   :  { %7191 = vmatprep.mubr.msk.f32.mxu1 %vm10916_vm12, %v6541_v7  ;;  %7219 = vmatprep.mubr.msk.f32.mxu0 %vm10917_vm6, %v6557_v27  ;;  %v6568_v40 = vsel %vm10925_vm10, 1.0, %v10903_v34  ;;  %v6584_v35 = vsel %vm10926_vm15, 1.0, %v10903_v34  ;;  %vm10929_vm12 = vnez %v10798_v63  ;;  %vm10930_vm6 = vnez %v10816_v57  ;;  %vm10939_vm10 = vmmov %vm10932_vm1 }
 0x513   :  { %7697 = vmatpush3.bf16.msra.mxu1 %v8983_v26  ;;  %7713 = vmatpush3.bf16.msra.mxu0 %v8983_v26  ;;  %v6569_v46 = vsel %vm10929_vm12, 1.0, %v10903_v34  ;;  %v6585_v25 = vsel %vm10930_vm6, 1.0, %v10903_v34  ;;  %vm10940_vm15 = vmmov %vm10932_vm1 }
 0x514   :  { %7699 = vmatprep.subr.bf16.mxu1 %v9066_v1  ;;  %7715 = vmatprep.subr.bf16.mxu0 %v9066_v1  ;;  %vm10943_vm12 = vmmov %vm10932_vm1 }
 0x515   :  { %7192 = vmatmul.mubr.msk.f32.gmra.mrb[14].mxu1 %vm10920_vm4, %v6542_v29  ;;  %7220 = vmatmul.mubr.msk.f32.gmra.mrb[14].mxu0 %vm10921_vm5, %v6558_v45  ;;  %vm10933_vm4 = vnez %v10796_v60  ;;  %vm10934_vm5 = vnez %v10814_v41  ;;  %vm10944_vm6 = vmmov %vm10932_vm1 }
 0x516   :  { %7238 = vmatprep.mubr.msk.f32.mxu1 %vm10910_vm2, %v6567_v12  ;;  %7266 = vmatprep.mubr.msk.f32.mxu0 %vm10924_vm7, %v6583_v38  ;;  %v6570_v44 = vsel %vm10933_vm4, 1.0, %v10903_v34  ;;  %v6586_v63 = vsel %vm10934_vm5, 1.0, %v10903_v34  ;;  %vm10937_vm2 = vnez %v10802_v21  ;;  %vm10938_vm7 = vnez %v10821_v17  ;;  %vm10947_vm4 = vmmov %vm10944_vm6 }
 0x517   :  { %7701 = vmatpush3.bf16.msra.mxu1 %v9066_v1  ;;  %7717 = vmatpush3.bf16.msra.mxu0 %v9066_v1  ;;  %v6571_v55 = vsel %vm10937_vm2, 1.0, %v10903_v34  ;;  %v6587_v57 = vsel %vm10938_vm7, 1.0, %v10903_v34  ;;  %vm10948_vm5 = vmmov %vm10947_vm4 }
 0x518   :  { %7719 = vmatprep.subr.bf16.mxu1 %v8969_v10  ;;  %7735 = vmatprep.subr.bf16.mxu0 %v8969_v10  ;;  %vm10951_vm2 = vmmov %vm10947_vm4 }
 0x519   :  { %vm10952_vm7 = vmmov %vm10951_vm2 }
 0x51a   :  { %7239 = vmatmul.mubr.msk.f32.vlgmr.msra.gmra.mrb[16].mxu1 %vm10927_vm14, %v6568_v40  ;;  %7267 = vmatmul.mubr.msk.f32.vlgmr.msra.gmra.mrb[16].mxu0 %vm10928_vm3, %v6584_v35  ;;  %vm10941_vm14 = vnez %v10800_v20  ;;  %vm10942_vm3 = vnez %v10819_v52 }
 0x51b   :  { %7241 = vmatprep.mubr.msk.f32.mxu1 %vm10931_vm9, %v6569_v46  ;;  %7269 = vmatprep.mubr.msk.f32.mxu0 %vm10932_vm1, %v6585_v25  ;;  %v6572_v60 = vsel %vm10941_vm14, 1.0, %v10903_v34  ;;  %v6588_v21 = vsel %vm10942_vm3, 1.0, %v10903_v34  ;;  %vm10945_vm9 = vnez %v10806_v43  ;;  %vm10946_vm1 = vnez %v10826_v31  ;;  %vm10955_vm14 = vmmov %vm10951_vm2 }
 0x51c   :  { %7721 = vmatpush3.bf16.msra.mxu1 %v8969_v10  ;;  %7737 = vmatpush3.bf16.msra.mxu0 %v8969_v10  ;;  %v6573_v41 = vsel %vm10945_vm9, 1.0, %v10903_v34  ;;  %v6589_v17 = vsel %vm10946_vm1, 1.0, %v10903_v34  ;;  %vm10956_vm3 = vmmov %vm10951_vm2 }
 0x51d   :  { %7723 = vmatprep.subr.bf16.mxu1 %v8976_v49  ;;  %7739 = vmatprep.subr.bf16.mxu0 %v8976_v49  ;;  %vm10959_vm9 = vmmov %vm10951_vm2 }
 0x51e   :  { %7242 = vmatmul.mubr.msk.f32.gmra.mrb[18].mxu1 %vm10935_vm8, %v6570_v44  ;;  %7270 = vmatmul.mubr.msk.f32.gmra.mrb[18].mxu0 %vm10936_vm13, %v6586_v63  ;;  %vm10949_vm8 = vnez %v10804_v32  ;;  %vm10950_vm13 = vnez %v10824_v13  ;;  %vm10960_vm1 = vmmov %vm10951_vm2 }
 0x51f   :  { %7244 = vmatprep.mubr.msk.f32.mxu1 %vm10939_vm10, %v6571_v55  ;;  %7272 = vmatprep.mubr.msk.f32.mxu0 %vm10940_vm15, %v6587_v57  ;;  %v6574_v20 = vsel %vm10949_vm8, 1.0, %v10903_v34  ;;  %v6590_v43 = vsel %vm10950_vm13, 1.0, %v10903_v34  ;;  %vm10953_vm10 = vnez %v10832_v42  ;;  %vm10954_vm15 = vnez %v10857_v2  ;;  %vm10963_vm8 = vmmov %vm10960_vm1 }
 0x520   :  { %7725 = vmatpush3.bf16.msra.mxu1 %v8976_v49  ;;  %7741 = vmatpush3.bf16.msra.mxu0 %v8976_v49  ;;  %v6599_v52 = vsel %vm10953_vm10, 1.0, %v10903_v34  ;;  %v6615_v31 = vsel %vm10954_vm15, 1.0, %v10903_v34  ;;  %vm10964_vm13 = vmmov %vm10960_vm1 }
 0x521   :  { %7727 = vmatprep.subr.bf16.mxu1 %v8983_v26  ;;  %7743 = vmatprep.subr.bf16.mxu0 %v8983_v26  ;;  %vm10967_vm10 = vmmov %vm10960_vm1 }
 0x522   :  { %7245 = vmatmul.mubr.msk.f32.gmra.mrb[20].mxu1 %vm10943_vm12, %v6572_v60  ;;  %7273 = vmatmul.mubr.msk.f32.gmra.mrb[20].mxu0 %vm10944_vm6, %v6588_v21  ;;  %vm10957_vm12 = vnez %v10830_v33  ;;  %vm10958_vm6 = vnez %v10855_v37  ;;  %vm10968_vm15 = vmmov %vm10960_vm1 }
 0x523   :  { %7247 = vmatprep.mubr.msk.f32.mxu1 %vm10947_vm4, %v6573_v41  ;;  %7275 = vmatprep.mubr.msk.f32.mxu0 %vm10948_vm5, %v6589_v17  ;;  %v6600_v32 = vsel %vm10957_vm12, 1.0, %v10903_v34  ;;  %v6616_v13 = vsel %vm10958_vm6, 1.0, %v10903_v34  ;;  %vm10961_vm4 = vnez %v10838_v47  ;;  %vm10962_vm5 = vnez %v10863_v39  ;;  %vm10971_vm12 = vmmov %vm10960_vm1 }
 0x524   :  { %7729 = vmatpush3.bf16.msra.mxu1 %v8983_v26  ;;  %7745 = vmatpush3.bf16.msra.mxu0 %v8983_v26  ;;  %v6601_v42 = vsel %vm10961_vm4, 1.0, %v10903_v34  ;;  %v6617_v2 = vsel %vm10962_vm5, 1.0, %v10903_v34  ;;  %vm10972_vm6 = vmmov %vm10960_vm1 }
 0x525   :  { %7731 = vmatprep.subr.bf16.mxu1 %v9066_v1  ;;  %7747 = vmatprep.subr.bf16.mxu0 %v9066_v1  ;;  %vm10976_vm4 = vmmov %vm10972_vm6 }
 0x526   :  { %7248 = vmatmul.mubr.msk.f32.gmra.mrb[22].mxu1 %vm10951_vm2, %v6574_v20  ;;  %7276 = vmatmul.mubr.msk.f32.gmra.mrb[22].mxu0 %vm10952_vm7, %v6590_v43  ;;  %vm10965_vm2 = vnez %v10836_v61  ;;  %vm10966_vm7 = vnez %v10861_v14  ;;  %v10973_v61 = vld [vmem:[#allocation12_spill] sm:$0xff]  ;;  %vm10977_vm5 = vmmov %vm10976_vm4 }
 0x527   :  { %7294 = vmatprep.mubr.msk.f32.mxu1 %vm10955_vm14, %v6599_v52  ;;  %7322 = vmatprep.mubr.msk.f32.mxu0 %vm10956_vm3, %v6615_v31  ;;  %v6602_v33 = vsel %vm10965_vm2, 1.0, %v10903_v34  ;;  %v6618_v47 = vsel %vm10966_vm7, 1.0, %v10903_v34  ;;  %vm10969_vm14 = vnez %v10844_v9  ;;  %vm10970_vm3 = vnez %v10868_v51  ;;  %v10978_v51 = vld [vmem:[#allocation14_spill] sm:$0xff]  ;;  %vm10982_vm2 = vmmov %vm10976_vm4 }
 0x528   :  { %7733 = vmatpush3.bf16.msra.mxu1 %v9066_v1  ;;  %7749 = vmatpush3.bf16.msra.mxu0 %v9066_v1  ;;  %v6603_v37 = vsel %vm10969_vm14, 1.0, %v10903_v34  ;;  %v6619_v39 = vsel %vm10970_vm3, 1.0, %v10903_v34  ;;  %vm10983_vm7 = vmmov %vm10982_vm2 }
 0x529   :  { %7751 = vmatprep.subr.bf16.mxu1 %v8969_v10  ;;  %7767 = vmatprep.subr.bf16.mxu0 %v8969_v10  ;;  %vm10988_vm14 = vmmov %vm10982_vm2 }
 0x52a   :  { %vm10989_vm3 = vmmov %vm10982_vm2 }
 0x52b   :  { %7295 = vmatmul.mubr.msk.f32.vlgmr.msra.gmra.mrb[24].mxu1 %vm10959_vm9, %v6600_v32  ;;  %7323 = vmatmul.mubr.msk.f32.vlgmr.msra.gmra.mrb[24].mxu0 %vm10960_vm1, %v6616_v13  ;;  %vm10974_vm9 = vnez %v10973_v61  ;;  %vm10975_vm1 = vnez %v10866_v6  ;;  %v10984_v6 = vld [vmem:[#allocation13_spill] sm:$0xff] }
 0x52c   :  { %7297 = vmatprep.mubr.msk.f32.mxu1 %vm10963_vm8, %v6601_v42  ;;  %7325 = vmatprep.mubr.msk.f32.mxu0 %vm10964_vm13, %v6617_v2  ;;  %v6604_v9 = vsel %vm10974_vm9, 1.0, %v10903_v34  ;;  %v6620_v14 = vsel %vm10975_vm1, 1.0, %v10903_v34  ;;  %vm10979_vm8 = vnez %v10978_v51  ;;  %vm10992_vm9 = vnez %v10878_v5  ;;  %vm10993_vm1 = vmmov %vm10982_vm2  ;;  %v11012_v42 = vld [vmem:[#allocation5_spill] sm:$0xff] }
 0x52d   :  { %7753 = vmatpush3.bf16.msra.mxu1 %v8969_v10  ;;  %7769 = vmatpush3.bf16.msra.mxu0 %v8969_v10  ;;  %v6605_v10 = vsel %vm10979_vm8, 1.0, %v10903_v34  ;;  %v6632_v62 = vsel %vm10992_vm9, 1.0, %v10903_v34 }
 0x52e   :  { %7755 = vmatprep.subr.bf16.mxu1 %v8976_v49  ;;  %7771 = vmatprep.subr.bf16.mxu0 %v8976_v49 }
 0x52f   :  { %7298 = vmatmul.mubr.msk.f32.gmra.mrb[26].mxu1 %vm10967_vm10, %v6602_v33  ;;  %7326 = vmatmul.mubr.msk.f32.gmra.mrb[26].mxu0 %vm10968_vm15, %v6618_v47  ;;  %vm10985_vm10 = vnez %v10984_v6  ;;  %vm10987_vm15 = vnez %v10986_v0 }
 0x530   :  { %7300 = vmatprep.mubr.msk.f32.mxu1 %vm10971_vm12, %v6603_v37  ;;  %7328 = vmatprep.mubr.msk.f32.mxu0 %vm10972_vm6, %v6619_v39  ;;  %v6606_v58 = vsel %vm10985_vm10, 1.0, %v10903_v34  ;;  %v6622_v3 = vsel %vm10987_vm15, 1.0, %v10903_v34  ;;  %vm10990_vm12 = vnez %v10880_v59  ;;  %vm10991_vm6 = vmmov %vm10982_vm2  ;;  %v10996_v59 = vld [vmem:[#allocation17_spill] sm:$0xff]  ;;  %v11013_v39 = vld [vmem:[#allocation4_spill] sm:$0xff] }
 0x531   :  { %7757 = vmatpush3.bf16.msra.mxu1 %v8976_v49  ;;  %7773 = vmatpush3.bf16.msra.mxu0 %v8976_v49  ;;  %v10980_v49 = vld [vmem:[#allocation16_spill] sm:$0xff]  ;;  %vm10997_vm8 = vnez %v10996_v59  ;;  %vm11001_vm10 = vmmov %vm10993_vm1 }
 0x532   :  { %7759 = vmatprep.subr.bf16.mxu1 %v8983_v26  ;;  %7775 = vmatprep.subr.bf16.mxu0 %v8983_v26  ;;  %vm10981_vm13 = vnez %v10980_v49  ;;  %v6634_v28 = vsel %vm10997_vm8, 1.0, %v10903_v34  ;;  %vm11002_vm15 = vmmov %vm10993_vm1 }
 0x533   :  { %7301 = vmatmul.mubr.msk.f32.gmra.mrb[28].mxu1 %vm10976_vm4, %v6604_v9  ;;  %7329 = vmatmul.mubr.msk.f32.gmra.mrb[28].mxu0 %vm10977_vm5, %v6620_v14  ;;  %v6621_v50 = vsel %vm10981_vm13, 1.0, %v10903_v34  ;;  %vm10994_vm4 = vnez %v10887_v18  ;;  %vm10995_vm5 = vmmov %vm10993_vm1  ;;  %v6637_v18 = vsel %vm9054_vm11, 1.0, %v10903_v34 }
 0x534   :  { %7303 = vmatprep.mubr.msk.f32.mxu1 %vm10982_vm2, %v6605_v10  ;;  %7331 = vmatprep.mubr.msk.f32.mxu0 %vm10983_vm7, %v6621_v50  ;;  %v6633_v30 = vsel %vm10994_vm4, 1.0, %v10903_v34  ;;  %vm10998_vm13 = vmmov %vm10993_vm1  ;;  %vm11000_vm7 = vnez %v10890_v48 }
 0x535   :  { %7761 = vmatpush3.bf16.msra.mxu1 %v8983_v26  ;;  %7777 = vmatpush3.bf16.msra.mxu0 %v8983_v26  ;;  %v6631_v26 = vsel %vm10990_vm12, 1.0, %v10903_v34  ;;  %vm10999_vm2 = vmmov %vm10993_vm1  ;;  %v6636_v5 = vsel %vm11000_vm7, 1.0, %v10903_v34 }
 0x536   :  { %7763 = vmatprep.subr.bf16.mxu1 %v9066_v1  ;;  %7779 = vmatprep.subr.bf16.mxu0 %v9066_v1  ;;  %vm11005_vm11 = vmmov %vm10993_vm1 }
 0x537   :  { %7304 = vmatmul.mubr.msk.f32.gmra.mrb[30].mxu1 %vm10988_vm14, %v6606_v58  ;;  %7332 = vmatmul.mubr.msk.f32.gmra.mrb[30].mxu0 %vm10989_vm3, %v6622_v3  ;;  %vm11003_vm14 = vnez %v10895_v23  ;;  %vm11004_vm3 = vmmov %vm10993_vm1 }
 0x538   :  { %7350 = vmatprep.mubr.msk.f32.mxu1 %vm10991_vm6, %v6631_v26  ;;  %v6638_v8 = vsel %vm11003_vm14, 1.0, %v10903_v34  ;;  %vm11006_vm6 = vmmov %vm10993_vm1 }
 0x539   :  { %7765 = vmatpush3.bf16.msra.mxu1 %v9066_v1  ;;  %7781 = vmatpush3.bf16.msra.mxu0 %v9066_v1  ;;  %v6635_v1 = vsel %vm9036_vm0, 1.0, %v10903_v34  ;;  %vm11007_vm4 = vmmov %vm10999_vm2 }
 0x53a   :  { %vm11008_vm8 = vmmov %vm10999_vm2 }
 0x53b   :  { %vm11010_vm14 = vmmov %vm10999_vm2 }
 0x53c   :  { %7351 = vmatmul.mubr.msk.f32.vlgmr.msra.gmra.mrb[32].mxu1 %vm10993_vm1, %v6632_v62 }
 0x53d   :  { %7353 = vmatprep.mubr.msk.f32.mxu1 %vm10995_vm5, %v6633_v30  ;;  %v11016_v30 = vld [vmem:[#allocation6_spill] sm:$0xff] }
 0x540   :  { %7354 = vmatmul.mubr.msk.f32.gmra.mrb[34].mxu1 %vm10998_vm13, %v6634_v28 }
 0x541   :  { %7356 = vmatprep.mubr.msk.f32.mxu1 %vm10999_vm2, %v6635_v1 }
 0x544   :  { %7357 = vmatmul.mubr.msk.f32.gmra.mrb[36].mxu1 %vm11001_vm10, %v6636_v5  ;;  %vm11009_vm10 = vmmov %vm10999_vm2 }
 0x545   :  { %7359 = vmatprep.mubr.msk.f32.mxu1 %vm11002_vm15, %v6637_v18 }
 0x548   :  { %7360 = vmatmul.mubr.msk.f32.gmra.mrb[38].mxu1 %vm11004_vm3, %v6638_v8  ;;  %vm11011_vm3 = vmmov %vm10999_vm2 }
 0x57c   :  { %v2487_v4 = vpop.xlane.xlu1 %2486 }
 0x57d   :  { %v2515_v22 = vand.u32 63, %v2487_v4  ;;  %v2484_v54 = vpop.xlane.xlu0 %2483 }
 0x57e   :  { %v2514_v11 = vand.u32 63, %v2484_v54 }
 0x57f   :  { %vm2523_vm0 = vcmp.eq.s32.totalorder %v8269_v53, %v2515_v22 }
 0x580   :  { %vm2522_vm12 = vcmp.eq.s32.totalorder %v8269_v53, %v2514_v11  ;;  %v6648_v16 = vsel %vm2523_vm0, 1.0, %v10903_v34  ;;  %vm813_vm0 = vcmask 154624   ;;  %v11019_v11 = vld [vmem:[#allocation7_spill] sm:$0xff] }
 0x581   :  { %v2493_v48 = vpop.xlane.xlu0 %2492  ;;  %v6647_v19 = vsel %vm2522_vm12, 1.0, %v10903_v34  ;;  %vm11014_vm12 = vcmask 23552  }
 0x582   :  { %7378 = vmatprep.mubr.msk.f32.mxu0 %vm11005_vm11, %v6647_v19  ;;  %v2517_v56 = vand.u32 63, %v2493_v48  ;;  %vm11015_vm11 = vmmov %vm11014_vm12 }
 0x583   :  { %7379 = vmatmul.mubr.msk.f32.vlgmr.msra.gmra.mrb[32].mxu0 %vm11006_vm6, %v6648_v16  ;;  %vm11017_vm6 = vmmov %vm11015_vm11 }
 0x584   :  { %v2499_v23 = vpop.xlane.xlu1 %2498  ;;  %vm2525_vm9 = vcmp.eq.s32.totalorder %v8269_v53, %v2517_v56 }
 0x585   :  { %v2490_v15 = vpop.xlane.xlu0 %2489  ;;  %v2519_v36 = vand.u32 63, %v2499_v23  ;;  %v6650_v12 = vsel %vm2525_vm9, 1.0, %v10903_v34  ;;  %vm11018_vm9 = vmmov %vm11017_vm6 }
 0x586   :  { %v2516_v24 = vand.u32 63, %v2490_v15 }
 0x587   :  { %vm2527_vm5 = vcmp.eq.s32.totalorder %v8269_v53, %v2519_v36 }
 0x588   :  { %vm2524_vm1 = vcmp.eq.s32.totalorder %v8269_v53, %v2516_v24  ;;  %v2505_v7 = vpop.xlane.xlu1 %2504  ;;  %v6652_v25 = vsel %vm2527_vm5, 1.0, %v10903_v34 }
 0x589   :  { %v2496_v27 = vpop.xlane.xlu0 %2495  ;;  %v6649_v29 = vsel %vm2524_vm1, 1.0, %v10903_v34  ;;  %v2521_v38 = vand.u32 63, %v2505_v7  ;;  %vm11020_vm1 = vmmov %vm11017_vm6 }
 0x58a   :  { %v2518_v45 = vand.u32 63, %v2496_v27  ;;  %7381 = vmatprep.mubr.msk.f32.mxu0 %vm11007_vm4, %v6649_v29  ;;  %vm11021_vm4 = vmmov %vm11020_vm1 }
 0x58b   :  { %7382 = vmatmul.mubr.msk.f32.gmra.mrb[34].mxu0 %vm11008_vm8, %v6650_v12  ;;  %vm2529_vm7 = vcmp.eq.s32.totalorder %v8269_v53, %v2521_v38  ;;  %vm11022_vm5 = vmmov %vm11020_vm1 }
 0x58c   :  { %vm2526_vm13 = vcmp.eq.s32.totalorder %v8269_v53, %v2518_v45  ;;  %v6654_v63 = vsel %vm2529_vm7, 1.0, %v10903_v34  ;;  %vm11024_vm8 = vmmov %vm11020_vm1 }
 0x58d   :  { %v2502_v40 = vpop.xlane.xlu0 %2501  ;;  %v6651_v35 = vsel %vm2526_vm13, 1.0, %v10903_v34  ;;  %vm11025_vm13 = vmmov %vm11020_vm1 }
 0x58e   :  { %v2520_v46 = vand.u32 63, %v2502_v40  ;;  %7384 = vmatprep.mubr.msk.f32.mxu0 %vm10999_vm2, %v6651_v35  ;;  %vm11026_vm2 = vmmov %vm11020_vm1 }
 0x58f   :  { %7385 = vmatmul.mubr.msk.f32.gmra.mrb[36].mxu0 %vm11009_vm10, %v6652_v25  ;;  %vm11027_vm7 = vmmov %vm11020_vm1 }
 0x590   :  { %vm2528_vm15 = vcmp.eq.s32.totalorder %v8269_v53, %v2520_v46  ;;  %vm11028_vm10 = vmmov %vm11020_vm1 }
 0x591   :  { %v6653_v44 = vsel %vm2528_vm15, 1.0, %v10903_v34  ;;  %vm11029_vm15 = vmmov %vm11020_vm1 }
 0x592   :  { %7387 = vmatprep.mubr.msk.f32.mxu0 %vm11010_vm14, %v6653_v44  ;;  %vm11031_vm14 = vmmov %vm11020_vm1 }
 0x593   :  { %7388 = vmatmul.mubr.msk.f32.gmra.mrb[38].mxu0 %vm11011_vm3, %v6654_v63  ;;  %vm11032_vm3 = vmmov %vm11020_vm1 }
 0x5dc   :  { %v7184_v55 = vpop.f32.mrb[8].mxu1  ;;  %v7212_v57 = vpop.f32.mrb[8].mxu0 }
 0x5dd   :  { %815 = vst.msk [vmem:[#allocation3 + $0x8] sm:$0xff] %vm813_vm0, %v7184_v55  ;;  %1081 = vst.msk [vmem:[#allocation3 + $0x48] sm:$0xff] %vm813_vm0, %v7212_v57  ;;  %v774_v60 = vpop.f32.mrb[9].mxu1  ;;  %v1040_v21 = vpop.f32.mrb[9].mxu0 }
 0x5de   :  { %814 = vst.msk [vmem:[#allocation3] sm:$0xff] %vm813_vm0, %v774_v60  ;;  %1080 = vst.msk [vmem:[#allocation3 + $0x40] sm:$0xff] %vm813_vm0, %v1040_v21 }
 0x5e0   :  { %v7187_v53 = vpop.f32.mrb[10].mxu1  ;;  %v7215_v41 = vpop.f32.mrb[10].mxu0 }
 0x5e1   :  { %817 = vst.msk [vmem:[#allocation3 + $0x18] sm:$0xff] %vm813_vm0, %v7187_v53  ;;  %1083 = vst.msk [vmem:[#allocation3 + $0x58] sm:$0xff] %vm813_vm0, %v7215_v41  ;;  %v784_v34 = vpop.f32.mrb[11].mxu1  ;;  %v1050_v17 = vpop.f32.mrb[11].mxu0 }
 0x5e2   :  { %816 = vst.msk [vmem:[#allocation3 + $0x10] sm:$0xff] %vm813_vm0, %v784_v34  ;;  %1082 = vst.msk [vmem:[#allocation3 + $0x50] sm:$0xff] %vm813_vm0, %v1050_v17 }
 0x5e4   :  { %v7190_v20 = vpop.f32.mrb[12].mxu1  ;;  %v7218_v43 = vpop.f32.mrb[12].mxu0  ;;  %v823_v52 = vld [vmem:[#allocation3 + $0x8] sm:$0xff] }
 0x5e5   :  { %v1089_v31 = vld [vmem:[#allocation3 + $0x48] sm:$0xff]  ;;  %819 = vst.msk [vmem:[#allocation3 + $0x28] sm:$0xff] %vm813_vm0, %v7190_v20  ;;  %1085 = vst.msk [vmem:[#allocation3 + $0x68] sm:$0xff] %vm813_vm0, %v7218_v43  ;;  %v794_v32 = vpop.f32.mrb[13].mxu1  ;;  %v1060_v13 = vpop.f32.mrb[13].mxu0  ;;  %v831_v2 = vsub.f32 %v823_v52, %v11012_v42  ;;  %v822_v33 = vld [vmem:[#allocation3] sm:$0xff] }
 0x5e6   :  { %v1097_v47 = vsub.f32 %v1089_v31, %v11012_v42  ;;  %v1088_v37 = vld [vmem:[#allocation3 + $0x40] sm:$0xff]  ;;  %818 = vst.msk [vmem:[#allocation3 + $0x20] sm:$0xff] %vm813_vm0, %v794_v32  ;;  %1084 = vst.msk [vmem:[#allocation3 + $0x60] sm:$0xff] %vm813_vm0, %v1060_v13  ;;  %v830_v61 = vsub.f32 %v822_v33, %v11013_v39 }
 0x5e7   :  { %v1096_v9 = vsub.f32 %v1088_v37, %v11013_v39  ;;  %v839_v14 = vmul.f32 %v831_v2, %v831_v2  ;;  %v11023_v52 = vld [vmem:[#allocation8_spill] sm:$0xff] }
 0x5e8   :  { %v7193_v51 = vpop.f32.mrb[14].mxu1  ;;  %v7221_v10 = vpop.f32.mrb[14].mxu0  ;;  %v838_v49 = vmul.f32 %v830_v61, %v830_v61  ;;  %v1105_v0 = vmul.f32 %v1097_v47, %v1097_v47  ;;  %v825_v28 = vld [vmem:[#allocation3 + $0x18] sm:$0xff] }
 0x5e9   :  { %821 = vst.msk [vmem:[#allocation3 + $0x38] sm:$0xff] %vm813_vm0, %v7193_v51  ;;  %1087 = vst.msk [vmem:[#allocation3 + $0x78] sm:$0xff] %vm813_vm0, %v7221_v10  ;;  %v804_v50 = vpop.f32.mrb[15].mxu1  ;;  %v1070_v6 = vpop.f32.mrb[15].mxu0  ;;  %v849_v58 = vsel %vm11014_vm12, %v839_v14, 0.0  ;;  %v824_v3 = vld [vmem:[#allocation3 + $0x10] sm:$0xff]  ;;  %v1104_v62 = vmul.f32 %v1096_v9, %v1096_v9  ;;  %v833_v48 = vsub.f32 %v825_v28, %v11019_v11 }
 0x5ea   :  { %820 = vst.msk [vmem:[#allocation3 + $0x30] sm:$0xff] %vm813_vm0, %v804_v50  ;;  %1086 = vst.msk [vmem:[#allocation3 + $0x70] sm:$0xff] %vm813_vm0, %v1070_v6  ;;  %850 = vadd.xlane.f32.xlu1 %v849_v58  ;;  %v846_v26 = vsel %vm11015_vm11, %v838_v49, 0.0  ;;  %v832_v59 = vsub.f32 %v824_v3, %v11016_v30  ;;  %v1115_v18 = vsel %vm11017_vm6, %v1105_v0, 0.0  ;;  %v1090_v19 = vld [vmem:[#allocation3 + $0x50] sm:$0xff]  ;;  %v1091_v27 = vld [vmem:[#allocation3 + $0x58] sm:$0xff] }
 0x5eb   :  { %847 = vadd.xlane.f32.xlu0 %v846_v26  ;;  %v1112_v22 = vsel %vm11018_vm9, %v1104_v62, 0.0  ;;  %v841_v36 = vmul.f32 %v833_v48, %v833_v48  ;;  %v1098_v7 = vsub.f32 %v1090_v19, %v11016_v30  ;;  %v1099_v44 = vsub.f32 %v1091_v27, %v11019_v11  ;;  %vm11033_vm12 = vmmov %vm11020_vm1 }
 0x5ec   :  { %v840_v54 = vmul.f32 %v832_v59, %v832_v59  ;;  %vm11034_vm11 = vmmov %vm11020_vm1 }
 0x5ed   :  { %v7240_v1 = vpop.f32.mrb[16].mxu1  ;;  %v7268_v5 = vpop.f32.mrb[16].mxu0  ;;  %v855_v35 = vsel %vm11021_vm4, %v841_v36, 0.0  ;;  %v1106_v46 = vmul.f32 %v1098_v7, %v1098_v7  ;;  %v826_v57 = vld [vmem:[#allocation3 + $0x20] sm:$0xff]  ;;  %v1107_v43 = vmul.f32 %v1099_v44, %v1099_v44  ;;  %vm11035_vm6 = vmmov %vm11020_vm1 }
 0x5ee   :  { %1347 = vst.msk [vmem:[#allocation3 + $0x88] sm:$0xff] %vm813_vm0, %v7240_v1  ;;  %1613 = vst.msk [vmem:[#allocation3 + $0xc8] sm:$0xff] %vm813_vm0, %v7268_v5  ;;  %v1306_v8 = vpop.f32.mrb[17].mxu1  ;;  %v1572_v4 = vpop.f32.mrb[17].mxu0  ;;  %1116 = vadd.xlane.f32.xlu1 %v1115_v18  ;;  %v852_v24 = vsel %vm11020_vm1, %v840_v54, 0.0  ;;  %v834_v31 = vsub.f32 %v826_v57, %v11023_v52  ;;  %v827_v5 = vld [vmem:[#allocation3 + $0x28] sm:$0xff] }
 0x5ef   :  { %1346 = vst.msk [vmem:[#allocation3 + $0x80] sm:$0xff] %vm813_vm0, %v1306_v8  ;;  %1612 = vst.msk [vmem:[#allocation3 + $0xc0] sm:$0xff] %vm813_vm0, %v1572_v4  ;;  %1113 = vadd.xlane.f32.xlu0 %v1112_v22  ;;  %v1118_v20 = vsel %vm11022_vm5, %v1106_v46, 0.0  ;;  %v1121_v61 = vsel %vm11025_vm13, %v1107_v43, 0.0  ;;  %v1092_v7 = vld [vmem:[#allocation3 + $0x60] sm:$0xff] }
 0x5f0   :  { %v842_v9 = vmul.f32 %v834_v31, %v834_v31  ;;  %v1093_v31 = vld [vmem:[#allocation3 + $0x68] sm:$0xff]  ;;  %vm11036_vm9 = vmmov %vm11020_vm1 }
 0x5f1   :  { %v7243_v16 = vpop.f32.mrb[18].mxu1  ;;  %v7271_v56 = vpop.f32.mrb[18].mxu0  ;;  %vm11039_vm4 = vmmov %vm11020_vm1 }
 0x5f2   :  { %1349 = vst.msk [vmem:[#allocation3 + $0x98] sm:$0xff] %vm813_vm0, %v7243_v16  ;;  %1615 = vst.msk [vmem:[#allocation3 + $0xd8] sm:$0xff] %vm813_vm0, %v7271_v56  ;;  %v1316_v23 = vpop.f32.mrb[19].mxu1  ;;  %v1582_v15 = vpop.f32.mrb[19].mxu0  ;;  %v858_v3 = vsel %vm11027_vm7, %v842_v9, 0.0  ;;  %v11030_v56 = vld [vmem:[#allocation9_spill] sm:$0xff] }
 0x5f3   :  { %1348 = vst.msk [vmem:[#allocation3 + $0x90] sm:$0xff] %vm813_vm0, %v1316_v23  ;;  %1614 = vst.msk [vmem:[#allocation3 + $0xd0] sm:$0xff] %vm813_vm0, %v1582_v15  ;;  %853 = vadd.xlane.f32.xlu0 %v852_v24  ;;  %v835_v23 = vsub.f32 %v827_v5, %v11030_v56 }
 0x5f4   :  { %vm11040_vm5 = vmmov %vm11020_vm1 }
 0x5f5   :  { %v7246_v29 = vpop.f32.mrb[20].mxu1  ;;  %v7274_v45 = vpop.f32.mrb[20].mxu0  ;;  %v1355_v12 = vld [vmem:[#allocation3 + $0x88] sm:$0xff]  ;;  %vm11044_vm13 = vmmov %vm11020_vm1 }
 0x5f6   :  { %1351 = vst.msk [vmem:[#allocation3 + $0xa8] sm:$0xff] %vm813_vm0, %v7246_v29  ;;  %1617 = vst.msk [vmem:[#allocation3 + $0xe8] sm:$0xff] %vm813_vm0, %v7274_v45  ;;  %v1326_v38 = vpop.f32.mrb[21].mxu1  ;;  %v1592_v40 = vpop.f32.mrb[21].mxu0  ;;  %v1354_v25 = vld [vmem:[#allocation3 + $0x80] sm:$0xff]  ;;  %v1363_v55 = vsub.f32 %v1355_v12, %v11012_v42  ;;  %v1621_v33 = vld [vmem:[#allocation3 + $0xc8] sm:$0xff] }
 0x5f7   :  { %1350 = vst.msk [vmem:[#allocation3 + $0xa0] sm:$0xff] %vm813_vm0, %v1326_v38  ;;  %1616 = vst.msk [vmem:[#allocation3 + $0xe0] sm:$0xff] %vm813_vm0, %v1592_v40  ;;  %856 = vadd.xlane.f32.xlu0 %v855_v35  ;;  %v1362_v63 = vsub.f32 %v1354_v25, %v11013_v39  ;;  %v1620_v60 = vld [vmem:[#allocation3 + $0xc0] sm:$0xff]  ;;  %v1629_v50 = vsub.f32 %v1621_v33, %v11012_v42  ;;  %v843_v35 = vmul.f32 %v835_v23, %v835_v23 }
 0x5f8   :  { %v1371_v13 = vmul.f32 %v1363_v55, %v1363_v55  ;;  %v1628_v2 = vsub.f32 %v1620_v60, %v11013_v39  ;;  %vm11046_vm7 = vmmov %vm11020_vm1 }
 0x5f9   :  { %v7249_v21 = vpop.f32.mrb[22].mxu1  ;;  %v7277_v53 = vpop.f32.mrb[22].mxu0  ;;  %v1370_v41 = vmul.f32 %v1362_v63, %v1362_v63  ;;  %v1637_v28 = vmul.f32 %v1629_v50, %v1629_v50  ;;  %v1357_v18 = vld [vmem:[#allocation3 + $0x98] sm:$0xff]  ;;  %v1100_v63 = vsub.f32 %v1092_v7, %v11023_v52 }
 0x5fa   :  { %1353 = vst.msk [vmem:[#allocation3 + $0xb8] sm:$0xff] %vm813_vm0, %v7249_v21  ;;  %1619 = vst.msk [vmem:[#allocation3 + $0xf8] sm:$0xff] %vm813_vm0, %v7277_v53  ;;  %v1336_v34 = vpop.f32.mrb[23].mxu1  ;;  %v1602_v17 = vpop.f32.mrb[23].mxu0  ;;  %v1381_v10 = vsel %vm11026_vm2, %v1371_v13, 0.0  ;;  %v1636_v49 = vmul.f32 %v1628_v2, %v1628_v2  ;;  %v1356_v6 = vld [vmem:[#allocation3 + $0x90] sm:$0xff]  ;;  %v1365_v24 = vsub.f32 %v1357_v18, %v11019_v11 }
 0x5fb   :  { %1352 = vst.msk [vmem:[#allocation3 + $0xb0] sm:$0xff] %vm813_vm0, %v1336_v34  ;;  %1618 = vst.msk [vmem:[#allocation3 + $0xf0] sm:$0xff] %vm813_vm0, %v1602_v17  ;;  %1119 = vadd.xlane.f32.xlu0 %v1118_v20  ;;  %v1378_v32 = vsel %vm11024_vm8, %v1370_v41, 0.0  ;;  %v1364_v1 = vsub.f32 %v1356_v6, %v11016_v30  ;;  %v1647_v48 = vsel %vm11029_vm15, %v1637_v28, 0.0  ;;  %v1622_v55 = vld [vmem:[#allocation3 + $0xd0] sm:$0xff]  ;;  %v1623_v57 = vld [vmem:[#allocation3 + $0xd8] sm:$0xff]  ;;  %v1108_v20 = vmul.f32 %v1100_v63, %v1100_v63 }
 0x5fc   :  { %1379 = vadd.xlane.f32.xlu1 %v1378_v32  ;;  %v1644_v59 = vsel %vm11028_vm10, %v1636_v49, 0.0  ;;  %v1373_v44 = vmul.f32 %v1365_v24, %v1365_v24  ;;  %v861_v21 = vsel %vm11033_vm12, %v843_v35, 0.0  ;;  %v1630_v41 = vsub.f32 %v1622_v55, %v11016_v30  ;;  %v828_v32 = vld [vmem:[#allocation3 + $0x30] sm:$0xff]  ;;  %vm11041_vm8 = vmmov %vm11020_vm1 }
 0x5fd   :  { %v1372_v19 = vmul.f32 %v1364_v1, %v1364_v1  ;;  %v1631_v43 = vsub.f32 %v1623_v57, %v11019_v11  ;;  %v1359_v28 = vld [vmem:[#allocation3 + $0xa8] sm:$0xff]  ;;  %v829_v1 = vld [vmem:[#allocation3 + $0x38] sm:$0xff]  ;;  %vm11045_vm2 = vmmov %vm11020_vm1 }
 0x5fe   :  { %v7296_v47 = vpop.f32.mrb[24].mxu1  ;;  %v7324_v37 = vpop.f32.mrb[24].mxu0  ;;  %v1387_v17 = vsel %vm11034_vm11, %v1373_v44, 0.0  ;;  %v1638_v33 = vmul.f32 %v1630_v41, %v1630_v41  ;;  %v1624_v23 = vld [vmem:[#allocation3 + $0xe0] sm:$0xff]  ;;  %vm11047_vm10 = vmmov %vm11020_vm1  ;;  %v1095_v57 = vld [vmem:[#allocation3 + $0x78] sm:$0xff] }
 0x5ff   :  { %1879 = vst.msk [vmem:[#allocation3 + $0x108] sm:$0xff] %vm813_vm0, %v7296_v47  ;;  %2145 = vst.msk [vmem:[#allocation3 + $0x148] sm:$0xff] %vm813_vm0, %v7324_v37  ;;  %v1838_v14 = vpop.f32.mrb[25].mxu1  ;;  %v2104_v51 = vpop.f32.mrb[25].mxu0  ;;  %1122 = vadd.xlane.f32.xlu0 %v1121_v61  ;;  %v1384_v40 = vsel %vm11031_vm14, %v1372_v19, 0.0  ;;  %v1101_v47 = vsub.f32 %v1093_v31, %v11030_v56  ;;  %v1124_v61 = vsel %vm11036_vm9, %v1108_v20, 0.0  ;;  %v1639_v9 = vmul.f32 %v1631_v43, %v1631_v43 }
 0x600   :  { %1878 = vst.msk [vmem:[#allocation3 + $0x100] sm:$0xff] %vm813_vm0, %v1838_v14  ;;  %2144 = vst.msk [vmem:[#allocation3 + $0x140] sm:$0xff] %vm813_vm0, %v2104_v51  ;;  %1382 = vadd.xlane.f32.xlu1 %v1381_v10  ;;  %v11037_v14 = vld [vmem:[#allocation10_spill] sm:$0xff]  ;;  %v1358_v10 = vld [vmem:[#allocation3 + $0xa0] sm:$0xff]  ;;  %v1650_v6 = vsel %vm11020_vm1, %v1638_v33, 0.0  ;;  %v1632_v7 = vsub.f32 %v1624_v23, %v11023_v52 }
 0x601   :  { %v9453_v51 = vsub.f32 %v828_v32, %v11037_v14  ;;  %v11042_v19 = vld [vmem:[#allocation11_spill] sm:$0xff]  ;;  %vm11049_vm15 = vmmov %vm11020_vm1 }
 0x602   :  { %v7299_v58 = vpop.f32.mrb[26].mxu1  ;;  %v7327_v0 = vpop.f32.mrb[26].mxu0  ;;  %v1640_v35 = vmul.f32 %v1632_v7, %v1632_v7  ;;  %vm11050_vm14 = vmmov %vm11020_vm1  ;;  %v1361_v20 = vld [vmem:[#allocation3 + $0xb8] sm:$0xff]  ;;  %v1360_v43 = vld [vmem:[#allocation3 + $0xb0] sm:$0xff] }
 0x603   :  { %1881 = vst.msk [vmem:[#allocation3 + $0x118] sm:$0xff] %vm813_vm0, %v7299_v58  ;;  %2147 = vst.msk [vmem:[#allocation3 + $0x158] sm:$0xff] %vm813_vm0, %v7327_v0  ;;  %v1848_v26 = vpop.f32.mrb[27].mxu1  ;;  %v2114_v62 = vpop.f32.mrb[27].mxu0  ;;  %859 = vadd.xlane.f32.xlu0 %v858_v3  ;;  %v1109_v58 = vmul.f32 %v1101_v47, %v1101_v47  ;;  %v1366_v0 = vsub.f32 %v1358_v10, %v11023_v52  ;;  %v1368_v47 = vsub.f32 %v1360_v43, %v11037_v14 }
 0x604   :  { %1880 = vst.msk [vmem:[#allocation3 + $0x110] sm:$0xff] %vm813_vm0, %v1848_v26  ;;  %2146 = vst.msk [vmem:[#allocation3 + $0x150] sm:$0xff] %vm813_vm0, %v2114_v62  ;;  %1645 = vadd.xlane.f32.xlu1 %v1644_v59  ;;  %v1653_v26 = vsel %vm11039_vm4, %v1639_v9, 0.0  ;;  %v844_v62 = vmul.f32 %v9453_v51, %v9453_v51 }
 0x605   :  { %11038 = vst [vmem:[#allocation12_spill] sm:$0xff] %v9453_v51  ;;  %v1127_v18 = vsel %vm11040_vm5, %v1109_v58, 0.0  ;;  %vm11053_vm12 = vmmov %vm11020_vm1 }
 0x606   :  { %v7302_v8 = vpop.f32.mrb[28].mxu1  ;;  %v7330_v4 = vpop.f32.mrb[28].mxu0  ;;  %v1887_v36 = vld [vmem:[#allocation3 + $0x108] sm:$0xff]  ;;  %vm11054_vm11 = vmmov %vm11020_vm1 }
 0x607   :  { %1883 = vst.msk [vmem:[#allocation3 + $0x128] sm:$0xff] %vm813_vm0, %v7302_v8  ;;  %2149 = vst.msk [vmem:[#allocation3 + $0x168] sm:$0xff] %vm813_vm0, %v7330_v4  ;;  %v1858_v22 = vpop.f32.mrb[29].mxu1  ;;  %v2124_v54 = vpop.f32.mrb[29].mxu0  ;;  %v1886_v16 = vld [vmem:[#allocation3 + $0x100] sm:$0xff]  ;;  %v1895_v46 = vsub.f32 %v1887_v36, %v11012_v42  ;;  %v1374_v8 = vmul.f32 %v1366_v0, %v1366_v0  ;;  %v1367_v4 = vsub.f32 %v1359_v28, %v11030_v56  ;;  %v2153_v0 = vld [vmem:[#allocation3 + $0x148] sm:$0xff] }
 0x608   :  { %1882 = vst.msk [vmem:[#allocation3 + $0x120] sm:$0xff] %vm813_vm0, %v1858_v22  ;;  %2148 = vst.msk [vmem:[#allocation3 + $0x160] sm:$0xff] %vm813_vm0, %v2124_v54  ;;  %1648 = vadd.xlane.f32.xlu1 %v1647_v48  ;;  %v1894_v15 = vsub.f32 %v1886_v16, %v11013_v39  ;;  %v864_v54 = vsel %vm11041_vm8, %v844_v62, 0.0  ;;  %v9469_v16 = vsub.f32 %v829_v1, %v11042_v19 }
 0x609   :  { %v1903_v53 = vmul.f32 %v1895_v46, %v1895_v46  ;;  %v1390_v24 = vsel %vm11044_vm13, %v1374_v8, 0.0  ;;  %v1375_v36 = vmul.f32 %v1367_v4, %v1367_v4  ;;  %vm11056_vm9 = vmmov %vm11020_vm1 }
 0x60a   :  { %v7305_v27 = vpop.f32.mrb[30].mxu1  ;;  %v7333_v29 = vpop.f32.mrb[30].mxu0  ;;  %v1902_v45 = vmul.f32 %v1894_v15, %v1894_v15  ;;  %11043 = vst [vmem:[#allocation14_spill] sm:$0xff] %v9469_v16  ;;  %v1889_v15 = vld [vmem:[#allocation3 + $0x118] sm:$0xff]  ;;  %vm11057_vm4 = vmmov %vm11020_vm1 }
 0x60b   :  { %1885 = vst.msk [vmem:[#allocation3 + $0x138] sm:$0xff] %vm813_vm0, %v7305_v27  ;;  %2151 = vst.msk [vmem:[#allocation3 + $0x178] sm:$0xff] %vm813_vm0, %v7333_v29  ;;  %v1868_v12 = vpop.f32.mrb[31].mxu1  ;;  %v2134_v38 = vpop.f32.mrb[31].mxu0  ;;  %v1913_v2 = vsel %vm11035_vm6, %v1903_v53, 0.0  ;;  %v1888_v49 = vld [vmem:[#allocation3 + $0x110] sm:$0xff]  ;;  %v845_v29 = vmul.f32 %v9469_v16, %v9469_v16 }
 0x60c   :  { %1884 = vst.msk [vmem:[#allocation3 + $0x130] sm:$0xff] %vm813_vm0, %v1868_v12  ;;  %2150 = vst.msk [vmem:[#allocation3 + $0x170] sm:$0xff] %vm813_vm0, %v2134_v38  ;;  %1385 = vadd.xlane.f32.xlu1 %v1384_v40  ;;  %v1910_v25 = vsel %vm11032_vm3, %v1902_v45, 0.0  ;;  %v1896_v59 = vsub.f32 %v1888_v49, %v11016_v30  ;;  %v1897_v45 = vsub.f32 %v1889_v15, %v11019_v11  ;;  %v1625_v12 = vld [vmem:[#allocation3 + $0xe8] sm:$0xff]  ;;  %v1094_v38 = vld [vmem:[#allocation3 + $0x70] sm:$0xff]  ;;  %v1393_v40 = vsel %vm11046_vm7, %v1375_v36, 0.0 }
 0x60d   :  { %1911 = vadd.xlane.f32.xlu0 %v1910_v25  ;;  %v1633_v46 = vsub.f32 %v1625_v12, %v11030_v56  ;;  %v867_v25 = vsel %vm11047_vm10, %v845_v29, 0.0  ;;  %v9482_v63 = vsub.f32 %v1094_v38, %v11037_v14  ;;  %vm11052_vm3 = vmmov %vm11020_vm1 }
 0x60e   :  { %v1904_v48 = vmul.f32 %v1896_v59, %v1896_v59  ;;  %v1905_v44 = vmul.f32 %v1897_v45, %v1897_v45  ;;  %vm11055_vm6 = vmmov %vm11020_vm1  ;;  %v2161_v59 = vsub.f32 %v2153_v0, %v11012_v42 }
 0x60f   :  { %v7352_v60 = vpop.f32.mrb[32].mxu1  ;;  %11048 = vst [vmem:[#allocation16_spill] sm:$0xff] %v9482_v63  ;;  %v1890_v55 = vld [vmem:[#allocation3 + $0x120] sm:$0xff]  ;;  %vm11058_vm5 = vmmov %vm11020_vm1 }
 0x610   :  { %2411 = vst.msk [vmem:[#allocation3 + $0x188] sm:$0xff] %vm813_vm0, %v7352_v60  ;;  %v2370_v34 = vpop.f32.mrb[33].mxu1  ;;  %862 = vadd.xlane.f32.xlu1 %v861_v21  ;;  %v1916_v27 = vsel %vm11045_vm2, %v1904_v48, 0.0  ;;  %v1656_v60 = vsel %vm11049_vm15, %v1640_v35, 0.0  ;;  %v1641_v21 = vmul.f32 %v1633_v46, %v1633_v46  ;;  %v1898_v53 = vsub.f32 %v1890_v55, %v11023_v52  ;;  %vm11059_vm8 = vmmov %vm11020_vm1  ;;  %v2152_v35 = vld [vmem:[#allocation3 + $0x140] sm:$0xff] }
 0x611   :  { %2410 = vst.msk [vmem:[#allocation3 + $0x180] sm:$0xff] %vm813_vm0, %v2370_v34  ;;  %1388 = vadd.xlane.f32.xlu0 %v1387_v17  ;;  %v1919_v41 = vsel %vm11050_vm14, %v1905_v44, 0.0  ;;  %v1110_v34 = vmul.f32 %v9482_v63, %v9482_v63  ;;  %v9490_v17 = vsub.f32 %v1095_v57, %v11042_v19  ;;  %vm11060_vm13 = vmmov %vm11020_vm1 }
 0x612   :  { %v1659_v31 = vsel %vm11052_vm3, %v1641_v21, 0.0  ;;  %v1906_v32 = vmul.f32 %v1898_v53, %v1898_v53  ;;  %v1893_v36 = vld [vmem:[#allocation3 + $0x138] sm:$0xff]  ;;  %vm11061_vm2 = vmmov %vm11020_vm1 }
 0x613   :  { %v7355_v13 = vpop.f32.mrb[34].mxu1  ;;  %11051 = vst [vmem:[#allocation13_spill] sm:$0xff] %v9490_v17  ;;  %v1111_v33 = vmul.f32 %v9490_v17, %v9490_v17  ;;  %v1892_v8 = vld [vmem:[#allocation3 + $0x130] sm:$0xff]  ;;  %v1901_v38 = vsub.f32 %v1893_v36, %v11042_v19  ;;  %vm11062_vm7 = vmmov %vm11020_vm1  ;;  %v2155_v53 = vld [vmem:[#allocation3 + $0x158] sm:$0xff] }
 0x614   :  { %2413 = vst.msk [vmem:[#allocation3 + $0x198] sm:$0xff] %vm813_vm0, %v7355_v13  ;;  %v2380_v37 = vpop.f32.mrb[35].mxu1  ;;  %1914 = vadd.xlane.f32.xlu1 %v1913_v2  ;;  %v1369_v13 = vsub.f32 %v1361_v20, %v11042_v19  ;;  %v1130_v2 = vsel %vm11053_vm12, %v1110_v34, 0.0  ;;  %v1922_v9 = vsel %vm11054_vm11, %v1906_v32, 0.0  ;;  %v1900_v15 = vsub.f32 %v1892_v8, %v11037_v14  ;;  %vm11063_vm10 = vmmov %vm11020_vm1 }
 0x615   :  { %2412 = vst.msk [vmem:[#allocation3 + $0x190] sm:$0xff] %vm813_vm0, %v2380_v37  ;;  %1125 = vadd.xlane.f32.xlu0 %v1124_v61  ;;  %v1627_v37 = vld [vmem:[#allocation3 + $0xf8] sm:$0xff]  ;;  %v1891_v61 = vld [vmem:[#allocation3 + $0x128] sm:$0xff]  ;;  %v1909_v57 = vmul.f32 %v1901_v38, %v1901_v38  ;;  %vm11064_vm15 = vmmov %vm11020_vm1  ;;  %v2163_v32 = vsub.f32 %v2155_v53, %v11019_v11 }
 0x616   :  { %v1377_v10 = vmul.f32 %v1369_v13, %v1369_v13  ;;  %v1635_v49 = vsub.f32 %v1627_v37, %v11042_v19  ;;  %v1899_v58 = vsub.f32 %v1891_v61, %v11030_v56  ;;  %v1908_v12 = vmul.f32 %v1900_v15, %v1900_v15  ;;  %vm11065_vm14 = vmmov %vm11020_vm1 }
 0x617   :  { %v7358_v50 = vpop.f32.mrb[36].mxu1  ;;  %v1931_v43 = vsel %vm11064_vm15, %v1909_v57, 0.0  ;;  %vm11066_vm3 = vmmov %vm11020_vm1 }
 0x618   :  { %2415 = vst.msk [vmem:[#allocation3 + $0x1a8] sm:$0xff] %vm813_vm0, %v7358_v50  ;;  %v2390_v3 = vpop.f32.mrb[37].mxu1  ;;  %1651 = vadd.xlane.f32.xlu1 %v1650_v6  ;;  %v1133_v50 = vsel %vm11055_vm6, %v1111_v33, 0.0  ;;  %v1376_v6 = vmul.f32 %v1368_v47, %v1368_v47  ;;  %v1643_v62 = vmul.f32 %v1635_v49, %v1635_v49  ;;  %v1907_v1 = vmul.f32 %v1899_v58, %v1899_v58  ;;  %vm11067_vm12 = vmmov %vm11020_vm1 }
 0x619   :  { %2414 = vst.msk [vmem:[#allocation3 + $0x1a0] sm:$0xff] %vm813_vm0, %v2390_v3  ;;  %1654 = vadd.xlane.f32.xlu0 %v1653_v26  ;;  %v1626_v3 = vld [vmem:[#allocation3 + $0xf0] sm:$0xff]  ;;  %v1399_v26 = vsel %vm11056_vm9, %v1377_v10, 0.0  ;;  %v1928_v55 = vsel %vm11062_vm7, %v1908_v12, 0.0  ;;  %vm11068_vm11 = vmmov %vm11020_vm1 }
 0x61a   :  { %v1396_v28 = vsel %vm11020_vm1, %v1376_v6, 0.0  ;;  %v1665_v4 = vsel %vm11057_vm4, %v1643_v62, 0.0  ;;  %v1925_v48 = vsel %vm11058_vm5, %v1907_v1, 0.0  ;;  %vm11069_vm6 = vmmov %vm11020_vm1 }
 0x61b   :  { %v7361_v5 = vpop.f32.mrb[38].mxu1  ;;  %v2421_v21 = vld [vmem:[#allocation3 + $0x198] sm:$0xff]  ;;  %vm11070_vm9 = vmmov %vm11020_vm1 }
 0x61c   :  { %2417 = vst.msk [vmem:[#allocation3 + $0x1b8] sm:$0xff] %vm813_vm0, %v7361_v5  ;;  %v2400_v22 = vpop.f32.mrb[39].mxu1  ;;  %1128 = vadd.xlane.f32.xlu1 %v1127_v18  ;;  %v1634_v5 = vsub.f32 %v1626_v3, %v11037_v14  ;;  %v2156_v18 = vld [vmem:[#allocation3 + $0x160] sm:$0xff]  ;;  %v2429_v20 = vsub.f32 %v2421_v21, %v11019_v11  ;;  %vm11071_vm4 = vmmov %vm11020_vm1  ;;  %v2420_v15 = vld [vmem:[#allocation3 + $0x190] sm:$0xff] }
 0x61d   :  { %2416 = vst.msk [vmem:[#allocation3 + $0x1b0] sm:$0xff] %vm813_vm0, %v2400_v22  ;;  %865 = vadd.xlane.f32.xlu0 %v864_v54  ;;  %v2169_v22 = vmul.f32 %v2161_v59, %v2161_v59  ;;  %v2164_v54 = vsub.f32 %v2156_v18, %v11023_v52  ;;  %v2159_v59 = vld [vmem:[#allocation3 + $0x178] sm:$0xff]  ;;  %vm11072_vm5 = vmmov %vm11020_vm1 }
 0x61e   :  { %v1642_v23 = vmul.f32 %v1634_v5, %v1634_v5  ;;  %v2437_v47 = vmul.f32 %v2429_v20, %v2429_v20  ;;  %v2167_v8 = vsub.f32 %v2159_v59, %v11042_v19  ;;  %vm11078_vm7 = vmmov %vm11020_vm1 }
 0x61f   :  { %v2179_v7 = vsel %vm11059_vm8, %v2169_v22, 0.0  ;;  %v2423_v13 = vld [vmem:[#allocation3 + $0x1a8] sm:$0xff]  ;;  %vm11073_vm8 = vmmov %vm11020_vm1 }
 0x620   :  { %1391 = vadd.xlane.f32.xlu1 %v1390_v24  ;;  %v2419_v24 = vld [vmem:[#allocation3 + $0x188] sm:$0xff]  ;;  %v1662_v45 = vsel %vm11060_vm13, %v1642_v23, 0.0  ;;  %v2431_v37 = vsub.f32 %v2423_v13, %v11030_v56  ;;  %v2422_v49 = vld [vmem:[#allocation3 + $0x1a0] sm:$0xff]  ;;  %v2451_v6 = vsel %vm11067_vm12, %v2437_v47, 0.0  ;;  %vm11075_vm13 = vmmov %vm11020_vm1 }
 0x621   :  { %1917 = vadd.xlane.f32.xlu0 %v1916_v27  ;;  %v2172_v27 = vmul.f32 %v2164_v54, %v2164_v54  ;;  %v2427_v29 = vsub.f32 %v2419_v24, %v11012_v42  ;;  %v2430_v0 = vsub.f32 %v2422_v49, %v11023_v52 }
 0x622   :  { %v2439_v58 = vmul.f32 %v2431_v37, %v2431_v37 }
 0x623   :  { %v2188_v46 = vsel %vm11061_vm2, %v2172_v27, 0.0  ;;  %v2438_v1 = vmul.f32 %v2430_v0, %v2430_v0  ;;  %vm11077_vm2 = vmmov %vm11020_vm1 }
 0x624   :  { %1394 = vadd.xlane.f32.xlu1 %v1393_v40  ;;  %v2418_v40 = vld [vmem:[#allocation3 + $0x180] sm:$0xff] }
 0x625   :  { %868 = vadd.xlane.f32.xlu0 %v867_v25  ;;  %v2435_v25 = vmul.f32 %v2427_v29, %v2427_v29  ;;  %v2426_v44 = vsub.f32 %v2418_v40, %v11013_v39  ;;  %v2454_v22 = vsel %vm11020_vm1, %v2438_v1, 0.0  ;;  %v2428_v29 = vsub.f32 %v2420_v15, %v11016_v30 }
 0x627   :  { %v2434_v34 = vmul.f32 %v2426_v44, %v2426_v44  ;;  %v2436_v12 = vmul.f32 %v2428_v29, %v2428_v29 }
 0x628   :  { %1657 = vadd.xlane.f32.xlu1 %v1656_v60  ;;  %v2160_v60 = vsub.f32 %v2152_v35, %v11013_v39 }
 0x629   :  { %1920 = vadd.xlane.f32.xlu0 %v1919_v41  ;;  %v2445_v41 = vsel %vm11063_vm10, %v2435_v25, 0.0  ;;  %v2442_v33 = vsel %vm11065_vm14, %v2434_v34, 0.0  ;;  %v2448_v44 = vsel %vm11075_vm13, %v2436_v12, 0.0  ;;  %v2424_v34 = vld [vmem:[#allocation3 + $0x1b0] sm:$0xff]  ;;  %vm11081_vm10 = vmmov %vm11020_vm1 }
 0x62a   :  { %v2432_v47 = vsub.f32 %v2424_v34, %v11037_v14 }
 0x62c   :  { %1660 = vadd.xlane.f32.xlu1 %v1659_v31  ;;  %v2168_v31 = vmul.f32 %v2160_v60, %v2160_v60 }
 0x62d   :  { %1131 = vadd.xlane.f32.xlu0 %v1130_v2  ;;  %v2154_v2 = vld [vmem:[#allocation3 + $0x150] sm:$0xff] }
 0x62e   :  { %v2176_v61 = vsel %vm11066_vm3, %v2168_v31, 0.0  ;;  %v2162_v10 = vsub.f32 %v2154_v2, %v11016_v30 }
 0x630   :  { %1923 = vadd.xlane.f32.xlu1 %v1922_v9  ;;  %v2171_v9 = vmul.f32 %v2163_v32, %v2163_v32 }
 0x631   :  { %1134 = vadd.xlane.f32.xlu0 %v1133_v50  ;;  %v2157_v50 = vld [vmem:[#allocation3 + $0x168] sm:$0xff] }
 0x632   :  { %v2185_v3 = vsel %vm11068_vm11, %v2171_v9, 0.0  ;;  %v2165_v62 = vsub.f32 %v2157_v50, %v11030_v56 }
 0x634   :  { %1400 = vadd.xlane.f32.xlu1 %v1399_v26  ;;  %v2170_v26 = vmul.f32 %v2162_v10, %v2162_v10  ;;  %v2173_v18 = vmul.f32 %v2165_v62, %v2165_v62 }
 0x635   :  { %1397 = vadd.xlane.f32.xlu0 %v1396_v28  ;;  %v2457_v28 = vsel %vm11069_vm6, %v2439_v58, 0.0  ;;  %v2440_v58 = vmul.f32 %v2432_v47, %v2432_v47 }
 0x636   :  { %v2182_v5 = vsel %vm11070_vm9, %v2170_v26, 0.0  ;;  %v2191_v54 = vsel %vm11071_vm4, %v2173_v18, 0.0  ;;  %vm11094_vm9 = vcmask 1042432  }
 0x638   :  { %1666 = vadd.xlane.f32.xlu1 %v1665_v4  ;;  %v2158_v4 = vld [vmem:[#allocation3 + $0x170] sm:$0xff] }
 0x639   :  { %1926 = vadd.xlane.f32.xlu0 %v1925_v48  ;;  %v2175_v48 = vmul.f32 %v2167_v8, %v2167_v8  ;;  %v2166_v23 = vsub.f32 %v2158_v4, %v11037_v14 }
 0x63b   :  { %v2174_v27 = vmul.f32 %v2166_v23, %v2166_v23 }
 0x63c   :  { %2180 = vadd.xlane.f32.xlu1 %v2179_v7  ;;  %v2197_v7 = vsel %vm11072_vm5, %v2175_v48, 0.0 }
 0x63d   :  { %1663 = vadd.xlane.f32.xlu0 %v1662_v45  ;;  %v2194_v45 = vsel %vm11073_vm8, %v2174_v27, 0.0 }
 0x640   :  { %2189 = vadd.xlane.f32.xlu1 %v2188_v46 }
 0x641   :  { %1929 = vadd.xlane.f32.xlu0 %v1928_v55 }
 0x644   :  { %2446 = vadd.xlane.f32.xlu1 %v2445_v41 }
 0x645   :  { %1932 = vadd.xlane.f32.xlu0 %v1931_v43 }
 0x648   :  { %2443 = vadd.xlane.f32.xlu1 %v2442_v33 }
 0x649   :  { %2177 = vadd.xlane.f32.xlu0 %v2176_v61 }
 0x64c   :  { %2452 = vadd.xlane.f32.xlu1 %v2451_v6 }
 0x64d   :  { %2186 = vadd.xlane.f32.xlu0 %v2185_v3  ;;  %v2425_v3 = vld [vmem:[#allocation3 + $0x1b8] sm:$0xff] }
 0x64e   :  { %v2433_v1 = vsub.f32 %v2425_v3, %v11042_v19 }
 0x650   :  { %2458 = vadd.xlane.f32.xlu1 %v2457_v28 }
 0x651   :  { %2183 = vadd.xlane.f32.xlu0 %v2182_v5 }
 0x654   :  { %2455 = vadd.xlane.f32.xlu1 %v2454_v22 }
 0x655   :  { %2192 = vadd.xlane.f32.xlu0 %v2191_v54  ;;  %v2441_v54 = vmul.f32 %v2433_v1, %v2433_v1 }
 0x656   :  { %v7380_v24 = vpop.f32.mrb[32].mxu0 }
 0x657   :  { %2677 = vst.msk [vmem:[#allocation3 + $0x1c8] sm:$0xff] %vm813_vm0, %v7380_v24  ;;  %v2636_v36 = vpop.f32.mrb[33].mxu0 }
 0x658   :  { %2676 = vst.msk [vmem:[#allocation3 + $0x1c0] sm:$0xff] %vm813_vm0, %v2636_v36 }
 0x659   :  { %2198 = vadd.xlane.f32.xlu0 %v2197_v7 }
 0x65d   :  { %2195 = vadd.xlane.f32.xlu0 %v2194_v45 }
 0x65e   :  { %v7383_v38 = vpop.f32.mrb[34].mxu0  ;;  %v2685_v40 = vld [vmem:[#allocation3 + $0x1c8] sm:$0xff] }
 0x65f   :  { %2679 = vst.msk [vmem:[#allocation3 + $0x1d8] sm:$0xff] %vm813_vm0, %v7383_v38  ;;  %v2646_v35 = vpop.f32.mrb[35].mxu0  ;;  %v9543_v46 = vsub.f32 %v2685_v40, %v11012_v42  ;;  %v2684_v25 = vld [vmem:[#allocation3 + $0x1c0] sm:$0xff] }
 0x660   :  { %2678 = vst.msk [vmem:[#allocation3 + $0x1d0] sm:$0xff] %vm813_vm0, %v2646_v35  ;;  %v9548_v55 = vsub.f32 %v2684_v25, %v11013_v39 }
 0x661   :  { %11074 = vst [vmem:[#allocation15_spill] sm:$0xff] %v9543_v46  ;;  %2449 = vadd.xlane.f32.xlu0 %v2448_v44  ;;  %v2701_v57 = vmul.f32 %v9543_v46, %v9543_v46 }
 0x662   :  { %11076 = vst [vmem:[#allocation17_spill] sm:$0xff] %v9548_v55  ;;  %v7386_v60 = vpop.f32.mrb[36].mxu0  ;;  %v2700_v41 = vmul.f32 %v9548_v55, %v9548_v55 }
 0x663   :  { %2681 = vst.msk [vmem:[#allocation3 + $0x1e8] sm:$0xff] %vm813_vm0, %v7386_v60  ;;  %v2656_v21 = vpop.f32.mrb[37].mxu0  ;;  %v2711_v53 = vsel %vm11077_vm2, %v2701_v57, 0.0 }
 0x664   :  { %2680 = vst.msk [vmem:[#allocation3 + $0x1e0] sm:$0xff] %vm813_vm0, %v2656_v21  ;;  %2712 = vadd.xlane.f32.xlu1 %v2711_v53  ;;  %v2708_v32 = vsel %vm11078_vm7, %v2700_v41, 0.0  ;;  %v9613_v53 = vld [vmem:[%s10648_s7] sm:$0x7] }
 0x665   :  { %11093 = vst [vmem:[#allocation24_spill] sm:$0xff] %v9613_v53  ;;  %7390 = vmatprep.subr.msk.mxu0 %vm11094_vm9, %v9613_v53 }
 0x666   :  { %v7389_v20 = vpop.f32.mrb[38].mxu0  ;;  %v2687_v43 = vld [vmem:[#allocation3 + $0x1d8] sm:$0xff] }
 0x667   :  { %2683 = vst.msk [vmem:[#allocation3 + $0x1f8] sm:$0xff] %vm813_vm0, %v7389_v20  ;;  %v2666_v31 = vpop.f32.mrb[39].mxu0  ;;  %v9560_v13 = vsub.f32 %v2687_v43, %v11019_v11  ;;  %v2686_v2 = vld [vmem:[#allocation3 + $0x1d0] sm:$0xff] }
 0x668   :  { %2682 = vst.msk [vmem:[#allocation3 + $0x1f0] sm:$0xff] %vm813_vm0, %v2666_v31  ;;  %2709 = vadd.xlane.f32.xlu1 %v2708_v32  ;;  %v9564_v33 = vsub.f32 %v2686_v2, %v11016_v30  ;;  %vm11083_vm0 = vmmov %vm11020_vm1 }
 0x669   :  { %11079 = vst [vmem:[#allocation18_spill] sm:$0xff] %v9560_v13  ;;  %v2703_v37 = vmul.f32 %v9560_v13, %v9560_v13  ;;  %vm11085_vm15 = vmmov %vm11083_vm0 }
 0x66a   :  { %11080 = vst [vmem:[#allocation19_spill] sm:$0xff] %v9564_v33  ;;  %v2702_v61 = vmul.f32 %v9564_v33, %v9564_v33  ;;  %v2689_v9 = vld [vmem:[#allocation3 + $0x1e8] sm:$0xff]  ;;  %vm11086_vm14 = vmmov %vm11083_vm0 }
 0x66b   :  { %v2717_v10 = vsel %vm11081_vm10, %v2703_v37, 0.0  ;;  %v9573_v49 = vsub.f32 %v2689_v9, %v11030_v56  ;;  %v2688_v50 = vld [vmem:[#allocation3 + $0x1e0] sm:$0xff]  ;;  %v2460_v5 = vsel %vm11086_vm14, %v2440_v58, 0.0  ;;  %vm11088_vm3 = vmmov %vm11083_vm0 }
 0x66c   :  { %2718 = vadd.xlane.f32.xlu1 %v2717_v10  ;;  %v2714_v6 = vsel %vm11083_vm0, %v2702_v61, 0.0  ;;  %v9577_v0 = vsub.f32 %v2688_v50, %v11023_v52  ;;  %vm11090_vm12 = vmmov %vm11083_vm0 }
 0x66d   :  { %11082 = vst [vmem:[#allocation20_spill] sm:$0xff] %v9573_v49  ;;  %2715 = vadd.xlane.f32.xlu0 %v2714_v6  ;;  %v2705_v26 = vmul.f32 %v9573_v49, %v9573_v49  ;;  %vm11091_vm11 = vmmov %vm11083_vm0 }
 0x66e   :  { %11084 = vst [vmem:[#allocation21_spill] sm:$0xff] %v9577_v0  ;;  %v2704_v59 = vmul.f32 %v9577_v0, %v9577_v0  ;;  %v2691_v8 = vld [vmem:[#allocation3 + $0x1f8] sm:$0xff]  ;;  %v2463_v15 = vsel %vm11091_vm11, %v2441_v54, 0.0  ;;  %vm11092_vm6 = vmmov %vm11083_vm0 }
 0x66f   :  { %v2723_v62 = vsel %vm11085_vm15, %v2705_v26, 0.0  ;;  %v2690_v28 = vld [vmem:[#allocation3 + $0x1f0] sm:$0xff]  ;;  %v9593_v48 = vsub.f32 %v2691_v8, %v11042_v19  ;;  %vm11095_vm1 = vmmov %vm11094_vm9 }
 0x670   :  { %2724 = vadd.xlane.f32.xlu1 %v2723_v62  ;;  %v9587_v18 = vsub.f32 %v2690_v28, %v11037_v14  ;;  %v2720_v22 = vsel %vm11088_vm3, %v2704_v59, 0.0  ;;  %7834 = vmatprep.subr.msk.mxu1 %vm11095_vm1, %v9613_v53  ;;  %vm11096_vm4 = vmmov %vm11095_vm1 }
 0x671   :  { %2461 = vadd.xlane.f32.xlu0 %v2460_v5  ;;  %11089 = vst [vmem:[#allocation23_spill] sm:$0xff] %v9593_v48  ;;  %v2707_v24 = vmul.f32 %v9593_v48, %v9593_v48  ;;  %7391 = vmatpush3.msk.msra.mxu0 %vm11096_vm4, %v9613_v53  ;;  %vm11097_vm5 = vmmov %vm11095_vm1 }
 0x672   :  { %11087 = vst [vmem:[#allocation22_spill] sm:$0xff] %v9587_v18  ;;  %v2706_v4 = vmul.f32 %v9587_v18, %v9587_v18  ;;  %7835 = vmatpush3.msk.msra.mxu1 %vm11097_vm5, %v9613_v53  ;;  %vm11098_vm8 = vmmov %vm11095_vm1  ;;  %vm11101_vm5 = vcmask 23552  }
 0x673   :  { %v2729_v7 = vsel %vm11092_vm6, %v2707_v24, 0.0  ;;  %7420 = vmatprep.subr.msk.mxu1 %vm11098_vm8, %v9613_v53  ;;  %vm11102_vm8 = vmmov %vm11101_vm5 }
 0x674   :  { %2721 = vadd.xlane.f32.xlu1 %v2720_v22  ;;  %v2726_v23 = vsel %vm11090_vm12, %v2706_v4, 0.0 }
 0x675   :  { %2727 = vadd.xlane.f32.xlu0 %v2726_v23 }
 0x677   :  { %v851_v29 = vpop.xlane.xlu1 %850 }
 0x678   :  { %v9599_v36 = vpop.xlane.xlu0 %847  ;;  %2464 = vadd.xlane.f32.xlu1 %v2463_v15  ;;  %v871_v33 = vmax.f32 %v851_v29, 0.0 }
 0x679   :  { %v870_v55 = vmax.f32 %v9599_v36, 0.0 }
 0x67b   :  { %v1117_v38 = vpop.xlane.xlu1 %1116 }
 0x67c   :  { %v1114_v27 = vpop.xlane.xlu0 %1113  ;;  %2730 = vadd.xlane.f32.xlu1 %v2729_v7  ;;  %v1137_v19 = vmax.f32 %v871_v33, %v1117_v38 }
 0x67d   :  { %v1136_v17 = vmax.f32 %v870_v55, %v1114_v27 }
 0x680   :  { %v9602_v45 = vpop.xlane.xlu0 %853 }
 0x681   :  { %v872_v39 = vmax.f32 %v9602_v45, 0.0 }
 0x684   :  { %v9604_v12 = vpop.xlane.xlu0 %856 }
 0x685   :  { %v873_v16 = vmax.f32 %v9604_v12, 0.0 }
 0x688   :  { %v9606_v35 = vpop.xlane.xlu0 %1119 }
 0x689   :  { %v1380_v40 = vpop.xlane.xlu1 %1379  ;;  %v1138_v55 = vmax.f32 %v872_v39, %v9606_v35 }
 0x68a   :  { %v1402_v51 = vmax.f32 %v1136_v17, %v1380_v40 }
 0x68c   :  { %v1123_v44 = vpop.xlane.xlu0 %1122 }
 0x68d   :  { %v1383_v25 = vpop.xlane.xlu1 %1382  ;;  %v1139_v56 = vmax.f32 %v873_v16, %v1123_v44 }
 0x68e   :  { %v1403_v63 = vmax.f32 %v1137_v19, %v1383_v25 }
 0x690   :  { %v9608_v21 = vpop.xlane.xlu0 %859 }
 0x691   :  { %v1646_v57 = vpop.xlane.xlu1 %1645  ;;  %v874_v45 = vmax.f32 %v9608_v21, 0.0 }
 0x692   :  { %v1668_v30 = vmax.f32 %v1402_v51, %v1646_v57 }
 0x695   :  { %v1649_v60 = vpop.xlane.xlu1 %1648 }
 0x696   :  { %v1669_v52 = vmax.f32 %v1403_v63, %v1649_v60 }
 0x699   :  { %v9619_v41 = vpop.xlane.xlu1 %1385 }
 0x69a   :  { %v1912_v34 = vpop.xlane.xlu0 %1911  ;;  %v1404_v40 = vmax.f32 %v1138_v55, %v9619_v41 }
 0x69b   :  { %v1934_v42 = vmax.f32 %v1668_v30, %v1912_v34 }
 0x69d   :  { %v863_v20 = vpop.xlane.xlu1 %862 }
 0x69e   :  { %v1389_v43 = vpop.xlane.xlu0 %1388  ;;  %v875_v36 = vmax.f32 %v863_v20, 0.0 }
 0x69f   :  { %v1405_v33 = vmax.f32 %v1139_v56, %v1389_v43 }
 0x6a1   :  { %v1915_v31 = vpop.xlane.xlu1 %1914 }
 0x6a2   :  { %v9627_v32 = vpop.xlane.xlu0 %1125  ;;  %v1935_v11 = vmax.f32 %v1669_v52, %v1915_v31 }
 0x6a5   :  { %v1652_v2 = vpop.xlane.xlu1 %1651 }
 0x6a6   :  { %v1655_v47 = vpop.xlane.xlu0 %1654  ;;  %v1670_v44 = vmax.f32 %v1404_v40, %v1652_v2 }
 0x6a7   :  { %v1671_v19 = vmax.f32 %v1405_v33, %v1655_v47 }
 0x6a9   :  { %v1129_v37 = vpop.xlane.xlu1 %1128 }
 0x6aa   :  { %v9629_v61 = vpop.xlane.xlu0 %865  ;;  %v1141_v27 = vmax.f32 %v875_v36, %v1129_v37 }
 0x6ab   :  { %v876_v39 = vmax.f32 %v9629_v61, 0.0 }
 0x6ad   :  { %v9631_v9 = vpop.xlane.xlu1 %1391 }
 0x6ae   :  { %v9633_v10 = vpop.xlane.xlu0 %1917 }
 0x6af   :  { %v1936_v56 = vmax.f32 %v1670_v44, %v9633_v10 }
 0x6b1   :  { %v1395_v50 = vpop.xlane.xlu1 %1394 }
 0x6b2   :  { %v9635_v6 = vpop.xlane.xlu0 %868  ;;  %v1407_v51 = vmax.f32 %v1141_v27, %v1395_v50 }
 0x6b5   :  { %v9637_v58 = vpop.xlane.xlu1 %1657 }
 0x6b6   :  { %v1921_v3 = vpop.xlane.xlu0 %1920 }
 0x6b7   :  { %v1937_v52 = vmax.f32 %v1671_v19, %v1921_v3 }
 0x6b9   :  { %v1661_v26 = vpop.xlane.xlu1 %1660 }
 0x6ba   :  { %v1132_v62 = vpop.xlane.xlu0 %1131  ;;  %v1673_v30 = vmax.f32 %v1407_v51, %v1661_v26 }
 0x6bb   :  { %v1142_v34 = vmax.f32 %v876_v39, %v1132_v62 }
 0x6bd   :  { %v9639_v59 = vpop.xlane.xlu1 %1923 }
 0x6be   :  { %v9641_v28 = vpop.xlane.xlu0 %1134 }
 0x6c1   :  { %v9643_v1 = vpop.xlane.xlu1 %1400 }
 0x6c2   :  { %v9645_v5 = vpop.xlane.xlu0 %1397 }
 0x6c5   :  { %v9647_v8 = vpop.xlane.xlu1 %1666 }
 0x6c6   :  { %v1927_v4 = vpop.xlane.xlu0 %1926 }
 0x6c9   :  { %v2181_v22 = vpop.xlane.xlu1 %2180 }
 0x6ca   :  { %v9649_v54 = vpop.xlane.xlu0 %1663  ;;  %v2201_v38 = vmax.f32 %v1935_v11, %v2181_v22 }
 0x6cd   :  { %v9653_v15 = vpop.xlane.xlu1 %2189 }
 0x6ce   :  { %v9651_v23 = vpop.xlane.xlu0 %1929 }
 0x6d1   :  { %v2447_v7 = vpop.xlane.xlu1 %2446 }
 0x6d2   :  { %v9655_v24 = vpop.xlane.xlu0 %1932  ;;  %v2467_v12 = vmax.f32 %v2201_v38, %v2447_v7 }
 0x6d5   :  { %v2444_v49 = vpop.xlane.xlu1 %2443 }
 0x6d6   :  { %v2178_v48 = vpop.xlane.xlu0 %2177 }
 0x6d7   :  { %v2200_v17 = vmax.f32 %v1934_v42, %v2178_v48  ;;  %v1140_v42 = vmax.f32 %v874_v45, %v9627_v32  ;;  %v1939_v48 = vmax.f32 %v1673_v30, %v1927_v4  ;;  %v877_v32 = vmax.f32 %v9635_v6, 0.0 }
 0x6d9   :  { %v2453_v13 = vpop.xlane.xlu1 %2452  ;;  %v2466_v11 = vmax.f32 %v2200_v17, %v2444_v49  ;;  %v1406_v43 = vmax.f32 %v1140_v42, %v9631_v9 }
 0x6da   :  { %v2187_v18 = vpop.xlane.xlu0 %2186 }
 0x6db   :  { %v2203_v57 = vmax.f32 %v1937_v52, %v2187_v18  ;;  %v1408_v18 = vmax.f32 %v1142_v34, %v9645_v5  ;;  %v1672_v47 = vmax.f32 %v1406_v43, %v9637_v58  ;;  %v2832_v43 = vld [vmem:[#allocation3] sm:$0xff] }
 0x6dd   :  { %v9658_v14 = vpop.xlane.xlu1 %2458  ;;  %v2469_v31 = vmax.f32 %v2203_v57, %v2453_v13  ;;  %v1674_v10 = vmax.f32 %v1408_v18, %v9649_v54  ;;  %v1143_v13 = vmax.f32 %v877_v32, %v9641_v28  ;;  %v11099_v18 = vld [vmem:[#allocation5_spill] sm:$0xff] }
 0x6de   :  { %v2184_v0 = vpop.xlane.xlu0 %2183 }
 0x6df   :  { %v2202_v20 = vmax.f32 %v1936_v56, %v2184_v0  ;;  %v1938_v0 = vmax.f32 %v1672_v47, %v9639_v59  ;;  %v1940_v9 = vmax.f32 %v1674_v10, %v9651_v23  ;;  %v1409_v5 = vmax.f32 %v1143_v13, %v9643_v1 }
 0x6e1   :  { %v9664_v29 = vpop.xlane.xlu1 %2455  ;;  %v2204_v6 = vmax.f32 %v1938_v0, %v9653_v15  ;;  %v1675_v15 = vmax.f32 %v1409_v5, %v9647_v8  ;;  %v2835_v5 = vld [vmem:[#allocation3 + $0x18] sm:$0xff] }
 0x6e2   :  { %v2193_v46 = vpop.xlane.xlu0 %2192 }
 0x6e3   :  { %v2205_v21 = vmax.f32 %v1939_v48, %v2193_v46  ;;  %v2470_v22 = vmax.f32 %v2204_v6, %v9664_v29  ;;  %v1941_v29 = vmax.f32 %v1675_v15, %v9655_v24 }
 0x6e5   :  { %v2471_v46 = vmax.f32 %v2205_v21, %v9658_v14 }
 0x6e6   :  { %v9661_v53 = vpop.xlane.xlu0 %2198 }
 0x6e7   :  { %v2207_v8 = vmax.f32 %v1941_v29, %v9661_v53 }
 0x6ea   :  { %v2196_v63 = vpop.xlane.xlu0 %2195 }
 0x6eb   :  { %v2206_v59 = vmax.f32 %v1940_v9, %v2196_v63 }
 0x6ee   :  { %v2450_v60 = vpop.xlane.xlu0 %2449 }
 0x6ef   :  { %v2468_v49 = vmax.f32 %v2202_v20, %v2450_v60  ;;  %v2833_v60 = vld [vmem:[#allocation3 + $0x8] sm:$0xff] }
 0x6f1   :  { %v2713_v16 = vpop.xlane.xlu1 %2712 }
 0x6f2   :  { %v2733_v25 = vmax.f32 %v2467_v12, %v2713_v16 }
 0x6f4   :  { %7842 = vrsqrt.f32 %v2733_v25  ;;  %vm2749_vm13 = vcmp.eq.f32.partialorder %v2733_v25, inf  ;;  %v2752_v14 = vand.u32 2147483648, %v2733_v25  ;;  %vm2751_vm2 = vcmp.eq.f32.partialorder %v2733_v25, 0.0 }
 0x6f5   :  { %v2710_v35 = vpop.xlane.xlu1 %2709 }
 0x6f6   :  { %v2732_v41 = vmax.f32 %v2466_v11, %v2710_v35 }
 0x6f8   :  { %7844 = vrsqrt.f32 %v2732_v41  ;;  %vm2742_vm7 = vcmp.eq.f32.partialorder %v2732_v41, inf  ;;  %v2745_v27 = vand.u32 2147483648, %v2732_v41  ;;  %vm2744_vm10 = vcmp.eq.f32.partialorder %v2732_v41, 0.0 }
 0x6f9   :  { %v2719_v2 = vpop.xlane.xlu1 %2718 }
 0x6fa   :  { %v9675_v37 = vmax.f32 %v2469_v31, %v2719_v2  ;;  %v2716_v61 = vpop.xlane.xlu0 %2715 }
 0x6fb   :  { %v9679_v50 = vmax.f32 %v2468_v49, %v2716_v61  ;;  %v2841_v49 = vsub.f32 %v2833_v60, %v11099_v18 }
 0x6fc   :  { %7846 = vrsqrt.f32 %v9675_v37  ;;  %vm2763_vm0 = vcmp.eq.f32.partialorder %v9675_v37, inf  ;;  %vm2765_vm15 = vcmp.eq.f32.partialorder %v9675_v37, 0.0  ;;  %v2766_v24 = vand.u32 2147483648, %v9675_v37 }
 0x6fd   :  { %7848 = vrsqrt.f32 %v9679_v50  ;;  %v2725_v58 = vpop.xlane.xlu1 %2724  ;;  %vm2756_vm14 = vcmp.eq.f32.partialorder %v9679_v50, inf  ;;  %v2759_v53 = vand.u32 2147483648, %v9679_v50  ;;  %vm2758_vm3 = vcmp.eq.f32.partialorder %v9679_v50, 0.0 }
 0x6fe   :  { %v7843_v3 = vpop.eup %7842  ;;  %v9688_v26 = vmax.f32 %v2471_v46, %v2725_v58  ;;  %v2462_v62 = vpop.xlane.xlu0 %2461 }
 0x6ff   :  { %v2748_v4 = vmul.f32 %v7843_v3, %v2733_v25  ;;  %v2472_v54 = vmax.f32 %v2206_v59, %v2462_v62 }
 0x700   :  { %7850 = vrsqrt.f32 %v9688_v26  ;;  %vm2777_vm12 = vcmp.eq.f32.partialorder %v9688_v26, inf  ;;  %v2780_v34 = vand.u32 2147483648, %v9688_v26  ;;  %vm2779_vm11 = vcmp.eq.f32.partialorder %v9688_v26, 0.0 }
 0x701   :  { %v2750_v28 = vsel %vm2749_vm13, %v2733_v25, %v2748_v4  ;;  %v2722_v23 = vpop.xlane.xlu1 %2721  ;;  %vm11104_vm13 = vmmov %vm11101_vm5 }
 0x702   :  { %v7845_v7 = vpop.eup %7844  ;;  %v2753_v36 = vsel %vm2751_vm2, %v2752_v14, %v2750_v28  ;;  %v9694_v33 = vmax.f32 %v2470_v22, %v2722_v23  ;;  %v2728_v38 = vpop.xlane.xlu0 %2727  ;;  %v2834_v14 = vld [vmem:[#allocation3 + $0x10] sm:$0xff] }
 0x703   :  { %v2797_v1 = vadd.f32 1e-10, %v2753_v36  ;;  %v2741_v55 = vmul.f32 %v7845_v7, %v2732_v41  ;;  %v9696_v19 = vmax.f32 %v2472_v54, %v2728_v38  ;;  %v11103_v7 = vld [vmem:[#allocation7_spill] sm:$0xff]  ;;  %v11105_v38 = vld [vmem:[#allocation6_spill] sm:$0xff] }
 0x704   :  { %7852 = vrsqrt.f32 %v9694_v33  ;;  %vm2770_vm6 = vcmp.eq.f32.partialorder %v9694_v33, inf  ;;  %v2773_v32 = vand.u32 2147483648, %v9694_v33  ;;  %vm2772_vm9 = vcmp.eq.f32.partialorder %v9694_v33, 0.0 }
 0x705   :  { %7854 = vrcp.f32 %v2797_v1  ;;  %v2743_v12 = vsel %vm2742_vm7, %v2732_v41, %v2741_v55  ;;  %v2465_v17 = vpop.xlane.xlu1 %2464  ;;  %vm2784_vm1 = vcmp.eq.f32.partialorder %v9696_v19, inf  ;;  %v2787_v58 = vand.u32 2147483648, %v9696_v19  ;;  %v2837_v55 = vld [vmem:[#allocation3 + $0x28] sm:$0xff]  ;;  %vm11106_vm7 = vmmov %vm11101_vm5 }
 0x706   :  { %v7847_v63 = vpop.eup %7846  ;;  %v2746_v40 = vsel %vm2744_vm10, %v2745_v27, %v2743_v12  ;;  %7856 = vrsqrt.f32 %v9696_v19  ;;  %v2473_v45 = vmax.f32 %v2207_v8, %v2465_v17  ;;  %vm2786_vm4 = vcmp.eq.f32.partialorder %v9696_v19, 0.0 }
 0x707   :  { %v7849_v16 = vpop.eup %7848  ;;  %v2796_v51 = vadd.f32 1e-10, %v2746_v40  ;;  %v2762_v52 = vmul.f32 %v7847_v63, %v9675_v37  ;;  %v2843_v15 = vsub.f32 %v2835_v5, %v11103_v7  ;;  %v2842_v1 = vsub.f32 %v2834_v14, %v11105_v38 }
 0x708   :  { %v2755_v25 = vmul.f32 %v7849_v16, %v9679_v50  ;;  %v11107_v16 = vld [vmem:[#allocation9_spill] sm:$0xff] }
 0x709   :  { %7858 = vrcp.f32 %v2796_v51  ;;  %v2764_v44 = vsel %vm2763_vm0, %v9675_v37, %v2762_v52  ;;  %v2731_v30 = vpop.xlane.xlu1 %2730  ;;  %v2845_v51 = vsub.f32 %v2837_v55, %v11107_v16  ;;  %vm11108_vm0 = vmmov %vm11101_vm5 }
 0x70a   :  { %v7851_v57 = vpop.eup %7850  ;;  %v2767_v11 = vsel %vm2765_vm15, %v2766_v24, %v2764_v44  ;;  %v2757_v39 = vsel %vm2756_vm14, %v9679_v50, %v2755_v25  ;;  %v9712_v56 = vmax.f32 %v2473_v45, %v2731_v30  ;;  %v11100_v50 = vld [vmem:[#allocation4_spill] sm:$0xff]  ;;  %vm11109_vm15 = vmmov %vm11108_vm0 }
 0x70b   :  { %v2799_v35 = vadd.f32 1e-10, %v2767_v11  ;;  %v2760_v42 = vsel %vm2758_vm3, %v2759_v53, %v2757_v39  ;;  %v2776_v48 = vmul.f32 %v7851_v57, %v9688_v26  ;;  %v2840_v0 = vsub.f32 %v2832_v43, %v11100_v50  ;;  %v2836_v45 = vld [vmem:[#allocation3 + $0x20] sm:$0xff]  ;;  %vm11110_vm14 = vmmov %vm11108_vm0 }
 0x70c   :  { %v2798_v41 = vadd.f32 1e-10, %v2760_v42  ;;  %7860 = vrsqrt.f32 %v9712_v56  ;;  %vm2791_vm2 = vcmp.eq.f32.partialorder %v9712_v56, inf  ;;  %v2794_v29 = vand.u32 2147483648, %v9712_v56  ;;  %vm11111_vm3 = vmmov %vm11108_vm0  ;;  %v11112_v57 = vld [vmem:[#allocation24_spill] sm:$0xff] }
 0x70d   :  { %7862 = vrcp.f32 %v2799_v35  ;;  %v2778_v20 = vsel %vm2777_vm12, %v9688_v26, %v2776_v48  ;;  %vm2793_vm10 = vcmp.eq.f32.partialorder %v9712_v56, 0.0  ;;  %vm11113_vm12 = vcmask 1042432   ;;  %v11114_v39 = vld [vmem:[#allocation8_spill] sm:$0xff] }
 0x70e   :  { %v7853_v21 = vpop.eup %7852  ;;  %7864 = vrcp.f32 %v2798_v41  ;;  %v2781_v31 = vsel %vm2779_vm11, %v2780_v34, %v2778_v20  ;;  %vm11115_vm11 = vmmov %vm11113_vm12  ;;  %v3250_v42 = vld [vmem:[#allocation3 + $0x40] sm:$0xff] }
 0x70f   :  { %v9721_v2 = vpop.eup %7854  ;;  %v2801_v47 = vadd.f32 1e-10, %v2781_v31  ;;  %v2769_v37 = vmul.f32 %v7853_v21, %v9694_v33  ;;  %v11118_v34 = vld [vmem:[#allocation12_spill] sm:$0xff]  ;;  %v3258_v21 = vsub.f32 %v3250_v42, %v11100_v50  ;;  %v3251_v31 = vld [vmem:[#allocation3 + $0x48] sm:$0xff] }
 0x710   :  { %v7857_v61 = vpop.eup %7856  ;;  %v2849_v10 = vmul.f32 %v9721_v2, %v2841_v49  ;;  %v3252_v49 = vld [vmem:[#allocation3 + $0x50] sm:$0xff]  ;;  %v11138_v42 = vld [vmem:[#allocation13_spill] sm:$0xff] }
 0x711   :  { %7866 = vrcp.f32 %v2801_v47  ;;  %v2771_v46 = vsel %vm2770_vm6, %v9694_v33, %v2769_v37  ;;  %v2783_v13 = vmul.f32 %v7857_v61, %v9696_v19  ;;  %vm11116_vm6 = vmmov %vm11108_vm0 }
 0x712   :  { %v2774_v9 = vsel %vm2772_vm9, %v2773_v32, %v2771_v46  ;;  %v2857_v3 = vmul.f32 %v2849_v10, %v2849_v10  ;;  %vm11117_vm9 = vmmov %vm11108_vm0  ;;  %v3259_v32 = vsub.f32 %v3251_v31, %v11099_v18  ;;  %v3664_v31 = vld [vmem:[#allocation3 + $0xa0] sm:$0xff] }
 0x713   :  { %v9733_v6 = vpop.eup %7858  ;;  %v2800_v26 = vadd.f32 1e-10, %v2774_v9  ;;  %v2785_v62 = vsel %vm2784_vm1, %v9696_v19, %v2783_v13  ;;  %vm11119_vm1 = vmmov %vm11108_vm0  ;;  %v3254_v9 = vld [vmem:[#allocation3 + $0x60] sm:$0xff] }
 0x714   :  { %v2788_v59 = vsel %vm2786_vm4, %v2787_v58, %v2785_v62  ;;  %v2867_v4 = vsel %vm11101_vm5, %v2857_v3, 0.0  ;;  %v2848_v22 = vmul.f32 %v9733_v6, %v2840_v0  ;;  %vm11120_vm4 = vmmov %vm11108_vm0  ;;  %v3266_v61 = vmul.f32 %v9733_v6, %v3258_v21  ;;  %v3253_v0 = vld [vmem:[#allocation3 + $0x58] sm:$0xff]  ;;  %v11123_v3 = vld [vmem:[#allocation14_spill] sm:$0xff] }
 0x715   :  { %7868 = vrcp.f32 %v2800_v26  ;;  %v2802_v28 = vadd.f32 1e-10, %v2788_v59  ;;  %2868 = vadd.xlane.f32.xlu1 %v2867_v4  ;;  %vm11121_vm5 = vmmov %vm11108_vm0  ;;  %v3267_v13 = vmul.f32 %v9721_v2, %v3259_v32  ;;  %v3261_v59 = vsub.f32 %v3253_v0, %v11103_v7 }
 0x716   :  { %v7861_v54 = vpop.eup %7860  ;;  %7392 = vmatprep.mubr.msk.f32.mxu0 %vm11102_vm8, %v2848_v22  ;;  %v2856_v23 = vmul.f32 %v2848_v22, %v2848_v22  ;;  %vm11122_vm8 = vmmov %vm11108_vm0  ;;  %v3274_v62 = vmul.f32 %v3266_v61, %v3266_v61  ;;  %v3262_v22 = vsub.f32 %v3254_v9, %v11114_v39  ;;  %v3665_v9 = vld [vmem:[#allocation3 + $0xa8] sm:$0xff] }
 0x717   :  { %v9741_v36 = vpop.eup %7862  ;;  %7870 = vrcp.f32 %v2802_v28  ;;  %v2790_v33 = vmul.f32 %v7861_v54, %v9712_v56  ;;  %7393 = vmatmul.mubr.msk.f32.vlgmr.msra.gmra.mrb[40].mxu0 %vm11104_vm13, %v2849_v10  ;;  %v3260_v10 = vsub.f32 %v3252_v49, %v11105_v38  ;;  %vm11124_vm13 = vmmov %vm11108_vm0  ;;  %v3275_v14 = vmul.f32 %v3267_v13, %v3267_v13  ;;  %v3255_v54 = vld [vmem:[#allocation3 + $0x68] sm:$0xff] }
 0x718   :  { %v9746_v19 = vpop.eup %7864  ;;  %v2864_v27 = vsel %vm11106_vm7, %v2856_v23, 0.0  ;;  %v2851_v12 = vmul.f32 %v9741_v36, %v2843_v15  ;;  %v3269_v28 = vmul.f32 %v9741_v36, %v3261_v59  ;;  %vm11126_vm7 = vmmov %vm11108_vm0  ;;  %v3263_v55 = vsub.f32 %v3255_v54, %v11107_v16 }
 0x719   :  { %v2792_v17 = vsel %vm2791_vm2, %v9712_v56, %v2790_v33  ;;  %2865 = vadd.xlane.f32.xlu0 %v2864_v27  ;;  %v2850_v63 = vmul.f32 %v9746_v19, %v2842_v1  ;;  %v2844_v56 = vsub.f32 %v2836_v45, %v11114_v39  ;;  %v3268_v5 = vmul.f32 %v9746_v19, %v3260_v10  ;;  %vm11125_vm2 = vmmov %vm11108_vm0 }
 0x71a   :  { %v2795_v8 = vsel %vm2793_vm10, %v2794_v29, %v2792_v17  ;;  %v2859_v40 = vmul.f32 %v2851_v12, %v2851_v12  ;;  %vm11127_vm10 = vmmov %vm11108_vm0  ;;  %v3660_v29 = vld [vmem:[#allocation3 + $0x80] sm:$0xff]  ;;  %v3672_v10 = vsub.f32 %v3664_v31, %v11114_v39  ;;  %v3673_v59 = vsub.f32 %v3665_v9, %v11107_v16 }
 0x71b   :  { %v9756_v52 = vpop.eup %7866  ;;  %v2803_v24 = vadd.f32 1e-10, %v2795_v8  ;;  %7395 = vmatprep.mubr.msk.f32.mxu1 %vm11108_vm0, %v2850_v63  ;;  %v2858_v25 = vmul.f32 %v2850_v63, %v2850_v63  ;;  %v3282_v15 = vsel %vm11127_vm10, %v3274_v62, 0.0  ;;  %v3276_v33 = vmul.f32 %v3268_v5, %v3268_v5  ;;  %vm11144_vm10 = vmmov %vm11108_vm0 }
 0x71c   :  { %7396 = vmatmul.mubr.msk.f32.vlgmr.msra.gmra.mrb[40].mxu1 %vm11109_vm15, %v2851_v12  ;;  %v2873_v44 = vsel %vm11110_vm14, %v2859_v40, 0.0  ;;  %v2853_v53 = vmul.f32 %v9756_v52, %v2845_v51  ;;  %vm11128_vm15 = vmmov %vm11108_vm0  ;;  %v3277_v12 = vmul.f32 %v3269_v28, %v3269_v28  ;;  %v3271_v8 = vmul.f32 %v9756_v52, %v3263_v55  ;;  %v11132_v40 = vld [vmem:[#allocation16_spill] sm:$0xff] }
 0x71d   :  { %7872 = vrcp.f32 %v2803_v24  ;;  %2874 = vadd.xlane.f32.xlu1 %v2873_v44  ;;  %v2870_v30 = vsel %vm11111_vm3, %v2858_v25, 0.0  ;;  %7421 = vmatpush3.msk.msra.mxu1 %vm11113_vm12, %v11112_v57  ;;  %vm11129_vm14 = vmmov %vm11108_vm0  ;;  %v3668_v24 = vsub.f32 %v3660_v29, %v11100_v50  ;;  %v3661_v25 = vld [vmem:[#allocation3 + $0x88] sm:$0xff] }
 0x71e   :  { %2871 = vadd.xlane.f32.xlu0 %v2870_v30  ;;  %v2861_v11 = vmul.f32 %v2853_v53, %v2853_v53  ;;  %7450 = vmatprep.subr.msk.mxu1 %vm11115_vm11, %v11112_v57  ;;  %v3285_v27 = vsel %vm11129_vm14, %v3275_v14, 0.0  ;;  %vm11130_vm3 = vmmov %vm11115_vm11  ;;  %v4070_v14 = vld [vmem:[#allocation3 + $0xc0] sm:$0xff] }
 0x71f   :  { %v9768_v35 = vpop.eup %7868  ;;  %vm11131_vm12 = vmmov %vm11108_vm0  ;;  %v3676_v44 = vmul.f32 %v9733_v6, %v3668_v24  ;;  %v4078_v29 = vsub.f32 %v4070_v14, %v11100_v50 }
 0x720   :  { %v2879_v48 = vsel %vm11116_vm6, %v2861_v11, 0.0  ;;  %v2852_v60 = vmul.f32 %v9768_v35, %v2844_v56  ;;  %v3270_v1 = vmul.f32 %v9768_v35, %v3262_v22  ;;  %v3288_v17 = vsel %vm11131_vm12, %v3276_v33, 0.0  ;;  %vm11133_vm11 = vmmov %vm11130_vm3 }
 0x721   :  { %v9772_v41 = vpop.eup %7870  ;;  %2880 = vadd.xlane.f32.xlu1 %v2879_v48  ;;  %vm11134_vm6 = vmmov %vm11108_vm0  ;;  %v3279_v11 = vmul.f32 %v3271_v8, %v3271_v8 }
 0x722   :  { %7398 = vmatprep.mubr.msk.f32.mxu1 %vm11117_vm9, %v2852_v60  ;;  %v2854_v20 = vmul.f32 %v9772_v41, %v11118_v34  ;;  %v2860_v43 = vmul.f32 %v2852_v60, %v2852_v60  ;;  %v3278_v63 = vmul.f32 %v3270_v1, %v3270_v1  ;;  %v3272_v51 = vmul.f32 %v9772_v41, %v11132_v40  ;;  %vm11135_vm9 = vmmov %vm11108_vm0 }
 0x723   :  { %7399 = vmatmul.mubr.msk.f32.gmra.mrb[42].mxu1 %vm11119_vm1, %v2853_v53  ;;  %vm11136_vm1 = vmmov %vm11108_vm0  ;;  %v3662_v53 = vld [vmem:[#allocation3 + $0x90] sm:$0xff]  ;;  %v3669_v60 = vsub.f32 %v3661_v25, %v11099_v18  ;;  %v4086_v40 = vmul.f32 %v9733_v6, %v4078_v29 }
 0x724   :  { %7401 = vmatprep.mubr.msk.f32.mxu1 %vm11120_vm4, %v2854_v20  ;;  %v2876_v47 = vsel %vm11121_vm5, %v2860_v43, 0.0  ;;  %v2862_v37 = vmul.f32 %v2854_v20, %v2854_v20  ;;  %v3291_v45 = vsel %vm11136_vm1, %v3277_v12, 0.0  ;;  %vm11137_vm4 = vmmov %vm11108_vm0  ;;  %v3280_v56 = vmul.f32 %v3272_v51, %v3272_v51  ;;  %v3663_v20 = vld [vmem:[#allocation3 + $0x98] sm:$0xff] }
 0x725   :  { %2877 = vadd.xlane.f32.xlu0 %v2876_v47  ;;  %v3294_v30 = vsel %vm11137_vm4, %v3278_v63, 0.0  ;;  %vm11139_vm5 = vmmov %vm11108_vm0  ;;  %v3670_v34 = vsub.f32 %v3662_v53, %v11105_v38  ;;  %v3684_v43 = vmul.f32 %v3676_v44, %v3676_v44  ;;  %v3677_v21 = vmul.f32 %v9721_v2, %v3669_v60  ;;  %v4072_v63 = vld [vmem:[#allocation3 + $0xd0] sm:$0xff] }
 0x726   :  { %v2882_v58 = vsel %vm11122_vm8, %v2862_v37, 0.0  ;;  %vm11140_vm8 = vmmov %vm11108_vm0  ;;  %v3671_v32 = vsub.f32 %v3663_v20, %v11103_v7  ;;  %v4080_v53 = vsub.f32 %v4072_v63, %v11105_v38  ;;  %v4094_v20 = vmul.f32 %v4086_v40, %v4086_v40 }
 0x727   :  { %v9784_v46 = vpop.eup %7872  ;;  %v3685_v0 = vmul.f32 %v3677_v21, %v3677_v21  ;;  %vm11146_vm14 = vmmov %vm11108_vm0 }
 0x728   :  { %v2855_v26 = vmul.f32 %v9784_v46, %v11123_v3  ;;  %v3273_v48 = vmul.f32 %v9784_v46, %v11138_v42  ;;  %vm11149_vm12 = vmmov %vm11108_vm0  ;;  %v4074_v42 = vld [vmem:[#allocation3 + $0xe0] sm:$0xff] }
 0x729   :  { %2883 = vadd.xlane.f32.xlu0 %v2882_v58  ;;  %v3666_v58 = vld [vmem:[#allocation3 + $0xb0] sm:$0xff]  ;;  %vm11152_vm1 = vmmov %vm11108_vm0 }
 0x72a   :  { %7402 = vmatmul.mubr.msk.f32.gmra.mrb[44].mxu1 %vm11124_vm13, %v2855_v26  ;;  %v2863_v4 = vmul.f32 %v2855_v26, %v2855_v26  ;;  %vm11141_vm13 = vmmov %vm11108_vm0  ;;  %v3281_v37 = vmul.f32 %v3273_v48, %v3273_v48 }
 0x72b   :  { %7422 = vmatprep.mubr.msk.f32.mxu1 %vm11125_vm2, %v3266_v61  ;;  %v3297_v49 = vsel %vm11141_vm13, %v3279_v11, 0.0  ;;  %vm11142_vm2 = vmmov %vm11108_vm0  ;;  %v3678_v61 = vmul.f32 %v9746_v19, %v3670_v34  ;;  %v4088_v11 = vmul.f32 %v9746_v19, %v4080_v53 }
 0x72c   :  { %v2885_v23 = vsel %vm11126_vm7, %v2863_v4, 0.0  ;;  %v3300_v47 = vsel %vm11142_vm2, %v3280_v56, 0.0  ;;  %vm11143_vm7 = vmmov %vm11108_vm0  ;;  %v3303_v3 = vsel %vm11108_vm0, %v3281_v37, 0.0  ;;  %v11147_v4 = vld [vmem:[#allocation10_spill] sm:$0xff]  ;;  %v4073_v56 = vld [vmem:[#allocation3 + $0xd8] sm:$0xff] }
 0x72d   :  { %2886 = vadd.xlane.f32.xlu1 %v2885_v23  ;;  %3283 = vadd.xlane.f32.xlu0 %v3282_v15  ;;  %v3686_v62 = vmul.f32 %v3678_v61, %v3678_v61  ;;  %v3674_v22 = vsub.f32 %v3666_v58, %v11147_v4  ;;  %v3667_v23 = vld [vmem:[#allocation3 + $0xb8] sm:$0xff]  ;;  %vm11154_vm4 = vmmov %vm11108_vm0  ;;  %v4076_v37 = vld [vmem:[#allocation3 + $0xf0] sm:$0xff] }
 0x72e   :  { %7423 = vmatmul.mubr.msk.f32.vlgmr.msra.gmra.mrb[46].mxu1 %vm11108_vm0, %v3267_v13  ;;  %v3679_v13 = vmul.f32 %v9741_v36, %v3671_v32  ;;  %vm11157_vm13 = vmmov %vm11108_vm0  ;;  %v4084_v9 = vsub.f32 %v4076_v37, %v11147_v4  ;;  %v4077_v58 = vld [vmem:[#allocation3 + $0xf8] sm:$0xff] }
 0x72f   :  { %7425 = vmatprep.mubr.msk.f32.mxu1 %vm11128_vm15, %v3268_v5  ;;  %7451 = vmatpush3.msk.msra.mxu1 %vm11130_vm3, %v11112_v57  ;;  %vm11145_vm15 = vmmov %vm11108_vm0  ;;  %v3680_v5 = vmul.f32 %v9768_v35, %v3672_v10  ;;  %v3682_v55 = vmul.f32 %v9772_v41, %v3674_v22  ;;  %v4487_v37 = vld [vmem:[#allocation3 + $0x138] sm:$0xff] }
 0x730   :  { %7480 = vmatprep.subr.msk.mxu1 %vm11133_vm11, %v11112_v57  ;;  %v3692_v26 = vsel %vm11145_vm15, %v3684_v43, 0.0  ;;  %vm11148_vm3 = vmmov %vm11108_vm0  ;;  %v3687_v54 = vmul.f32 %v3679_v13, %v3679_v13  ;;  %v4081_v43 = vsub.f32 %v4073_v56, %v11103_v7  ;;  %v4092_v14 = vmul.f32 %v9772_v41, %v4084_v9 }
 0x731   :  { %3286 = vadd.xlane.f32.xlu1 %v3285_v27  ;;  %3289 = vadd.xlane.f32.xlu0 %v3288_v17  ;;  %v3688_v33 = vmul.f32 %v3680_v5, %v3680_v5  ;;  %v11153_v27 = vld [vmem:[#allocation11_spill] sm:$0xff]  ;;  %v4071_v17 = vld [vmem:[#allocation3 + $0xc8] sm:$0xff]  ;;  %v3690_v25 = vmul.f32 %v3682_v55, %v3682_v55  ;;  %vm11158_vm2 = vmmov %vm11108_vm0 }
 0x732   :  { %7426 = vmatmul.mubr.msk.f32.gmra.mrb[48].mxu1 %vm11134_vm6, %v3269_v28  ;;  %v3695_v28 = vsel %vm11149_vm12, %v3685_v0, 0.0  ;;  %vm11150_vm6 = vmmov %vm11108_vm0  ;;  %v3675_v12 = vsub.f32 %v3667_v23, %v11153_v27  ;;  %v4089_v10 = vmul.f32 %v9741_v36, %v4081_v43  ;;  %v4481_v23 = vld [vmem:[#allocation3 + $0x108] sm:$0xff] }
 0x733   :  { %7428 = vmatprep.mubr.msk.f32.mxu1 %vm11135_vm9, %v3270_v1  ;;  %v3698_v15 = vsel %vm11150_vm6, %v3686_v62, 0.0  ;;  %v3681_v1 = vmul.f32 %v9756_v52, %v3673_v59  ;;  %vm11151_vm9 = vmmov %vm11133_vm11  ;;  %v4489_v63 = vsub.f32 %v4481_v23, %v11099_v18 }
 0x734   :  { %vm11161_vm15 = vmmov %vm11108_vm0 }
 0x735   :  { %3292 = vadd.xlane.f32.xlu1 %v3291_v45  ;;  %3295 = vadd.xlane.f32.xlu0 %v3294_v30  ;;  %v3689_v24 = vmul.f32 %v3681_v1, %v3681_v1  ;;  %v3683_v45 = vmul.f32 %v9784_v46, %v3675_v12  ;;  %vm11164_vm12 = vmmov %vm11108_vm0 }
 0x736   :  { %7429 = vmatmul.mubr.msk.f32.gmra.mrb[50].mxu1 %vm11139_vm5, %v3271_v8  ;;  %vm11155_vm5 = vmmov %vm11108_vm0 }
 0x737   :  { %7431 = vmatprep.mubr.msk.f32.mxu1 %vm11140_vm8, %v3272_v51  ;;  %v3701_v8 = vsel %vm11155_vm5, %v3687_v54, 0.0  ;;  %vm11156_vm8 = vmmov %vm11108_vm0  ;;  %v3691_v34 = vmul.f32 %v3683_v45, %v3683_v45 }
 0x738   :  { %v3704_v51 = vsel %vm11156_vm8, %v3688_v33, 0.0  ;;  %vm11166_vm6 = vmmov %vm11108_vm0 }
 0x739   :  { %3298 = vadd.xlane.f32.xlu1 %v3297_v49  ;;  %3301 = vadd.xlane.f32.xlu0 %v3300_v47  ;;  %v4096_v49 = vmul.f32 %v4088_v11, %v4088_v11  ;;  %v4075_v47 = vld [vmem:[#allocation3 + $0xe8] sm:$0xff]  ;;  %vm11170_vm5 = vmmov %vm11108_vm0 }
 0x73a   :  { %7432 = vmatmul.mubr.msk.f32.gmra.mrb[52].mxu1 %vm11143_vm7, %v3273_v48  ;;  %vm11159_vm7 = vmmov %vm11108_vm0 }
 0x73b   :  { %7452 = vmatprep.mubr.msk.f32.mxu1 %vm11144_vm10, %v3676_v44  ;;  %v4079_v44 = vsub.f32 %v4071_v17, %v11099_v18  ;;  %v3707_v48 = vsel %vm11159_vm7, %v3689_v24, 0.0  ;;  %vm11160_vm10 = vmmov %vm11108_vm0  ;;  %v4100_v17 = vmul.f32 %v4092_v14, %v4092_v14  ;;  %v4483_v24 = vld [vmem:[#allocation3 + $0x118] sm:$0xff] }
 0x73c   :  { %v3710_v60 = vsel %vm11160_vm10, %v3690_v25, 0.0  ;;  %vm11171_vm8 = vmmov %vm11108_vm0  ;;  %v4484_v25 = vld [vmem:[#allocation3 + $0x120] sm:$0xff] }
 0x73d   :  { %3304 = vadd.xlane.f32.xlu1 %v3303_v3  ;;  %3693 = vadd.xlane.f32.xlu0 %v3692_v26  ;;  %v4087_v30 = vmul.f32 %v9721_v2, %v4079_v44  ;;  %v4480_v3 = vld [vmem:[#allocation3 + $0x100] sm:$0xff]  ;;  %vm11174_vm7 = vmmov %vm11108_vm0  ;;  %v4492_v56 = vsub.f32 %v4484_v25, %v11114_v39  ;;  %v4896_v25 = vld [vmem:[#allocation3 + $0x170] sm:$0xff] }
 0x73e   :  { %7453 = vmatmul.mubr.msk.f32.vlgmr.msra.gmra.mrb[54].mxu1 %vm11146_vm14, %v3677_v21  ;;  %v4082_v21 = vsub.f32 %v4074_v42, %v11114_v39  ;;  %vm11162_vm14 = vmmov %vm11108_vm0  ;;  %v4488_v54 = vsub.f32 %v4480_v3, %v11100_v50  ;;  %v4485_v42 = vld [vmem:[#allocation3 + $0x128] sm:$0xff]  ;;  %v4495_v3 = vsub.f32 %v4487_v37, %v11153_v27 }
 0x73f   :  { %7455 = vmatprep.mubr.msk.f32.mxu1 %vm11148_vm3, %v3678_v61  ;;  %7481 = vmatpush3.msk.msra.mxu1 %vm11133_vm11, %v11112_v57  ;;  %v4095_v31 = vmul.f32 %v4087_v30, %v4087_v30  ;;  %v3713_v61 = vsel %vm11162_vm14, %v3691_v34, 0.0  ;;  %vm11163_vm3 = vmmov %vm11108_vm0  ;;  %v4486_v34 = vld [vmem:[#allocation3 + $0x130] sm:$0xff] }
 0x740   :  { %7510 = vmatprep.subr.msk.mxu1 %vm11151_vm9, %v11112_v57  ;;  %v4102_v32 = vsel %vm11163_vm3, %v4094_v20, 0.0  ;;  %v4090_v0 = vmul.f32 %v9768_v35, %v4082_v21  ;;  %vm11165_vm11 = vmmov %vm11108_vm0  ;;  %v4496_v33 = vmul.f32 %v9733_v6, %v4488_v54 }
 0x741   :  { %3696 = vadd.xlane.f32.xlu1 %v3695_v28  ;;  %3699 = vadd.xlane.f32.xlu0 %v3698_v15  ;;  %v4105_v26 = vsel %vm11166_vm6, %v4095_v31, 0.0  ;;  %vm11167_vm9 = vmmov %vm11108_vm0  ;;  %v4085_v28 = vsub.f32 %v4077_v58, %v11153_v27  ;;  %v4500_v31 = vmul.f32 %v9768_v35, %v4492_v56 }
 0x742   :  { %7456 = vmatmul.mubr.msk.f32.gmra.mrb[56].mxu1 %vm11152_vm1, %v3679_v13  ;;  %v4083_v13 = vsub.f32 %v4075_v47, %v11107_v16  ;;  %v4108_v62 = vsel %vm11167_vm9, %v4096_v49, 0.0  ;;  %vm11168_vm1 = vcmask 1042432   ;;  %v4098_v59 = vmul.f32 %v4090_v0, %v4090_v0  ;;  %vm11175_vm10 = vmmov %vm11108_vm0 }
 0x743   :  { %7458 = vmatprep.mubr.msk.f32.mxu1 %vm11154_vm4, %v3680_v5  ;;  %v4097_v5 = vmul.f32 %v4089_v10, %v4089_v10  ;;  %vm11169_vm4 = vmmov %vm11168_vm1  ;;  %v4093_v15 = vmul.f32 %v9784_v46, %v4085_v28  ;;  %v4504_v53 = vmul.f32 %v4496_v33, %v4496_v33  ;;  %v4493_v49 = vsub.f32 %v4485_v42, %v11107_v16 }
 0x744   :  { %v4091_v22 = vmul.f32 %v9756_v52, %v4083_v13  ;;  %vm11177_vm14 = vmmov %vm11108_vm0  ;;  %v4494_v47 = vsub.f32 %v4486_v34, %v11147_v4  ;;  %v4508_v9 = vmul.f32 %v4500_v31, %v4500_v31  ;;  %v5300_v34 = vld [vmem:[#allocation3 + $0x180] sm:$0xff] }
 0x745   :  { %3702 = vadd.xlane.f32.xlu1 %v3701_v8  ;;  %3705 = vadd.xlane.f32.xlu0 %v3704_v51  ;;  %v4497_v51 = vmul.f32 %v9721_v2, %v4489_v63  ;;  %vm11178_vm3 = vmmov %vm11108_vm0 }
 0x746   :  { %7459 = vmatmul.mubr.msk.f32.gmra.mrb[58].mxu1 %vm11157_vm13, %v3681_v1  ;;  %v4482_v1 = vld [vmem:[#allocation3 + $0x110] sm:$0xff]  ;;  %vm11172_vm13 = vmmov %vm11108_vm0  ;;  %v4099_v12 = vmul.f32 %v4091_v22, %v4091_v22  ;;  %v4502_v58 = vmul.f32 %v9772_v41, %v4494_v47 }
 0x747   :  { %7461 = vmatprep.mubr.msk.f32.mxu1 %vm11158_vm2, %v3682_v55  ;;  %v4111_v55 = vsel %vm11172_vm13, %v4097_v5, 0.0  ;;  %vm11173_vm2 = vmmov %vm11108_vm0  ;;  %v4490_v8 = vsub.f32 %v4482_v1, %v11105_v38 }
 0x748   :  { %v4114_v29 = vsel %vm11173_vm2, %v4098_v59, 0.0  ;;  %vm11181_vm6 = vmmov %vm11108_vm0  ;;  %v4891_v59 = vld [vmem:[#allocation3 + $0x148] sm:$0xff]  ;;  %v4510_v54 = vmul.f32 %v4502_v58, %v4502_v58 }
 0x749   :  { %3708 = vadd.xlane.f32.xlu1 %v3707_v48  ;;  %3711 = vadd.xlane.f32.xlu0 %v3710_v60  ;;  %v4505_v60 = vmul.f32 %v4497_v51, %v4497_v51  ;;  %vm11182_vm9 = vmmov %vm11108_vm0  ;;  %v4899_v23 = vsub.f32 %v4891_v59, %v11099_v18  ;;  %v5303_v59 = vld [vmem:[#allocation3 + $0x198] sm:$0xff] }
 0x74a   :  { %7462 = vmatmul.mubr.msk.f32.gmra.mrb[60].mxu1 %vm11108_vm0, %v3683_v45  ;;  %v4117_v45 = vsel %vm11108_vm0, %v4099_v12, 0.0  ;;  %vm11186_vm13 = vmmov %vm11108_vm0 }
 0x74b   :  { %7482 = vmatprep.mubr.msk.f32.mxu1 %vm11161_vm15, %v4086_v40  ;;  %v4101_v40 = vmul.f32 %v4093_v15, %v4093_v15  ;;  %vm11176_vm15 = vmmov %vm11108_vm0  ;;  %v4907_v63 = vmul.f32 %v9721_v2, %v4899_v23 }
 0x74c   :  { %v4120_v44 = vsel %vm11176_vm15, %v4100_v17, 0.0  ;;  %vm11187_vm2 = vmmov %vm11108_vm0 }
 0x74d   :  { %3714 = vadd.xlane.f32.xlu1 %v3713_v61  ;;  %4103 = vadd.xlane.f32.xlu0 %v4102_v32  ;;  %v4890_v61 = vld [vmem:[#allocation3 + $0x140] sm:$0xff]  ;;  %vm11190_vm15 = vmmov %vm11108_vm0 }
 0x74e   :  { %7483 = vmatmul.mubr.msk.f32.vlgmr.msra.gmra.mrb[62].mxu1 %vm11164_vm12, %v4087_v30  ;;  %v4498_v30 = vmul.f32 %v9746_v19, %v4490_v8  ;;  %vm11179_vm12 = vmmov %vm11108_vm0 }
 0x74f   :  { %7485 = vmatprep.mubr.msk.f32.mxu1 %vm11165_vm11, %v4088_v11  ;;  %7511 = vmatpush3.msk.msra.mxu1 %vm11168_vm1, %v11112_v57  ;;  %v4491_v11 = vsub.f32 %v4483_v24, %v11103_v7  ;;  %v4123_v48 = vsel %vm11179_vm12, %v4101_v40, 0.0  ;;  %vm11180_vm11 = vmmov %vm11108_vm0  ;;  %v4895_v24 = vld [vmem:[#allocation3 + $0x168] sm:$0xff] }
 0x750   :  { %7540 = vmatprep.subr.msk.mxu1 %vm11169_vm4, %v11112_v57  ;;  %v4512_v20 = vsel %vm11180_vm11, %v4504_v53, 0.0  ;;  %v4506_v43 = vmul.f32 %v4498_v30, %v4498_v30  ;;  %vm11183_vm1 = vmmov %vm11108_vm0  ;;  %v4915_v53 = vmul.f32 %v4907_v63, %v4907_v63  ;;  %v4903_v42 = vsub.f32 %v4895_v24, %v11107_v16 }
 0x751   :  { %4106 = vadd.xlane.f32.xlu1 %v4105_v26  ;;  %4109 = vadd.xlane.f32.xlu0 %v4108_v62  ;;  %v4499_v21 = vmul.f32 %v9741_v36, %v4491_v11  ;;  %v4515_v32 = vsel %vm11183_vm1, %v4505_v60, 0.0  ;;  %v4898_v26 = vsub.f32 %v4890_v61, %v11100_v50  ;;  %v4503_v62 = vmul.f32 %v9784_v46, %v4495_v3  ;;  %vm11193_vm12 = vmmov %vm11108_vm0  ;;  %v4897_v60 = vld [vmem:[#allocation3 + $0x178] sm:$0xff] }
 0x752   :  { %7486 = vmatmul.mubr.msk.f32.gmra.mrb[64].mxu1 %vm11170_vm5, %v4089_v10  ;;  %v4501_v10 = vmul.f32 %v9756_v52, %v4493_v49  ;;  %vm11184_vm5 = vmmov %vm11108_vm0  ;;  %v4905_v61 = vsub.f32 %v4897_v60, %v11153_v27 }
 0x753   :  { %7488 = vmatprep.mubr.msk.f32.mxu1 %vm11171_vm8, %v4090_v0  ;;  %v4518_v0 = vsel %vm11184_vm5, %v4506_v43, 0.0  ;;  %v4507_v13 = vmul.f32 %v4499_v21, %v4499_v21  ;;  %vm11185_vm8 = vmmov %vm11169_vm4  ;;  %v4906_v5 = vmul.f32 %v9733_v6, %v4898_v26  ;;  %v4911_v43 = vmul.f32 %v9756_v52, %v4903_v42  ;;  %v11222_v42 = vld [vmem:[#allocation17_spill] sm:$0xff] }
 0x754   :  { %v4509_v28 = vmul.f32 %v4501_v10, %v4501_v10  ;;  %vm11194_vm11 = vmmov %vm11108_vm0 }
 0x755   :  { %4112 = vadd.xlane.f32.xlu1 %v4111_v55  ;;  %4115 = vadd.xlane.f32.xlu0 %v4114_v29  ;;  %v4914_v1 = vmul.f32 %v4906_v5, %v4906_v5  ;;  %v4893_v55 = vld [vmem:[#allocation3 + $0x158] sm:$0xff]  ;;  %v4894_v29 = vld [vmem:[#allocation3 + $0x160] sm:$0xff]  ;;  %vm11197_vm1 = vmmov %vm11108_vm0  ;;  %v4919_v26 = vmul.f32 %v4911_v43, %v4911_v43 }
 0x756   :  { %7489 = vmatmul.mubr.msk.f32.gmra.mrb[66].mxu1 %vm11174_vm7, %v4091_v22  ;;  %v4892_v22 = vld [vmem:[#allocation3 + $0x150] sm:$0xff]  ;;  %vm11188_vm7 = vmmov %vm11108_vm0  ;;  %v4901_v40 = vsub.f32 %v4893_v55, %v11103_v7 }
 0x757   :  { %7491 = vmatprep.mubr.msk.f32.mxu1 %vm11175_vm10, %v4092_v14  ;;  %v4521_v14 = vsel %vm11188_vm7, %v4507_v13, 0.0  ;;  %vm11189_vm10 = vmmov %vm11108_vm0 }
 0x758   :  { %v4909_v11 = vmul.f32 %v9741_v36, %v4901_v40  ;;  %vm11199_vm5 = vmmov %vm11185_vm8  ;;  %v5307_v40 = vld [vmem:[#allocation3 + $0x1b8] sm:$0xff] }
 0x759   :  { %4118 = vadd.xlane.f32.xlu1 %v4117_v45  ;;  %4121 = vadd.xlane.f32.xlu0 %v4120_v44  ;;  %vm11203_vm7 = vmmov %vm11108_vm0 }
 0x75a   :  { %7492 = vmatmul.mubr.msk.f32.gmra.mrb[68].mxu1 %vm11177_vm14, %v4093_v15  ;;  %v4900_v15 = vsub.f32 %v4892_v22, %v11105_v38  ;;  %vm11191_vm14 = vmmov %vm11108_vm0  ;;  %v4917_v47 = vmul.f32 %v4909_v11, %v4909_v11 }
 0x75b   :  { %7512 = vmatprep.mubr.msk.f32.mxu1 %vm11178_vm3, %v4496_v33  ;;  %v4511_v33 = vmul.f32 %v4503_v62, %v4503_v62  ;;  %v4527_v12 = vsel %vm11191_vm14, %v4509_v28, 0.0  ;;  %vm11192_vm3 = vmmov %vm11108_vm0 }
 0x75c   :  { %v4530_v17 = vsel %vm11192_vm3, %v4510_v54, 0.0  ;;  %v4908_v8 = vmul.f32 %v9746_v19, %v4900_v15  ;;  %vm11206_vm14 = vmmov %vm11108_vm0 }
 0x75d   :  { %4124 = vadd.xlane.f32.xlu1 %v4123_v48  ;;  %4513 = vadd.xlane.f32.xlu0 %v4512_v20  ;;  %v4904_v48 = vsub.f32 %v4896_v25, %v11147_v4  ;;  %v9950_v20 = vld [vmem:[%s10648_s7] sm:$0x7]  ;;  %vm11207_vm3 = vmmov %vm11108_vm0 }
 0x75e   :  { %7513 = vmatmul.mubr.msk.f32.vlgmr.msra.gmra.mrb[70].mxu1 %vm11181_vm6, %v4497_v51  ;;  %v4902_v51 = vsub.f32 %v4894_v29, %v11114_v39  ;;  %vm11195_vm6 = vmmov %vm11108_vm0 }
 0x75f   :  { %7515 = vmatprep.mubr.msk.f32.mxu1 %vm11182_vm9, %v4498_v30  ;;  %7541 = vmatpush3.msk.msra.mxu1 %vm11169_vm4, %v11112_v57  ;;  %v4533_v45 = vsel %vm11195_vm6, %v4511_v33, 0.0  ;;  %vm11196_vm9 = vmmov %vm11108_vm0  ;;  %v4916_v30 = vmul.f32 %v4908_v8, %v4908_v8  ;;  %v5305_v33 = vld [vmem:[#allocation3 + $0x1a8] sm:$0xff] }
 0x760   :  { %7570 = vmatprep.subr.msk.mxu1 %vm11185_vm8, %v11112_v57  ;;  %v4524_v57 = vsel %vm11189_vm10, %v4508_v9, 0.0  ;;  %v4922_v44 = vsel %vm11196_vm9, %v4914_v1, 0.0  ;;  %v4910_v56 = vmul.f32 %v9768_v35, %v4902_v51  ;;  %vm11198_vm4 = vmmov %vm11108_vm0  ;;  %v5302_v9 = vld [vmem:[#allocation3 + $0x190] sm:$0xff] }
 0x761   :  { %4516 = vadd.xlane.f32.xlu1 %v4515_v32  ;;  %4519 = vadd.xlane.f32.xlu0 %v4518_v0  ;;  %vm11200_vm8 = vmmov %vm11108_vm0  ;;  %v5308_v32 = vsub.f32 %v5300_v34, %v11100_v50  ;;  %v4913_v0 = vmul.f32 %v9784_v46, %v4905_v61  ;;  %v5306_v1 = vld [vmem:[#allocation3 + $0x1b0] sm:$0xff] }
 0x762   :  { %7516 = vmatmul.mubr.msk.f32.gmra.mrb[72].mxu1 %vm11186_vm13, %v4499_v21  ;;  %v4912_v21 = vmul.f32 %v9772_v41, %v4904_v48  ;;  %vm11201_vm13 = vmmov %vm11108_vm0  ;;  %v4918_v37 = vmul.f32 %v4910_v56, %v4910_v56  ;;  %v5710_v48 = vmul.f32 %v9733_v6, %v11222_v42 }
 0x763   :  { %7518 = vmatprep.mubr.msk.f32.mxu1 %vm11187_vm2, %v4500_v31  ;;  %v4925_v31 = vsel %vm11200_vm8, %v4915_v53, 0.0  ;;  %v4928_v49 = vsel %vm11201_vm13, %v4916_v30, 0.0  ;;  %vm11202_vm2 = vmmov %vm11199_vm5  ;;  %v5316_v13 = vmul.f32 %v9733_v6, %v5308_v32  ;;  %v4921_v22 = vmul.f32 %v4913_v0, %v4913_v0  ;;  %v2830_v53 = vld [vmem:[%s10649_s8] sm:$0xff]  ;;  %v2831_v30 = vld [vmem:[%s10649_s8 + $0x8] sm:$0x7f] }
 0x764   :  { %vm11204_vm10 = vmmov %vm11108_vm0  ;;  %v11229_v32 = vld [vmem:[#allocation19_spill] sm:$0xff] }
 0x765   :  { %4522 = vadd.xlane.f32.xlu1 %v4521_v14  ;;  %4525 = vadd.xlane.f32.xlu0 %v4524_v57  ;;  %v5304_v57 = vld [vmem:[#allocation3 + $0x1a0] sm:$0xff]  ;;  %v5324_v23 = vmul.f32 %v5316_v13, %v5316_v13  ;;  %vm11210_vm6 = vmmov %vm11108_vm0 }
 0x766   :  { %7519 = vmatmul.mubr.msk.f32.gmra.mrb[74].mxu1 %vm11108_vm0, %v4501_v10  ;;  %v5301_v10 = vld [vmem:[#allocation3 + $0x188] sm:$0xff]  ;;  %vm11211_vm9 = vmmov %vm11108_vm0 }
 0x767   :  { %7521 = vmatprep.mubr.msk.f32.mxu1 %vm11190_vm15, %v4502_v58  ;;  %v4931_v58 = vsel %vm11108_vm0, %v4917_v47, 0.0  ;;  %vm11205_vm15 = vmmov %vm11108_vm0  ;;  %v5309_v50 = vsub.f32 %v5301_v10, %v11099_v18  ;;  %v5311_v18 = vsub.f32 %v5303_v59, %v11103_v7  ;;  %v5313_v7 = vsub.f32 %v5305_v33, %v11107_v16 }
 0x768   :  { %v4934_v3 = vsel %vm11205_vm15, %v4918_v37, 0.0  ;;  %vm11215_vm8 = vmmov %vm11108_vm0  ;;  %v11228_v37 = vld [vmem:[#allocation15_spill] sm:$0xff]  ;;  %v5712_v10 = vmul.f32 %v9746_v19, %v11229_v32 }
 0x769   :  { %4528 = vadd.xlane.f32.xlu1 %v4527_v12  ;;  %4531 = vadd.xlane.f32.xlu0 %v4530_v17  ;;  %v5317_v14 = vmul.f32 %v9721_v2, %v5309_v50  ;;  %v5319_v29 = vmul.f32 %v9741_v36, %v5311_v18  ;;  %vm11216_vm13 = vmmov %vm11108_vm0  ;;  %v5321_v25 = vmul.f32 %v9756_v52, %v5313_v7 }
 0x76a   :  { %7522 = vmatmul.mubr.msk.f32.gmra.mrb[76].mxu1 %vm11193_vm12, %v4503_v62  ;;  %v4920_v62 = vmul.f32 %v4912_v21, %v4912_v21  ;;  %vm11208_vm12 = vmmov %vm11108_vm0  ;;  %v5711_v61 = vmul.f32 %v9721_v2, %v11228_v37 }
 0x76b   :  { %7542 = vmatprep.mubr.msk.f32.mxu1 %vm11194_vm11, %v4906_v5  ;;  %v5310_v5 = vsub.f32 %v5302_v9, %v11105_v38  ;;  %v4937_v28 = vsel %vm11208_vm12, %v4919_v26, 0.0  ;;  %vm11209_vm11 = vmmov %vm11108_vm0  ;;  %v5312_v38 = vsub.f32 %v5304_v57, %v11114_v39  ;;  %v5325_v55 = vmul.f32 %v5317_v14, %v5317_v14 }
 0x76c   :  { %v4940_v54 = vsel %vm11209_vm11, %v4920_v62, 0.0  ;;  %v5314_v39 = vsub.f32 %v5306_v1, %v11147_v4  ;;  %v5327_v24 = vmul.f32 %v5319_v29, %v5319_v29  ;;  %v5315_v4 = vsub.f32 %v5307_v40, %v11153_v27  ;;  %v11235_v62 = vld [vmem:[#allocation21_spill] sm:$0xff] }
 0x76d   :  { %4534 = vadd.xlane.f32.xlu1 %v4533_v45  ;;  %4923 = vadd.xlane.f32.xlu0 %v4922_v44  ;;  %v5318_v15 = vmul.f32 %v9746_v19, %v5310_v5  ;;  %v5335_v51 = vsel %vm11216_vm13, %v5325_v55, 0.0  ;;  %v5719_v9 = vmul.f32 %v5711_v61, %v5711_v61  ;;  %v5714_v2 = vmul.f32 %v9768_v35, %v11235_v62  ;;  %v11238_v19 = vld [vmem:[#allocation20_spill] sm:$0xff]  ;;  %v11239_v5 = vld [vmem:[#allocation22_spill] sm:$0xff] }
 0x76e   :  { %7543 = vmatmul.mubr.msk.f32.vlgmr.msra.gmra.mrb[78].mxu1 %vm11197_vm1, %v4907_v63  ;;  %vm11212_vm1 = vmmov %vm11108_vm0  ;;  %v5322_v45 = vmul.f32 %v9772_v41, %v5314_v39  ;;  %v5323_v27 = vmul.f32 %v9784_v46, %v5315_v4  ;;  %v5715_v50 = vmul.f32 %v9756_v52, %v11238_v19  ;;  %v5716_v59 = vmul.f32 %v9772_v41, %v11239_v5 }
 0x76f   :  { %7545 = vmatprep.mubr.msk.f32.mxu1 %vm11198_vm4, %v4908_v8  ;;  %7571 = vmatpush3.msk.msra.mxu1 %vm11199_vm5, %v9950_v20  ;;  %v4943_v12 = vsel %vm11212_vm1, %v4921_v22, 0.0  ;;  %vm11213_vm4 = vmmov %vm11108_vm0  ;;  %v5326_v63 = vmul.f32 %v5318_v15, %v5318_v15  ;;  %v5320_v8 = vmul.f32 %v9768_v35, %v5312_v38  ;;  %v5722_v57 = vmul.f32 %v5714_v2, %v5714_v2  ;;  %v11244_v35 = vld [vmem:[#allocation23_spill] sm:$0xff] }
 0x770   :  { %7600 = vmatprep.subr.msk.mxu1 %vm11202_vm2, %v9950_v20  ;;  %v5332_v17 = vsel %vm11213_vm4, %v5324_v23, 0.0  ;;  %vm11214_vm5 = vmmov %vm11108_vm0  ;;  %v5331_v6 = vmul.f32 %v5323_v27, %v5323_v27  ;;  %v5723_v41 = vmul.f32 %v5715_v50, %v5715_v50  ;;  %v5724_v23 = vmul.f32 %v5716_v59, %v5716_v59 }
 0x771   :  { %4926 = vadd.xlane.f32.xlu1 %v4925_v31  ;;  %4929 = vadd.xlane.f32.xlu0 %v4928_v49  ;;  %v5328_v16 = vmul.f32 %v5320_v8, %v5320_v8  ;;  %vm11223_vm12 = vmmov %vm11212_vm1  ;;  %v5718_v31 = vmul.f32 %v5710_v48, %v5710_v48  ;;  %v2821_v40 = vmul.f32 %v9950_v20, %v9950_v20 }
 0x772   :  { %7546 = vmatmul.mubr.msk.f32.gmra.mrb[80].mxu1 %vm11203_vm7, %v4909_v11  ;;  %vm11217_vm7 = vmmov %vm11108_vm0  ;;  %vm8081_vm0 = vmmov 1   ;;  %v5341_v60 = vsel %vm11223_vm12, %v5327_v24, 0.0 }
 0x773   :  { %7548 = vmatprep.mubr.msk.f32.mxu1 %vm11204_vm10, %v4910_v56  ;;  %v5338_v44 = vsel %vm11217_vm7, %v5326_v63, 0.0  ;;  %vm3093_vm10 = vcmask 1046528   ;;  %v10006_v56 = vpack.c.bf16 %v2831_v30, %v2830_v53  ;;  %vm11224_vm11 = vmmov %vm11212_vm1 }
 0x774   :  { %vm10001_vm15 = vmpackc.low %vm3093_vm10, %vm8081_vm0  ;;  %v5344_v34 = vsel %vm11224_vm11, %v5328_v16, 0.0 }
 0x775   :  { %4932 = vadd.xlane.f32.xlu1 %v4931_v58  ;;  %4935 = vadd.xlane.f32.xlu0 %v4934_v3  ;;  %vm11227_vm4 = vmmov %vm11212_vm1  ;;  %v5720_v58 = vmul.f32 %v5712_v10, %v5712_v10  ;;  %v11234_v3 = vld [vmem:[#allocation18_spill] sm:$0xff] }
 0x776   :  { %7549 = vmatmul.mubr.msk.f32.gmra.mrb[82].mxu1 %vm11206_vm14, %v4911_v43  ;;  %vm11220_vm14 = vmmov %vm11212_vm1  ;;  %v5329_v43 = vmul.f32 %v5321_v25, %v5321_v25  ;;  %7784 = vmatprep.subr.msk.bf16.mxu0 %vm10001_vm15, %v10006_v56  ;;  %v5713_v26 = vmul.f32 %v9741_v36, %v11234_v3 }
 0x777   :  { %7551 = vmatprep.mubr.msk.f32.mxu1 %vm11207_vm3, %v4912_v21  ;;  %vm11221_vm3 = vmmov %vm11212_vm1  ;;  %v5330_v21 = vmul.f32 %v5322_v45, %v5322_v45  ;;  %7787 = vmatpush3.bf16.msk.msra.mxu0 %vm10001_vm15, %v10006_v56 }
 0x778   :  { %7790 = vmatprep.subr.msk.bf16.mxu0 %vm10001_vm15, %v10006_v56  ;;  %v5347_v49 = vsel %vm11212_vm1, %v5329_v43, 0.0  ;;  %vm11232_vm13 = vmmov %vm11212_vm1  ;;  %v5721_v36 = vmul.f32 %v5713_v26, %v5713_v26 }
 0x779   :  { %4938 = vadd.xlane.f32.xlu1 %v4937_v28  ;;  %4941 = vadd.xlane.f32.xlu0 %v4940_v54  ;;  %v5350_v47 = vsel %vm11227_vm4, %v5330_v21, 0.0  ;;  %vm11236_vm7 = vmmov %vm11212_vm1  ;;  %v5717_v28 = vmul.f32 %v9784_v46, %v11244_v35 }
 0x77a   :  { %7552 = vmatmul.mubr.msk.f32.gmra.mrb[84].mxu1 %vm11210_vm6, %v4913_v0  ;;  %vm11225_vm6 = vmmov %vm11212_vm1  ;;  %v5353_v0 = vsel %vm11232_vm13, %v5331_v6, 0.0 }
 0x77b   :  { %7572 = vmatprep.mubr.msk.f32.mxu1 %vm11211_vm9, %v5316_v13  ;;  %vm11226_vm9 = vmmov %vm11212_vm1  ;;  %v5725_v38 = vmul.f32 %v5717_v28, %v5717_v28 }
 0x77c   :  { %vm11237_vm10 = vmmov %vm11212_vm1 }
 0x77d   :  { %4944 = vadd.xlane.f32.xlu1 %v4943_v12  ;;  %5333 = vadd.xlane.f32.xlu0 %v5332_v17  ;;  %vm11240_vm0 = vmmov %vm11212_vm1 }
 0x77e   :  { %7573 = vmatmul.mubr.msk.f32.vlgmr.msra.gmra.mrb[86].mxu1 %vm11214_vm5, %v5317_v14  ;;  %vm11230_vm5 = vmmov %vm11212_vm1  ;;  %v5729_v22 = vsel %vm11240_vm0, %v5719_v9, 0.0 }
 0x77f   :  { %7575 = vmatprep.mubr.msk.f32.mxu1 %vm11215_vm8, %v5318_v15  ;;  %7601 = vmatpush3.msk.msra.mxu1 %vm11202_vm2, %v9950_v20  ;;  %vm11231_vm8 = vmmov %vm11212_vm1 }
 0x780   :  { %vm11233_vm2 = vmmov %vm11212_vm1 }
 0x781   :  { %5336 = vadd.xlane.f32.xlu1 %v5335_v51  ;;  %5339 = vadd.xlane.f32.xlu0 %v5338_v44  ;;  %v5726_v13 = vsel %vm11233_vm2, %v5718_v31, 0.0  ;;  %vm11243_vm12 = vmmov %vm11240_vm0  ;;  %vm2822_vm2 = vcmask 116736  }
 0x782   :  { %7576 = vmatmul.mubr.msk.f32.gmra.mrb[88].mxu1 %vm11220_vm14, %v5319_v29  ;;  %vm11241_vm14 = vmmov %vm11240_vm0  ;;  %v2823_v24 = vsel %vm2822_vm2, %v2821_v40, 0.0 }
 0x783   :  { %7578 = vmatprep.mubr.msk.f32.mxu1 %vm11221_vm3, %v5320_v8  ;;  %v5732_v14 = vsel %vm11241_vm14, %v5720_v58, 0.0  ;;  %vm11242_vm3 = vmmov %vm11240_vm0 }
 0x784   :  { %vm11245_vm11 = vmmov %vm11240_vm0 }
 0x785   :  { %5342 = vadd.xlane.f32.xlu1 %v5341_v60  ;;  %5345 = vadd.xlane.f32.xlu0 %v5344_v34  ;;  %v5735_v52 = vsel %vm11245_vm11, %v5721_v36, 0.0  ;;  %vm11248_vm1 = vmmov %vm11240_vm0 }
 0x786   :  { %7579 = vmatmul.mubr.msk.f32.gmra.mrb[90].mxu1 %vm11225_vm6, %v5321_v25  ;;  %vm11246_vm6 = vmmov %vm11240_vm0 }
 0x787   :  { %7581 = vmatprep.mubr.msk.f32.mxu1 %vm11226_vm9, %v5322_v45  ;;  %v5738_v54 = vsel %vm11246_vm6, %v5722_v57, 0.0  ;;  %vm11247_vm9 = vmmov %vm11240_vm0  ;;  %v2824_v45 = vrot.slane %v2823_v24, 4 }
 0x788   :  { %vm11249_vm4 = vmmov %vm11240_vm0 }
 0x789   :  { %5348 = vadd.xlane.f32.xlu1 %v5347_v49  ;;  %5351 = vadd.xlane.f32.xlu0 %v5350_v47  ;;  %v5741_v15 = vsel %vm11249_vm4, %v5723_v41, 0.0  ;;  %vm11252_vm13 = vmmov %vm11240_vm0  ;;  %v2825_v4 = vadd.f32 %v2824_v45, %v2823_v24 }
 0x78a   :  { %7582 = vmatmul.mubr.msk.f32.gmra.mrb[92].mxu1 %vm11230_vm5, %v5323_v27  ;;  %vm11250_vm5 = vmmov %vm11240_vm0  ;;  %v5747_v46 = vsel %vm11252_vm13, %v5725_v38, 0.0 }
 0x78b   :  { %7602 = vmatprep.mubr.msk.f32.mxu1 %vm11231_vm8, %v5710_v48  ;;  %v5744_v18 = vsel %vm11250_vm5, %v5724_v23, 0.0  ;;  %vm11251_vm8 = vmmov %vm11240_vm0  ;;  %v2826_v53 = vrot.slane %v2825_v4, 2 }
 0x78d   :  { %5354 = vadd.xlane.f32.xlu1 %v5353_v0  ;;  %5727 = vadd.xlane.f32.xlu0 %v5726_v13  ;;  %v2827_v42 = vadd.f32 %v2826_v53, %v2825_v4 }
 0x78e   :  { %7603 = vmatmul.mubr.msk.f32.vlgmr.msra.gmra.mrb[94].mxu1 %vm11236_vm7, %v5711_v61  ;;  %vm3068_vm7 = vcmask 121856  }
 0x78f   :  { %7605 = vmatprep.mubr.msk.f32.mxu1 %vm11237_vm10, %v5712_v10  ;;  %v2828_v60 = vrot.slane %v2827_v42, 1 }
 0x791   :  { %5730 = vadd.xlane.f32.xlu1 %v5729_v22  ;;  %5733 = vadd.xlane.f32.xlu0 %v5732_v14  ;;  %v10085_v34 = vadd.f32 %v2828_v60, %v2827_v42 }
 0x792   :  { %7606 = vmatmul.mubr.msk.f32.gmra.mrb[96].mxu1 %vm11242_vm3, %v5713_v26 }
 0x793   :  { %7608 = vmatprep.mubr.msk.f32.mxu1 %vm11243_vm12, %v5714_v2 }
 0x795   :  { %5736 = vadd.xlane.f32.xlu1 %v5735_v52  ;;  %5739 = vadd.xlane.f32.xlu0 %v5738_v54 }
 0x796   :  { %7609 = vmatmul.mubr.msk.f32.gmra.mrb[98].mxu1 %vm11247_vm9, %v5715_v50 }
 0x797   :  { %7611 = vmatprep.mubr.msk.f32.mxu1 %vm11248_vm1, %v5716_v59 }
 0x799   :  { %5742 = vadd.xlane.f32.xlu1 %v5741_v15  ;;  %5745 = vadd.xlane.f32.xlu0 %v5744_v18 }
 0x79a   :  { %7612 = vmatmul.mubr.msk.f32.gmra.mrb[100].mxu1 %vm11251_vm8, %v5717_v28 }
 0x79d   :  { %5748 = vadd.xlane.f32.xlu1 %v5747_v46 }
 0x7a2   :  { %v2869_v1 = vpop.xlane.xlu1 %2868 }
 0x7a3   :  { %v3021_v31 = vadd.f32 %v2869_v1, %v10085_v34 }
 0x7a6   :  { %v2866_v33 = vpop.xlane.xlu0 %2865 }
 0x7a7   :  { %v3020_v37 = vadd.f32 %v2866_v33, %v10085_v34 }
 0x7aa   :  { %v2875_v55 = vpop.xlane.xlu1 %2874 }
 0x7ab   :  { %v2872_v29 = vpop.xlane.xlu0 %2871  ;;  %v3023_v3 = vadd.f32 %v2875_v55, %v10085_v34 }
 0x7ac   :  { %v3022_v19 = vadd.f32 %v2872_v29, %v10085_v34 }
 0x7ae   :  { %v2881_v17 = vpop.xlane.xlu1 %2880 }
 0x7af   :  { %v3025_v41 = vadd.f32 %v2881_v17, %v10085_v34 }
 0x7b2   :  { %v2878_v12 = vpop.xlane.xlu0 %2877 }
 0x7b3   :  { %v3024_v38 = vadd.f32 %v2878_v12, %v10085_v34 }
 0x7b6   :  { %v10061_v8 = vpop.xlane.xlu0 %2883 }
 0x7ba   :  { %v10059_v63 = vpop.xlane.xlu1 %2886  ;;  %v10065_v39 = vpop.xlane.xlu0 %3283 }
 0x7bb   :  { %v3027_v53 = vadd.f32 %v10059_v63, %v10085_v34 }
 0x7be   :  { %v10063_v7 = vpop.xlane.xlu1 %3286  ;;  %v10071_v25 = vpop.xlane.xlu0 %3289 }
 0x7c2   :  { %v10069_v51 = vpop.xlane.xlu1 %3292  ;;  %v10075_v16 = vpop.xlane.xlu0 %3295 }
 0x7c6   :  { %v10073_v44 = vpop.xlane.xlu1 %3298  ;;  %v10079_v27 = vpop.xlane.xlu0 %3301 }
 0x7ca   :  { %v10077_v30 = vpop.xlane.xlu1 %3304  ;;  %v10083_v20 = vpop.xlane.xlu0 %3693 }
 0x7ce   :  { %v10081_v48 = vpop.xlane.xlu1 %3696  ;;  %v10089_v21 = vpop.xlane.xlu0 %3699 }
 0x7d2   :  { %v10087_v43 = vpop.xlane.xlu1 %3702  ;;  %v10095_v0 = vpop.xlane.xlu0 %3705 }
 0x7d6   :  { %v10093_v32 = vpop.xlane.xlu1 %3708  ;;  %v10101_v57 = vpop.xlane.xlu0 %3711 }
 0x7da   :  { %v10099_v14 = vpop.xlane.xlu1 %3714  ;;  %v10107_v55 = vpop.xlane.xlu0 %4103 }
 0x7de   :  { %v10105_v33 = vpop.xlane.xlu1 %4106 }
 0x7ea   :  { %v7394_v6 = vpop.f32.mrb[40].mxu0 }
 0x7eb   :  { %v3029_v49 = vmul.f32 2.0, %v7394_v6  ;;  %v2981_v47 = vpop.f32.mrb[41].mxu0 }
 0x7ec   :  { %v3028_v61 = vmul.f32 2.0, %v2981_v47 }
 0x7ed   :  { %v3037_v10 = vsub.f32 %v3021_v31, %v3029_v49  ;;  %v3026_v31 = vadd.f32 %v10061_v8, %v10085_v34  ;;  %v10113_v49 = vpop.xlane.xlu1 %4112  ;;  %v3436_v8 = vadd.f32 %v10063_v7, %v10085_v34  ;;  %v6807_v7 = vld [vmem:[%s10650_s9] ss:$0 sm:$0xff] }
 0x7ee   :  { %v3036_v13 = vsub.f32 %v3020_v37, %v3028_v61  ;;  %v10116_v37 = vpop.xlane.xlu0 %4109  ;;  %6110 = vrot.lane.b32.xlu0 %v6807_v7, %s8080_s5 }
 0x7ef   :  { %v3045_v9 = vmul.f32 -5.5555553, %v3037_v10  ;;  %v7397_v58 = vpop.f32.mrb[40].mxu1 }
 0x7f0   :  { %v3044_v26 = vmul.f32 -5.5555553, %v3036_v13  ;;  %v3031_v62 = vmul.f32 2.0, %v7397_v58  ;;  %v2991_v2 = vpop.f32.mrb[41].mxu1 }
 0x7f1   :  { %v3054_v50 = vmul.f32 1.442695, %v3045_v9  ;;  %v3030_v5 = vmul.f32 2.0, %v2991_v2 }
 0x7f2   :  { %v3052_v59 = vmul.f32 1.442695, %v3044_v26  ;;  %v3039_v22 = vsub.f32 %v3023_v3, %v3031_v62  ;;  %v3435_v26 = vadd.f32 %v10065_v39, %v10085_v34  ;;  %v3438_v39 = vadd.f32 %v10069_v51, %v10085_v34 }
 0x7f3   :  { %v3038_v36 = vsub.f32 %v3022_v19, %v3030_v5  ;;  %v3440_v51 = vadd.f32 %v10073_v44, %v10085_v34 }
 0x7f4   :  { %7874 = vpow2.f32 %v3052_v59  ;;  %v3047_v35 = vmul.f32 -5.5555553, %v3039_v22  ;;  %v10133_v59 = vpop.xlane.xlu1 %4118 }
 0x7f5   :  { %7876 = vpow2.f32 %v3054_v50  ;;  %v3046_v28 = vmul.f32 -5.5555553, %v3038_v36 }
 0x7f6   :  { %v3058_v52 = vmul.f32 1.442695, %v3047_v35  ;;  %v7400_v54 = vpop.f32.mrb[42].mxu1 }
 0x7f7   :  { %v3056_v23 = vmul.f32 1.442695, %v3046_v28  ;;  %v3033_v15 = vmul.f32 2.0, %v7400_v54  ;;  %v3001_v18 = vpop.f32.mrb[43].mxu1  ;;  %v10139_v28 = vpop.xlane.xlu0 %4115 }
 0x7f8   :  { %v3032_v46 = vmul.f32 2.0, %v3001_v18 }
 0x7f9   :  { %7878 = vpow2.f32 %v3056_v23  ;;  %v3041_v1 = vsub.f32 %v3025_v41, %v3033_v15  ;;  %v3437_v23 = vadd.f32 %v10071_v25, %v10085_v34  ;;  %v3439_v25 = vadd.f32 %v10075_v16, %v10085_v34 }
 0x7fa   :  { %7880 = vpow2.f32 %v3058_v52  ;;  %v3040_v29 = vsub.f32 %v3024_v38, %v3032_v46  ;;  %v3442_v16 = vadd.f32 %v10077_v30, %v10085_v34  ;;  %v3846_v30 = vadd.f32 %v10081_v48, %v10085_v34 }
 0x7fb   :  { %v3049_v40 = vmul.f32 -5.5555553, %v3041_v1 }
 0x7fc   :  { %v3048_v24 = vmul.f32 -5.5555553, %v3040_v29 }
 0x7fd   :  { %v3062_v45 = vmul.f32 1.442695, %v3049_v40  ;;  %v7403_v4 = vpop.f32.mrb[44].mxu1 }
 0x7fe   :  { %v7875_v17 = vpop.eup %7874  ;;  %v3060_v42 = vmul.f32 1.442695, %v3048_v24  ;;  %v3035_v12 = vmul.f32 2.0, %v7403_v4  ;;  %v3011_v60 = vpop.f32.mrb[45].mxu1 }
 0x7ff   :  { %v7877_v6 = vpop.eup %7876  ;;  %v3034_v47 = vmul.f32 2.0, %v3011_v60  ;;  %7408 = vmatprep.mubr.msk.f32.mxu0 %vm3068_vm7, %v7875_v17 }
 0x800   :  { %7882 = vpow2.f32 %v3060_v42  ;;  %v3043_v61 = vsub.f32 %v3027_v53, %v3035_v12  ;;  %7409 = vmatmul.mubr.msk.f32.vlgmr.msra.gmra.mrb[42].mxu0 %vm3068_vm7, %v7877_v6  ;;  %v10147_v42 = vpop.xlane.xlu1 %4124  ;;  %v10150_v6 = vpop.xlane.xlu0 %4121 }
 0x801   :  { %7884 = vpow2.f32 %v3062_v45  ;;  %v3042_v63 = vsub.f32 %v3026_v31, %v3034_v47  ;;  %v7424_v10 = vpop.f32.mrb[46].mxu1  ;;  %7793 = vmatpush3.bf16.msk.msra.mxu0 %vm10001_vm15, %v10006_v56 }
 0x802   :  { %v3051_v13 = vmul.f32 -5.5555553, %v3043_v61  ;;  %v3444_v9 = vmul.f32 2.0, %v7424_v10  ;;  %v3396_v58 = vpop.f32.mrb[47].mxu1  ;;  %7796 = vmatprep.subr.msk.bf16.mxu0 %vm10001_vm15, %v10006_v56 }
 0x803   :  { %v7879_v3 = vpop.eup %7878  ;;  %v3050_v62 = vmul.f32 -5.5555553, %v3042_v63  ;;  %v3443_v2 = vmul.f32 2.0, %v3396_v58 }
 0x804   :  { %v7881_v19 = vpop.eup %7880  ;;  %v3066_v50 = vmul.f32 1.442695, %v3051_v13  ;;  %v3452_v5 = vsub.f32 %v3436_v8, %v3444_v9  ;;  %7411 = vmatprep.mubr.msk.f32.mxu0 %vm3068_vm7, %v7879_v3  ;;  %v3441_v9 = vadd.f32 %v10079_v27, %v10085_v34 }
 0x805   :  { %v3064_v22 = vmul.f32 1.442695, %v3050_v62  ;;  %v3451_v36 = vsub.f32 %v3435_v26, %v3443_v2  ;;  %7412 = vmatmul.mubr.msk.f32.gmra.mrb[44].mxu0 %vm3068_vm7, %v7881_v19  ;;  %v7427_v35 = vpop.f32.mrb[48].mxu1  ;;  %v10157_v19 = vpop.xlane.xlu1 %4516 }
 0x806   :  { %v3460_v52 = vmul.f32 -5.5555553, %v3452_v5  ;;  %v3446_v54 = vmul.f32 2.0, %v7427_v35  ;;  %v3406_v41 = vpop.f32.mrb[49].mxu1 }
 0x807   :  { %7886 = vpow2.f32 %v3064_v22  ;;  %v3459_v15 = vmul.f32 -5.5555553, %v3451_v36  ;;  %v3445_v18 = vmul.f32 2.0, %v3406_v41  ;;  %v10161_v36 = vpop.xlane.xlu0 %4513 }
 0x808   :  { %7888 = vpow2.f32 %v3066_v50  ;;  %v3469_v38 = vmul.f32 1.442695, %v3460_v52  ;;  %v3454_v46 = vsub.f32 %v3438_v39, %v3446_v54  ;;  %v3845_v52 = vadd.f32 %v10083_v20, %v10085_v34 }
 0x809   :  { %v3467_v1 = vmul.f32 1.442695, %v3459_v15  ;;  %v3453_v29 = vsub.f32 %v3437_v23, %v3445_v18  ;;  %v7430_v40 = vpop.f32.mrb[50].mxu1 }
 0x80a   :  { %v7883_v24 = vpop.eup %7882  ;;  %v3462_v45 = vmul.f32 -5.5555553, %v3454_v46  ;;  %v3448_v4 = vmul.f32 2.0, %v7430_v40  ;;  %v3416_v17 = vpop.f32.mrb[51].mxu1 }
 0x80b   :  { %v7885_v53 = vpop.eup %7884  ;;  %7890 = vpow2.f32 %v3467_v1  ;;  %v3461_v12 = vmul.f32 -5.5555553, %v3453_v29  ;;  %v3447_v60 = vmul.f32 2.0, %v3416_v17  ;;  %7414 = vmatprep.mubr.msk.f32.mxu0 %vm3068_vm7, %v7883_v24  ;;  %v3848_v29 = vadd.f32 %v10087_v43, %v10085_v34 }
 0x80c   :  { %7892 = vpow2.f32 %v3469_v38  ;;  %v3473_v31 = vmul.f32 1.442695, %v3462_v45  ;;  %v3456_v47 = vsub.f32 %v3440_v51, %v3448_v4  ;;  %7415 = vmatmul.mubr.msk.f32.gmra.mrb[46].mxu0 %vm3068_vm7, %v7885_v53  ;;  %v3847_v51 = vadd.f32 %v10089_v21, %v10085_v34  ;;  %v10172_v45 = vpop.xlane.xlu1 %4522  ;;  %v10175_v53 = vpop.xlane.xlu0 %4519 }
 0x80d   :  { %v3471_v44 = vmul.f32 1.442695, %v3461_v12  ;;  %v3455_v61 = vsub.f32 %v3439_v25, %v3447_v60  ;;  %v7433_v63 = vpop.f32.mrb[52].mxu1 }
 0x80e   :  { %v3464_v10 = vmul.f32 -5.5555553, %v3456_v47  ;;  %v3450_v8 = vmul.f32 2.0, %v7433_v63  ;;  %v3426_v13 = vpop.f32.mrb[53].mxu1 }
 0x80f   :  { %7894 = vpow2.f32 %v3471_v44  ;;  %v3463_v58 = vmul.f32 -5.5555553, %v3455_v61  ;;  %v3449_v3 = vmul.f32 2.0, %v3426_v13  ;;  %v3850_v44 = vadd.f32 %v10093_v32, %v10085_v34 }
 0x810   :  { %7896 = vpow2.f32 %v3473_v31  ;;  %v3477_v26 = vmul.f32 1.442695, %v3464_v10  ;;  %v3458_v62 = vsub.f32 %v3442_v16, %v3450_v8  ;;  %v3849_v10 = vadd.f32 %v10095_v0, %v10085_v34 }
 0x811   :  { %v7887_v2 = vpop.eup %7886  ;;  %v3475_v50 = vmul.f32 1.442695, %v3463_v58  ;;  %v3457_v5 = vsub.f32 %v3441_v9, %v3449_v3  ;;  %v7454_v7 = vpop.f32.mrb[54].mxu1 }
 0x812   :  { %v7889_v22 = vpop.eup %7888  ;;  %v3466_v35 = vmul.f32 -5.5555553, %v3458_v62  ;;  %v3854_v27 = vmul.f32 2.0, %v7454_v7  ;;  %7417 = vmatprep.mubr.msk.f32.mxu0 %vm3068_vm7, %v7887_v2  ;;  %v3806_v39 = vpop.f32.mrb[55].mxu1 }
 0x813   :  { %7898 = vpow2.f32 %v3475_v50  ;;  %v3465_v54 = vmul.f32 -5.5555553, %v3457_v5  ;;  %v3853_v41 = vmul.f32 2.0, %v3806_v39  ;;  %7418 = vmatmul.mubr.msk.f32.gmra.mrb[48].mxu0 %vm3068_vm7, %v7889_v22  ;;  %v3852_v5 = vadd.f32 %v10099_v14, %v10085_v34  ;;  %v10193_v7 = vpop.xlane.xlu0 %4525 }
 0x814   :  { %7900 = vpow2.f32 %v3477_v26  ;;  %v3481_v23 = vmul.f32 1.442695, %v3466_v35  ;;  %v3862_v15 = vsub.f32 %v3846_v30, %v3854_v27  ;;  %v10189_v26 = vpop.xlane.xlu1 %4528  ;;  %v3851_v35 = vadd.f32 %v10101_v57, %v10085_v34 }
 0x815   :  { %v7891_v18 = vpop.eup %7890  ;;  %v3479_v48 = vmul.f32 1.442695, %v3465_v54  ;;  %v3861_v38 = vsub.f32 %v3845_v52, %v3853_v41  ;;  %v7457_v46 = vpop.f32.mrb[56].mxu1 }
 0x816   :  { %v7893_v1 = vpop.eup %7892  ;;  %v3870_v40 = vmul.f32 -5.5555553, %v3862_v15  ;;  %v3856_v24 = vmul.f32 2.0, %v7457_v46  ;;  %7438 = vmatprep.mubr.msk.f32.mxu0 %vm3068_vm7, %v7891_v18  ;;  %v3816_v20 = vpop.f32.mrb[57].mxu1 }
 0x817   :  { %7902 = vpow2.f32 %v3479_v48  ;;  %v3869_v4 = vmul.f32 -5.5555553, %v3861_v38  ;;  %v3855_v17 = vmul.f32 2.0, %v3816_v20  ;;  %7439 = vmatmul.mubr.msk.f32.vlgmr.msra.gmra.mrb[50].mxu0 %vm3068_vm7, %v7893_v1  ;;  %v4256_v48 = vadd.f32 %v10105_v33, %v10085_v34  ;;  %v10207_v20 = vpop.xlane.xlu0 %4531 }
 0x818   :  { %7904 = vpow2.f32 %v3481_v23  ;;  %v3879_v25 = vmul.f32 1.442695, %v3870_v40  ;;  %v3864_v43 = vsub.f32 %v3848_v29, %v3856_v24  ;;  %7799 = vmatpush3.bf16.msk.msra.mxu0 %vm10001_vm15, %v10006_v56  ;;  %v4255_v1 = vadd.f32 %v10107_v55, %v10085_v34  ;;  %v10204_v29 = vpop.xlane.xlu1 %4534 }
 0x819   :  { %v7895_v12 = vpop.eup %7894  ;;  %v3877_v60 = vmul.f32 1.442695, %v3869_v4  ;;  %v3863_v31 = vsub.f32 %v3847_v51, %v3855_v17  ;;  %v7460_v21 = vpop.f32.mrb[58].mxu1  ;;  %7802 = vmatprep.subr.msk.bf16.mxu0 %vm10001_vm15, %v10006_v56  ;;  %v4258_v55 = vadd.f32 %v10113_v49, %v10085_v34 }
 0x81a   :  { %v7897_v47 = vpop.eup %7896  ;;  %v3872_v61 = vmul.f32 -5.5555553, %v3864_v43  ;;  %v3858_v63 = vmul.f32 2.0, %v7460_v21  ;;  %7441 = vmatprep.mubr.msk.f32.mxu0 %vm3068_vm7, %v7895_v12  ;;  %v3826_v16 = vpop.f32.mrb[59].mxu1 }
 0x81b   :  { %7906 = vpow2.f32 %v3877_v60  ;;  %v3871_v8 = vmul.f32 -5.5555553, %v3863_v31  ;;  %v3857_v13 = vmul.f32 2.0, %v3826_v16  ;;  %7442 = vmatmul.mubr.msk.f32.gmra.mrb[52].mxu0 %vm3068_vm7, %v7897_v47  ;;  %v4257_v47 = vadd.f32 %v10116_v37, %v10085_v34 }
 0x81c   :  { %7908 = vpow2.f32 %v3879_v25  ;;  %v3883_v9 = vmul.f32 1.442695, %v3872_v61  ;;  %v3866_v58 = vsub.f32 %v3850_v44, %v3858_v63 }
 0x81d   :  { %v7899_v3 = vpop.eup %7898  ;;  %v3881_v32 = vmul.f32 1.442695, %v3871_v8  ;;  %v3865_v62 = vsub.f32 %v3849_v10, %v3857_v13  ;;  %v7463_v2 = vpop.f32.mrb[60].mxu1 }
 0x81e   :  { %v7901_v50 = vpop.eup %7900  ;;  %v3874_v0 = vmul.f32 -5.5555553, %v3866_v58  ;;  %v3860_v22 = vmul.f32 2.0, %v7463_v2  ;;  %7444 = vmatprep.mubr.msk.f32.mxu0 %vm3068_vm7, %v7899_v3  ;;  %v3836_v30 = vpop.f32.mrb[61].mxu1  ;;  %v4260_v58 = vadd.f32 %v10133_v59, %v10085_v34 }
 0x81f   :  { %7910 = vpow2.f32 %v3881_v32  ;;  %v3873_v27 = vmul.f32 -5.5555553, %v3865_v62  ;;  %v3859_v39 = vmul.f32 2.0, %v3836_v30  ;;  %7445 = vmatmul.mubr.msk.f32.gmra.mrb[54].mxu0 %vm3068_vm7, %v7901_v50  ;;  %v10218_v10 = vpop.xlane.xlu1 %4926  ;;  %v10225_v3 = vpop.xlane.xlu0 %4923  ;;  %v4259_v50 = vadd.f32 %v10139_v28, %v10085_v34 }
 0x820   :  { %7912 = vpow2.f32 %v3883_v9  ;;  %v3887_v52 = vmul.f32 1.442695, %v3874_v0  ;;  %v3868_v54 = vsub.f32 %v3852_v5, %v3860_v22 }
 0x821   :  { %v7903_v41 = vpop.eup %7902  ;;  %v3885_v14 = vmul.f32 1.442695, %v3873_v27  ;;  %v3867_v23 = vsub.f32 %v3851_v35, %v3859_v39  ;;  %v7484_v15 = vpop.f32.mrb[62].mxu1 }
 0x822   :  { %v7905_v18 = vpop.eup %7904  ;;  %v3876_v38 = vmul.f32 -5.5555553, %v3868_v54  ;;  %v4264_v46 = vmul.f32 2.0, %v7484_v15  ;;  %7447 = vmatprep.mubr.msk.f32.mxu0 %vm3068_vm7, %v7903_v41  ;;  %v4216_v57 = vpop.f32.mrb[63].mxu1  ;;  %v4262_v54 = vadd.f32 %v10147_v42, %v10085_v34 }
 0x823   :  { %7914 = vpow2.f32 %v3885_v14  ;;  %v3875_v40 = vmul.f32 -5.5555553, %v3867_v23  ;;  %v4263_v24 = vmul.f32 2.0, %v4216_v57  ;;  %7448 = vmatmul.mubr.msk.f32.gmra.mrb[56].mxu0 %vm3068_vm7, %v7905_v18  ;;  %v4261_v23 = vadd.f32 %v10150_v6, %v10085_v34  ;;  %v10236_v15 = vpop.xlane.xlu1 %4932 }
 0x824   :  { %7916 = vpow2.f32 %v3887_v52  ;;  %v3891_v51 = vmul.f32 1.442695, %v3876_v38  ;;  %v4272_v33 = vsub.f32 %v4256_v48, %v4264_v46  ;;  %v10239_v38 = vpop.xlane.xlu0 %4929  ;;  %v4666_v6 = vadd.f32 %v10157_v19, %v10085_v34 }
 0x825   :  { %v7907_v4 = vpop.eup %7906  ;;  %v3889_v17 = vmul.f32 1.442695, %v3875_v40  ;;  %v4271_v25 = vsub.f32 %v4255_v1, %v4263_v24  ;;  %v7487_v43 = vpop.f32.mrb[64].mxu1 }
 0x826   :  { %v7909_v12 = vpop.eup %7908  ;;  %v4280_v60 = vmul.f32 -5.5555553, %v4272_v33  ;;  %v4266_v31 = vmul.f32 2.0, %v7487_v43  ;;  %7468 = vmatprep.mubr.msk.f32.mxu0 %vm3068_vm7, %v7907_v4  ;;  %v4226_v21 = vpop.f32.mrb[65].mxu1 }
 0x827   :  { %7918 = vpow2.f32 %v3889_v17  ;;  %v4279_v44 = vmul.f32 -5.5555553, %v4271_v25  ;;  %v4265_v61 = vmul.f32 2.0, %v4226_v21  ;;  %7469 = vmatmul.mubr.msk.f32.vlgmr.msra.gmra.mrb[58].mxu0 %vm3068_vm7, %v7909_v12  ;;  %v4665_v25 = vadd.f32 %v10161_v36, %v10085_v34  ;;  %v10247_v21 = vpop.xlane.xlu1 %4938 }
 0x828   :  { %7920 = vpow2.f32 %v3891_v51  ;;  %v4289_v63 = vmul.f32 1.442695, %v4280_v60  ;;  %v4274_v16 = vsub.f32 %v4258_v55, %v4266_v31  ;;  %7805 = vmatpush3.bf16.msk.msra.mxu0 %vm10001_vm15, %v10006_v56 }
 0x829   :  { %v7911_v49 = vpop.eup %7910  ;;  %v4287_v8 = vmul.f32 1.442695, %v4279_v44  ;;  %v4273_v13 = vsub.f32 %v4257_v47, %v4265_v61  ;;  %v7490_v9 = vpop.f32.mrb[66].mxu1  ;;  %7808 = vmatprep.subr.msk.bf16.mxu0 %vm10001_vm15, %v10006_v56 }
 0x82a   :  { %v7913_v37 = vpop.eup %7912  ;;  %v4282_v32 = vmul.f32 -5.5555553, %v4274_v16  ;;  %v4268_v62 = vmul.f32 2.0, %v7490_v9  ;;  %7471 = vmatprep.mubr.msk.f32.mxu0 %vm3068_vm7, %v7911_v49  ;;  %v4236_v2 = vpop.f32.mrb[67].mxu1 }
 0x82b   :  { %7922 = vpow2.f32 %v4287_v8  ;;  %v4281_v5 = vmul.f32 -5.5555553, %v4273_v13  ;;  %v4267_v0 = vmul.f32 2.0, %v4236_v2  ;;  %7472 = vmatmul.mubr.msk.f32.gmra.mrb[60].mxu0 %vm3068_vm7, %v7913_v37  ;;  %v10251_v16 = vpop.xlane.xlu0 %4935  ;;  %v4667_v13 = vadd.f32 %v10175_v53, %v10085_v34 }
 0x82c   :  { %7924 = vpow2.f32 %v4289_v63  ;;  %v4293_v22 = vmul.f32 1.442695, %v4282_v32  ;;  %v4276_v30 = vsub.f32 %v4260_v58, %v4268_v62  ;;  %v4668_v63 = vadd.f32 %v10172_v45, %v10085_v34 }
 0x82d   :  { %v7915_v35 = vpop.eup %7914  ;;  %v4291_v59 = vmul.f32 1.442695, %v4281_v5  ;;  %v4275_v27 = vsub.f32 %v4259_v50, %v4267_v0  ;;  %v7493_v39 = vpop.f32.mrb[68].mxu1  ;;  %v4670_v5 = vadd.f32 %v10189_v26, %v10085_v34 }
 0x82e   :  { %v7917_v52 = vpop.eup %7916  ;;  %v4284_v41 = vmul.f32 -5.5555553, %v4276_v30  ;;  %v4270_v14 = vmul.f32 2.0, %v7493_v39  ;;  %7474 = vmatprep.mubr.msk.f32.mxu0 %vm3068_vm7, %v7915_v35  ;;  %v4246_v28 = vpop.f32.mrb[69].mxu1  ;;  %v4669_v35 = vadd.f32 %v10193_v7, %v10085_v34  ;;  %v4672_v7 = vadd.f32 %v10204_v29, %v10085_v34 }
 0x82f   :  { %7926 = vpow2.f32 %v4291_v59  ;;  %v4283_v18 = vmul.f32 -5.5555553, %v4275_v27  ;;  %v4269_v48 = vmul.f32 2.0, %v4246_v28  ;;  %7475 = vmatmul.mubr.msk.f32.gmra.mrb[62].mxu0 %vm3068_vm7, %v7917_v52  ;;  %v10268_v59 = vpop.xlane.xlu1 %4944  ;;  %v10271_v52 = vpop.xlane.xlu0 %4941 }
 0x830   :  { %7928 = vpow2.f32 %v4293_v22  ;;  %v4297_v46 = vmul.f32 1.442695, %v4284_v41  ;;  %v4278_v42 = vsub.f32 %v4262_v54, %v4270_v14 }
 0x831   :  { %v7919_v57 = vpop.eup %7918  ;;  %v4295_v1 = vmul.f32 1.442695, %v4283_v18  ;;  %v4277_v40 = vsub.f32 %v4261_v23, %v4269_v48  ;;  %v7514_v24 = vpop.f32.mrb[70].mxu1 }
 0x832   :  { %v7921_v51 = vpop.eup %7920  ;;  %v4286_v33 = vmul.f32 -5.5555553, %v4278_v42  ;;  %v4674_v4 = vmul.f32 2.0, %v7514_v24  ;;  %7477 = vmatprep.mubr.msk.f32.mxu0 %vm3068_vm7, %v7919_v57  ;;  %v4626_v17 = vpop.f32.mrb[71].mxu1  ;;  %v4671_v57 = vadd.f32 %v10207_v20, %v10085_v34 }
 0x833   :  { %7930 = vpow2.f32 %v4295_v1  ;;  %v4285_v43 = vmul.f32 -5.5555553, %v4277_v40  ;;  %v4673_v12 = vmul.f32 2.0, %v4626_v17  ;;  %7478 = vmatmul.mubr.msk.f32.gmra.mrb[64].mxu0 %vm3068_vm7, %v7921_v51 }
 0x834   :  { %7932 = vpow2.f32 %v4297_v46  ;;  %v4301_v55 = vmul.f32 1.442695, %v4286_v33  ;;  %v4682_v60 = vsub.f32 %v4666_v6, %v4674_v4  ;;  %v10279_v33 = vpop.xlane.xlu1 %5336 }
 0x835   :  { %v7923_v31 = vpop.eup %7922  ;;  %v4299_v19 = vmul.f32 1.442695, %v4285_v43  ;;  %v4681_v47 = vsub.f32 %v4665_v25, %v4673_v12  ;;  %v7517_v44 = vpop.f32.mrb[72].mxu1  ;;  %v5076_v43 = vadd.f32 %v10218_v10, %v10085_v34 }
 0x836   :  { %v7925_v61 = vpop.eup %7924  ;;  %v4690_v36 = vmul.f32 -5.5555553, %v4682_v60  ;;  %v4676_v49 = vmul.f32 2.0, %v7517_v44  ;;  %7498 = vmatprep.mubr.msk.f32.mxu0 %vm3068_vm7, %v7923_v31  ;;  %v4636_v8 = vpop.f32.mrb[73].mxu1  ;;  %v5075_v31 = vadd.f32 %v10225_v3, %v10085_v34 }
 0x837   :  { %7934 = vpow2.f32 %v4299_v19  ;;  %v4689_v9 = vmul.f32 -5.5555553, %v4681_v47  ;;  %v4675_v37 = vmul.f32 2.0, %v4636_v8  ;;  %7499 = vmatmul.mubr.msk.f32.vlgmr.msra.gmra.mrb[66].mxu0 %vm3068_vm7, %v7925_v61  ;;  %v10283_v12 = vpop.xlane.xlu0 %5333 }
 0x838   :  { %7936 = vpow2.f32 %v4301_v55  ;;  %v4699_v58 = vmul.f32 1.442695, %v4690_v36  ;;  %v4684_v32 = vsub.f32 %v4668_v63, %v4676_v49  ;;  %7811 = vmatpush3.bf16.msk.msra.mxu0 %vm10001_vm15, %v10006_v56 }
 0x839   :  { %v7927_v45 = vpop.eup %7926  ;;  %v4697_v62 = vmul.f32 1.442695, %v4689_v9  ;;  %v4683_v2 = vsub.f32 %v4667_v13, %v4675_v37  ;;  %v7520_v50 = vpop.f32.mrb[74].mxu1  ;;  %7814 = vmatprep.subr.msk.bf16.mxu0 %vm10001_vm15, %v10006_v56  ;;  %v5078_v13 = vadd.f32 %v10236_v15, %v10085_v34 }
 0x83a   :  { %v7929_v53 = vpop.eup %7928  ;;  %v4692_v0 = vmul.f32 -5.5555553, %v4684_v32  ;;  %v4678_v22 = vmul.f32 2.0, %v7520_v50  ;;  %7501 = vmatprep.mubr.msk.f32.mxu0 %vm3068_vm7, %v7927_v45  ;;  %v4646_v30 = vpop.f32.mrb[75].mxu1 }
 0x83b   :  { %7938 = vpow2.f32 %v4697_v62  ;;  %v4691_v27 = vmul.f32 -5.5555553, %v4683_v2  ;;  %v4677_v39 = vmul.f32 2.0, %v4646_v30  ;;  %7502 = vmatmul.mubr.msk.f32.gmra.mrb[68].mxu0 %vm3068_vm7, %v7929_v53  ;;  %v10294_v32 = vpop.xlane.xlu1 %5342  ;;  %v10297_v2 = vpop.xlane.xlu0 %5339  ;;  %v5080_v30 = vadd.f32 %v10247_v21, %v10085_v34 }
 0x83c   :  { %7940 = vpow2.f32 %v4699_v58  ;;  %v4703_v54 = vmul.f32 1.442695, %v4692_v0  ;;  %v4686_v26 = vsub.f32 %v4670_v5, %v4678_v22  ;;  %v5077_v58 = vadd.f32 %v10239_v38, %v10085_v34 }
 0x83d   :  { %v7931_v41 = vpop.eup %7930  ;;  %v4701_v14 = vmul.f32 1.442695, %v4691_v27  ;;  %v4685_v28 = vsub.f32 %v4669_v35, %v4677_v39  ;;  %v7523_v23 = vpop.f32.mrb[76].mxu1 }
 0x83e   :  { %v7933_v18 = vpop.eup %7932  ;;  %v4694_v48 = vmul.f32 -5.5555553, %v4686_v26  ;;  %v4680_v46 = vmul.f32 2.0, %v7523_v23  ;;  %7504 = vmatprep.mubr.msk.f32.mxu0 %vm3068_vm7, %v7931_v41  ;;  %v4656_v42 = vpop.f32.mrb[77].mxu1 }
 0x83f   :  { %7942 = vpow2.f32 %v4701_v14  ;;  %v4693_v1 = vmul.f32 -5.5555553, %v4685_v28  ;;  %v4679_v40 = vmul.f32 2.0, %v4656_v42  ;;  %7505 = vmatmul.mubr.msk.f32.gmra.mrb[70].mxu0 %vm3068_vm7, %v7933_v18  ;;  %v10311_v18 = vpop.xlane.xlu1 %5348  ;;  %v5082_v42 = vadd.f32 %v10268_v59, %v10085_v34 }
 0x840   :  { %7944 = vpow2.f32 %v4703_v54  ;;  %v4707_v24 = vmul.f32 1.442695, %v4694_v48  ;;  %v4688_v51 = vsub.f32 %v4672_v7, %v4680_v46  ;;  %v5079_v54 = vadd.f32 %v10251_v16, %v10085_v34 }
 0x841   :  { %v7935_v6 = vpop.eup %7934  ;;  %v4705_v29 = vmul.f32 1.442695, %v4693_v1  ;;  %v4687_v4 = vsub.f32 %v4671_v57, %v4679_v40  ;;  %v7544_v17 = vpop.f32.mrb[78].mxu1 }
 0x842   :  { %v7937_v25 = vpop.eup %7936  ;;  %v4696_v20 = vmul.f32 -5.5555553, %v4688_v51  ;;  %v5084_v55 = vmul.f32 2.0, %v7544_v17  ;;  %7507 = vmatprep.mubr.msk.f32.mxu0 %vm3068_vm7, %v7935_v6  ;;  %v5036_v60 = vpop.f32.mrb[79].mxu1 }
 0x843   :  { %7946 = vpow2.f32 %v4705_v29  ;;  %v4695_v19 = vmul.f32 -5.5555553, %v4687_v4  ;;  %v5083_v47 = vmul.f32 2.0, %v5036_v60  ;;  %7508 = vmatmul.mubr.msk.f32.gmra.mrb[72].mxu0 %vm3068_vm7, %v7937_v25  ;;  %v10315_v57 = vpop.xlane.xlu0 %5345 }
 0x844   :  { %7948 = vpow2.f32 %v4707_v24  ;;  %v4711_v44 = vmul.f32 1.442695, %v4696_v20  ;;  %v5092_v61 = vsub.f32 %v5076_v43, %v5084_v55  ;;  %v5081_v24 = vadd.f32 %v10271_v52, %v10085_v34 }
 0x845   :  { %v7939_v63 = vpop.eup %7938  ;;  %v4709_v10 = vmul.f32 1.442695, %v4695_v19  ;;  %v5091_v36 = vsub.f32 %v5075_v31, %v5083_v47  ;;  %v7547_v49 = vpop.f32.mrb[80].mxu1  ;;  %v5486_v55 = vadd.f32 %v10279_v33, %v10085_v34  ;;  %v5485_v19 = vadd.f32 %v10283_v12, %v10085_v34 }
 0x846   :  { %v7941_v8 = vpop.eup %7940  ;;  %v5100_v9 = vmul.f32 -5.5555553, %v5092_v61  ;;  %v5086_v37 = vmul.f32 2.0, %v7547_v49  ;;  %7528 = vmatprep.mubr.msk.f32.mxu0 %vm3068_vm7, %v7939_v63  ;;  %v5046_v3 = vpop.f32.mrb[81].mxu1 }
 0x847   :  { %7950 = vpow2.f32 %v4709_v10  ;;  %v5099_v45 = vmul.f32 -5.5555553, %v5091_v36  ;;  %v5085_v62 = vmul.f32 2.0, %v5046_v3  ;;  %7529 = vmatmul.mubr.msk.f32.vlgmr.msra.gmra.mrb[74].mxu0 %vm3068_vm7, %v7941_v8  ;;  %v5355_v47 = vpop.xlane.xlu1 %5354  ;;  %v5352_v63 = vpop.xlane.xlu0 %5351 }
 0x848   :  { %7952 = vpow2.f32 %v4711_v44  ;;  %v5109_v50 = vmul.f32 1.442695, %v5100_v9  ;;  %v5094_v15 = vsub.f32 %v5078_v13, %v5086_v37  ;;  %7817 = vmatpush3.bf16.msk.msra.mxu0 %vm10001_vm15, %v10006_v56  ;;  %v5488_v37 = vadd.f32 %v10294_v32, %v10085_v34 }
 0x849   :  { %v7943_v53 = vpop.eup %7942  ;;  %v5107_v5 = vmul.f32 1.442695, %v5099_v45  ;;  %v5093_v0 = vsub.f32 %v5077_v58, %v5085_v62  ;;  %v7550_v38 = vpop.f32.mrb[82].mxu1  ;;  %7820 = vmatprep.subr.msk.bf16.mxu0 %vm10001_vm15, %v10006_v56  ;;  %v5487_v45 = vadd.f32 %v10297_v2, %v10085_v34 }
 0x84a   :  { %v7945_v22 = vpop.eup %7944  ;;  %v5102_v35 = vmul.f32 -5.5555553, %v5094_v15  ;;  %v5088_v27 = vmul.f32 2.0, %v7550_v38  ;;  %7531 = vmatprep.mubr.msk.f32.mxu0 %vm3068_vm7, %v7943_v53  ;;  %v5056_v39 = vpop.f32.mrb[83].mxu1 }
 0x84b   :  { %7954 = vpow2.f32 %v5107_v5  ;;  %v5101_v26 = vmul.f32 -5.5555553, %v5093_v0  ;;  %v5087_v41 = vmul.f32 2.0, %v5056_v39  ;;  %7532 = vmatmul.mubr.msk.f32.gmra.mrb[76].mxu0 %vm3068_vm7, %v7945_v22  ;;  %v5731_v5 = vpop.xlane.xlu1 %5730 }
 0x84c   :  { %7956 = vpow2.f32 %v5109_v50  ;;  %v5113_v14 = vmul.f32 1.442695, %v5102_v35  ;;  %v5096_v28 = vsub.f32 %v5080_v30, %v5088_v27  ;;  %v5490_v30 = vadd.f32 %v10311_v18, %v10085_v34  ;;  %v5728_v35 = vpop.xlane.xlu0 %5727 }
 0x84d   :  { %v7947_v23 = vpop.eup %7946  ;;  %v5111_v21 = vmul.f32 1.442695, %v5101_v26  ;;  %v5095_v7 = vsub.f32 %v5079_v54, %v5087_v41  ;;  %v7553_v48 = vpop.f32.mrb[84].mxu1  ;;  %v5489_v26 = vadd.f32 %v10315_v57, %v10085_v34 }
 0x84e   :  { %v7949_v46 = vpop.eup %7948  ;;  %v5104_v16 = vmul.f32 -5.5555553, %v5096_v28  ;;  %v5090_v1 = vmul.f32 2.0, %v7553_v48  ;;  %7534 = vmatprep.mubr.msk.f32.mxu0 %vm3068_vm7, %v7947_v23  ;;  %v5066_v40 = vpop.f32.mrb[85].mxu1 }
 0x84f   :  { %7958 = vpow2.f32 %v5111_v21  ;;  %v5103_v51 = vmul.f32 -5.5555553, %v5095_v7  ;;  %v5089_v6 = vmul.f32 2.0, %v5066_v40  ;;  %7535 = vmatmul.mubr.msk.f32.gmra.mrb[78].mxu0 %vm3068_vm7, %v7949_v46  ;;  %v5491_v40 = vadd.f32 %v5352_v63, %v10085_v34 }
 0x850   :  { %7960 = vpow2.f32 %v5113_v14  ;;  %v5117_v29 = vmul.f32 1.442695, %v5104_v16  ;;  %v5098_v4 = vsub.f32 %v5082_v42, %v5090_v1  ;;  %v5492_v42 = vadd.f32 %v5355_v47, %v10085_v34 }
 0x851   :  { %v7951_v17 = vpop.eup %7950  ;;  %v5115_v59 = vmul.f32 1.442695, %v5103_v51  ;;  %v5097_v25 = vsub.f32 %v5081_v24, %v5089_v6  ;;  %v7574_v43 = vpop.f32.mrb[86].mxu1  ;;  %v5879_v47 = vadd.f32 %v5728_v35, %v10085_v34 }
 0x852   :  { %v7953_v20 = vpop.eup %7952  ;;  %v5106_v60 = vmul.f32 -5.5555553, %v5098_v4  ;;  %v5494_v31 = vmul.f32 2.0, %v7574_v43  ;;  %7537 = vmatprep.mubr.msk.f32.mxu0 %vm3068_vm7, %v7951_v17  ;;  %v5446_v52 = vpop.f32.mrb[87].mxu1 }
 0x853   :  { %7962 = vpow2.f32 %v5115_v59  ;;  %v5105_v44 = vmul.f32 -5.5555553, %v5097_v25  ;;  %v5493_v61 = vmul.f32 2.0, %v5446_v52  ;;  %7538 = vmatmul.mubr.msk.f32.gmra.mrb[80].mxu0 %vm3068_vm7, %v7953_v20  ;;  %v5737_v24 = vpop.xlane.xlu1 %5736 }
 0x854   :  { %7964 = vpow2.f32 %v5117_v29  ;;  %v5121_v10 = vmul.f32 1.442695, %v5106_v60  ;;  %v5502_v36 = vsub.f32 %v5486_v55, %v5494_v31  ;;  %v5734_v29 = vpop.xlane.xlu0 %5733  ;;  %v5880_v60 = vadd.f32 %v5731_v5, %v10085_v34 }
 0x855   :  { %v7955_v49 = vpop.eup %7954  ;;  %v5119_v33 = vmul.f32 1.442695, %v5105_v44  ;;  %v5501_v8 = vsub.f32 %v5485_v19, %v5493_v61  ;;  %v7577_v13 = vpop.f32.mrb[88].mxu1 }
 0x856   :  { %v7957_v9 = vpop.eup %7956  ;;  %v5510_v3 = vmul.f32 -5.5555553, %v5502_v36  ;;  %v5496_v12 = vmul.f32 2.0, %v7577_v13  ;;  %7558 = vmatprep.mubr.msk.f32.mxu0 %vm3068_vm7, %v7955_v49  ;;  %v5456_v58 = vpop.f32.mrb[89].mxu1 }
 0x857   :  { %7966 = vpow2.f32 %v5119_v33  ;;  %v5509_v62 = vmul.f32 -5.5555553, %v5501_v8  ;;  %v5495_v50 = vmul.f32 2.0, %v5456_v58  ;;  %7559 = vmatmul.mubr.msk.f32.vlgmr.msra.gmra.mrb[82].mxu0 %vm3068_vm7, %v7957_v9  ;;  %v5743_v49 = vpop.xlane.xlu1 %5742 }
 0x858   :  { %7968 = vpow2.f32 %v5121_v10  ;;  %v5519_v15 = vmul.f32 1.442695, %v5510_v3  ;;  %v5504_v53 = vsub.f32 %v5488_v37, %v5496_v12  ;;  %7823 = vmatpush3.bf16.msk.msra.mxu0 %vm10001_vm15, %v10006_v56  ;;  %v5882_v37 = vadd.f32 %v5737_v24, %v10085_v34  ;;  %v5740_v3 = vpop.xlane.xlu0 %5739 }
 0x859   :  { %v7959_v32 = vpop.eup %7958  ;;  %v5517_v0 = vmul.f32 1.442695, %v5509_v62  ;;  %v5503_v38 = vsub.f32 %v5487_v45, %v5495_v50  ;;  %v7580_v22 = vpop.f32.mrb[90].mxu1  ;;  %7826 = vmatprep.subr.msk.bf16.mxu0 %vm10001_vm15, %v10006_v56  ;;  %v5881_v62 = vadd.f32 %v5734_v29, %v10085_v34 }
 0x85a   :  { %v7961_v2 = vpop.eup %7960  ;;  %v5512_v27 = vmul.f32 -5.5555553, %v5504_v53  ;;  %v5498_v39 = vmul.f32 2.0, %v7580_v22  ;;  %7561 = vmatprep.mubr.msk.f32.mxu0 %vm3068_vm7, %v7959_v32  ;;  %v5466_v54 = vpop.f32.mrb[91].mxu1 }
 0x85b   :  { %7970 = vpow2.f32 %v5517_v0  ;;  %v5511_v41 = vmul.f32 -5.5555553, %v5503_v38  ;;  %v5497_v14 = vmul.f32 2.0, %v5466_v54  ;;  %7562 = vmatmul.mubr.msk.f32.gmra.mrb[84].mxu0 %vm3068_vm7, %v7961_v2  ;;  %v5883_v54 = vadd.f32 %v5740_v3, %v10085_v34 }
 0x85c   :  { %7972 = vpow2.f32 %v5519_v15  ;;  %v5523_v28 = vmul.f32 1.442695, %v5512_v27  ;;  %v5506_v23 = vsub.f32 %v5490_v30, %v5498_v39  ;;  %v5884_v30 = vadd.f32 %v5743_v49, %v10085_v34  ;;  %v5746_v11 = vpop.xlane.xlu0 %5745 }
 0x85d   :  { %v7963_v21 = vpop.eup %7962  ;;  %v5521_v7 = vmul.f32 1.442695, %v5511_v41  ;;  %v5505_v18 = vsub.f32 %v5489_v26, %v5497_v14  ;;  %v7583_v48 = vpop.f32.mrb[92].mxu1 }
 0x85e   :  { %v7965_v46 = vpop.eup %7964  ;;  %v5514_v16 = vmul.f32 -5.5555553, %v5506_v23  ;;  %v5500_v1 = vmul.f32 2.0, %v7583_v48  ;;  %7564 = vmatprep.mubr.msk.f32.mxu0 %vm3068_vm7, %v7963_v21  ;;  %v5476_v57 = vpop.f32.mrb[93].mxu1 }
 0x85f   :  { %7974 = vpow2.f32 %v5521_v7  ;;  %v5513_v51 = vmul.f32 -5.5555553, %v5505_v18  ;;  %v5499_v6 = vmul.f32 2.0, %v5476_v57  ;;  %7565 = vmatmul.mubr.msk.f32.gmra.mrb[86].mxu0 %vm3068_vm7, %v7965_v46  ;;  %v5749_v26 = vpop.xlane.xlu1 %5748  ;;  %v5885_v57 = vadd.f32 %v5746_v11, %v10085_v34 }
 0x860   :  { %7976 = vpow2.f32 %v5523_v28  ;;  %v5527_v4 = vmul.f32 1.442695, %v5514_v16  ;;  %v5508_v17 = vsub.f32 %v5492_v42, %v5500_v1  ;;  %v5886_v46 = vadd.f32 %v5749_v26, %v10085_v34 }
 0x861   :  { %v7967_v59 = vpop.eup %7966  ;;  %v5525_v25 = vmul.f32 1.442695, %v5513_v51  ;;  %v5507_v43 = vsub.f32 %v5491_v40, %v5499_v6  ;;  %v7604_v20 = vpop.f32.mrb[94].mxu1 }
 0x862   :  { %v7969_v55 = vpop.eup %7968  ;;  %v5516_v31 = vmul.f32 -5.5555553, %v5508_v17  ;;  %v5888_v52 = vmul.f32 2.0, %v7604_v20  ;;  %7567 = vmatprep.mubr.msk.f32.mxu0 %vm3068_vm7, %v7967_v59  ;;  %v5840_v19 = vpop.f32.mrb[95].mxu1 }
 0x863   :  { %7978 = vpow2.f32 %v5525_v25  ;;  %v5515_v44 = vmul.f32 -5.5555553, %v5507_v43  ;;  %v5887_v61 = vmul.f32 2.0, %v5840_v19  ;;  %7568 = vmatmul.mubr.msk.f32.gmra.mrb[88].mxu0 %vm3068_vm7, %v7969_v55 }
 0x864   :  { %7980 = vpow2.f32 %v5527_v4  ;;  %v5531_v63 = vmul.f32 1.442695, %v5516_v31  ;;  %v5896_v10 = vsub.f32 %v5880_v60, %v5888_v52 }
 0x865   :  { %v7971_v36 = vpop.eup %7970  ;;  %v5529_v33 = vmul.f32 1.442695, %v5515_v44  ;;  %v5895_v8 = vsub.f32 %v5879_v47, %v5887_v61  ;;  %v7607_v13 = vpop.f32.mrb[96].mxu1 }
 0x866   :  { %v7973_v9 = vpop.eup %7972  ;;  %v5904_v12 = vmul.f32 -5.5555553, %v5896_v10  ;;  %v5890_v58 = vmul.f32 2.0, %v7607_v13  ;;  %7588 = vmatprep.mubr.msk.f32.mxu0 %vm3068_vm7, %v7971_v36  ;;  %v5850_v45 = vpop.f32.mrb[97].mxu1 }
 0x867   :  { %7982 = vpow2.f32 %v5529_v33  ;;  %v5903_v50 = vmul.f32 -5.5555553, %v5895_v8  ;;  %v5889_v15 = vmul.f32 2.0, %v5850_v45  ;;  %7589 = vmatmul.mubr.msk.f32.vlgmr.msra.gmra.mrb[90].mxu0 %vm3068_vm7, %v7973_v9 }
 0x868   :  { %7984 = vpow2.f32 %v5531_v63  ;;  %v5913_v53 = vmul.f32 1.442695, %v5904_v12  ;;  %v5898_v32 = vsub.f32 %v5882_v37, %v5890_v58  ;;  %7829 = vmatpush3.bf16.msk.msra.mxu0 %vm10001_vm15, %v10006_v56  ;;  %vm11253_vm15 = vcmask 154648  }
 0x869   :  { %v7975_v5 = vpop.eup %7974  ;;  %v5911_v0 = vmul.f32 1.442695, %v5903_v50  ;;  %v5897_v38 = vsub.f32 %v5881_v62, %v5889_v15  ;;  %v7610_v22 = vpop.f32.mrb[98].mxu1  ;;  %vm11254_vm10 = vmmov %vm11253_vm15 }
 0x86a   :  { %v7977_v2 = vpop.eup %7976  ;;  %v5906_v35 = vmul.f32 -5.5555553, %v5898_v32  ;;  %v5892_v27 = vmul.f32 2.0, %v7610_v22  ;;  %7591 = vmatprep.mubr.msk.f32.mxu0 %vm3068_vm7, %v7975_v5  ;;  %v5860_v39 = vpop.f32.mrb[99].mxu1  ;;  %vm11255_vm0 = vmmov %vm11254_vm10 }
 0x86b   :  { %7986 = vpow2.f32 %v5911_v0  ;;  %v5905_v41 = vmul.f32 -5.5555553, %v5897_v38  ;;  %v5891_v14 = vmul.f32 2.0, %v5860_v39  ;;  %7592 = vmatmul.mubr.msk.f32.gmra.mrb[92].mxu0 %vm3068_vm7, %v7977_v2  ;;  %vm11256_vm14 = vmmov %vm11255_vm0 }
 0x86c   :  { %7988 = vpow2.f32 %v5913_v53  ;;  %v5917_v56 = vmul.f32 1.442695, %v5906_v35  ;;  %v5900_v28 = vsub.f32 %v5884_v30, %v5892_v27  ;;  %vm11257_vm3 = vmmov %vm11255_vm0 }
 0x86d   :  { %v7979_v23 = vpop.eup %7978  ;;  %v5915_v21 = vmul.f32 1.442695, %v5905_v41  ;;  %v5899_v7 = vsub.f32 %v5883_v54, %v5891_v14  ;;  %v7613_v18 = vpop.f32.mrb[100].mxu1  ;;  %vm11258_vm12 = vmmov %vm11255_vm0 }
 0x86e   :  { %v7981_v48 = vpop.eup %7980  ;;  %v5908_v42 = vmul.f32 -5.5555553, %v5900_v28  ;;  %v5894_v16 = vmul.f32 2.0, %v7613_v18  ;;  %7594 = vmatprep.mubr.msk.f32.mxu0 %vm3068_vm7, %v7979_v23  ;;  %v5870_v1 = vpop.f32.mrb[101].mxu1  ;;  %vm11259_vm11 = vmmov %vm11255_vm0 }
 0x86f   :  { %7990 = vpow2.f32 %v5915_v21  ;;  %v5907_v40 = vmul.f32 -5.5555553, %v5899_v7  ;;  %v5893_v24 = vmul.f32 2.0, %v5870_v1  ;;  %7595 = vmatmul.mubr.msk.f32.gmra.mrb[94].mxu0 %vm3068_vm7, %v7981_v48  ;;  %vm11260_vm6 = vmmov %vm11255_vm0 }
 0x870   :  { %7992 = vpow2.f32 %v5917_v56  ;;  %v5921_v51 = vmul.f32 1.442695, %v5908_v42  ;;  %v5902_v6 = vsub.f32 %v5886_v46, %v5894_v16  ;;  %vm11261_vm9 = vmmov %vm11255_vm0 }
 0x871   :  { %v7983_v29 = vpop.eup %7982  ;;  %v5919_v4 = vmul.f32 1.442695, %v5907_v40  ;;  %v5901_v17 = vsub.f32 %v5885_v57, %v5893_v24  ;;  %vm11262_vm1 = vmmov %vm11255_vm0 }
 0x872   :  { %v7985_v59 = vpop.eup %7984  ;;  %v5910_v25 = vmul.f32 -5.5555553, %v5902_v6  ;;  %7597 = vmatprep.mubr.msk.f32.mxu0 %vm3068_vm7, %v7983_v29  ;;  %vm11263_vm4 = vmmov %vm11255_vm0 }
 0x873   :  { %7994 = vpow2.f32 %v5919_v4  ;;  %v5909_v43 = vmul.f32 -5.5555553, %v5901_v17  ;;  %7598 = vmatmul.mubr.msk.f32.gmra.mrb[96].mxu0 %vm3068_vm7, %v7985_v59  ;;  %vm11264_vm5 = vmmov %vm11255_vm0 }
 0x874   :  { %7996 = vpow2.f32 %v5921_v51  ;;  %v5925_v34 = vmul.f32 1.442695, %v5910_v25  ;;  %vm11265_vm8 = vmmov %vm11255_vm0 }
 0x875   :  { %v7987_v20 = vpop.eup %7986  ;;  %v5923_v55 = vmul.f32 1.442695, %v5909_v43  ;;  %vm11266_vm13 = vmmov %vm11255_vm0 }
 0x876   :  { %v7989_v60 = vpop.eup %7988  ;;  %7618 = vmatprep.mubr.msk.f32.mxu0 %vm3068_vm7, %v7987_v20  ;;  %vm11267_vm2 = vmmov %vm11255_vm0 }
 0x877   :  { %7998 = vpow2.f32 %v5923_v55  ;;  %7619 = vmatmul.mubr.msk.f32.vlgmr.msra.gmra.mrb[98].mxu0 %vm3068_vm7, %v7989_v60 }
 0x878   :  { %8000 = vpow2.f32 %v5925_v34  ;;  %v10429_v34 = vpop.permute.xlu0 %6110 }
 0x879   :  { %v7991_v31 = vpop.eup %7990 }
 0x87a   :  { %v7993_v52 = vpop.eup %7992  ;;  %7621 = vmatprep.mubr.msk.f32.mxu0 %vm3068_vm7, %v7991_v31 }
 0x87b   :  { %7622 = vmatmul.mubr.msk.f32.gmra.mrb[100].mxu0 %vm3068_vm7, %v7993_v52 }
 0x87d   :  { %v7995_v19 = vpop.eup %7994 }
 0x87e   :  { %v7997_v47 = vpop.eup %7996  ;;  %7624 = vmatprep.mubr.msk.f32.mxu0 %vm3068_vm7, %v7995_v19 }
 0x87f   :  { %7625 = vmatmul.mubr.msk.f32.gmra.mrb[102].mxu0 %vm3068_vm7, %v7997_v47 }
 0x881   :  { %v7999_v44 = vpop.eup %7998 }
 0x882   :  { %v8001_v61 = vpop.eup %8000  ;;  %7627 = vmatprep.mubr.msk.f32.mxu0 %vm3068_vm7, %v7999_v44 }
 0x883   :  { %7628 = vmatmul.mubr.msk.f32.gmra.mrb[104].mxu0 %vm3068_vm7, %v8001_v61  ;;  %vm11268_vm7 = vmmov %vm11255_vm0 }
 0x8d3   :  { %v7410_v63 = vpop.f32.mrb[42].mxu0 }
 0x8d4   :  { %3212 = vrot.lane.b32.xlu1 %v7410_v63, %s8080_s5  ;;  %v3163_v10 = vpop.f32.mrb[43].mxu0 }
 0x8d5   :  { %3210 = vrot.lane.b32.xlu0 %v3163_v10, %s8080_s5 }
 0x8d8   :  { %v7413_v36 = vpop.f32.mrb[44].mxu0 }
 0x8d9   :  { %3216 = vrot.lane.b32.xlu0 %v7413_v36, %s8080_s5  ;;  %v3173_v49 = vpop.f32.mrb[45].mxu0 }
 0x8dd   :  { %3214 = vrot.lane.b32.xlu0 %v3173_v49, %s8080_s5 }
 0x8df   :  { %v7416_v33 = vpop.f32.mrb[46].mxu0 }
 0x8e0   :  { %3220 = vrot.lane.b32.xlu1 %v7416_v33, %s8080_s5  ;;  %v3183_v8 = vpop.f32.mrb[47].mxu0 }
 0x8e4   :  { %3218 = vrot.lane.b32.xlu1 %v3183_v8, %s8080_s5 }
 0x8e6   :  { %v7419_v13 = vpop.f32.mrb[48].mxu0 }
 0x8e7   :  { %3224 = vrot.lane.b32.xlu0 %v7419_v13, %s8080_s5  ;;  %v3193_v9 = vpop.f32.mrb[49].mxu0 }
 0x8ea   :  { %v7440_v37 = vpop.f32.mrb[50].mxu0 }
 0x8eb   :  { %3222 = vrot.lane.b32.xlu0 %v3193_v9, %s8080_s5  ;;  %3622 = vrot.lane.b32.xlu1 %v7440_v37, %s8080_s5  ;;  %v3573_v3 = vpop.f32.mrb[51].mxu0 }
 0x8ee   :  { %v7443_v12 = vpop.f32.mrb[52].mxu0 }
 0x8ef   :  { %3620 = vrot.lane.b32.xlu1 %v3573_v3, %s8080_s5  ;;  %v3583_v58 = vpop.f32.mrb[53].mxu0  ;;  %v6809_v3 = vld [vmem:[%s10651_s11] ss:$0 sm:$0xff] }
 0x8f2   :  { %v7446_v45 = vpop.f32.mrb[54].mxu0 }
 0x8f3   :  { %3626 = vrot.lane.b32.xlu1 %v7443_v12, %s8080_s5  ;;  %3630 = vrot.lane.b32.xlu0 %v7446_v45, %s8080_s5  ;;  %v3593_v62 = vpop.f32.mrb[55].mxu0  ;;  %v8007_v12 = vld [vmem:[#allocation3 + $0x8] sm:$0xff] }
 0x8f4   :  { %v8008_v45 = vld [vmem:[#allocation3 + $0x48] sm:$0xff] }
 0x8f6   :  { %v7449_v50 = vpop.f32.mrb[56].mxu0 }
 0x8f7   :  { %3624 = vrot.lane.b32.xlu1 %v3583_v58, %s8080_s5  ;;  %3628 = vrot.lane.b32.xlu0 %v3593_v62, %s8080_s5  ;;  %v3603_v15 = vpop.f32.mrb[57].mxu0 }
 0x8fa   :  { %v7470_v53 = vpop.f32.mrb[58].mxu0 }
 0x8fb   :  { %3634 = vrot.lane.b32.xlu1 %v7449_v50, %s8080_s5  ;;  %v3983_v32 = vpop.f32.mrb[59].mxu0 }
 0x8fc   :  { %4030 = vrot.lane.b32.xlu0 %v3983_v32, %s8080_s5 }
 0x8fe   :  { %v7473_v5 = vpop.f32.mrb[60].mxu0 }
 0x8ff   :  { %3632 = vrot.lane.b32.xlu1 %v3603_v15, %s8080_s5  ;;  %v3993_v0 = vpop.f32.mrb[61].mxu0  ;;  %v6808_v15 = vld [vmem:[%s10652_s10] ss:$0 sm:$0xff] }
 0x900   :  { %4034 = vrot.lane.b32.xlu0 %v3993_v0, %s8080_s5 }
 0x902   :  { %v7476_v38 = vpop.f32.mrb[62].mxu0 }
 0x903   :  { %4032 = vrot.lane.b32.xlu1 %v7470_v53, %s8080_s5  ;;  %v4003_v22 = vpop.f32.mrb[63].mxu0 }
 0x904   :  { %4040 = vrot.lane.b32.xlu0 %v7476_v38, %s8080_s5  ;;  %v8010_v38 = vld [vmem:[#allocation3 + $0x40] sm:$0xff] }
 0x906   :  { %v7479_v2 = vpop.f32.mrb[64].mxu0 }
 0x907   :  { %4036 = vrot.lane.b32.xlu1 %v7473_v5, %s8080_s5  ;;  %v4013_v30 = vpop.f32.mrb[65].mxu0  ;;  %v8009_v5 = vld [vmem:[#allocation3] sm:$0xff] }
 0x908   :  { %4042 = vrot.lane.b32.xlu0 %v4013_v30, %s8080_s5 }
 0x90a   :  { %v7500_v35 = vpop.f32.mrb[66].mxu0 }
 0x90b   :  { %4038 = vrot.lane.b32.xlu1 %v4003_v22, %s8080_s5  ;;  %v4393_v27 = vpop.f32.mrb[67].mxu0 }
 0x90c   :  { %4442 = vrot.lane.b32.xlu0 %v7500_v35, %s8080_s5 }
 0x90e   :  { %v7503_v39 = vpop.f32.mrb[68].mxu0 }
 0x90f   :  { %4044 = vrot.lane.b32.xlu1 %v7479_v2, %s8080_s5  ;;  %v4403_v54 = vpop.f32.mrb[69].mxu0 }
 0x910   :  { %4446 = vrot.lane.b32.xlu0 %v7503_v39, %s8080_s5 }
 0x912   :  { %v7506_v26 = vpop.f32.mrb[70].mxu0 }
 0x913   :  { %4440 = vrot.lane.b32.xlu1 %v4393_v27, %s8080_s5  ;;  %v4413_v41 = vpop.f32.mrb[71].mxu0  ;;  %v8011_v27 = vld [vmem:[#allocation3 + $0x18] sm:$0xff] }
 0x914   :  { %4444 = vrot.lane.b32.xlu0 %v4403_v54, %s8080_s5  ;;  %v8012_v54 = vld [vmem:[#allocation3 + $0x28] sm:$0xff] }
 0x916   :  { %v7509_v14 = vpop.f32.mrb[72].mxu0 }
 0x917   :  { %4450 = vrot.lane.b32.xlu1 %v7506_v26, %s8080_s5  ;;  %v4423_v11 = vpop.f32.mrb[73].mxu0 }
 0x918   :  { %4452 = vrot.lane.b32.xlu0 %v4423_v11, %s8080_s5  ;;  %v8014_v11 = vld [vmem:[#allocation3 + $0x68] sm:$0xff] }
 0x91a   :  { %v7530_v56 = vpop.f32.mrb[74].mxu0 }
 0x91b   :  { %4448 = vrot.lane.b32.xlu1 %v4413_v41, %s8080_s5  ;;  %v4803_v28 = vpop.f32.mrb[75].mxu0  ;;  %v8013_v41 = vld [vmem:[#allocation3 + $0x58] sm:$0xff] }
 0x91c   :  { %4852 = vrot.lane.b32.xlu0 %v7530_v56, %s8080_s5 }
 0x91e   :  { %v7533_v23 = vpop.f32.mrb[76].mxu0 }
 0x91f   :  { %4454 = vrot.lane.b32.xlu1 %v7509_v14, %s8080_s5  ;;  %v4813_v21 = vpop.f32.mrb[77].mxu0 }
 0x920   :  { %4856 = vrot.lane.b32.xlu0 %v7533_v23, %s8080_s5 }
 0x922   :  { %v7536_v7 = vpop.f32.mrb[78].mxu0 }
 0x923   :  { %4850 = vrot.lane.b32.xlu1 %v4803_v28, %s8080_s5  ;;  %v4823_v18 = vpop.f32.mrb[79].mxu0 }
 0x924   :  { %4858 = vrot.lane.b32.xlu0 %v4823_v18, %s8080_s5  ;;  %v8015_v18 = vld [vmem:[#allocation3 + $0x10] sm:$0xff] }
 0x926   :  { %v7539_v48 = vpop.f32.mrb[80].mxu0 }
 0x927   :  { %4854 = vrot.lane.b32.xlu1 %v4813_v21, %s8080_s5  ;;  %v4833_v46 = vpop.f32.mrb[81].mxu0 }
 0x928   :  { %4862 = vrot.lane.b32.xlu0 %v4833_v46, %s8080_s5  ;;  %v8016_v46 = vld [vmem:[#allocation3 + $0x20] sm:$0xff] }
 0x92a   :  { %v7560_v42 = vpop.f32.mrb[82].mxu0 }
 0x92b   :  { %4860 = vrot.lane.b32.xlu1 %v7536_v7, %s8080_s5  ;;  %v5213_v16 = vpop.f32.mrb[83].mxu0 }
 0x92c   :  { %5260 = vrot.lane.b32.xlu0 %v5213_v16, %s8080_s5  ;;  %v8017_v16 = vld [vmem:[#allocation3 + $0x50] sm:$0xff] }
 0x92e   :  { %v7563_v1 = vpop.f32.mrb[84].mxu0 }
 0x92f   :  { %4864 = vrot.lane.b32.xlu1 %v7539_v48, %s8080_s5  ;;  %v5223_v57 = vpop.f32.mrb[85].mxu0 }
 0x932   :  { %v7566_v40 = vpop.f32.mrb[86].mxu0 }
 0x933   :  { %5262 = vrot.lane.b32.xlu1 %v7560_v42, %s8080_s5  ;;  %v5233_v24 = vpop.f32.mrb[87].mxu0 }
 0x934   :  { %5268 = vrot.lane.b32.xlu0 %v5233_v24, %s8080_s5 }
 0x936   :  { %v7569_v51 = vpop.f32.mrb[88].mxu0 }
 0x937   :  { %5266 = vrot.lane.b32.xlu1 %v7563_v1, %s8080_s5  ;;  %v5243_v6 = vpop.f32.mrb[89].mxu0 }
 0x938   :  { %5272 = vrot.lane.b32.xlu0 %v5243_v6, %s8080_s5 }
 0x93a   :  { %v7590_v29 = vpop.f32.mrb[90].mxu0 }
 0x93b   :  { %5264 = vrot.lane.b32.xlu1 %v5223_v57, %s8080_s5  ;;  %v5623_v4 = vpop.f32.mrb[91].mxu0  ;;  %v8018_v57 = vld [vmem:[#allocation3 + $0x60] sm:$0xff] }
 0x93c   :  { %5670 = vrot.lane.b32.xlu0 %v5623_v4, %s8080_s5 }
 0x93e   :  { %v7593_v17 = vpop.f32.mrb[92].mxu0 }
 0x93f   :  { %5270 = vrot.lane.b32.xlu1 %v7566_v40, %s8080_s5  ;;  %v5633_v59 = vpop.f32.mrb[93].mxu0 }
 0x940   :  { %5674 = vrot.lane.b32.xlu0 %v5633_v59, %s8080_s5 }
 0x942   :  { %v7596_v25 = vpop.f32.mrb[94].mxu0 }
 0x943   :  { %5274 = vrot.lane.b32.xlu1 %v7569_v51, %s8080_s5  ;;  %v5643_v43 = vpop.f32.mrb[95].mxu0 }
 0x944   :  { %5678 = vrot.lane.b32.xlu0 %v5643_v43, %s8080_s5  ;;  %v8021_v43 = vld [vmem:[#allocation3 + $0x80] sm:$0xff] }
 0x946   :  { %v7599_v20 = vpop.f32.mrb[96].mxu0  ;;  %v3213_v47 = vpop.permute.xlu1 %3212 }
 0x947   :  { %5672 = vrot.lane.b32.xlu1 %v7590_v29, %s8080_s5  ;;  %v5653_v55 = vpop.f32.mrb[97].mxu0  ;;  %v3211_v31 = vpop.permute.xlu0 %3210  ;;  %v3235_v58 = vmul.f32 %v8007_v12, %v3213_v47  ;;  %v8019_v29 = vld [vmem:[#allocation3 + $0x38] sm:$0xff]  ;;  %v8023_v47 = vld [vmem:[#allocation3 + $0x70] sm:$0xff] }
 0x948   :  { %5682 = vrot.lane.b32.xlu0 %v5653_v55, %s8080_s5  ;;  %v3234_v0 = vmul.f32 %v8009_v5, %v3211_v31 }
 0x94a   :  { %v7620_v60 = vpop.f32.mrb[98].mxu0 }
 0x94b   :  { %5676 = vrot.lane.b32.xlu1 %v7593_v17, %s8080_s5  ;;  %v6017_v52 = vpop.f32.mrb[99].mxu0  ;;  %v3217_v61 = vpop.permute.xlu0 %3216  ;;  %v8020_v17 = vld [vmem:[#allocation3 + $0x78] sm:$0xff] }
 0x94c   :  { %6066 = vrot.lane.b32.xlu0 %v7620_v60, %s8080_s5  ;;  %v3237_v39 = vmul.f32 %v8011_v27, %v3217_v61 }
 0x94e   :  { %v7623_v19 = vpop.f32.mrb[100].mxu0 }
 0x94f   :  { %5680 = vrot.lane.b32.xlu1 %v7596_v25, %s8080_s5  ;;  %v6027_v44 = vpop.f32.mrb[101].mxu0  ;;  %v3215_v33 = vpop.permute.xlu0 %3214 }
 0x950   :  { %6068 = vrot.lane.b32.xlu0 %v6027_v44, %s8080_s5  ;;  %v3236_v48 = vmul.f32 %v8015_v18, %v3215_v33 }
 0x952   :  { %v7626_v63 = vpop.f32.mrb[102].mxu0  ;;  %v3221_v10 = vpop.permute.xlu1 %3220 }
 0x953   :  { %6064 = vrot.lane.b32.xlu1 %v6017_v52, %s8080_s5  ;;  %v6037_v36 = vpop.f32.mrb[103].mxu0  ;;  %v3239_v26 = vmul.f32 %v8012_v54, %v3221_v10  ;;  %v8022_v52 = vld [vmem:[#allocation3 + $0x30] sm:$0xff] }
 0x954   :  { %6072 = vrot.lane.b32.xlu0 %v6037_v36, %s8080_s5 }
 0x956   :  { %v7629_v49 = vpop.f32.mrb[104].mxu0  ;;  %v3219_v13 = vpop.permute.xlu1 %3218 }
 0x957   :  { %6070 = vrot.lane.b32.xlu1 %v7623_v19, %s8080_s5  ;;  %v6047_v8 = vpop.f32.mrb[105].mxu0  ;;  %v3238_v42 = vmul.f32 %v8016_v46, %v3219_v13 }
 0x958   :  { %5684 = vrot.lane.b32.xlu0 %v7599_v20, %s8080_s5 }
 0x959   :  { %v3225_v9 = vpop.permute.xlu0 %3224 }
 0x95a   :  { %v3241_v4 = vmul.f32 %v8019_v29, %v3225_v9 }
 0x95b   :  { %6074 = vrot.lane.b32.xlu1 %v7626_v63, %s8080_s5  ;;  %v8024_v63 = vld [vmem:[#allocation3 + $0x90] sm:$0xff] }
 0x95c   :  { %6078 = vrot.lane.b32.xlu0 %v7629_v49, %s8080_s5 }
 0x95d   :  { %v3623_v37 = vpop.permute.xlu1 %3622  ;;  %v3223_v53 = vpop.permute.xlu0 %3222 }
 0x95e   :  { %v3645_v62 = vmul.f32 %v8008_v45, %v3623_v37  ;;  %v3240_v19 = vmul.f32 %v8022_v52, %v3223_v53  ;;  %v8026_v37 = vld [vmem:[#allocation3 + $0xa8] sm:$0xff] }
 0x95f   :  { %6076 = vrot.lane.b32.xlu1 %v6047_v8, %s8080_s5  ;;  %v8025_v8 = vld [vmem:[#allocation3 + $0x88] sm:$0xff] }
 0x960   :  { %v3653_v50 = vadd.f32 %v3645_v62, %v3235_v58  ;;  %6214 = vrot.lane.b32.xlu0 %v6809_v3, %s8080_s5  ;;  %v8027_v62 = vld [vmem:[#allocation3 + $0x98] sm:$0xff] }
 0x961   :  { %v3621_v32 = vpop.permute.xlu1 %3620 }
 0x962   :  { %v3644_v22 = vmul.f32 %v8010_v38, %v3621_v32  ;;  %v8028_v32 = vld [vmem:[#allocation3 + $0xb0] sm:$0xff] }
 0x963   :  { %6198 = vrot.lane.b32.xlu1 %v6808_v15, %s8080_s5 }
 0x964   :  { %v3652_v2 = vadd.f32 %v3644_v22, %v3234_v0 }
 0x965   :  { %v3627_v30 = vpop.permute.xlu1 %3626  ;;  %v3631_v35 = vpop.permute.xlu0 %3630 }
 0x966   :  { %v3647_v14 = vmul.f32 %v8013_v41, %v3627_v30  ;;  %v3649_v56 = vmul.f32 %v8014_v11, %v3631_v35 }
 0x968   :  { %v3655_v28 = vadd.f32 %v3647_v14, %v3237_v39  ;;  %v3657_v23 = vadd.f32 %v3649_v56, %v3239_v26  ;;  %v8030_v39 = vld [vmem:[#allocation3 + $0xb8] sm:$0xff] }
 0x969   :  { %v3625_v21 = vpop.permute.xlu1 %3624  ;;  %v3629_v7 = vpop.permute.xlu0 %3628 }
 0x96a   :  { %v3646_v1 = vmul.f32 %v8017_v16, %v3625_v21  ;;  %v3648_v40 = vmul.f32 %v8018_v57, %v3629_v7 }
 0x96c   :  { %v3654_v24 = vadd.f32 %v3646_v1, %v3236_v48  ;;  %v3656_v51 = vadd.f32 %v3648_v40, %v3238_v42 }
 0x96d   :  { %v3635_v6 = vpop.permute.xlu1 %3634 }
 0x96e   :  { %v3651_v59 = vmul.f32 %v8020_v17, %v3635_v6  ;;  %v4031_v25 = vpop.permute.xlu0 %4030 }
 0x96f   :  { %v4054_v20 = vmul.f32 %v8021_v43, %v4031_v25  ;;  %v6234_v25 = vld [vmem:[%s10653_s12 + $0x8] sm:$0xff] }
 0x970   :  { %v3659_v55 = vadd.f32 %v3651_v59, %v3241_v4  ;;  %v6233_v59 = vld [vmem:[%s10653_s12] sm:$0xff]  ;;  %s8082_s12 = smov 125  }
 0x971   :  { %v10452_v60 = vadd.f32 %v4054_v20, %v3652_v2  ;;  %v3633_v31 = vpop.permute.xlu1 %3632  ;;  %v8029_v2 = vld [vmem:[#allocation3 + $0xa0] sm:$0xff]  ;;  %v7830_v43 = vpack.c.bf16 %v6234_v25, %v6233_v59  ;;  %v8043_v59 = vld [vmem:[#allocation3 + $0x188] sm:$0xff] }
 0x972   :  { %v3650_v44 = vmul.f32 %v8023_v47, %v3633_v31  ;;  %v4035_v61 = vpop.permute.xlu0 %4034 }
 0x973   :  { %v4056_v10 = vmul.f32 %v8024_v63, %v4035_v61  ;;  %7831 = vmatprep.subr.bf16.mxu1 %v7830_v43 }
 0x974   :  { %v3658_v36 = vadd.f32 %v3650_v44, %v3240_v19  ;;  %7833 = vmatpush3.bf16.msra.mxu1 %v7830_v43  ;;  %v8031_v19 = vld [vmem:[#allocation3 + $0xc8] sm:$0xff]  ;;  %v8032_v44 = vld [vmem:[#allocation3 + $0xd0] sm:$0xff] }
 0x975   :  { %v10454_v49 = vadd.f32 %v4056_v10, %v3654_v24  ;;  %v4033_v33 = vpop.permute.xlu1 %4032  ;;  %v8033_v10 = vld [vmem:[#allocation3 + $0xd8] sm:$0xff] }
 0x976   :  { %v4055_v13 = vmul.f32 %v8025_v8, %v4033_v33  ;;  %v4041_v9 = vpop.permute.xlu0 %4040  ;;  %v8034_v33 = vld [vmem:[#allocation3 + $0x108] sm:$0xff] }
 0x977   :  { %v4059_v3 = vmul.f32 %v8026_v37, %v4041_v9  ;;  %v8035_v9 = vld [vmem:[#allocation3 + $0xc0] sm:$0xff] }
 0x978   :  { %v10456_v12 = vadd.f32 %v4055_v13, %v3653_v50 }
 0x979   :  { %v10458_v58 = vadd.f32 %v4059_v3, %v3657_v23  ;;  %v4037_v45 = vpop.permute.xlu1 %4036  ;;  %v8036_v3 = vld [vmem:[#allocation3 + $0xe8] sm:$0xff] }
 0x97a   :  { %v4057_v15 = vmul.f32 %v8027_v62, %v4037_v45  ;;  %v4043_v53 = vpop.permute.xlu0 %4042  ;;  %v8037_v62 = vld [vmem:[#allocation3 + $0x110] sm:$0xff] }
 0x97b   :  { %v4060_v5 = vmul.f32 %v8028_v32, %v4043_v53  ;;  %v8038_v32 = vld [vmem:[#allocation3 + $0x148] sm:$0xff] }
 0x97c   :  { %v10460_v0 = vadd.f32 %v4057_v15, %v3655_v28 }
 0x97d   :  { %v10462_v38 = vadd.f32 %v4060_v5, %v3658_v36  ;;  %v4039_v22 = vpop.permute.xlu1 %4038 }
 0x97e   :  { %v4058_v30 = vmul.f32 %v8029_v2, %v4039_v22  ;;  %v4443_v35 = vpop.permute.xlu0 %4442  ;;  %v8039_v2 = vld [vmem:[#allocation3 + $0xf0] sm:$0xff] }
 0x97f   :  { %v4465_v47 = vmul.f32 %v8031_v19, %v4443_v35  ;;  %v8040_v35 = vld [vmem:[#allocation3 + $0xe0] sm:$0xff] }
 0x980   :  { %v10464_v27 = vadd.f32 %v4058_v30, %v3656_v51  ;;  %v8045_v19 = vld [vmem:[#allocation3 + $0x140] sm:$0xff] }
 0x981   :  { %v4045_v50 = vpop.permute.xlu1 %4044  ;;  %v4473_v53 = vadd.f32 %v4465_v47, %v10456_v12 }
 0x982   :  { %v4061_v54 = vmul.f32 %v8030_v39, %v4045_v50  ;;  %v4447_v26 = vpop.permute.xlu0 %4446  ;;  %v8041_v39 = vld [vmem:[#allocation3 + $0x100] sm:$0xff] }
 0x983   :  { %v4467_v36 = vmul.f32 %v8033_v10, %v4447_v26 }
 0x984   :  { %v10466_v41 = vadd.f32 %v4061_v54, %v3659_v55 }
 0x985   :  { %v4441_v14 = vpop.permute.xlu1 %4440 }
 0x986   :  { %v4445_v11 = vpop.permute.xlu0 %4444  ;;  %v4464_v37 = vmul.f32 %v8035_v9, %v4441_v14 }
 0x987   :  { %v4466_v61 = vmul.f32 %v8032_v44, %v4445_v11  ;;  %v4475_v11 = vadd.f32 %v4467_v36, %v10460_v0 }
 0x988   :  { %v4472_v12 = vadd.f32 %v4464_v37, %v10452_v60 }
 0x989   :  { %v4451_v56 = vpop.permute.xlu1 %4450  ;;  %v4474_v22 = vadd.f32 %v4466_v61, %v10454_v49  ;;  %v8044_v49 = vld [vmem:[#allocation3 + $0x120] sm:$0xff]  ;;  %v8047_v61 = vld [vmem:[#allocation3 + $0x1c8] sm:$0xff] }
 0x98a   :  { %v4453_v23 = vpop.permute.xlu0 %4452  ;;  %v4469_v45 = vmul.f32 %v8036_v3, %v4451_v56  ;;  %v8051_v3 = vld [vmem:[#allocation3 + $0xf8] sm:$0xff] }
 0x98b   :  { %v4470_v30 = vmul.f32 %v8039_v2, %v4453_v23 }
 0x98d   :  { %v4449_v28 = vpop.permute.xlu1 %4448  ;;  %v10506_v10 = vadd.f32 %v4470_v30, %v10462_v38  ;;  %v8055_v30 = vld [vmem:[#allocation3 + $0x130] sm:$0xff] }
 0x98e   :  { %v4853_v21 = vpop.permute.xlu0 %4852  ;;  %v4468_v50 = vmul.f32 %v8040_v35, %v4449_v28  ;;  %v8056_v35 = vld [vmem:[#allocation3 + $0x128] sm:$0xff] }
 0x98f   :  { %v4875_v8 = vmul.f32 %v8034_v33, %v4853_v21  ;;  %v8042_v21 = vld [vmem:[#allocation3 + $0x150] sm:$0xff]  ;;  %v8049_v33 = vld [vmem:[#allocation3 + $0x160] sm:$0xff] }
 0x991   :  { %v10468_v7 = vpop.permute.xlu1 %4454  ;;  %v4883_v14 = vadd.f32 %v4875_v8, %v4473_v53 }
 0x992   :  { %v10470_v18 = vpop.permute.xlu0 %4856  ;;  %v4471_v38 = vmul.f32 %v8051_v3, %v10468_v7  ;;  %v8057_v7 = vld [vmem:[#allocation3 + $0x198] sm:$0xff] }
 0x995   :  { %v4851_v48 = vpop.permute.xlu1 %4850 }
 0x996   :  { %v4859_v46 = vpop.permute.xlu0 %4858  ;;  %v4874_v54 = vmul.f32 %v8041_v39, %v4851_v48  ;;  %v8046_v48 = vld [vmem:[#allocation3 + $0x190] sm:$0xff] }
 0x997   :  { %v4878_v43 = vmul.f32 %v8044_v49, %v4859_v46 }
 0x998   :  { %v4882_v36 = vadd.f32 %v4874_v54, %v4472_v12 }
 0x999   :  { %v4855_v42 = vpop.permute.xlu1 %4854 }
 0x99a   :  { %v10472_v16 = vpop.permute.xlu0 %4862  ;;  %v4876_v15 = vmul.f32 %v8037_v62, %v4855_v42  ;;  %v8052_v62 = vld [vmem:[#allocation3 + $0x158] sm:$0xff] }
 0x99c   :  { %v4884_v23 = vadd.f32 %v4876_v15, %v4474_v22  ;;  %v8053_v15 = vld [vmem:[#allocation3 + $0x1d0] sm:$0xff] }
 0x99d   :  { %v10474_v1 = vpop.permute.xlu1 %4860 }
 0x99e   :  { %v5261_v40 = vpop.permute.xlu0 %5260 }
 0x99f   :  { %v5284_v28 = vmul.f32 %v8045_v19, %v5261_v40  ;;  %v8050_v40 = vld [vmem:[#allocation3 + $0x180] sm:$0xff] }
 0x9a1   :  { %v10476_v57 = vpop.permute.xlu1 %4864  ;;  %v5292_v53 = vadd.f32 %v5284_v28, %v4882_v36 }
 0x9a5   :  { %v5263_v24 = vpop.permute.xlu1 %5262 }
 0x9a6   :  { %v10478_v51 = vpop.permute.xlu0 %5268  ;;  %v5285_v5 = vmul.f32 %v8038_v32, %v5263_v24  ;;  %v4477_v24 = vadd.f32 %v4469_v45, %v10458_v58 }
 0x9a7   :  { %v5288_v46 = vmul.f32 %v8049_v33, %v10478_v51 }
 0x9a8   :  { %v5293_v47 = vadd.f32 %v5285_v5, %v4883_v14  ;;  %v8054_v5 = vld [vmem:[#allocation3 + $0x1a0] sm:$0xff] }
 0x9a9   :  { %v10480_v6 = vpop.permute.xlu1 %5266 }
 0x9aa   :  { %v10482_v29 = vpop.permute.xlu0 %5272 }
 0x9ad   :  { %v5265_v4 = vpop.permute.xlu1 %5264 }
 0x9ae   :  { %v10484_v17 = vpop.permute.xlu0 %5670  ;;  %v5286_v56 = vmul.f32 %v8042_v21, %v5265_v4  ;;  %v4476_v4 = vadd.f32 %v4468_v50, %v10464_v27  ;;  %v5287_v27 = vmul.f32 %v8052_v62, %v10480_v6  ;;  %v4879_v50 = vmul.f32 %v8056_v35, %v10474_v1 }
 0x9af   :  { %v5694_v9 = vmul.f32 %v8050_v40, %v10484_v17  ;;  %v4880_v17 = vmul.f32 %v8055_v30, %v10472_v16  ;;  %v8061_v16 = vld [vmem:[#allocation3 + $0x1e0] sm:$0xff]  ;;  %v4479_v1 = vadd.f32 %v4471_v38, %v10466_v41  ;;  %v8067_v38 = vld [vmem:[#allocation3 + $0x1b0] sm:$0xff] }
 0x9b0   :  { %v5294_v8 = vadd.f32 %v5286_v56, %v4884_v23  ;;  %v4886_v45 = vadd.f32 %v4878_v43, %v4476_v4  ;;  %v8058_v56 = vld [vmem:[#allocation3 + $0x1c0] sm:$0xff]  ;;  %v4887_v28 = vadd.f32 %v4879_v50, %v4477_v24 }
 0x9b1   :  { %v10492_v20 = vpop.permute.xlu1 %5270  ;;  %v5702_v6 = vadd.f32 %v5694_v9, %v5292_v53  ;;  %v4888_v33 = vadd.f32 %v4880_v17, %v10506_v10  ;;  %v8068_v53 = vld [vmem:[#allocation3 + $0x1e8] sm:$0xff] }
 0x9b2   :  { %v5675_v55 = vpop.permute.xlu0 %5674  ;;  %v5296_v14 = vadd.f32 %v5288_v46, %v4886_v45 }
 0x9b3   :  { %v5696_v44 = vmul.f32 %v8046_v48, %v5675_v55 }
 0x9b5   :  { %v10494_v31 = vpop.permute.xlu1 %5274  ;;  %v5704_v32 = vadd.f32 %v5696_v44, %v5294_v8  ;;  %v8065_v8 = vld [vmem:[#allocation3 + $0x170] sm:$0xff] }
 0x9b6   :  { %v10496_v52 = vpop.permute.xlu0 %5678  ;;  %v5290_v24 = vmul.f32 %v8065_v8, %v10482_v29 }
 0x9b7   :  { %v5698_v51 = vmul.f32 %v8054_v5, %v10496_v52 }
 0x9b9   :  { %v5673_v63 = vpop.permute.xlu1 %5672  ;;  %v5706_v23 = vadd.f32 %v5698_v51, %v5296_v14  ;;  %v5298_v51 = vadd.f32 %v5290_v24, %v4888_v33 }
 0x9ba   :  { %v10498_v13 = vpop.permute.xlu0 %5682  ;;  %v5695_v42 = vmul.f32 %v8043_v59, %v5673_v63  ;;  %v8048_v63 = vld [vmem:[#allocation3 + $0x118] sm:$0xff] }
 0x9bb   :  { %v4877_v60 = vmul.f32 %v8048_v63, %v10470_v18  ;;  %v5700_v45 = vmul.f32 %v8067_v38, %v10498_v13 }
 0x9bc   :  { %v5703_v55 = vadd.f32 %v5695_v42, %v5293_v47  ;;  %v8062_v47 = vld [vmem:[#allocation3 + $0x178] sm:$0xff] }
 0x9bd   :  { %v5677_v26 = vpop.permute.xlu1 %5676  ;;  %v4885_v2 = vadd.f32 %v4877_v60, %v4475_v11  ;;  %v8060_v11 = vld [vmem:[#allocation3 + $0x168] sm:$0xff]  ;;  %v5291_v48 = vmul.f32 %v8062_v47, %v10494_v31  ;;  %v8064_v60 = vld [vmem:[#allocation3 + $0x1d8] sm:$0xff]  ;;  %v5708_v50 = vadd.f32 %v5700_v45, %v5298_v51 }
 0x9be   :  { %v6067_v25 = vpop.permute.xlu0 %6066  ;;  %v5697_v39 = vmul.f32 %v8057_v7, %v5677_v26  ;;  %v5289_v49 = vmul.f32 %v8060_v11, %v10492_v20 }
 0x9bf   :  { %v6089_v0 = vmul.f32 %v8047_v61, %v6067_v25  ;;  %v8059_v25 = vld [vmem:[#allocation3 + $0x138] sm:$0xff]  ;;  %v5295_v12 = vadd.f32 %v5287_v27, %v4885_v2  ;;  %v8063_v61 = vld [vmem:[#allocation3 + $0x1a8] sm:$0xff] }
 0x9c0   :  { %v4881_v52 = vmul.f32 %v8059_v25, %v10476_v57  ;;  %v5297_v40 = vadd.f32 %v5289_v49, %v4887_v28  ;;  %v8069_v2 = vld [vmem:[#allocation3 + $0x1f8] sm:$0xff] }
 0x9c1   :  { %v5681_v58 = vpop.permute.xlu1 %5680  ;;  %v6097_v22 = vadd.f32 %v6089_v0, %v5703_v55  ;;  %v5705_v44 = vadd.f32 %v5697_v39, %v5295_v12  ;;  %v8066_v55 = vld [vmem:[#allocation3 + $0x1b8] sm:$0xff] }
 0x9c2   :  { %v6069_v37 = vpop.permute.xlu0 %6068  ;;  %v5699_v57 = vmul.f32 %v8063_v61, %v5681_v58  ;;  %v4889_v46 = vadd.f32 %v4881_v52, %v4479_v1 }
 0x9c3   :  { %v6090_v18 = vmul.f32 %v8053_v15, %v6069_v37  ;;  %v10521_v26 = vadd.f32 %v10429_v34, %v6097_v22 }
 0x9c4   :  { %v5299_v3 = vadd.f32 %v5291_v48, %v4889_v46  ;;  %v5707_v62 = vadd.f32 %v5699_v57, %v5297_v40 }
 0x9c5   :  { %v6065_v54 = vpop.permute.xlu1 %6064  ;;  %v6098_v21 = vadd.f32 %v6090_v18, %v5704_v32  ;;  %v6124_v31 = vsel %vm11253_vm15, %v10521_v26, 0.0  ;;  %vm11269_vm15 = vcmask 130048  }
 0x9c6   :  { %v6088_v59 = vmul.f32 %v8058_v56, %v6065_v54  ;;  %v6073_v42 = vpop.permute.xlu0 %6072 }
 0x9c7   :  { %v6092_v43 = vmul.f32 %v8061_v16, %v6073_v42  ;;  %v6115_v4 = vadd.f32 %v10429_v34, %v6098_v21  ;;  %v8070_v21 = vld [vmem:[#allocation3 + $0x1f0] sm:$0xff] }
 0x9c8   :  { %v6096_v19 = vadd.f32 %v6088_v59, %v5702_v6 }
 0x9c9   :  { %v6071_v0 = vpop.permute.xlu1 %6070  ;;  %v6100_v63 = vadd.f32 %v6092_v43, %v5706_v23  ;;  %v6126_v15 = vsel %vm11255_vm0, %v6115_v4, 0.0 }
 0x9ca   :  { %v6113_v20 = vadd.f32 %v10429_v34, %v6096_v19  ;;  %v6091_v41 = vmul.f32 %v8064_v60, %v6071_v0  ;;  %v5685_v36 = vpop.permute.xlu0 %5684 }
 0x9cb   :  { %v5701_v37 = vmul.f32 %v8066_v55, %v5685_v36  ;;  %v6117_v29 = vadd.f32 %v10429_v34, %v6100_v63 }
 0x9cc   :  { %v6123_v58 = vsel %vm11254_vm10, %v6113_v20, 0.0  ;;  %v6099_v9 = vadd.f32 %v6091_v41, %v5705_v44  ;;  %vm11270_vm10 = vmmov %vm11269_vm15 }
 0x9cd   :  { %v6125_v27 = vadd.f32 %v6124_v31, %v6123_v58  ;;  %v6075_v10 = vpop.permute.xlu1 %6074  ;;  %v5709_v35 = vadd.f32 %v5701_v37, %v5299_v3  ;;  %v6130_v54 = vsel %vm11257_vm3, %v6117_v29, 0.0  ;;  %vm11271_vm0 = vmmov %vm11270_vm10 }
 0x9ce   :  { %v6116_v18 = vadd.f32 %v10429_v34, %v6099_v9  ;;  %v6093_v32 = vmul.f32 %v8068_v53, %v6075_v10  ;;  %v6079_v5 = vpop.permute.xlu0 %6078  ;;  %vm11273_vm3 = vmmov %vm11271_vm0 }
 0x9cf   :  { %v6127_v22 = vadd.f32 %v6126_v15, %v6125_v27  ;;  %v6095_v30 = vmul.f32 %v8069_v2, %v6079_v5 }
 0x9d0   :  { %v6128_v17 = vsel %vm11256_vm14, %v6116_v18, 0.0  ;;  %v6101_v13 = vadd.f32 %v6093_v32, %v5707_v62  ;;  %vm11272_vm14 = vmmov %vm11271_vm0 }
 0x9d1   :  { %v6129_v7 = vadd.f32 %v6128_v17, %v6127_v22  ;;  %v6077_v39 = vpop.permute.xlu1 %6076  ;;  %v6103_v6 = vadd.f32 %v6095_v30, %v5709_v35 }
 0x9d2   :  { %v6118_v14 = vadd.f32 %v10429_v34, %v6101_v13  ;;  %v6094_v56 = vmul.f32 %v8070_v21, %v6077_v39  ;;  %v6215_v21 = vpop.permute.xlu0 %6214 }
 0x9d3   :  { %v6131_v59 = vadd.f32 %v6130_v54, %v6129_v7  ;;  %v6120_v12 = vadd.f32 %v10429_v34, %v6103_v6 }
 0x9d4   :  { %v6132_v42 = vsel %vm11258_vm12, %v6118_v14, 0.0  ;;  %v6102_v25 = vadd.f32 %v6094_v56, %v5708_v50  ;;  %vm11274_vm12 = vmmov %vm11271_vm0 }
 0x9d5   :  { %v6133_v52 = vadd.f32 %v6132_v42, %v6131_v59  ;;  %v6136_v43 = vsel %vm11260_vm6, %v6120_v12, 0.0  ;;  %v6199_v7 = vpop.permute.xlu1 %6198  ;;  %vm11276_vm6 = vmmov %vm11271_vm0 }
 0x9d6   :  { %v6119_v11 = vadd.f32 %v10429_v34, %v6102_v25 }
 0x9d8   :  { %v6134_v49 = vsel %vm11259_vm11, %v6119_v11, 0.0  ;;  %vm11275_vm11 = vmmov %vm11271_vm0 }
 0x9d9   :  { %v6135_v16 = vadd.f32 %v6134_v49, %v6133_v52 }
 0x9db   :  { %v6137_v1 = vadd.f32 %v6136_v43, %v6135_v16 }
 0x9dd   :  { %v6138_v23 = vrot.slane %v6137_v1, 4 }
 0x9df   :  { %v6139_v19 = vadd.f32 %v6138_v23, %v6137_v1 }
 0x9e1   :  { %v6140_v28 = vrot.slane %v6139_v19, 2 }
 0x9e3   :  { %v6141_v47 = vadd.f32 %v6140_v28, %v6139_v19 }
 0x9e5   :  { %v6142_v48 = vrot.slane %v6141_v47, 1 }
 0x9e7   :  { %v6143_v44 = vadd.f32 %v6142_v48, %v6141_v47 }
 0x9e9   :  { %v6144_v61 = vmul.f32 0.015625, %v6143_v44 }
 0x9eb   :  { %v6145_v57 = vsub.f32 %v6113_v20, %v6144_v61  ;;  %v6146_v0 = vsub.f32 %v10521_v26, %v6144_v61  ;;  %v6147_v63 = vsub.f32 %v6115_v4, %v6144_v61  ;;  %v6148_v60 = vsub.f32 %v6116_v18, %v6144_v61 }
 0x9ec   :  { %v6149_v41 = vsub.f32 %v6117_v29, %v6144_v61  ;;  %v6150_v34 = vsub.f32 %v6118_v14, %v6144_v61  ;;  %v6151_v36 = vsub.f32 %v6119_v11, %v6144_v61  ;;  %v6152_v33 = vsub.f32 %v6120_v12, %v6144_v61 }
 0x9ed   :  { %v6153_v46 = vmul.f32 %v6145_v57, %v6145_v57  ;;  %v6154_v8 = vmul.f32 %v6146_v0, %v6146_v0  ;;  %v6155_v24 = vmul.f32 %v6147_v63, %v6147_v63  ;;  %v6156_v40 = vmul.f32 %v6148_v60, %v6148_v60 }
 0x9ee   :  { %v6157_v55 = vmul.f32 %v6149_v41, %v6149_v41  ;;  %v6158_v26 = vmul.f32 %v6150_v34, %v6150_v34  ;;  %v6159_v38 = vmul.f32 %v6151_v36, %v6151_v36  ;;  %v6160_v27 = vmul.f32 %v6152_v33, %v6152_v33 }
 0x9ef   :  { %v6161_v31 = vsel %vm11261_vm9, %v6153_v46, 0.0  ;;  %v6162_v58 = vsel %vm11262_vm1, %v6154_v8, 0.0  ;;  %v6164_v20 = vsel %vm11263_vm4, %v6155_v24, 0.0  ;;  %v6166_v4 = vsel %vm11264_vm5, %v6156_v40, 0.0 }
 0x9f0   :  { %v6163_v9 = vadd.f32 %v6162_v58, %v6161_v31  ;;  %v6168_v45 = vsel %vm11265_vm8, %v6157_v55, 0.0  ;;  %v6170_v10 = vsel %vm11266_vm13, %v6158_v26, 0.0  ;;  %v6172_v29 = vsel %vm11267_vm2, %v6159_v38, 0.0  ;;  %v6810_v26 = vld [vmem:[%s10654_s13] ss:$0 sm:$0xff] }
 0x9f1   :  { %v6174_v53 = vsel %vm11268_vm7, %v6160_v27, 0.0  ;;  %vm11277_vm9 = vcmask 261120  }
 0x9f2   :  { %v6165_v37 = vadd.f32 %v6164_v20, %v6163_v9  ;;  %vm11278_vm1 = vmmov %vm11277_vm9 }
 0x9f3   :  { %vm11279_vm4 = vmmov %vm11278_vm1 }
 0x9f4   :  { %v6167_v3 = vadd.f32 %v6166_v4, %v6165_v37  ;;  %vm11280_vm5 = vmmov %vm11278_vm1 }
 0x9f5   :  { %vm11281_vm8 = vmmov %vm11278_vm1 }
 0x9f6   :  { %v6169_v62 = vadd.f32 %v6168_v45, %v6167_v3  ;;  %vm11282_vm13 = vmmov %vm11278_vm1 }
 0x9f7   :  { %vm11283_vm2 = vmmov %vm11278_vm1 }
 0x9f8   :  { %v6171_v15 = vadd.f32 %v6170_v10, %v6169_v62  ;;  %vm11284_vm7 = vmmov %vm11278_vm1 }
 0x9fa   :  { %v6173_v18 = vadd.f32 %v6172_v29, %v6171_v15 }
 0x9fc   :  { %v6175_v32 = vadd.f32 %v6174_v53, %v6173_v18 }
 0x9fe   :  { %v6176_v5 = vrot.slane %v6175_v32, 4 }
 0xa00   :  { %v6177_v51 = vadd.f32 %v6176_v5, %v6175_v32 }
 0xa02   :  { %v6178_v22 = vrot.slane %v6177_v51, 2 }
 0xa04   :  { %v6179_v2 = vadd.f32 %v6178_v22, %v6177_v51 }
 0xa06   :  { %v6180_v30 = vrot.slane %v6179_v2, 1 }
 0xa08   :  { %v6181_v17 = vadd.f32 %v6180_v30, %v6179_v2 }
 0xa0a   :  { %v6182_v35 = vmul.f32 0.015625, %v6181_v17 }
 0xa0c   :  { %v6183_v13 = vadd.f32 1e-05, %v6182_v35 }
 0xa0e   :  { %8002 = vrsqrt.f32 %v6183_v13 }
 0xa18   :  { %v8003_v50 = vpop.eup %8002 }
 0xa19   :  { %v6191_v39 = vmul.f32 %v8003_v50, %v6151_v36  ;;  %v6186_v54 = vmul.f32 %v8003_v50, %v6146_v0  ;;  %v6185_v14 = vmul.f32 %v8003_v50, %v6145_v57  ;;  %v6188_v6 = vmul.f32 %v8003_v50, %v6148_v60 }
 0xa1a   :  { %v6187_v56 = vmul.f32 %v8003_v50, %v6147_v63  ;;  %v6190_v59 = vmul.f32 %v8003_v50, %v6150_v34  ;;  %v6189_v42 = vmul.f32 %v8003_v50, %v6149_v41  ;;  %v6192_v25 = vmul.f32 %v8003_v50, %v6152_v33 }
 0xa1b   :  { %v6202_v52 = vmul.f32 %v6199_v7, %v6186_v54  ;;  %v6201_v12 = vmul.f32 %v6199_v7, %v6185_v14  ;;  %v6204_v11 = vmul.f32 %v6199_v7, %v6188_v6  ;;  %v6207_v61 = vmul.f32 %v6199_v7, %v6191_v39 }
 0xa1c   :  { %v6203_v49 = vmul.f32 %v6199_v7, %v6187_v56  ;;  %v6206_v1 = vmul.f32 %v6199_v7, %v6190_v59  ;;  %v6205_v23 = vmul.f32 %v6199_v7, %v6189_v42  ;;  %v6208_v44 = vmul.f32 %v6199_v7, %v6192_v25 }
 0xa1d   :  { %v6218_v16 = vadd.f32 %v6215_v21, %v6202_v52  ;;  %v6217_v43 = vadd.f32 %v6215_v21, %v6201_v12  ;;  %v6220_v47 = vadd.f32 %v6215_v21, %v6204_v11  ;;  %v6223_v33 = vadd.f32 %v6215_v21, %v6207_v61 }
 0xa1e   :  { %v6219_v48 = vadd.f32 %v6215_v21, %v6203_v49  ;;  %v6222_v63 = vadd.f32 %v6215_v21, %v6206_v1  ;;  %v6221_v60 = vadd.f32 %v6215_v21, %v6205_v23  ;;  %v6224_v36 = vadd.f32 %v6215_v21, %v6208_v44 }
 0xa1f   :  { %v6226_v19 = vmax.f32 %v6218_v16, 0.0  ;;  %v6225_v28 = vmax.f32 %v6217_v43, 0.0  ;;  %v6228_v57 = vmax.f32 %v6220_v47, 0.0  ;;  %v6231_v8 = vmax.f32 %v6223_v33, 0.0 }
 0xa20   :  { %v6227_v0 = vmax.f32 %v6219_v48, 0.0  ;;  %v6230_v41 = vmax.f32 %v6222_v63, 0.0  ;;  %v6229_v34 = vmax.f32 %v6221_v60, 0.0  ;;  %v6232_v46 = vmax.f32 %v6224_v36, 0.0 }
 0xa21   :  { %6252 = vrot.lane.b32.xlu0 %v6226_v19, %s8082_s12  ;;  %6250 = vrot.lane.b32.xlu1 %v6225_v28, %s8082_s12 }
 0xa25   :  { %6256 = vrot.lane.b32.xlu0 %v6228_v57, %s8082_s12  ;;  %6254 = vrot.lane.b32.xlu1 %v6227_v0, %s8082_s12 }
 0xa29   :  { %6260 = vrot.lane.b32.xlu0 %v6230_v41, %s8082_s12  ;;  %6258 = vrot.lane.b32.xlu1 %v6229_v34, %s8082_s12 }
 0xa2d   :  { %6264 = vrot.lane.b32.xlu0 %v6232_v46, %s8082_s12  ;;  %6262 = vrot.lane.b32.xlu1 %v6231_v8, %s8082_s12 }
 0xa93   :  { %v6253_v24 = vpop.permute.xlu0 %6252  ;;  %v6251_v40 = vpop.permute.xlu1 %6250 }
 0xa94   :  { %7634 = vmatprep.mubr.msk.f32.mxu1 %vm11269_vm15, %v6251_v40  ;;  %vm11285_vm15 = vmmov %vm11278_vm1 }
 0xa95   :  { %7635 = vmatmul.mubr.msk.f32.vlgmr.msra.gmra.mrb[102].mxu1 %vm11270_vm10, %v6253_v24  ;;  %vm11286_vm10 = vmmov %vm11278_vm1 }
 0xa97   :  { %v6257_v31 = vpop.permute.xlu0 %6256  ;;  %v6255_v58 = vpop.permute.xlu1 %6254 }
 0xa98   :  { %7637 = vmatprep.mubr.msk.f32.mxu1 %vm11271_vm0, %v6255_v58  ;;  %vm11287_vm0 = vmmov %vm11278_vm1 }
 0xa99   :  { %7638 = vmatmul.mubr.msk.f32.gmra.mrb[104].mxu1 %vm11272_vm14, %v6257_v31  ;;  %vm11288_vm14 = vmmov %vm11287_vm0 }
 0xa9b   :  { %v6261_v9 = vpop.permute.xlu0 %6260  ;;  %v6259_v55 = vpop.permute.xlu1 %6258 }
 0xa9c   :  { %7640 = vmatprep.mubr.msk.f32.mxu1 %vm11273_vm3, %v6259_v55  ;;  %vm11289_vm3 = vmmov %vm11287_vm0 }
 0xa9d   :  { %7641 = vmatmul.mubr.msk.f32.gmra.mrb[106].mxu1 %vm11274_vm12, %v6261_v9  ;;  %vm11290_vm12 = vmmov %vm11287_vm0 }
 0xa9f   :  { %v6265_v20 = vpop.permute.xlu0 %6264  ;;  %v6263_v37 = vpop.permute.xlu1 %6262 }
 0xaa0   :  { %7643 = vmatprep.mubr.msk.f32.mxu1 %vm11275_vm11, %v6263_v37  ;;  %vm11291_vm11 = vmmov %vm11287_vm0 }
 0xaa1   :  { %7644 = vmatmul.mubr.msk.f32.gmra.mrb[108].mxu1 %vm11276_vm6, %v6265_v20  ;;  %vm11292_vm6 = vmmov %vm11287_vm0 }
 0xb68   :  { %v7636_v4 = vpop.f32.mrb[102].mxu1 }
 0xb69   :  { %v6354_v3 = vadd.f32 %v7636_v4, %v6810_v26  ;;  %v6348_v38 = vpop.f32.mrb[103].mxu1 }
 0xb6a   :  { %v6349_v45 = vadd.f32 %v6810_v26, %v6348_v38 }
 0xb6b   :  { %v6390_v62 = vsel %vm11277_vm9, %v6354_v3, 0.0  ;;  %vm11293_vm9 = vmmov %vm11287_vm0 }
 0xb6c   :  { %v6389_v27 = vsel %vm11278_vm1, %v6349_v45, 0.0  ;;  %v7639_v10 = vpop.f32.mrb[104].mxu1  ;;  %vm11294_vm1 = vmmov %vm11287_vm0 }
 0xb6d   :  { %v6391_v15 = vadd.f32 %v6390_v62, %v6389_v27  ;;  %v6358_v29 = vpop.f32.mrb[105].mxu1  ;;  %v6364_v18 = vadd.f32 %v7639_v10, %v6810_v26 }
 0xb6e   :  { %v6359_v53 = vadd.f32 %v6810_v26, %v6358_v29 }
 0xb6f   :  { %v6394_v2 = vsel %vm11280_vm5, %v6364_v18, 0.0  ;;  %vm11296_vm5 = vmmov %vm11287_vm0 }
 0xb70   :  { %v6392_v32 = vsel %vm11279_vm4, %v6359_v53, 0.0  ;;  %v7642_v5 = vpop.f32.mrb[106].mxu1  ;;  %vm11295_vm4 = vmmov %vm11287_vm0 }
 0xb71   :  { %v6393_v51 = vadd.f32 %v6392_v32, %v6391_v15  ;;  %v6368_v22 = vpop.f32.mrb[107].mxu1  ;;  %v6374_v30 = vadd.f32 %v7642_v5, %v6810_v26 }
 0xb72   :  { %v6369_v17 = vadd.f32 %v6810_v26, %v6368_v22  ;;  %v6819_v22 = vld [vmem:[%s10655_s14] ss:$0 sm:$0xff] }
 0xb73   :  { %v6395_v35 = vadd.f32 %v6394_v2, %v6393_v51  ;;  %v6398_v54 = vsel %vm11282_vm13, %v6374_v30, 0.0  ;;  %vm11298_vm13 = vmmov %vm11287_vm0 }
 0xb74   :  { %v6396_v13 = vsel %vm11281_vm8, %v6369_v17, 0.0  ;;  %v7645_v50 = vpop.f32.mrb[108].mxu1  ;;  %vm11297_vm8 = vmmov %vm11287_vm0 }
 0xb75   :  { %v6397_v7 = vadd.f32 %v6396_v13, %v6395_v35  ;;  %v6378_v39 = vpop.f32.mrb[109].mxu1  ;;  %v6384_v14 = vadd.f32 %v7645_v50, %v6810_v26  ;;  %v6820_v13 = vld [vmem:[%s10656_s15] ss:$0 sm:$0xff] }
 0xb76   :  { %v6379_v6 = vadd.f32 %v6810_v26, %v6378_v39 }
 0xb77   :  { %v6399_v21 = vadd.f32 %v6398_v54, %v6397_v7  ;;  %v6402_v42 = vsel %vm11284_vm7, %v6384_v14, 0.0  ;;  %vm11300_vm7 = vmmov %vm11287_vm0 }
 0xb78   :  { %v6400_v56 = vsel %vm11283_vm2, %v6379_v6, 0.0  ;;  %vm11299_vm2 = vmmov %vm11287_vm0 }
 0xb79   :  { %v6401_v59 = vadd.f32 %v6400_v56, %v6399_v21 }
 0xb7b   :  { %v6403_v25 = vadd.f32 %v6402_v42, %v6401_v59 }
 0xb7d   :  { %v6404_v52 = vrot.slane %v6403_v25, 4 }
 0xb7f   :  { %v6405_v12 = vadd.f32 %v6404_v52, %v6403_v25 }
 0xb81   :  { %v6406_v11 = vrot.slane %v6405_v12, 2 }
 0xb83   :  { %v6407_v49 = vadd.f32 %v6406_v11, %v6405_v12 }
 0xb85   :  { %v6408_v16 = vrot.slane %v6407_v49, 1 }
 0xb87   :  { %v6409_v43 = vadd.f32 %v6408_v16, %v6407_v49 }
 0xb89   :  { %v6410_v1 = vmul.f32 0.015625, %v6409_v43 }
 0xb8b   :  { %v6411_v23 = vsub.f32 %v6349_v45, %v6410_v1  ;;  %v6412_v19 = vsub.f32 %v6354_v3, %v6410_v1  ;;  %v6413_v28 = vsub.f32 %v6359_v53, %v6410_v1  ;;  %v6414_v47 = vsub.f32 %v6364_v18, %v6410_v1 }
 0xb8c   :  { %v6415_v48 = vsub.f32 %v6369_v17, %v6410_v1  ;;  %v6416_v44 = vsub.f32 %v6374_v30, %v6410_v1  ;;  %v6417_v61 = vsub.f32 %v6379_v6, %v6410_v1  ;;  %v6418_v57 = vsub.f32 %v6384_v14, %v6410_v1 }
 0xb8d   :  { %v6419_v0 = vmul.f32 %v6411_v23, %v6411_v23  ;;  %v6420_v63 = vmul.f32 %v6412_v19, %v6412_v19  ;;  %v6421_v60 = vmul.f32 %v6413_v28, %v6413_v28  ;;  %v6422_v41 = vmul.f32 %v6414_v47, %v6414_v47 }
 0xb8e   :  { %v6423_v46 = vmul.f32 %v6415_v48, %v6415_v48  ;;  %v6424_v40 = vmul.f32 %v6416_v44, %v6416_v44  ;;  %v6425_v9 = vmul.f32 %v6417_v61, %v6417_v61  ;;  %v6426_v37 = vmul.f32 %v6418_v57, %v6418_v57 }
 0xb8f   :  { %v6427_v34 = vsel %vm11285_vm15, %v6419_v0, 0.0  ;;  %v6428_v36 = vsel %vm11286_vm10, %v6420_v63, 0.0  ;;  %v6430_v8 = vsel %vm11287_vm0, %v6421_v60, 0.0  ;;  %v6432_v31 = vsel %vm11288_vm14, %v6422_v41, 0.0  ;;  %v8071_v60 = vld [vmem:[%s10644_s2] sm:$0xff] }
 0xb90   :  { %v6429_v33 = vadd.f32 %v6428_v36, %v6427_v34  ;;  %v6434_v55 = vsel %vm11289_vm3, %v6423_v46, 0.0  ;;  %v6436_v26 = vsel %vm11290_vm12, %v6424_v40, 0.0  ;;  %v6438_v3 = vsel %vm11291_vm11, %v6425_v9, 0.0  ;;  %v8072_v34 = vld [vmem:[%s10644_s2 + $0x8] sm:$0xff]  ;;  %v8075_v40 = vld [vmem:[%s10644_s2 + $0x20] sm:$0xff] }
 0xb91   :  { %v6440_v45 = vsel %vm11292_vm6, %v6426_v37, 0.0  ;;  %v8078_v37 = vld [vmem:[%s10644_s2 + $0x38] sm:$0xff] }
 0xb92   :  { %v6431_v24 = vadd.f32 %v6430_v8, %v6429_v33  ;;  %v8073_v33 = vld [vmem:[%s10644_s2 + $0x10] sm:$0xff]  ;;  %v8074_v8 = vld [vmem:[%s10644_s2 + $0x18] sm:$0xff] }
 0xb94   :  { %v6433_v58 = vadd.f32 %v6432_v31, %v6431_v24 }
 0xb96   :  { %v6435_v20 = vadd.f32 %v6434_v55, %v6433_v58  ;;  %v8076_v58 = vld [vmem:[%s10644_s2 + $0x28] sm:$0xff]  ;;  %v8077_v55 = vld [vmem:[%s10644_s2 + $0x30] sm:$0xff] }
 0xb98   :  { %v6437_v4 = vadd.f32 %v6436_v26, %v6435_v20 }
 0xb9a   :  { %v6439_v38 = vadd.f32 %v6438_v3, %v6437_v4 }
 0xb9c   :  { %v6441_v62 = vadd.f32 %v6440_v45, %v6439_v38 }
 0xb9e   :  { %v6442_v27 = vrot.slane %v6441_v62, 4 }
 0xba0   :  { %v6443_v10 = vadd.f32 %v6442_v27, %v6441_v62 }
 0xba2   :  { %v6444_v15 = vrot.slane %v6443_v10, 2 }
 0xba4   :  { %v6445_v29 = vadd.f32 %v6444_v15, %v6443_v10 }
 0xba6   :  { %v6446_v18 = vrot.slane %v6445_v29, 1 }
 0xba8   :  { %v6447_v53 = vadd.f32 %v6446_v18, %v6445_v29 }
 0xbaa   :  { %v6448_v32 = vmul.f32 0.015625, %v6447_v53 }
 0xbac   :  { %v6449_v5 = vadd.f32 1e-05, %v6448_v32 }
 0xbae   :  { %8004 = vrsqrt.f32 %v6449_v5 }
 0xbb8   :  { %v8005_v51 = vpop.eup %8004 }
 0xbb9   :  { %v6451_v2 = vmul.f32 %v8005_v51, %v6411_v23  ;;  %v6452_v30 = vmul.f32 %v8005_v51, %v6412_v19  ;;  %v6453_v17 = vmul.f32 %v8005_v51, %v6413_v28  ;;  %v6454_v35 = vmul.f32 %v8005_v51, %v6414_v47 }
 0xbba   :  { %v6455_v50 = vmul.f32 %v8005_v51, %v6415_v48  ;;  %v6456_v7 = vmul.f32 %v8005_v51, %v6416_v44  ;;  %v6457_v39 = vmul.f32 %v8005_v51, %v6417_v61  ;;  %v6458_v54 = vmul.f32 %v8005_v51, %v6418_v57 }
 0xbbb   :  { %v6465_v14 = vmul.f32 %v6819_v22, %v6451_v2  ;;  %v6466_v6 = vmul.f32 %v6819_v22, %v6452_v30  ;;  %v6467_v21 = vmul.f32 %v6819_v22, %v6453_v17  ;;  %v6468_v56 = vmul.f32 %v6819_v22, %v6454_v35 }
 0xbbc   :  { %v6469_v59 = vmul.f32 %v6819_v22, %v6455_v50  ;;  %v6470_v42 = vmul.f32 %v6819_v22, %v6456_v7  ;;  %v6471_v25 = vmul.f32 %v6819_v22, %v6457_v39  ;;  %v6472_v52 = vmul.f32 %v6819_v22, %v6458_v54 }
 0xbbd   :  { %v6479_v12 = vadd.f32 %v6820_v13, %v6465_v14  ;;  %v6480_v11 = vadd.f32 %v6820_v13, %v6466_v6  ;;  %v6481_v49 = vadd.f32 %v6820_v13, %v6467_v21  ;;  %v6482_v16 = vadd.f32 %v6820_v13, %v6468_v56 }
 0xbbe   :  { %v6483_v43 = vadd.f32 %v6820_v13, %v6469_v59  ;;  %v6484_v1 = vadd.f32 %v6820_v13, %v6470_v42  ;;  %v6485_v23 = vadd.f32 %v6820_v13, %v6471_v25  ;;  %v6486_v19 = vadd.f32 %v6820_v13, %v6472_v52 }
 0xbbf   :  { %v6487_v28 = vmax.f32 %v6479_v12, 0.0  ;;  %v6488_v47 = vmax.f32 %v6480_v11, 0.0  ;;  %v6489_v48 = vmax.f32 %v6481_v49, 0.0  ;;  %v6490_v44 = vmax.f32 %v6482_v16, 0.0 }
 0xbc0   :  { %v6491_v61 = vmax.f32 %v6483_v43, 0.0  ;;  %v6492_v57 = vmax.f32 %v6484_v1, 0.0  ;;  %v6493_v0 = vmax.f32 %v6485_v23, 0.0  ;;  %v6494_v63 = vmax.f32 %v6486_v19, 0.0 }
 0xbc1   :  { %v6495_v41 = vadd.f32 %v8071_v60, %v6487_v28  ;;  %v6496_v36 = vadd.f32 %v8072_v34, %v6488_v47  ;;  %v6497_v46 = vadd.f32 %v8073_v33, %v6489_v48  ;;  %v6498_v24 = vadd.f32 %v8074_v8, %v6490_v44 }
 0xbc2   :  { %v6499_v31 = vadd.f32 %v8075_v40, %v6491_v61  ;;  %v6500_v9 = vadd.f32 %v8076_v58, %v6492_v57  ;;  %v6501_v20 = vadd.f32 %v8077_v55, %v6493_v0  ;;  %v6502_v26 = vadd.f32 %v8078_v37, %v6494_v63 }
 0xbc3   :  { %6503 = vst.msk [vmem:[%s10657_s16] sm:$0xff] %vm11293_vm9, %v6495_v41 }
 0xbc4   :  { %6504 = vst.msk [vmem:[%s10657_s16 + $0x8] sm:$0xff] %vm11294_vm1, %v6496_v36 }
 0xbc5   :  { %6505 = vst.msk [vmem:[%s10657_s16 + $0x10] sm:$0xff] %vm11295_vm4, %v6497_v46 }
 0xbc6   :  { %6506 = vst.msk [vmem:[%s10657_s16 + $0x18] sm:$0xff] %vm11296_vm5, %v6498_v24 }
 0xbc7   :  { %6507 = vst.msk [vmem:[%s10657_s16 + $0x20] sm:$0xff] %vm11297_vm8, %v6499_v31 }
 0xbc8   :  { %6508 = vst.msk [vmem:[%s10657_s16 + $0x28] sm:$0xff] %vm11298_vm13, %v6500_v9 }
 0xbc9   :  { %6509 = vst.msk [vmem:[%s10657_s16 + $0x30] sm:$0xff] %vm11299_vm2, %v6501_v20 }
 0xbca   :  { %6510 = vst.msk [vmem:[%s10657_s16 + $0x38] sm:$0xff] %vm11300_vm7, %v6502_v26 }

</bundles_post_ra>
